<compile_context>
chip_gen: v6e
topology: v6e:2x2x1
jax: 0.10.0
libtpu: 0.0.40
codegen_flags: <defaults>
</compile_context>

<pallas_src>
import numpy as np

import jax
import jax.numpy as jnp
from jax import lax
from jax.experimental import pallas as pl
from jax.experimental.pallas import tpu as pltpu

_CLAMP_MIN = 1e-6
_CLAMP_MAX = 0.999999
_LANE = 128
_BLOCK_BYTES = 2 * 1024 * 1024       # target f32 bytes per input block
_MAX_PLANES_PER_BLOCK = 16           # bounds the in-kernel unrolled plane loop


# ------------------------- kernel -------------------------

def _patch_cos_fused_kernel(x_ref, y_ref, *refs):
    """One grid step: a (B, H, W) block of image planes from preds and labels.

    refs = (sh_t_0, sw_0, sh_t_1, sw_1, ..., o_ref)
      sh_t_j : (ph_j, H)  0/1 row-window selection matrix (already transposed)
      sw_j   : (W, pw_j)  0/1 col-window selection matrix
      o_ref  : (1, nk, 128) lane-dense per-block partial cosine sums
               (the scalar partial sum is splat across all 128 lanes; the
                wrapper reads lane 0).
    """
    o_ref = refs[-1]
    s_refs = refs[:-1]
    nk = len(s_refs) // 2
    n_planes = x_ref.shape[0]

    sh_list = [s_refs[2 * j][...] for j in range(nk)]        # (ph, H)
    sw_list = [s_refs[2 * j + 1][...] for j in range(nk)]    # (W, pw)
    cos_accs = [jnp.zeros((sh_list[j].shape[0], sw_list[j].shape[1]),
                          jnp.float32) for j in range(nk)]

    for p_idx in range(n_planes):                            # static unroll
        xb = jnp.clip(x_ref[p_idx].astype(jnp.float32), _CLAMP_MIN, _CLAMP_MAX)
        yb = jnp.clip(y_ref[p_idx].astype(jnp.float32), _CLAMP_MIN, _CLAMP_MAX)
        pb = xb * yb        # window sums of pb/ab/bb == per-patch dot/|x|^2/|y|^2
        ab = xb * xb
        bb = yb * yb

        for j in range(nk):
            sh_t, sw = sh_list[j], sw_list[j]

            def wsum(m, sh_t=sh_t, sw=sw):
                # k x k / stride-s window sum of one plane as two MXU matmuls.
                t = jnp.dot(m, sw, preferred_element_type=jnp.float32,
                            precision=jax.lax.Precision.HIGHEST)     # (H, pw)
                return jnp.dot(sh_t, t, preferred_element_type=jnp.float32,
                               precision=jax.lax.Precision.HIGHEST)  # (ph, pw)

            dot_p = wsum(pb)
            nx = wsum(ab)
            ny = wsum(bb)
            cos_accs[j] = cos_accs[j] + dot_p * lax.rsqrt(nx * ny)

    for j in range(nk):
        partial = jnp.sum(cos_accs[j])
        o_ref[:, j:j + 1, :] = jnp.broadcast_to(partial, (1, 1, _LANE))


# ------------------------- wrapper -------------------------

def _selection_matrices(h, w, k, s):
    """0/1 window-selection matrices for VALID k x k patches with stride s."""
    ph = (h - k) // s + 1
    pw = (w - k) // s + 1
    sh_t = np.zeros((ph, h), np.float32)
    for pi in range(ph):
        sh_t[pi, pi * s:pi * s + k] = 1.0
    sw = np.zeros((w, pw), np.float32)
    for pj in range(pw):
        sw[pj * s:pj * s + k, pj] = 1.0
    return sh_t, sw


def _planes_per_block(nc, h, w):
    """Largest divisor of nc that fits the block-byte / unroll budgets."""
    bp = max(1, min(nc, _MAX_PLANES_PER_BLOCK, _BLOCK_BYTES // (4 * h * w)))
    while nc % bp:          # always terminates (bp == 1 divides everything)
        bp -= 1
    return bp


def patch_loss_3d(preds, labels, kernel_sizes=(2, 4), loss_weight=1.0):
    """Pallas TPU implementation of basicsr patchLoss3D.forward."""
    if preds.shape != labels.shape:
        raise ValueError(f"shape mismatch: {preds.shape} vs {labels.shape}")
    n, c, h, w = preds.shape
    nc = n * c
    nk = len(kernel_sizes)

    sel_args, sel_specs, patch_counts = [], [], []
    for k in kernel_sizes:
        s = k // 2 + 1
        if h < k or w < k:
            raise ValueError(f"input {h}x{w} too small for kernel size {k}")
        sh_t, sw = _selection_matrices(h, w, k, s)
        patch_counts.append(nc * sh_t.shape[0] * sw.shape[1])
        sel_args.extend((jnp.asarray(sh_t), jnp.asarray(sw)))
        sel_specs.append(pl.BlockSpec(sh_t.shape, lambda i: (0, 0)))
        sel_specs.append(pl.BlockSpec(sw.shape, lambda i: (0, 0)))

    planes_per_blk = _planes_per_block(nc, h, w)
    grid = (nc // planes_per_blk,)

    # Free (metadata-only) reshape: no extra HBM traffic.
    x3 = preds.reshape(nc, h, w)
    y3 = labels.reshape(nc, h, w)
    plane_spec = pl.BlockSpec((planes_per_blk, h, w), lambda i: (i, 0, 0))

    partials = pl.pallas_call(
        _patch_cos_fused_kernel,
        out_shape=jax.ShapeDtypeStruct((grid[0], nk, _LANE), jnp.float32),
        grid_spec=pltpu.PrefetchScalarGridSpec(
            num_scalar_prefetch=0,
            grid=grid,
            in_specs=[plane_spec, plane_spec] + sel_specs,
            out_specs=pl.BlockSpec((1, nk, _LANE), lambda i: (i, 0, 0))),
        compiler_params=pltpu.CompilerParams(
            dimension_semantics=("parallel",),
            vmem_limit_bytes=48 * 1024 * 1024),
    )(x3, y3, *sel_args)

    # Lane 0 of each (block, kernel-size) row holds that block's partial sum.
    cos_sums = jnp.sum(partials[:, :, 0], axis=0)          # (nk,)
    loss = jnp.float32(0.0)
    for j in range(nk):
        loss = loss + (1.0 - cos_sums[j] / jnp.float32(patch_counts[j]))
    return loss * jnp.float32(loss_weight)


# ------------------------- reference + test -------------------------

def _patch_loss_ref(preds, labels, kernel_sizes=(2, 4), loss_weight=1.0):
    """Pure-JAX reference mirroring the PyTorch module (explicit unfold)."""
    n, c, h, w = preds.shape
    loss = jnp.float32(0.0)
    for k in kernel_sizes:
        s = k // 2 + 1
        ph = (h - k) // s + 1
        pw = (w - k) // s + 1

        def unfold(x):
            rows = []
            for pi in range(ph):
                for pj in range(pw):
                    rows.append(x[:, :, pi * s:pi * s + k,
                                  pj * s:pj * s + k].reshape(n, c, k * k))
            return jnp.stack(rows, axis=2).reshape(-1, k * k)

        xt = jnp.clip(unfold(preds), _CLAMP_MIN, _CLAMP_MAX)
        yt = jnp.clip(unfold(labels), _CLAMP_MIN, _CLAMP_MAX)
        dot = jnp.einsum('ik,ik->i', xt, yt)
        cos = jnp.mean(dot / jnp.sqrt(jnp.sum(xt ** 2, axis=1))
                       / jnp.sqrt(jnp.sum(yt ** 2, axis=1)))
        loss = loss + (1.0 - cos)
    return loss * jnp.float32(loss_weight)


if __name__ == "__main__":
    key = jax.random.PRNGKey(0)
    k1, k2 = jax.random.split(key)
    shape = (2, 4, 16, 16)  # N, C, H, W
    # Image-like values in (0, 1); the loss clamps to [1e-6, 0.999999] anyway.
    preds = jax.random.uniform(k1, shape, dtype=jnp.float32)
    labels = jax.random.uniform(k2, shape, dtype=jnp.float32)

    out = patch_loss_3d(preds, labels, kernel_sizes=(2, 4), loss_weight=1.0)
    jax.block_until_ready(out)

    ref = _patch_loss_ref(preds, labels, kernel_sizes=(2, 4), loss_weight=1.0)
    assert jnp.allclose(out, ref, rtol=1e-3, atol=1e-5), (out, ref)

    print("KERNEL_OK")
</pallas_src>

<mosaic_0001>
module attributes {stable_mosaic.version = 11 : i64} {
  func.func @_patch_cos_fused_kernel(%arg0: i32, %arg1: memref<8x16x16xf32, #tpu.memory_space<vmem>>, %arg2: memref<8x16x16xf32, #tpu.memory_space<vmem>>, %arg3: memref<8x16xf32, #tpu.memory_space<vmem>>, %arg4: memref<16x8xf32, #tpu.memory_space<vmem>>, %arg5: memref<5x16xf32, #tpu.memory_space<vmem>>, %arg6: memref<16x5xf32, #tpu.memory_space<vmem>>, %arg7: memref<1x2x128xf32, #tpu.memory_space<vmem>>) attributes {dimension_semantics = [#tpu.dimension_semantics<parallel>], iteration_bounds = array<i64: 1>, scalar_prefetch = 0 : i64, scratch_operands = 0 : i64, tpu.core_type = #tpu.core_type<tc>, window_params = [{transform_indices = @transform_0, window_bounds = array<i64: 8, 16, 16>}, {transform_indices = @transform_1, window_bounds = array<i64: 8, 16, 16>}, {pipeline_mode = #tpu.pipeline_mode<synchronous>, transform_indices = @transform_2, window_bounds = array<i64: 8, 16>}, {pipeline_mode = #tpu.pipeline_mode<synchronous>, transform_indices = @transform_3, window_bounds = array<i64: 16, 8>}, {pipeline_mode = #tpu.pipeline_mode<synchronous>, transform_indices = @transform_4, window_bounds = array<i64: 5, 16>}, {pipeline_mode = #tpu.pipeline_mode<synchronous>, transform_indices = @transform_5, window_bounds = array<i64: 16, 5>}, {transform_indices = @transform_6, window_bounds = array<i64: 1, 2, 128>}]} {
    %c0 = arith.constant 0 : index
    %c0_0 = arith.constant 0 : index
    %0 = vector.load %arg3[%c0, %c0_0] : memref<8x16xf32, #tpu.memory_space<vmem>>, vector<8x16xf32>
    %c0_1 = arith.constant 0 : index
    %c0_2 = arith.constant 0 : index
    %1 = vector.load %arg5[%c0_1, %c0_2] : memref<5x16xf32, #tpu.memory_space<vmem>>, vector<5x16xf32>
    %c0_3 = arith.constant 0 : index
    %c0_4 = arith.constant 0 : index
    %2 = vector.load %arg4[%c0_3, %c0_4] : memref<16x8xf32, #tpu.memory_space<vmem>>, vector<16x8xf32>
    %c0_5 = arith.constant 0 : index
    %c0_6 = arith.constant 0 : index
    %3 = vector.load %arg6[%c0_5, %c0_6] : memref<16x5xf32, #tpu.memory_space<vmem>>, vector<16x5xf32>
    %cst = arith.constant 0.000000e+00 : f32
    %4 = vector.broadcast %cst : f32 to vector<8x8xf32>
    %cst_7 = arith.constant 0.000000e+00 : f32
    %5 = vector.broadcast %cst_7 : f32 to vector<5x5xf32>
    %c0_8 = arith.constant 0 : index
    %c0_9 = arith.constant 0 : index
    %c0_10 = arith.constant 0 : index
    %6 = vector.load %arg1[%c0_8, %c0_9, %c0_10] : memref<8x16x16xf32, #tpu.memory_space<vmem>>, vector<1x16x16xf32>
    %7 = vector.shape_cast %6 : vector<1x16x16xf32> to vector<16x16xf32>
    %cst_11 = arith.constant 9.99999997E-7 : f32
    %cst_12 = arith.constant 0.999998986 : f32
    %8 = vector.broadcast %cst_11 : f32 to vector<16x16xf32>
    %9 = arith.maximumf %8, %7 : vector<16x16xf32>
    %10 = vector.broadcast %cst_12 : f32 to vector<16x16xf32>
    %11 = arith.minimumf %10, %9 : vector<16x16xf32>
    %c0_13 = arith.constant 0 : index
    %c0_14 = arith.constant 0 : index
    %c0_15 = arith.constant 0 : index
    %12 = vector.load %arg2[%c0_13, %c0_14, %c0_15] : memref<8x16x16xf32, #tpu.memory_space<vmem>>, vector<1x16x16xf32>
    %13 = vector.shape_cast %12 : vector<1x16x16xf32> to vector<16x16xf32>
    %cst_16 = arith.constant 9.99999997E-7 : f32
    %cst_17 = arith.constant 0.999998986 : f32
    %14 = vector.broadcast %cst_16 : f32 to vector<16x16xf32>
    %15 = arith.maximumf %14, %13 : vector<16x16xf32>
    %16 = vector.broadcast %cst_17 : f32 to vector<16x16xf32>
    %17 = arith.minimumf %16, %15 : vector<16x16xf32>
    %18 = arith.mulf %11, %17 : vector<16x16xf32>
    %19 = arith.mulf %11, %11 : vector<16x16xf32>
    %20 = arith.mulf %17, %17 : vector<16x16xf32>
    %cst_18 = arith.constant dense<0.000000e+00> : vector<16x8xf32>
    %21 = tpu.matmul %18, %2, %cst_18 {dimension_numbers = #tpu.dot_dimension_numbers<[1], [0], [0], [1], [0, 0, 1, 1], [], []>, precision = #tpu.contract_precision<fp32>} : vector<16x16xf32>, vector<16x8xf32>, vector<16x8xf32> -> vector<16x8xf32>
    %cst_19 = arith.constant dense<0.000000e+00> : vector<8x8xf32>
    %22 = tpu.matmul %0, %21, %cst_19 {dimension_numbers = #tpu.dot_dimension_numbers<[1], [0], [0], [1], [0, 0, 1, 1], [], []>, precision = #tpu.contract_precision<fp32>} : vector<8x16xf32>, vector<16x8xf32>, vector<8x8xf32> -> vector<8x8xf32>
    %cst_20 = arith.constant dense<0.000000e+00> : vector<16x8xf32>
    %23 = tpu.matmul %19, %2, %cst_20 {dimension_numbers = #tpu.dot_dimension_numbers<[1], [0], [0], [1], [0, 0, 1, 1], [], []>, precision = #tpu.contract_precision<fp32>} : vector<16x16xf32>, vector<16x8xf32>, vector<16x8xf32> -> vector<16x8xf32>
    %cst_21 = arith.constant dense<0.000000e+00> : vector<8x8xf32>
    %24 = tpu.matmul %0, %23, %cst_21 {dimension_numbers = #tpu.dot_dimension_numbers<[1], [0], [0], [1], [0, 0, 1, 1], [], []>, precision = #tpu.contract_precision<fp32>} : vector<8x16xf32>, vector<16x8xf32>, vector<8x8xf32> -> vector<8x8xf32>
    %cst_22 = arith.constant dense<0.000000e+00> : vector<16x8xf32>
    %25 = tpu.matmul %20, %2, %cst_22 {dimension_numbers = #tpu.dot_dimension_numbers<[1], [0], [0], [1], [0, 0, 1, 1], [], []>, precision = #tpu.contract_precision<fp32>} : vector<16x16xf32>, vector<16x8xf32>, vector<16x8xf32> -> vector<16x8xf32>
    %cst_23 = arith.constant dense<0.000000e+00> : vector<8x8xf32>
    %26 = tpu.matmul %0, %25, %cst_23 {dimension_numbers = #tpu.dot_dimension_numbers<[1], [0], [0], [1], [0, 0, 1, 1], [], []>, precision = #tpu.contract_precision<fp32>} : vector<8x16xf32>, vector<16x8xf32>, vector<8x8xf32> -> vector<8x8xf32>
    %27 = arith.mulf %24, %26 : vector<8x8xf32>
    %28 = math.rsqrt %27 : vector<8x8xf32>
    %29 = arith.mulf %22, %28 : vector<8x8xf32>
    %30 = arith.addf %4, %29 : vector<8x8xf32>
    %cst_24 = arith.constant dense<0.000000e+00> : vector<16x5xf32>
    %31 = tpu.matmul %18, %3, %cst_24 {dimension_numbers = #tpu.dot_dimension_numbers<[1], [0], [0], [1], [0, 0, 1, 1], [], []>, precision = #tpu.contract_precision<fp32>} : vector<16x16xf32>, vector<16x5xf32>, vector<16x5xf32> -> vector<16x5xf32>
    %cst_25 = arith.constant dense<0.000000e+00> : vector<5x5xf32>
    %32 = tpu.matmul %1, %31, %cst_25 {dimension_numbers = #tpu.dot_dimension_numbers<[1], [0], [0], [1], [0, 0, 1, 1], [], []>, precision = #tpu.contract_precision<fp32>} : vector<5x16xf32>, vector<16x5xf32>, vector<5x5xf32> -> vector<5x5xf32>
    %cst_26 = arith.constant dense<0.000000e+00> : vector<16x5xf32>
    %33 = tpu.matmul %19, %3, %cst_26 {dimension_numbers = #tpu.dot_dimension_numbers<[1], [0], [0], [1], [0, 0, 1, 1], [], []>, precision = #tpu.contract_precision<fp32>} : vector<16x16xf32>, vector<16x5xf32>, vector<16x5xf32> -> vector<16x5xf32>
    %cst_27 = arith.constant dense<0.000000e+00> : vector<5x5xf32>
    %34 = tpu.matmul %1, %33, %cst_27 {dimension_numbers = #tpu.dot_dimension_numbers<[1], [0], [0], [1], [0, 0, 1, 1], [], []>, precision = #tpu.contract_precision<fp32>} : vector<5x16xf32>, vector<16x5xf32>, vector<5x5xf32> -> vector<5x5xf32>
    %cst_28 = arith.constant dense<0.000000e+00> : vector<16x5xf32>
    %35 = tpu.matmul %20, %3, %cst_28 {dimension_numbers = #tpu.dot_dimension_numbers<[1], [0], [0], [1], [0, 0, 1, 1], [], []>, precision = #tpu.contract_precision<fp32>} : vector<16x16xf32>, vector<16x5xf32>, vector<16x5xf32> -> vector<16x5xf32>
    %cst_29 = arith.constant dense<0.000000e+00> : vector<5x5xf32>
    %36 = tpu.matmul %1, %35, %cst_29 {dimension_numbers = #tpu.dot_dimension_numbers<[1], [0], [0], [1], [0, 0, 1, 1], [], []>, precision = #tpu.contract_precision<fp32>} : vector<5x16xf32>, vector<16x5xf32>, vector<5x5xf32> -> vector<5x5xf32>
    %37 = arith.mulf %34, %36 : vector<5x5xf32>
    %38 = math.rsqrt %37 : vector<5x5xf32>
    %39 = arith.mulf %32, %38 : vector<5x5xf32>
    %40 = arith.addf %5, %39 : vector<5x5xf32>
    %c1 = arith.constant 1 : index
    %c0_30 = arith.constant 0 : index
    %c0_31 = arith.constant 0 : index
    %41 = vector.load %arg1[%c1, %c0_30, %c0_31] : memref<8x16x16xf32, #tpu.memory_space<vmem>>, vector<1x16x16xf32>
    %42 = vector.shape_cast %41 : vector<1x16x16xf32> to vector<16x16xf32>
    %cst_32 = arith.constant 9.99999997E-7 : f32
    %cst_33 = arith.constant 0.999998986 : f32
    %43 = vector.broadcast %cst_32 : f32 to vector<16x16xf32>
    %44 = arith.maximumf %43, %42 : vector<16x16xf32>
    %45 = vector.broadcast %cst_33 : f32 to vector<16x16xf32>
    %46 = arith.minimumf %45, %44 : vector<16x16xf32>
    %c1_34 = arith.constant 1 : index
    %c0_35 = arith.constant 0 : index
    %c0_36 = arith.constant 0 : index
    %47 = vector.load %arg2[%c1_34, %c0_35, %c0_36] : memref<8x16x16xf32, #tpu.memory_space<vmem>>, vector<1x16x16xf32>
    %48 = vector.shape_cast %47 : vector<1x16x16xf32> to vector<16x16xf32>
    %cst_37 = arith.constant 9.99999997E-7 : f32
    %cst_38 = arith.constant 0.999998986 : f32
    %49 = vector.broadcast %cst_37 : f32 to vector<16x16xf32>
    %50 = arith.maximumf %49, %48 : vector<16x16xf32>
    %51 = vector.broadcast %cst_38 : f32 to vector<16x16xf32>
    %52 = arith.minimumf %51, %50 : vector<16x16xf32>
    %53 = arith.mulf %46, %52 : vector<16x16xf32>
    %54 = arith.mulf %46, %46 : vector<16x16xf32>
    %55 = arith.mulf %52, %52 : vector<16x16xf32>
    %cst_39 = arith.constant dense<0.000000e+00> : vector<16x8xf32>
    %56 = tpu.matmul %53, %2, %cst_39 {dimension_numbers = #tpu.dot_dimension_numbers<[1], [0], [0], [1], [0, 0, 1, 1], [], []>, precision = #tpu.contract_precision<fp32>} : vector<16x16xf32>, vector<16x8xf32>, vector<16x8xf32> -> vector<16x8xf32>
    %cst_40 = arith.constant dense<0.000000e+00> : vector<8x8xf32>
    %57 = tpu.matmul %0, %56, %cst_40 {dimension_numbers = #tpu.dot_dimension_numbers<[1], [0], [0], [1], [0, 0, 1, 1], [], []>, precision = #tpu.contract_precision<fp32>} : vector<8x16xf32>, vector<16x8xf32>, vector<8x8xf32> -> vector<8x8xf32>
    %cst_41 = arith.constant dense<0.000000e+00> : vector<16x8xf32>
    %58 = tpu.matmul %54, %2, %cst_41 {dimension_numbers = #tpu.dot_dimension_numbers<[1], [0], [0], [1], [0, 0, 1, 1], [], []>, precision = #tpu.contract_precision<fp32>} : vector<16x16xf32>, vector<16x8xf32>, vector<16x8xf32> -> vector<16x8xf32>
    %cst_42 = arith.constant dense<0.000000e+00> : vector<8x8xf32>
    %59 = tpu.matmul %0, %58, %cst_42 {dimension_numbers = #tpu.dot_dimension_numbers<[1], [0], [0], [1], [0, 0, 1, 1], [], []>, precision = #tpu.contract_precision<fp32>} : vector<8x16xf32>, vector<16x8xf32>, vector<8x8xf32> -> vector<8x8xf32>
    %cst_43 = arith.constant dense<0.000000e+00> : vector<16x8xf32>
    %60 = tpu.matmul %55, %2, %cst_43 {dimension_numbers = #tpu.dot_dimension_numbers<[1], [0], [0], [1], [0, 0, 1, 1], [], []>, precision = #tpu.contract_precision<fp32>} : vector<16x16xf32>, vector<16x8xf32>, vector<16x8xf32> -> vector<16x8xf32>
    %cst_44 = arith.constant dense<0.000000e+00> : vector<8x8xf32>
    %61 = tpu.matmul %0, %60, %cst_44 {dimension_numbers = #tpu.dot_dimension_numbers<[1], [0], [0], [1], [0, 0, 1, 1], [], []>, precision = #tpu.contract_precision<fp32>} : vector<8x16xf32>, vector<16x8xf32>, vector<8x8xf32> -> vector<8x8xf32>
    %62 = arith.mulf %59, %61 : vector<8x8xf32>
    %63 = math.rsqrt %62 : vector<8x8xf32>
    %64 = arith.mulf %57, %63 : vector<8x8xf32>
    %65 = arith.addf %30, %64 : vector<8x8xf32>
    %cst_45 = arith.constant dense<0.000000e+00> : vector<16x5xf32>
    %66 = tpu.matmul %53, %3, %cst_45 {dimension_numbers = #tpu.dot_dimension_numbers<[1], [0], [0], [1], [0, 0, 1, 1], [], []>, precision = #tpu.contract_precision<fp32>} : vector<16x16xf32>, vector<16x5xf32>, vector<16x5xf32> -> vector<16x5xf32>
    %cst_46 = arith.constant dense<0.000000e+00> : vector<5x5xf32>
    %67 = tpu.matmul %1, %66, %cst_46 {dimension_numbers = #tpu.dot_dimension_numbers<[1], [0], [0], [1], [0, 0, 1, 1], [], []>, precision = #tpu.contract_precision<fp32>} : vector<5x16xf32>, vector<16x5xf32>, vector<5x5xf32> -> vector<5x5xf32>
    %cst_47 = arith.constant dense<0.000000e+00> : vector<16x5xf32>
    %68 = tpu.matmul %54, %3, %cst_47 {dimension_numbers = #tpu.dot_dimension_numbers<[1], [0], [0], [1], [0, 0, 1, 1], [], []>, precision = #tpu.contract_precision<fp32>} : vector<16x16xf32>, vector<16x5xf32>, vector<16x5xf32> -> vector<16x5xf32>
    %cst_48 = arith.constant dense<0.000000e+00> : vector<5x5xf32>
    %69 = tpu.matmul %1, %68, %cst_48 {dimension_numbers = #tpu.dot_dimension_numbers<[1], [0], [0], [1], [0, 0, 1, 1], [], []>, precision = #tpu.contract_precision<fp32>} : vector<5x16xf32>, vector<16x5xf32>, vector<5x5xf32> -> vector<5x5xf32>
    %cst_49 = arith.constant dense<0.000000e+00> : vector<16x5xf32>
    %70 = tpu.matmul %55, %3, %cst_49 {dimension_numbers = #tpu.dot_dimension_numbers<[1], [0], [0], [1], [0, 0, 1, 1], [], []>, precision = #tpu.contract_precision<fp32>} : vector<16x16xf32>, vector<16x5xf32>, vector<16x5xf32> -> vector<16x5xf32>
    %cst_50 = arith.constant dense<0.000000e+00> : vector<5x5xf32>
    %71 = tpu.matmul %1, %70, %cst_50 {dimension_numbers = #tpu.dot_dimension_numbers<[1], [0], [0], [1], [0, 0, 1, 1], [], []>, precision = #tpu.contract_precision<fp32>} : vector<5x16xf32>, vector<16x5xf32>, vector<5x5xf32> -> vector<5x5xf32>
    %72 = arith.mulf %69, %71 : vector<5x5xf32>
    %73 = math.rsqrt %72 : vector<5x5xf32>
    %74 = arith.mulf %67, %73 : vector<5x5xf32>
    %75 = arith.addf %40, %74 : vector<5x5xf32>
    %c2 = arith.constant 2 : index
    %c0_51 = arith.constant 0 : index
    %c0_52 = arith.constant 0 : index
    %76 = vector.load %arg1[%c2, %c0_51, %c0_52] : memref<8x16x16xf32, #tpu.memory_space<vmem>>, vector<1x16x16xf32>
    %77 = vector.shape_cast %76 : vector<1x16x16xf32> to vector<16x16xf32>
    %cst_53 = arith.constant 9.99999997E-7 : f32
    %cst_54 = arith.constant 0.999998986 : f32
    %78 = vector.broadcast %cst_53 : f32 to vector<16x16xf32>
    %79 = arith.maximumf %78, %77 : vector<16x16xf32>
    %80 = vector.broadcast %cst_54 : f32 to vector<16x16xf32>
    %81 = arith.minimumf %80, %79 : vector<16x16xf32>
    %c2_55 = arith.constant 2 : index
    %c0_56 = arith.constant 0 : index
    %c0_57 = arith.constant 0 : index
    %82 = vector.load %arg2[%c2_55, %c0_56, %c0_57] : memref<8x16x16xf32, #tpu.memory_space<vmem>>, vector<1x16x16xf32>
    %83 = vector.shape_cast %82 : vector<1x16x16xf32> to vector<16x16xf32>
    %cst_58 = arith.constant 9.99999997E-7 : f32
    %cst_59 = arith.constant 0.999998986 : f32
    %84 = vector.broadcast %cst_58 : f32 to vector<16x16xf32>
    %85 = arith.maximumf %84, %83 : vector<16x16xf32>
    %86 = vector.broadcast %cst_59 : f32 to vector<16x16xf32>
    %87 = arith.minimumf %86, %85 : vector<16x16xf32>
    %88 = arith.mulf %81, %87 : vector<16x16xf32>
    %89 = arith.mulf %81, %81 : vector<16x16xf32>
    %90 = arith.mulf %87, %87 : vector<16x16xf32>
    %cst_60 = arith.constant dense<0.000000e+00> : vector<16x8xf32>
    %91 = tpu.matmul %88, %2, %cst_60 {dimension_numbers = #tpu.dot_dimension_numbers<[1], [0], [0], [1], [0, 0, 1, 1], [], []>, precision = #tpu.contract_precision<fp32>} : vector<16x16xf32>, vector<16x8xf32>, vector<16x8xf32> -> vector<16x8xf32>
    %cst_61 = arith.constant dense<0.000000e+00> : vector<8x8xf32>
    %92 = tpu.matmul %0, %91, %cst_61 {dimension_numbers = #tpu.dot_dimension_numbers<[1], [0], [0], [1], [0, 0, 1, 1], [], []>, precision = #tpu.contract_precision<fp32>} : vector<8x16xf32>, vector<16x8xf32>, vector<8x8xf32> -> vector<8x8xf32>
    %cst_62 = arith.constant dense<0.000000e+00> : vector<16x8xf32>
    %93 = tpu.matmul %89, %2, %cst_62 {dimension_numbers = #tpu.dot_dimension_numbers<[1], [0], [0], [1], [0, 0, 1, 1], [], []>, precision = #tpu.contract_precision<fp32>} : vector<16x16xf32>, vector<16x8xf32>, vector<16x8xf32> -> vector<16x8xf32>
    %cst_63 = arith.constant dense<0.000000e+00> : vector<8x8xf32>
    %94 = tpu.matmul %0, %93, %cst_63 {dimension_numbers = #tpu.dot_dimension_numbers<[1], [0], [0], [1], [0, 0, 1, 1], [], []>, precision = #tpu.contract_precision<fp32>} : vector<8x16xf32>, vector<16x8xf32>, vector<8x8xf32> -> vector<8x8xf32>
    %cst_64 = arith.constant dense<0.000000e+00> : vector<16x8xf32>
    %95 = tpu.matmul %90, %2, %cst_64 {dimension_numbers = #tpu.dot_dimension_numbers<[1], [0], [0], [1], [0, 0, 1, 1], [], []>, precision = #tpu.contract_precision<fp32>} : vector<16x16xf32>, vector<16x8xf32>, vector<16x8xf32> -> vector<16x8xf32>
    %cst_65 = arith.constant dense<0.000000e+00> : vector<8x8xf32>
    %96 = tpu.matmul %0, %95, %cst_65 {dimension_numbers = #tpu.dot_dimension_numbers<[1], [0], [0], [1], [0, 0, 1, 1], [], []>, precision = #tpu.contract_precision<fp32>} : vector<8x16xf32>, vector<16x8xf32>, vector<8x8xf32> -> vector<8x8xf32>
    %97 = arith.mulf %94, %96 : vector<8x8xf32>
    %98 = math.rsqrt %97 : vector<8x8xf32>
    %99 = arith.mulf %92, %98 : vector<8x8xf32>
    %100 = arith.addf %65, %99 : vector<8x8xf32>
    %cst_66 = arith.constant dense<0.000000e+00> : vector<16x5xf32>
    %101 = tpu.matmul %88, %3, %cst_66 {dimension_numbers = #tpu.dot_dimension_numbers<[1], [0], [0], [1], [0, 0, 1, 1], [], []>, precision = #tpu.contract_precision<fp32>} : vector<16x16xf32>, vector<16x5xf32>, vector<16x5xf32> -> vector<16x5xf32>
    %cst_67 = arith.constant dense<0.000000e+00> : vector<5x5xf32>
    %102 = tpu.matmul %1, %101, %cst_67 {dimension_numbers = #tpu.dot_dimension_numbers<[1], [0], [0], [1], [0, 0, 1, 1], [], []>, precision = #tpu.contract_precision<fp32>} : vector<5x16xf32>, vector<16x5xf32>, vector<5x5xf32> -> vector<5x5xf32>
    %cst_68 = arith.constant dense<0.000000e+00> : vector<16x5xf32>
    %103 = tpu.matmul %89, %3, %cst_68 {dimension_numbers = #tpu.dot_dimension_numbers<[1], [0], [0], [1], [0, 0, 1, 1], [], []>, precision = #tpu.contract_precision<fp32>} : vector<16x16xf32>, vector<16x5xf32>, vector<16x5xf32> -> vector<16x5xf32>
    %cst_69 = arith.constant dense<0.000000e+00> : vector<5x5xf32>
    %104 = tpu.matmul %1, %103, %cst_69 {dimension_numbers = #tpu.dot_dimension_numbers<[1], [0], [0], [1], [0, 0, 1, 1], [], []>, precision = #tpu.contract_precision<fp32>} : vector<5x16xf32>, vector<16x5xf32>, vector<5x5xf32> -> vector<5x5xf32>
    %cst_70 = arith.constant dense<0.000000e+00> : vector<16x5xf32>
    %105 = tpu.matmul %90, %3, %cst_70 {dimension_numbers = #tpu.dot_dimension_numbers<[1], [0], [0], [1], [0, 0, 1, 1], [], []>, precision = #tpu.contract_precision<fp32>} : vector<16x16xf32>, vector<16x5xf32>, vector<16x5xf32> -> vector<16x5xf32>
    %cst_71 = arith.constant dense<0.000000e+00> : vector<5x5xf32>
    %106 = tpu.matmul %1, %105, %cst_71 {dimension_numbers = #tpu.dot_dimension_numbers<[1], [0], [0], [1], [0, 0, 1, 1], [], []>, precision = #tpu.contract_precision<fp32>} : vector<5x16xf32>, vector<16x5xf32>, vector<5x5xf32> -> vector<5x5xf32>
    %107 = arith.mulf %104, %106 : vector<5x5xf32>
    %108 = math.rsqrt %107 : vector<5x5xf32>
    %109 = arith.mulf %102, %108 : vector<5x5xf32>
    %110 = arith.addf %75, %109 : vector<5x5xf32>
    %c3 = arith.constant 3 : index
    %c0_72 = arith.constant 0 : index
    %c0_73 = arith.constant 0 : index
    %111 = vector.load %arg1[%c3, %c0_72, %c0_73] : memref<8x16x16xf32, #tpu.memory_space<vmem>>, vector<1x16x16xf32>
    %112 = vector.shape_cast %111 : vector<1x16x16xf32> to vector<16x16xf32>
    %cst_74 = arith.constant 9.99999997E-7 : f32
    %cst_75 = arith.constant 0.999998986 : f32
    %113 = vector.broadcast %cst_74 : f32 to vector<16x16xf32>
    %114 = arith.maximumf %113, %112 : vector<16x16xf32>
    %115 = vector.broadcast %cst_75 : f32 to vector<16x16xf32>
    %116 = arith.minimumf %115, %114 : vector<16x16xf32>
    %c3_76 = arith.constant 3 : index
    %c0_77 = arith.constant 0 : index
    %c0_78 = arith.constant 0 : index
    %117 = vector.load %arg2[%c3_76, %c0_77, %c0_78] : memref<8x16x16xf32, #tpu.memory_space<vmem>>, vector<1x16x16xf32>
    %118 = vector.shape_cast %117 : vector<1x16x16xf32> to vector<16x16xf32>
    %cst_79 = arith.constant 9.99999997E-7 : f32
    %cst_80 = arith.constant 0.999998986 : f32
    %119 = vector.broadcast %cst_79 : f32 to vector<16x16xf32>
    %120 = arith.maximumf %119, %118 : vector<16x16xf32>
    %121 = vector.broadcast %cst_80 : f32 to vector<16x16xf32>
    %122 = arith.minimumf %121, %120 : vector<16x16xf32>
    %123 = arith.mulf %116, %122 : vector<16x16xf32>
    %124 = arith.mulf %116, %116 : vector<16x16xf32>
    %125 = arith.mulf %122, %122 : vector<16x16xf32>
    %cst_81 = arith.constant dense<0.000000e+00> : vector<16x8xf32>
    %126 = tpu.matmul %123, %2, %cst_81 {dimension_numbers = #tpu.dot_dimension_numbers<[1], [0], [0], [1], [0, 0, 1, 1], [], []>, precision = #tpu.contract_precision<fp32>} : vector<16x16xf32>, vector<16x8xf32>, vector<16x8xf32> -> vector<16x8xf32>
    %cst_82 = arith.constant dense<0.000000e+00> : vector<8x8xf32>
    %127 = tpu.matmul %0, %126, %cst_82 {dimension_numbers = #tpu.dot_dimension_numbers<[1], [0], [0], [1], [0, 0, 1, 1], [], []>, precision = #tpu.contract_precision<fp32>} : vector<8x16xf32>, vector<16x8xf32>, vector<8x8xf32> -> vector<8x8xf32>
    %cst_83 = arith.constant dense<0.000000e+00> : vector<16x8xf32>
    %128 = tpu.matmul %124, %2, %cst_83 {dimension_numbers = #tpu.dot_dimension_numbers<[1], [0], [0], [1], [0, 0, 1, 1], [], []>, precision = #tpu.contract_precision<fp32>} : vector<16x16xf32>, vector<16x8xf32>, vector<16x8xf32> -> vector<16x8xf32>
    %cst_84 = arith.constant dense<0.000000e+00> : vector<8x8xf32>
    %129 = tpu.matmul %0, %128, %cst_84 {dimension_numbers = #tpu.dot_dimension_numbers<[1], [0], [0], [1], [0, 0, 1, 1], [], []>, precision = #tpu.contract_precision<fp32>} : vector<8x16xf32>, vector<16x8xf32>, vector<8x8xf32> -> vector<8x8xf32>
    %cst_85 = arith.constant dense<0.000000e+00> : vector<16x8xf32>
    %130 = tpu.matmul %125, %2, %cst_85 {dimension_numbers = #tpu.dot_dimension_numbers<[1], [0], [0], [1], [0, 0, 1, 1], [], []>, precision = #tpu.contract_precision<fp32>} : vector<16x16xf32>, vector<16x8xf32>, vector<16x8xf32> -> vector<16x8xf32>
    %cst_86 = arith.constant dense<0.000000e+00> : vector<8x8xf32>
    %131 = tpu.matmul %0, %130, %cst_86 {dimension_numbers = #tpu.dot_dimension_numbers<[1], [0], [0], [1], [0, 0, 1, 1], [], []>, precision = #tpu.contract_precision<fp32>} : vector<8x16xf32>, vector<16x8xf32>, vector<8x8xf32> -> vector<8x8xf32>
    %132 = arith.mulf %129, %131 : vector<8x8xf32>
    %133 = math.rsqrt %132 : vector<8x8xf32>
    %134 = arith.mulf %127, %133 : vector<8x8xf32>
    %135 = arith.addf %100, %134 : vector<8x8xf32>
    %cst_87 = arith.constant dense<0.000000e+00> : vector<16x5xf32>
    %136 = tpu.matmul %123, %3, %cst_87 {dimension_numbers = #tpu.dot_dimension_numbers<[1], [0], [0], [1], [0, 0, 1, 1], [], []>, precision = #tpu.contract_precision<fp32>} : vector<16x16xf32>, vector<16x5xf32>, vector<16x5xf32> -> vector<16x5xf32>
    %cst_88 = arith.constant dense<0.000000e+00> : vector<5x5xf32>
    %137 = tpu.matmul %1, %136, %cst_88 {dimension_numbers = #tpu.dot_dimension_numbers<[1], [0], [0], [1], [0, 0, 1, 1], [], []>, precision = #tpu.contract_precision<fp32>} : vector<5x16xf32>, vector<16x5xf32>, vector<5x5xf32> -> vector<5x5xf32>
    %cst_89 = arith.constant dense<0.000000e+00> : vector<16x5xf32>
    %138 = tpu.matmul %124, %3, %cst_89 {dimension_numbers = #tpu.dot_dimension_numbers<[1], [0], [0], [1], [0, 0, 1, 1], [], []>, precision = #tpu.contract_precision<fp32>} : vector<16x16xf32>, vector<16x5xf32>, vector<16x5xf32> -> vector<16x5xf32>
    %cst_90 = arith.constant dense<0.000000e+00> : vector<5x5xf32>
    %139 = tpu.matmul %1, %138, %cst_90 {dimension_numbers = #tpu.dot_dimension_numbers<[1], [0], [0], [1], [0, 0, 1, 1], [], []>, precision = #tpu.contract_precision<fp32>} : vector<5x16xf32>, vector<16x5xf32>, vector<5x5xf32> -> vector<5x5xf32>
    %cst_91 = arith.constant dense<0.000000e+00> : vector<16x5xf32>
    %140 = tpu.matmul %125, %3, %cst_91 {dimension_numbers = #tpu.dot_dimension_numbers<[1], [0], [0], [1], [0, 0, 1, 1], [], []>, precision = #tpu.contract_precision<fp32>} : vector<16x16xf32>, vector<16x5xf32>, vector<16x5xf32> -> vector<16x5xf32>
    %cst_92 = arith.constant dense<0.000000e+00> : vector<5x5xf32>
    %141 = tpu.matmul %1, %140, %cst_92 {dimension_numbers = #tpu.dot_dimension_numbers<[1], [0], [0], [1], [0, 0, 1, 1], [], []>, precision = #tpu.contract_precision<fp32>} : vector<5x16xf32>, vector<16x5xf32>, vector<5x5xf32> -> vector<5x5xf32>
    %142 = arith.mulf %139, %141 : vector<5x5xf32>
    %143 = math.rsqrt %142 : vector<5x5xf32>
    %144 = arith.mulf %137, %143 : vector<5x5xf32>
    %145 = arith.addf %110, %144 : vector<5x5xf32>
    %c4 = arith.constant 4 : index
    %c0_93 = arith.constant 0 : index
    %c0_94 = arith.constant 0 : index
    %146 = vector.load %arg1[%c4, %c0_93, %c0_94] : memref<8x16x16xf32, #tpu.memory_space<vmem>>, vector<1x16x16xf32>
    %147 = vector.shape_cast %146 : vector<1x16x16xf32> to vector<16x16xf32>
    %cst_95 = arith.constant 9.99999997E-7 : f32
    %cst_96 = arith.constant 0.999998986 : f32
    %148 = vector.broadcast %cst_95 : f32 to vector<16x16xf32>
    %149 = arith.maximumf %148, %147 : vector<16x16xf32>
    %150 = vector.broadcast %cst_96 : f32 to vector<16x16xf32>
    %151 = arith.minimumf %150, %149 : vector<16x16xf32>
    %c4_97 = arith.constant 4 : index
    %c0_98 = arith.constant 0 : index
    %c0_99 = arith.constant 0 : index
    %152 = vector.load %arg2[%c4_97, %c0_98, %c0_99] : memref<8x16x16xf32, #tpu.memory_space<vmem>>, vector<1x16x16xf32>
    %153 = vector.shape_cast %152 : vector<1x16x16xf32> to vector<16x16xf32>
    %cst_100 = arith.constant 9.99999997E-7 : f32
    %cst_101 = arith.constant 0.999998986 : f32
    %154 = vector.broadcast %cst_100 : f32 to vector<16x16xf32>
    %155 = arith.maximumf %154, %153 : vector<16x16xf32>
    %156 = vector.broadcast %cst_101 : f32 to vector<16x16xf32>
    %157 = arith.minimumf %156, %155 : vector<16x16xf32>
    %158 = arith.mulf %151, %157 : vector<16x16xf32>
    %159 = arith.mulf %151, %151 : vector<16x16xf32>
    %160 = arith.mulf %157, %157 : vector<16x16xf32>
    %cst_102 = arith.constant dense<0.000000e+00> : vector<16x8xf32>
    %161 = tpu.matmul %158, %2, %cst_102 {dimension_numbers = #tpu.dot_dimension_numbers<[1], [0], [0], [1], [0, 0, 1, 1], [], []>, precision = #tpu.contract_precision<fp32>} : vector<16x16xf32>, vector<16x8xf32>, vector<16x8xf32> -> vector<16x8xf32>
    %cst_103 = arith.constant dense<0.000000e+00> : vector<8x8xf32>
    %162 = tpu.matmul %0, %161, %cst_103 {dimension_numbers = #tpu.dot_dimension_numbers<[1], [0], [0], [1], [0, 0, 1, 1], [], []>, precision = #tpu.contract_precision<fp32>} : vector<8x16xf32>, vector<16x8xf32>, vector<8x8xf32> -> vector<8x8xf32>
    %cst_104 = arith.constant dense<0.000000e+00> : vector<16x8xf32>
    %163 = tpu.matmul %159, %2, %cst_104 {dimension_numbers = #tpu.dot_dimension_numbers<[1], [0], [0], [1], [0, 0, 1, 1], [], []>, precision = #tpu.contract_precision<fp32>} : vector<16x16xf32>, vector<16x8xf32>, vector<16x8xf32> -> vector<16x8xf32>
    %cst_105 = arith.constant dense<0.000000e+00> : vector<8x8xf32>
    %164 = tpu.matmul %0, %163, %cst_105 {dimension_numbers = #tpu.dot_dimension_numbers<[1], [0], [0], [1], [0, 0, 1, 1], [], []>, precision = #tpu.contract_precision<fp32>} : vector<8x16xf32>, vector<16x8xf32>, vector<8x8xf32> -> vector<8x8xf32>
    %cst_106 = arith.constant dense<0.000000e+00> : vector<16x8xf32>
    %165 = tpu.matmul %160, %2, %cst_106 {dimension_numbers = #tpu.dot_dimension_numbers<[1], [0], [0], [1], [0, 0, 1, 1], [], []>, precision = #tpu.contract_precision<fp32>} : vector<16x16xf32>, vector<16x8xf32>, vector<16x8xf32> -> vector<16x8xf32>
    %cst_107 = arith.constant dense<0.000000e+00> : vector<8x8xf32>
    %166 = tpu.matmul %0, %165, %cst_107 {dimension_numbers = #tpu.dot_dimension_numbers<[1], [0], [0], [1], [0, 0, 1, 1], [], []>, precision = #tpu.contract_precision<fp32>} : vector<8x16xf32>, vector<16x8xf32>, vector<8x8xf32> -> vector<8x8xf32>
    %167 = arith.mulf %164, %166 : vector<8x8xf32>
    %168 = math.rsqrt %167 : vector<8x8xf32>
    %169 = arith.mulf %162, %168 : vector<8x8xf32>
    %170 = arith.addf %135, %169 : vector<8x8xf32>
    %cst_108 = arith.constant dense<0.000000e+00> : vector<16x5xf32>
    %171 = tpu.matmul %158, %3, %cst_108 {dimension_numbers = #tpu.dot_dimension_numbers<[1], [0], [0], [1], [0, 0, 1, 1], [], []>, precision = #tpu.contract_precision<fp32>} : vector<16x16xf32>, vector<16x5xf32>, vector<16x5xf32> -> vector<16x5xf32>
    %cst_109 = arith.constant dense<0.000000e+00> : vector<5x5xf32>
    %172 = tpu.matmul %1, %171, %cst_109 {dimension_numbers = #tpu.dot_dimension_numbers<[1], [0], [0], [1], [0, 0, 1, 1], [], []>, precision = #tpu.contract_precision<fp32>} : vector<5x16xf32>, vector<16x5xf32>, vector<5x5xf32> -> vector<5x5xf32>
    %cst_110 = arith.constant dense<0.000000e+00> : vector<16x5xf32>
    %173 = tpu.matmul %159, %3, %cst_110 {dimension_numbers = #tpu.dot_dimension_numbers<[1], [0], [0], [1], [0, 0, 1, 1], [], []>, precision = #tpu.contract_precision<fp32>} : vector<16x16xf32>, vector<16x5xf32>, vector<16x5xf32> -> vector<16x5xf32>
    %cst_111 = arith.constant dense<0.000000e+00> : vector<5x5xf32>
    %174 = tpu.matmul %1, %173, %cst_111 {dimension_numbers = #tpu.dot_dimension_numbers<[1], [0], [0], [1], [0, 0, 1, 1], [], []>, precision = #tpu.contract_precision<fp32>} : vector<5x16xf32>, vector<16x5xf32>, vector<5x5xf32> -> vector<5x5xf32>
    %cst_112 = arith.constant dense<0.000000e+00> : vector<16x5xf32>
    %175 = tpu.matmul %160, %3, %cst_112 {dimension_numbers = #tpu.dot_dimension_numbers<[1], [0], [0], [1], [0, 0, 1, 1], [], []>, precision = #tpu.contract_precision<fp32>} : vector<16x16xf32>, vector<16x5xf32>, vector<16x5xf32> -> vector<16x5xf32>
    %cst_113 = arith.constant dense<0.000000e+00> : vector<5x5xf32>
    %176 = tpu.matmul %1, %175, %cst_113 {dimension_numbers = #tpu.dot_dimension_numbers<[1], [0], [0], [1], [0, 0, 1, 1], [], []>, precision = #tpu.contract_precision<fp32>} : vector<5x16xf32>, vector<16x5xf32>, vector<5x5xf32> -> vector<5x5xf32>
    %177 = arith.mulf %174, %176 : vector<5x5xf32>
    %178 = math.rsqrt %177 : vector<5x5xf32>
    %179 = arith.mulf %172, %178 : vector<5x5xf32>
    %180 = arith.addf %145, %179 : vector<5x5xf32>
    %c5 = arith.constant 5 : index
    %c0_114 = arith.constant 0 : index
    %c0_115 = arith.constant 0 : index
    %181 = vector.load %arg1[%c5, %c0_114, %c0_115] : memref<8x16x16xf32, #tpu.memory_space<vmem>>, vector<1x16x16xf32>
    %182 = vector.shape_cast %181 : vector<1x16x16xf32> to vector<16x16xf32>
    %cst_116 = arith.constant 9.99999997E-7 : f32
    %cst_117 = arith.constant 0.999998986 : f32
    %183 = vector.broadcast %cst_116 : f32 to vector<16x16xf32>
    %184 = arith.maximumf %183, %182 : vector<16x16xf32>
    %185 = vector.broadcast %cst_117 : f32 to vector<16x16xf32>
    %186 = arith.minimumf %185, %184 : vector<16x16xf32>
    %c5_118 = arith.constant 5 : index
    %c0_119 = arith.constant 0 : index
    %c0_120 = arith.constant 0 : index
    %187 = vector.load %arg2[%c5_118, %c0_119, %c0_120] : memref<8x16x16xf32, #tpu.memory_space<vmem>>, vector<1x16x16xf32>
    %188 = vector.shape_cast %187 : vector<1x16x16xf32> to vector<16x16xf32>
    %cst_121 = arith.constant 9.99999997E-7 : f32
    %cst_122 = arith.constant 0.999998986 : f32
    %189 = vector.broadcast %cst_121 : f32 to vector<16x16xf32>
    %190 = arith.maximumf %189, %188 : vector<16x16xf32>
    %191 = vector.broadcast %cst_122 : f32 to vector<16x16xf32>
    %192 = arith.minimumf %191, %190 : vector<16x16xf32>
    %193 = arith.mulf %186, %192 : vector<16x16xf32>
    %194 = arith.mulf %186, %186 : vector<16x16xf32>
    %195 = arith.mulf %192, %192 : vector<16x16xf32>
    %cst_123 = arith.constant dense<0.000000e+00> : vector<16x8xf32>
    %196 = tpu.matmul %193, %2, %cst_123 {dimension_numbers = #tpu.dot_dimension_numbers<[1], [0], [0], [1], [0, 0, 1, 1], [], []>, precision = #tpu.contract_precision<fp32>} : vector<16x16xf32>, vector<16x8xf32>, vector<16x8xf32> -> vector<16x8xf32>
    %cst_124 = arith.constant dense<0.000000e+00> : vector<8x8xf32>
    %197 = tpu.matmul %0, %196, %cst_124 {dimension_numbers = #tpu.dot_dimension_numbers<[1], [0], [0], [1], [0, 0, 1, 1], [], []>, precision = #tpu.contract_precision<fp32>} : vector<8x16xf32>, vector<16x8xf32>, vector<8x8xf32> -> vector<8x8xf32>
    %cst_125 = arith.constant dense<0.000000e+00> : vector<16x8xf32>
    %198 = tpu.matmul %194, %2, %cst_125 {dimension_numbers = #tpu.dot_dimension_numbers<[1], [0], [0], [1], [0, 0, 1, 1], [], []>, precision = #tpu.contract_precision<fp32>} : vector<16x16xf32>, vector<16x8xf32>, vector<16x8xf32> -> vector<16x8xf32>
    %cst_126 = arith.constant dense<0.000000e+00> : vector<8x8xf32>
    %199 = tpu.matmul %0, %198, %cst_126 {dimension_numbers = #tpu.dot_dimension_numbers<[1], [0], [0], [1], [0, 0, 1, 1], [], []>, precision = #tpu.contract_precision<fp32>} : vector<8x16xf32>, vector<16x8xf32>, vector<8x8xf32> -> vector<8x8xf32>
    %cst_127 = arith.constant dense<0.000000e+00> : vector<16x8xf32>
    %200 = tpu.matmul %195, %2, %cst_127 {dimension_numbers = #tpu.dot_dimension_numbers<[1], [0], [0], [1], [0, 0, 1, 1], [], []>, precision = #tpu.contract_precision<fp32>} : vector<16x16xf32>, vector<16x8xf32>, vector<16x8xf32> -> vector<16x8xf32>
    %cst_128 = arith.constant dense<0.000000e+00> : vector<8x8xf32>
    %201 = tpu.matmul %0, %200, %cst_128 {dimension_numbers = #tpu.dot_dimension_numbers<[1], [0], [0], [1], [0, 0, 1, 1], [], []>, precision = #tpu.contract_precision<fp32>} : vector<8x16xf32>, vector<16x8xf32>, vector<8x8xf32> -> vector<8x8xf32>
    %202 = arith.mulf %199, %201 : vector<8x8xf32>
    %203 = math.rsqrt %202 : vector<8x8xf32>
    %204 = arith.mulf %197, %203 : vector<8x8xf32>
    %205 = arith.addf %170, %204 : vector<8x8xf32>
    %cst_129 = arith.constant dense<0.000000e+00> : vector<16x5xf32>
    %206 = tpu.matmul %193, %3, %cst_129 {dimension_numbers = #tpu.dot_dimension_numbers<[1], [0], [0], [1], [0, 0, 1, 1], [], []>, precision = #tpu.contract_precision<fp32>} : vector<16x16xf32>, vector<16x5xf32>, vector<16x5xf32> -> vector<16x5xf32>
    %cst_130 = arith.constant dense<0.000000e+00> : vector<5x5xf32>
    %207 = tpu.matmul %1, %206, %cst_130 {dimension_numbers = #tpu.dot_dimension_numbers<[1], [0], [0], [1], [0, 0, 1, 1], [], []>, precision = #tpu.contract_precision<fp32>} : vector<5x16xf32>, vector<16x5xf32>, vector<5x5xf32> -> vector<5x5xf32>
    %cst_131 = arith.constant dense<0.000000e+00> : vector<16x5xf32>
    %208 = tpu.matmul %194, %3, %cst_131 {dimension_numbers = #tpu.dot_dimension_numbers<[1], [0], [0], [1], [0, 0, 1, 1], [], []>, precision = #tpu.contract_precision<fp32>} : vector<16x16xf32>, vector<16x5xf32>, vector<16x5xf32> -> vector<16x5xf32>
    %cst_132 = arith.constant dense<0.000000e+00> : vector<5x5xf32>
    %209 = tpu.matmul %1, %208, %cst_132 {dimension_numbers = #tpu.dot_dimension_numbers<[1], [0], [0], [1], [0, 0, 1, 1], [], []>, precision = #tpu.contract_precision<fp32>} : vector<5x16xf32>, vector<16x5xf32>, vector<5x5xf32> -> vector<5x5xf32>
    %cst_133 = arith.constant dense<0.000000e+00> : vector<16x5xf32>
    %210 = tpu.matmul %195, %3, %cst_133 {dimension_numbers = #tpu.dot_dimension_numbers<[1], [0], [0], [1], [0, 0, 1, 1], [], []>, precision = #tpu.contract_precision<fp32>} : vector<16x16xf32>, vector<16x5xf32>, vector<16x5xf32> -> vector<16x5xf32>
    %cst_134 = arith.constant dense<0.000000e+00> : vector<5x5xf32>
    %211 = tpu.matmul %1, %210, %cst_134 {dimension_numbers = #tpu.dot_dimension_numbers<[1], [0], [0], [1], [0, 0, 1, 1], [], []>, precision = #tpu.contract_precision<fp32>} : vector<5x16xf32>, vector<16x5xf32>, vector<5x5xf32> -> vector<5x5xf32>
    %212 = arith.mulf %209, %211 : vector<5x5xf32>
    %213 = math.rsqrt %212 : vector<5x5xf32>
    %214 = arith.mulf %207, %213 : vector<5x5xf32>
    %215 = arith.addf %180, %214 : vector<5x5xf32>
    %c6 = arith.constant 6 : index
    %c0_135 = arith.constant 0 : index
    %c0_136 = arith.constant 0 : index
    %216 = vector.load %arg1[%c6, %c0_135, %c0_136] : memref<8x16x16xf32, #tpu.memory_space<vmem>>, vector<1x16x16xf32>
    %217 = vector.shape_cast %216 : vector<1x16x16xf32> to vector<16x16xf32>
    %cst_137 = arith.constant 9.99999997E-7 : f32
    %cst_138 = arith.constant 0.999998986 : f32
    %218 = vector.broadcast %cst_137 : f32 to vector<16x16xf32>
    %219 = arith.maximumf %218, %217 : vector<16x16xf32>
    %220 = vector.broadcast %cst_138 : f32 to vector<16x16xf32>
    %221 = arith.minimumf %220, %219 : vector<16x16xf32>
    %c6_139 = arith.constant 6 : index
    %c0_140 = arith.constant 0 : index
    %c0_141 = arith.constant 0 : index
    %222 = vector.load %arg2[%c6_139, %c0_140, %c0_141] : memref<8x16x16xf32, #tpu.memory_space<vmem>>, vector<1x16x16xf32>
    %223 = vector.shape_cast %222 : vector<1x16x16xf32> to vector<16x16xf32>
    %cst_142 = arith.constant 9.99999997E-7 : f32
    %cst_143 = arith.constant 0.999998986 : f32
    %224 = vector.broadcast %cst_142 : f32 to vector<16x16xf32>
    %225 = arith.maximumf %224, %223 : vector<16x16xf32>
    %226 = vector.broadcast %cst_143 : f32 to vector<16x16xf32>
    %227 = arith.minimumf %226, %225 : vector<16x16xf32>
    %228 = arith.mulf %221, %227 : vector<16x16xf32>
    %229 = arith.mulf %221, %221 : vector<16x16xf32>
    %230 = arith.mulf %227, %227 : vector<16x16xf32>
    %cst_144 = arith.constant dense<0.000000e+00> : vector<16x8xf32>
    %231 = tpu.matmul %228, %2, %cst_144 {dimension_numbers = #tpu.dot_dimension_numbers<[1], [0], [0], [1], [0, 0, 1, 1], [], []>, precision = #tpu.contract_precision<fp32>} : vector<16x16xf32>, vector<16x8xf32>, vector<16x8xf32> -> vector<16x8xf32>
    %cst_145 = arith.constant dense<0.000000e+00> : vector<8x8xf32>
    %232 = tpu.matmul %0, %231, %cst_145 {dimension_numbers = #tpu.dot_dimension_numbers<[1], [0], [0], [1], [0, 0, 1, 1], [], []>, precision = #tpu.contract_precision<fp32>} : vector<8x16xf32>, vector<16x8xf32>, vector<8x8xf32> -> vector<8x8xf32>
    %cst_146 = arith.constant dense<0.000000e+00> : vector<16x8xf32>
    %233 = tpu.matmul %229, %2, %cst_146 {dimension_numbers = #tpu.dot_dimension_numbers<[1], [0], [0], [1], [0, 0, 1, 1], [], []>, precision = #tpu.contract_precision<fp32>} : vector<16x16xf32>, vector<16x8xf32>, vector<16x8xf32> -> vector<16x8xf32>
    %cst_147 = arith.constant dense<0.000000e+00> : vector<8x8xf32>
    %234 = tpu.matmul %0, %233, %cst_147 {dimension_numbers = #tpu.dot_dimension_numbers<[1], [0], [0], [1], [0, 0, 1, 1], [], []>, precision = #tpu.contract_precision<fp32>} : vector<8x16xf32>, vector<16x8xf32>, vector<8x8xf32> -> vector<8x8xf32>
    %cst_148 = arith.constant dense<0.000000e+00> : vector<16x8xf32>
    %235 = tpu.matmul %230, %2, %cst_148 {dimension_numbers = #tpu.dot_dimension_numbers<[1], [0], [0], [1], [0, 0, 1, 1], [], []>, precision = #tpu.contract_precision<fp32>} : vector<16x16xf32>, vector<16x8xf32>, vector<16x8xf32> -> vector<16x8xf32>
    %cst_149 = arith.constant dense<0.000000e+00> : vector<8x8xf32>
    %236 = tpu.matmul %0, %235, %cst_149 {dimension_numbers = #tpu.dot_dimension_numbers<[1], [0], [0], [1], [0, 0, 1, 1], [], []>, precision = #tpu.contract_precision<fp32>} : vector<8x16xf32>, vector<16x8xf32>, vector<8x8xf32> -> vector<8x8xf32>
    %237 = arith.mulf %234, %236 : vector<8x8xf32>
    %238 = math.rsqrt %237 : vector<8x8xf32>
    %239 = arith.mulf %232, %238 : vector<8x8xf32>
    %240 = arith.addf %205, %239 : vector<8x8xf32>
    %cst_150 = arith.constant dense<0.000000e+00> : vector<16x5xf32>
    %241 = tpu.matmul %228, %3, %cst_150 {dimension_numbers = #tpu.dot_dimension_numbers<[1], [0], [0], [1], [0, 0, 1, 1], [], []>, precision = #tpu.contract_precision<fp32>} : vector<16x16xf32>, vector<16x5xf32>, vector<16x5xf32> -> vector<16x5xf32>
    %cst_151 = arith.constant dense<0.000000e+00> : vector<5x5xf32>
    %242 = tpu.matmul %1, %241, %cst_151 {dimension_numbers = #tpu.dot_dimension_numbers<[1], [0], [0], [1], [0, 0, 1, 1], [], []>, precision = #tpu.contract_precision<fp32>} : vector<5x16xf32>, vector<16x5xf32>, vector<5x5xf32> -> vector<5x5xf32>
    %cst_152 = arith.constant dense<0.000000e+00> : vector<16x5xf32>
    %243 = tpu.matmul %229, %3, %cst_152 {dimension_numbers = #tpu.dot_dimension_numbers<[1], [0], [0], [1], [0, 0, 1, 1], [], []>, precision = #tpu.contract_precision<fp32>} : vector<16x16xf32>, vector<16x5xf32>, vector<16x5xf32> -> vector<16x5xf32>
    %cst_153 = arith.constant dense<0.000000e+00> : vector<5x5xf32>
    %244 = tpu.matmul %1, %243, %cst_153 {dimension_numbers = #tpu.dot_dimension_numbers<[1], [0], [0], [1], [0, 0, 1, 1], [], []>, precision = #tpu.contract_precision<fp32>} : vector<5x16xf32>, vector<16x5xf32>, vector<5x5xf32> -> vector<5x5xf32>
    %cst_154 = arith.constant dense<0.000000e+00> : vector<16x5xf32>
    %245 = tpu.matmul %230, %3, %cst_154 {dimension_numbers = #tpu.dot_dimension_numbers<[1], [0], [0], [1], [0, 0, 1, 1], [], []>, precision = #tpu.contract_precision<fp32>} : vector<16x16xf32>, vector<16x5xf32>, vector<16x5xf32> -> vector<16x5xf32>
    %cst_155 = arith.constant dense<0.000000e+00> : vector<5x5xf32>
    %246 = tpu.matmul %1, %245, %cst_155 {dimension_numbers = #tpu.dot_dimension_numbers<[1], [0], [0], [1], [0, 0, 1, 1], [], []>, precision = #tpu.contract_precision<fp32>} : vector<5x16xf32>, vector<16x5xf32>, vector<5x5xf32> -> vector<5x5xf32>
    %247 = arith.mulf %244, %246 : vector<5x5xf32>
    %248 = math.rsqrt %247 : vector<5x5xf32>
    %249 = arith.mulf %242, %248 : vector<5x5xf32>
    %250 = arith.addf %215, %249 : vector<5x5xf32>
    %c7 = arith.constant 7 : index
    %c0_156 = arith.constant 0 : index
    %c0_157 = arith.constant 0 : index
    %251 = vector.load %arg1[%c7, %c0_156, %c0_157] : memref<8x16x16xf32, #tpu.memory_space<vmem>>, vector<1x16x16xf32>
    %252 = vector.shape_cast %251 : vector<1x16x16xf32> to vector<16x16xf32>
    %cst_158 = arith.constant 9.99999997E-7 : f32
    %cst_159 = arith.constant 0.999998986 : f32
    %253 = vector.broadcast %cst_158 : f32 to vector<16x16xf32>
    %254 = arith.maximumf %253, %252 : vector<16x16xf32>
    %255 = vector.broadcast %cst_159 : f32 to vector<16x16xf32>
    %256 = arith.minimumf %255, %254 : vector<16x16xf32>
    %c7_160 = arith.constant 7 : index
    %c0_161 = arith.constant 0 : index
    %c0_162 = arith.constant 0 : index
    %257 = vector.load %arg2[%c7_160, %c0_161, %c0_162] : memref<8x16x16xf32, #tpu.memory_space<vmem>>, vector<1x16x16xf32>
    %258 = vector.shape_cast %257 : vector<1x16x16xf32> to vector<16x16xf32>
    %cst_163 = arith.constant 9.99999997E-7 : f32
    %cst_164 = arith.constant 0.999998986 : f32
    %259 = vector.broadcast %cst_163 : f32 to vector<16x16xf32>
    %260 = arith.maximumf %259, %258 : vector<16x16xf32>
    %261 = vector.broadcast %cst_164 : f32 to vector<16x16xf32>
    %262 = arith.minimumf %261, %260 : vector<16x16xf32>
    %263 = arith.mulf %256, %262 : vector<16x16xf32>
    %264 = arith.mulf %256, %256 : vector<16x16xf32>
    %265 = arith.mulf %262, %262 : vector<16x16xf32>
    %cst_165 = arith.constant dense<0.000000e+00> : vector<16x8xf32>
    %266 = tpu.matmul %263, %2, %cst_165 {dimension_numbers = #tpu.dot_dimension_numbers<[1], [0], [0], [1], [0, 0, 1, 1], [], []>, precision = #tpu.contract_precision<fp32>} : vector<16x16xf32>, vector<16x8xf32>, vector<16x8xf32> -> vector<16x8xf32>
    %cst_166 = arith.constant dense<0.000000e+00> : vector<8x8xf32>
    %267 = tpu.matmul %0, %266, %cst_166 {dimension_numbers = #tpu.dot_dimension_numbers<[1], [0], [0], [1], [0, 0, 1, 1], [], []>, precision = #tpu.contract_precision<fp32>} : vector<8x16xf32>, vector<16x8xf32>, vector<8x8xf32> -> vector<8x8xf32>
    %cst_167 = arith.constant dense<0.000000e+00> : vector<16x8xf32>
    %268 = tpu.matmul %264, %2, %cst_167 {dimension_numbers = #tpu.dot_dimension_numbers<[1], [0], [0], [1], [0, 0, 1, 1], [], []>, precision = #tpu.contract_precision<fp32>} : vector<16x16xf32>, vector<16x8xf32>, vector<16x8xf32> -> vector<16x8xf32>
    %cst_168 = arith.constant dense<0.000000e+00> : vector<8x8xf32>
    %269 = tpu.matmul %0, %268, %cst_168 {dimension_numbers = #tpu.dot_dimension_numbers<[1], [0], [0], [1], [0, 0, 1, 1], [], []>, precision = #tpu.contract_precision<fp32>} : vector<8x16xf32>, vector<16x8xf32>, vector<8x8xf32> -> vector<8x8xf32>
    %cst_169 = arith.constant dense<0.000000e+00> : vector<16x8xf32>
    %270 = tpu.matmul %265, %2, %cst_169 {dimension_numbers = #tpu.dot_dimension_numbers<[1], [0], [0], [1], [0, 0, 1, 1], [], []>, precision = #tpu.contract_precision<fp32>} : vector<16x16xf32>, vector<16x8xf32>, vector<16x8xf32> -> vector<16x8xf32>
    %cst_170 = arith.constant dense<0.000000e+00> : vector<8x8xf32>
    %271 = tpu.matmul %0, %270, %cst_170 {dimension_numbers = #tpu.dot_dimension_numbers<[1], [0], [0], [1], [0, 0, 1, 1], [], []>, precision = #tpu.contract_precision<fp32>} : vector<8x16xf32>, vector<16x8xf32>, vector<8x8xf32> -> vector<8x8xf32>
    %272 = arith.mulf %269, %271 : vector<8x8xf32>
    %273 = math.rsqrt %272 : vector<8x8xf32>
    %274 = arith.mulf %267, %273 : vector<8x8xf32>
    %275 = arith.addf %240, %274 : vector<8x8xf32>
    %cst_171 = arith.constant dense<0.000000e+00> : vector<16x5xf32>
    %276 = tpu.matmul %263, %3, %cst_171 {dimension_numbers = #tpu.dot_dimension_numbers<[1], [0], [0], [1], [0, 0, 1, 1], [], []>, precision = #tpu.contract_precision<fp32>} : vector<16x16xf32>, vector<16x5xf32>, vector<16x5xf32> -> vector<16x5xf32>
    %cst_172 = arith.constant dense<0.000000e+00> : vector<5x5xf32>
    %277 = tpu.matmul %1, %276, %cst_172 {dimension_numbers = #tpu.dot_dimension_numbers<[1], [0], [0], [1], [0, 0, 1, 1], [], []>, precision = #tpu.contract_precision<fp32>} : vector<5x16xf32>, vector<16x5xf32>, vector<5x5xf32> -> vector<5x5xf32>
    %cst_173 = arith.constant dense<0.000000e+00> : vector<16x5xf32>
    %278 = tpu.matmul %264, %3, %cst_173 {dimension_numbers = #tpu.dot_dimension_numbers<[1], [0], [0], [1], [0, 0, 1, 1], [], []>, precision = #tpu.contract_precision<fp32>} : vector<16x16xf32>, vector<16x5xf32>, vector<16x5xf32> -> vector<16x5xf32>
    %cst_174 = arith.constant dense<0.000000e+00> : vector<5x5xf32>
    %279 = tpu.matmul %1, %278, %cst_174 {dimension_numbers = #tpu.dot_dimension_numbers<[1], [0], [0], [1], [0, 0, 1, 1], [], []>, precision = #tpu.contract_precision<fp32>} : vector<5x16xf32>, vector<16x5xf32>, vector<5x5xf32> -> vector<5x5xf32>
    %cst_175 = arith.constant dense<0.000000e+00> : vector<16x5xf32>
    %280 = tpu.matmul %265, %3, %cst_175 {dimension_numbers = #tpu.dot_dimension_numbers<[1], [0], [0], [1], [0, 0, 1, 1], [], []>, precision = #tpu.contract_precision<fp32>} : vector<16x16xf32>, vector<16x5xf32>, vector<16x5xf32> -> vector<16x5xf32>
    %cst_176 = arith.constant dense<0.000000e+00> : vector<5x5xf32>
    %281 = tpu.matmul %1, %280, %cst_176 {dimension_numbers = #tpu.dot_dimension_numbers<[1], [0], [0], [1], [0, 0, 1, 1], [], []>, precision = #tpu.contract_precision<fp32>} : vector<5x16xf32>, vector<16x5xf32>, vector<5x5xf32> -> vector<5x5xf32>
    %282 = arith.mulf %279, %281 : vector<5x5xf32>
    %283 = math.rsqrt %282 : vector<5x5xf32>
    %284 = arith.mulf %277, %283 : vector<5x5xf32>
    %285 = arith.addf %250, %284 : vector<5x5xf32>
    %286 = vector.shape_cast %275 : vector<8x8xf32> to vector<1x8x8xf32>
    %cst_177 = arith.constant dense<0.000000e+00> : vector<1xf32>
    %287 = vector.multi_reduction <add>, %286, %cst_177 [1, 2] : vector<1x8x8xf32> to vector<1xf32>
    %288 = vector.shape_cast %287 : vector<1xf32> to vector<1x1x1xf32>
    %289 = vector.extract %288[0, 0, 0] : f32 from vector<1x1x1xf32>
    %290 = vector.broadcast %289 : f32 to vector<1x1x128xf32>
    %c0_178 = arith.constant 0 : index
    %c0_179 = arith.constant 0 : index
    %c0_180 = arith.constant 0 : index
    %291 = vector.load %arg7[%c0_178, %c0_179, %c0_180] : memref<1x2x128xf32, #tpu.memory_space<vmem>>, vector<1x1x128xf32>
    tpu.vector_store %arg7[%c0_178, %c0_179, %c0_180], %290 {strides = array<i32>} : memref<1x2x128xf32, #tpu.memory_space<vmem>>, vector<1x1x128xf32>,
    %292 = vector.shape_cast %285 : vector<5x5xf32> to vector<1x5x5xf32>
    %cst_181 = arith.constant dense<0.000000e+00> : vector<1xf32>
    %293 = vector.multi_reduction <add>, %292, %cst_181 [1, 2] : vector<1x5x5xf32> to vector<1xf32>
    %294 = vector.shape_cast %293 : vector<1xf32> to vector<1x1x1xf32>
    %295 = vector.extract %294[0, 0, 0] : f32 from vector<1x1x1xf32>
    %296 = vector.broadcast %295 : f32 to vector<1x1x128xf32>
    %c0_182 = arith.constant 0 : index
    %c1_183 = arith.constant 1 : index
    %c0_184 = arith.constant 0 : index
    %297 = vector.load %arg7[%c0_182, %c1_183, %c0_184] : memref<1x2x128xf32, #tpu.memory_space<vmem>>, vector<1x1x128xf32>
    tpu.vector_store %arg7[%c0_182, %c1_183, %c0_184], %296 {strides = array<i32>} : memref<1x2x128xf32, #tpu.memory_space<vmem>>, vector<1x1x128xf32>,
    return
  }
  func.func @transform_0(%arg0: i32) -> (i32, i32, i32) {
    %c0_i32 = arith.constant 0 : i32
    %c0_i32_0 = arith.constant 0 : i32
    %c0_i32_1 = arith.constant 0 : i32
    return %arg0, %c0_i32, %c0_i32_0 : i32, i32, i32
  }
  func.func @transform_1(%arg0: i32) -> (i32, i32, i32) {
    %c0_i32 = arith.constant 0 : i32
    %c0_i32_0 = arith.constant 0 : i32
    %c0_i32_1 = arith.constant 0 : i32
    return %arg0, %c0_i32, %c0_i32_0 : i32, i32, i32
  }
  func.func @transform_2(%arg0: i32) -> (i32, i32) {
    %c0_i32 = arith.constant 0 : i32
    %c0_i32_0 = arith.constant 0 : i32
    %c0_i32_1 = arith.constant 0 : i32
    return %c0_i32, %c0_i32_0 : i32, i32
  }
  func.func @transform_3(%arg0: i32) -> (i32, i32) {
    %c0_i32 = arith.constant 0 : i32
    %c0_i32_0 = arith.constant 0 : i32
    %c0_i32_1 = arith.constant 0 : i32
    return %c0_i32, %c0_i32_0 : i32, i32
  }
  func.func @transform_4(%arg0: i32) -> (i32, i32) {
    %c0_i32 = arith.constant 0 : i32
    %c0_i32_0 = arith.constant 0 : i32
    %c0_i32_1 = arith.constant 0 : i32
    return %c0_i32, %c0_i32_0 : i32, i32
  }
  func.func @transform_5(%arg0: i32) -> (i32, i32) {
    %c0_i32 = arith.constant 0 : i32
    %c0_i32_0 = arith.constant 0 : i32
    %c0_i32_1 = arith.constant 0 : i32
    return %c0_i32, %c0_i32_0 : i32, i32
  }
  func.func @transform_6(%arg0: i32) -> (i32, i32, i32) {
    %c0_i32 = arith.constant 0 : i32
    %c0_i32_0 = arith.constant 0 : i32
    %c0_i32_1 = arith.constant 0 : i32
    return %arg0, %c0_i32, %c0_i32_0 : i32, i32, i32
  }
}

</mosaic_0001>

<bundles_post_ra>
// kernel: tpu_custom_call.1
= control target key start
LH: loop header
LB: loop body
LE: loop exit
PB: predicated region body
PF: predicated region fallthrough
CT: control target
= control target key end

     0   :  { %11 = vsyncpa [#allocation3], 0  ;;  %s57009_s0 = inlined_call_operand.hbm [shape: f32[8,16,16], index: 0, kind: input, shape index: {}]   ;;  %s57010_s1 = inlined_call_operand.hbm [shape: f32[8,16,16], index: 1, kind: input, shape index: {}]   ;;  %s57011_s2 = inlined_call_operand.vmem [shape: f32[8,16], index: 2, kind: input, shape index: {}]   ;;  %s57012_s3 = inlined_call_operand.vmem [shape: f32[16,8], index: 3, kind: input, shape index: {}]   ;;  %s57013_s4 = inlined_call_operand.vmem [shape: f32[5,16], index: 4, kind: input, shape index: {}]   ;;  %s57014_s5 = inlined_call_operand.vmem [shape: f32[16,5], index: 5, kind: input, shape index: {}]   ;;  %s57015_s6 = inlined_call_operand.hbm [shape: f32[1,2,128], index: 6, kind: output, shape index: {}]  }
   0x1   :  { %12 = vsyncpa [#allocation6], 0 }
   0x2   :  { %13 = vsyncpa [#allocation4], 0  ;;  %s52758_s21 = smov [#allocation2]  }
   0x3   :  { %s19_s22 = sshll.u32 %s52758_s21, 4  ;;  %s20_s22 = int_to_ptr.vmem [resolvable:$true] %s19_s22 }
   0x4   :  { %s52700_s23 = scalar_lea.vmem %s20_s22, 2048  ;;  %p52705_p1 = scmp.lt.s32.totalorder %s20_s22, %s20_s22 }
   0x5   :  { %p52701_p0 = scmp.ne.s32.totalorder %s20_s22, %s52700_s23  ;;  %p52706_p2 = scmp.lt.s32.totalorder %s52700_s23, %s52700_s23 }
   0x7   :  { %p52707_p3 = por %p52706_p2, %p52705_p1 }
   0x9   :  { %p52708_p4 = pnand %p52707_p3, %p52701_p0 }
   0xb   :  { %52711 = shalt.err (!%p52708_p4)
}
   0xc   :  { %s52759_s24 = smov 128   ;;  %s52760_s25 = smov 8  }
   0xd   :  { %25 = dma.hbm_to_vmem [thread:$0]  %s57009_s0, 2048, %s20_s22, [#allocation3], %s52759_s24, %s52759_s24, %s52760_s25  }
   0xe   :  { %s52761_s28 = smov [#allocation5]  }
   0xf   :  { %s31_s29 = sshll.u32 %s52761_s28, 4  ;;  %s32_s29 = int_to_ptr.vmem [resolvable:$true] %s31_s29 }
  0x10   :  { %s52720_s30 = scalar_lea.vmem %s32_s29, 2048  ;;  %p52725_p6 = scmp.lt.s32.totalorder %s32_s29, %s32_s29 }
  0x11   :  { %p52721_p5 = scmp.ne.s32.totalorder %s32_s29, %s52720_s30  ;;  %p52726_p7 = scmp.lt.s32.totalorder %s52720_s30, %s52720_s30 }
  0x13   :  { %p52727_p8 = por %p52726_p7, %p52725_p6 }
  0x15   :  { %p52728_p9 = pnand %p52727_p8, %p52721_p5 }
  0x17   :  { %52731 = shalt.err (!%p52728_p9)
}
  0x18   :  { %37 = dma.hbm_to_vmem [thread:$0]  %s57010_s1, 2048, %s32_s29, [#allocation6], %s52759_s24, %s52759_s24, %s52760_s25  }
  0x19   :  { %52752 = dma.done.wait [#allocation3], 2048  }
  0x1a   :  { %52753 = vsyncadd [#allocation3], 4294965248 }
  0x1b   :  { %52754 = dma.done.wait [#allocation6], 2048  }
  0x1c   :  { %52755 = vsyncadd [#allocation6], 4294965248  ;;  %v54_v0 = vld [vmem:[%s57012_s3] sm:$0xff]  ;;  %v55_v1 = vld [vmem:[%s57012_s3 + $0x8] sm:$0xff]  ;;  %vm76_vm0 = vcmask 130048   ;;  %v57016_v38 = vmov 0.0  }
  0x1d   :  { %v52812_v2 = vand.u32 4294901760, %v55_v1  ;;  %v52814_v3 = vand.u32 4294901760, %v54_v0  ;;  %v58_v4 = vld [vmem:[#allocation2] sm:$0xff]  ;;  %v59_v8 = vld [vmem:[#allocation2 + $0x8] sm:$0xff]  ;;  %vm52763_vm1 = vmmov 0   ;;  %vm46559_vm2 = vcmask 64512  }
  0x1e   :  { %v64_v5 = vld [vmem:[#allocation5] sm:$0xff]  ;;  %v60_v6 = vmax.f32 %v58_v4, 1e-06  ;;  %v61_v11 = vmax.f32 %v59_v8, 1e-06  ;;  %v65_v12 = vld [vmem:[#allocation5 + $0x8] sm:$0xff] }
  0x1f   :  { %57093 = vst [vmem:[#allocation11_spill] sm:$0xff] %v52812_v2  ;;  %57094 = vst [vmem:[#allocation12_spill] sm:$0xff] %v52814_v3  ;;  %v66_v7 = vmax.f32 %v64_v5, 1e-06  ;;  %48617 = vmatprep.subr.mxu0 %v52812_v2  ;;  %v52818_v9 = vsub.f32 %v55_v1, %v52812_v2  ;;  %v52821_v10 = vsub.f32 %v54_v0, %v52814_v3  ;;  %v67_v15 = vmax.f32 %v65_v12, 1e-06 }
  0x20   :  { %48618 = vmatpush3.msra.mxu0 %v52812_v2  ;;  %v52824_v13 = vmin.f32 %v60_v6, 0.999999  ;;  %v52835_v18 = vmin.f32 %v61_v11, 0.999999  ;;  %v52_v39 = vld [vmem:[%s57011_s2] sm:$0xff]  ;;  %vm46572_vm3 = vcmask 36864  }
  0x21   :  { %57095 = vst [vmem:[#allocation13_spill] sm:$0xff] %v52818_v9  ;;  %57096 = vst [vmem:[#allocation14_spill] sm:$0xff] %v52821_v10  ;;  %v52826_v14 = vmin.f32 %v66_v7, 0.999999  ;;  %v52829_v16 = vand.u32 4294901760, %v52818_v9  ;;  %48619 = vmatprep.subr.mxu0 %v52814_v3  ;;  %v52833_v17 = vand.u32 4294901760, %v52821_v10 }
  0x22   :  { %48620 = vmatpush3.msra.mxu0 %v52814_v3  ;;  %v52840_v20 = vmin.f32 %v67_v15, 0.999999  ;;  %v586_v41 = vsel %vm76_vm0, %v52_v39, 0  ;;  %v72_v59 = vmul.f32 %v52824_v13, %v52824_v13  ;;  %v73_v62 = vmul.f32 %v52835_v18, %v52835_v18  ;;  %s52764_s16 = smov [#allocation7]  }
  0x23   :  { %57097 = vst [vmem:[#allocation15_spill] sm:$0xff] %v52829_v16  ;;  %57098 = vst [vmem:[#allocation16_spill] sm:$0xff] %v52833_v17  ;;  %v70_v19 = vmul.f32 %v52826_v14, %v52824_v13  ;;  %v202_v21 = vsub.f32 %v52818_v9, %v52829_v16  ;;  %v209_v22 = vsub.f32 %v52821_v10, %v52833_v17  ;;  %48631 = vmatprep.subr.mxu0 %v52818_v9  ;;  %s46591_s17 = sshll.u32 %s52764_s16, 4  ;;  %s46592_s17 = int_to_ptr.vmem [resolvable:$true] %s46591_s17 }
  0x24   :  { %v71_v24 = vmul.f32 %v52840_v20, %v52835_v18  ;;  %v52920_v43 = vand.u32 4294901760, %v586_v41  ;;  %v1048_v6 = vsel %vm76_vm0, %v72_v59, 0  ;;  %v1051_v11 = vsel %vm76_vm0, %v73_v62, 0  ;;  %s52732_s19 = scalar_lea.vmem %s46592_s17, 32  ;;  %p52737_p11 = scmp.lt.s32.totalorder %s46592_s17, %s46592_s17 }
  0x25   :  { %v78_v23 = vsel %vm76_vm0, %v70_v19, 0  ;;  %v52850_v25 = vand.u32 4294901760, %v202_v21  ;;  %v52852_v26 = vand.u32 4294901760, %v209_v22  ;;  %v52938_v19 = vand.u32 4294901760, %v1048_v6  ;;  %p52733_p10 = scmp.ne.s32.totalorder %s46592_s17, %s52732_s19  ;;  %p52738_p12 = scmp.lt.s32.totalorder %s52732_s19, %s52732_s19 }
  0x26   :  { %v52854_v27 = vand.u32 4294901760, %v78_v23  ;;  %v81_v28 = vsel %vm76_vm0, %v71_v24, 0  ;;  %v52923_v47 = vsub.f32 %v586_v41, %v52920_v43  ;;  %v52941_v18 = vand.u32 4294901760, %v1051_v11 }
  0x27   :  { %57099 = vst [vmem:[#allocation17_spill] sm:$0xff] %v52850_v25  ;;  %57100 = vst [vmem:[#allocation18_spill] sm:$0xff] %v52852_v26  ;;  %48624 = vmatprep.subr.mxu1 %v52850_v25  ;;  %v52862_v30 = vand.u32 4294901760, %v81_v28  ;;  %p52739_p13 = por %p52738_p12, %p52737_p11 }
  0x28   :  { %v52859_v29 = vsub.f32 %v78_v23, %v52854_v27  ;;  %48628 = vmatprep.mubr.f32.mxu1 %v52854_v27  ;;  %48625 = vmatpush3.msra.mxu1 %v52850_v25  ;;  %v52926_v54 = vand.u32 4294901760, %v52923_v47 }
  0x29   :  { %48626 = vmatprep.subr.mxu1 %v52852_v26  ;;  %v52870_v32 = vsub.f32 %v81_v28, %v52862_v30  ;;  %v52948_v28 = vsub.f32 %v1048_v6, %v52938_v19  ;;  %p52740_p0 = pnand %p52739_p13, %p52733_p10 }
  0x2a   :  { %v52867_v31 = vand.u32 4294901760, %v52859_v29  ;;  %48627 = vmatpush3.msra.mxu1 %v52852_v26  ;;  %v658_v0 = vsub.f32 %v52923_v47, %v52926_v54 }
  0x2b   :  { %v52876_v34 = vand.u32 4294901760, %v52870_v32  ;;  %48629 = vmatmul.mubr.f32.vlgmr.msra.gmra.mxu1 %v52862_v30  ;;  %48638 = vmatprep.subr.mxu1 %v52812_v2  ;;  %v52957_v41 = vand.u32 4294901760, %v52948_v28 }
  0x2c   :  { %v153_v33 = vsub.f32 %v52859_v29, %v52867_v31  ;;  %48639 = vmatpush3.msra.mxu1 %v52812_v2  ;;  %48642 = vmatprep.mubr.f32.mxu1 %v52867_v31  ;;  %v52936_v12 = vand.u32 4294901760, %v658_v0 }
  0x2d   :  { %v163_v36 = vsub.f32 %v52870_v32, %v52876_v34  ;;  %48640 = vmatprep.subr.mxu1 %v52814_v3 }
  0x2e   :  { %v52882_v35 = vand.u32 4294901760, %v153_v33  ;;  %48641 = vmatpush3.msra.mxu1 %v52814_v3  ;;  %v52952_v33 = vsub.f32 %v1051_v11, %v52941_v18 }
  0x2f   :  { %v52889_v37 = vand.u32 4294901760, %v163_v36  ;;  %48643 = vmatmul.mubr.f32.vlgmr.msra.gmra.mxu1 %v52876_v34  ;;  %48652 = vmatprep.subr.mxu1 %v52812_v2 }
  0x30   :  { %48621 = vmatprep.mubr.f32.mxu0 %v52882_v35  ;;  %48656 = vmatprep.mubr.f32.mxu1 %v52854_v27 }
  0x31   :  { %48622 = vmatmul.mubr.f32.vlgmr.msra.gmra.mxu0 %v52889_v37  ;;  %48653 = vmatpush3.msra.mxu1 %v52812_v2 }
  0x32   :  { %48632 = vmatpush3.msra.mxu0 %v52818_v9  ;;  %48635 = vmatprep.mubr.f32.mxu0 %v52859_v29 }
  0x33   :  { %48633 = vmatprep.subr.mxu0 %v52821_v10  ;;  %48654 = vmatprep.subr.mxu1 %v52814_v3 }
  0x34   :  { %48634 = vmatpush3.msra.mxu0 %v52821_v10  ;;  %48655 = vmatpush3.msra.mxu1 %v52814_v3 }
  0x35   :  { %48636 = vmatmul.mubr.f32.vlgmr.msra.gmra.mxu0 %v52870_v32  ;;  %48645 = vmatprep.subr.mxu0 %v52829_v16 }
  0x36   :  { %48646 = vmatpush3.msra.mxu0 %v52829_v16  ;;  %48649 = vmatprep.mubr.f32.mxu0 %v52854_v27 }
  0x37   :  { %48647 = vmatprep.subr.mxu0 %v52833_v17  ;;  %48657 = vmatmul.mubr.f32.vlgmr.msra.gmra.mxu1 %v52862_v30 }
  0x38   :  { %48648 = vmatpush3.msra.mxu0 %v52833_v17  ;;  %48666 = vmatprep.subr.mxu1 %v57016_v38 }
  0x39   :  { %48650 = vmatmul.mubr.f32.vlgmr.msra.gmra.mxu0 %v52862_v30  ;;  %48659 = vmatprep.subr.mxu0 %v57016_v38 }
  0x3a   :  { %48663 = vmatprep.mubr.msk.f32.mxu0 %vm52763_vm1, %v57016_v38  ;;  %48670 = vmatprep.mubr.msk.f32.mxu1 %vm52763_vm1, %v57016_v38 }
  0xeb   :  { %v48630_v40 = vpop.f32.mrf.mxu1 }
  0xed   :  { %v247_v42 = vpop.f32.mrf.mxu1 }
  0xef   :  { %v48644_v45 = vpop.f32.mrf.mxu1 }
  0xf1   :  { %v48623_v44 = vpop.f32.mrf.mxu0  ;;  %v411_v50 = vpop.f32.mrf.mxu1 }
  0xf2   :  { %v254_v48 = vadd.f32 %v48630_v40, %v48623_v44  ;;  %v1123_v44 = vsub.f32 %v52948_v28, %v52957_v41 }
  0xf3   :  { %v156_v46 = vpop.f32.mrf.mxu0 }
  0xf4   :  { %v248_v51 = vadd.f32 %v247_v42, %v156_v46  ;;  %v52962_v42 = vand.u32 4294901760, %v52952_v33  ;;  %v52979_v46 = vand.u32 4294901760, %v1123_v44 }
  0xf5   :  { %v48637_v49 = vpop.f32.mrf.mxu0 }
  0xf6   :  { %v337_v52 = vadd.f32 %v48637_v49, %v254_v48 }
  0xf7   :  { %v329_v53 = vpop.f32.mrf.mxu0  ;;  %v48658_v58 = vpop.f32.mrf.mxu1 }
  0xf8   :  { %v420_v55 = vadd.f32 %v48644_v45, %v337_v52  ;;  %v330_v56 = vadd.f32 %v329_v53, %v248_v51  ;;  %v1133_v45 = vsub.f32 %v52952_v33, %v52962_v42 }
  0xf9   :  { %v48651_v57 = vpop.f32.mrf.mxu0  ;;  %v575_v5 = vpop.f32.mrf.mxu1 }
  0xfa   :  { %v412_v60 = vadd.f32 %v411_v50, %v330_v56  ;;  %v503_v61 = vadd.f32 %v48651_v57, %v420_v55  ;;  %v52983_v48 = vand.u32 4294901760, %v1133_v45 }
  0xfb   :  { %v496_v63 = vpop.f32.mrf.mxu0 }
  0xfc   :  { %v582_v1 = vadd.f32 %v48658_v58, %v503_v61  ;;  %v497_v4 = vadd.f32 %v496_v63, %v412_v60 }
  0xfe   :  { %v617_v7 = vand.u32 4294901760, %v582_v1  ;;  %v576_v8 = vadd.f32 %v575_v5, %v497_v4 }
 0x100   :  { %v695_v13 = vsub.f32 %v582_v1, %v617_v7  ;;  %v620_v15 = vand.u32 4294901760, %v576_v8  ;;  %48660 = vmatpush3.msra.mxu0 %v617_v7 }
 0x101   :  { %48661 = vmatprep.subr.mxu0 %v57016_v38 }
 0x102   :  { %v696_v21 = vand.u32 4294901760, %v695_v13  ;;  %v702_v22 = vsub.f32 %v576_v8, %v620_v15  ;;  %48662 = vmatpush3.msra.mxu0 %v620_v15 }
 0x103   :  { %48673 = vmatprep.subr.mxu0 %v57016_v38  ;;  %48664 = vmatmul.mubr.f32.vlgmr.msra.gmra.mxu0 %v52936_v12 }
 0x104   :  { %v697_v23 = vsub.f32 %v695_v13, %v696_v21  ;;  %v703_v24 = vand.u32 4294901760, %v702_v22  ;;  %48674 = vmatpush3.msra.mxu0 %v695_v13  ;;  %48677 = vmatprep.mubr.msk.f32.mxu0 %vm52763_vm1, %v57016_v38 }
 0x105   :  { %48675 = vmatprep.subr.mxu0 %v57016_v38 }
 0x106   :  { %48676 = vmatpush3.msra.mxu0 %v702_v22  ;;  %v698_v36 = vand.u32 4294901760, %v697_v23  ;;  %v704_v39 = vsub.f32 %v702_v22, %v703_v24 }
 0x107   :  { %48687 = vmatprep.subr.mxu0 %v57016_v38  ;;  %48678 = vmatmul.mubr.f32.vlgmr.msra.gmra.mxu0 %v52923_v47 }
 0x108   :  { %48667 = vmatpush3.msra.mxu1 %v698_v36  ;;  %48688 = vmatpush3.msra.mxu0 %v696_v21  ;;  %v705_v40 = vand.u32 4294901760, %v704_v39 }
 0x109   :  { %48668 = vmatprep.subr.mxu1 %v57016_v38  ;;  %48689 = vmatprep.subr.mxu0 %v57016_v38 }
 0x10a   :  { %48669 = vmatpush3.msra.mxu1 %v705_v40  ;;  %48690 = vmatpush3.msra.mxu0 %v703_v24 }
 0x10b   :  { %48671 = vmatmul.mubr.f32.vlgmr.msra.gmra.mxu1 %v52920_v43  ;;  %48680 = vmatprep.subr.mxu1 %v57016_v38 }
 0x10c   :  { %48681 = vmatpush3.msra.mxu1 %v617_v7  ;;  %48684 = vmatprep.mubr.msk.f32.mxu1 %vm52763_vm1, %v57016_v38 }
 0x10d   :  { %48682 = vmatprep.subr.mxu1 %v57016_v38  ;;  %48691 = vmatprep.mubr.msk.f32.mxu0 %vm52763_vm1, %v57016_v38 }
 0x10e   :  { %48683 = vmatpush3.msra.mxu1 %v620_v15  ;;  %48692 = vmatmul.mubr.f32.vlgmr.msra.gmra.mxu0 %v52920_v43 }
 0x10f   :  { %48685 = vmatmul.mubr.f32.vlgmr.msra.gmra.mxu1 %v52926_v54  ;;  %48694 = vmatprep.subr.mxu1 %v57016_v38 }
 0x110   :  { %48701 = vmatprep.subr.mxu0 %v52812_v2  ;;  %48695 = vmatpush3.msra.mxu1 %v617_v7 }
 0x111   :  { %48702 = vmatpush3.msra.mxu0 %v52812_v2  ;;  %48696 = vmatprep.subr.mxu1 %v57016_v38 }
 0x112   :  { %48703 = vmatprep.subr.mxu0 %v52814_v3  ;;  %48697 = vmatpush3.msra.mxu1 %v620_v15 }
 0x113   :  { %48698 = vmatprep.mubr.msk.f32.mxu1 %vm52763_vm1, %v57016_v38  ;;  %48704 = vmatpush3.msra.mxu0 %v52814_v3 }
 0x114   :  { %48705 = vmatprep.mubr.f32.mxu0 %v52979_v46  ;;  %48699 = vmatmul.mubr.f32.vlgmr.msra.gmra.mxu1 %v52920_v43 }
 0x115   :  { %48706 = vmatmul.mubr.f32.vlgmr.msra.gmra.mxu0 %v52983_v48  ;;  %48708 = vmatprep.subr.mxu1 %v52850_v25 }
 0x116   :  { %48715 = vmatprep.subr.mxu0 %v52818_v9  ;;  %48709 = vmatpush3.msra.mxu1 %v52850_v25 }
 0x117   :  { %48716 = vmatpush3.msra.mxu0 %v52818_v9  ;;  %48710 = vmatprep.subr.mxu1 %v52852_v26 }
 0x118   :  { %48717 = vmatprep.subr.mxu0 %v52821_v10  ;;  %48711 = vmatpush3.msra.mxu1 %v52852_v26 }
 0x119   :  { %48712 = vmatprep.mubr.f32.mxu1 %v52938_v19  ;;  %48718 = vmatpush3.msra.mxu0 %v52821_v10 }
 0x11a   :  { %48719 = vmatprep.mubr.f32.mxu0 %v52948_v28  ;;  %48713 = vmatmul.mubr.f32.vlgmr.msra.gmra.mxu1 %v52941_v18 }
 0x11b   :  { %48720 = vmatmul.mubr.f32.vlgmr.msra.gmra.mxu0 %v52952_v33  ;;  %48722 = vmatprep.subr.mxu1 %v52812_v2 }
 0x11c   :  { %48729 = vmatprep.subr.mxu0 %v52829_v16  ;;  %48723 = vmatpush3.msra.mxu1 %v52812_v2 }
 0x11d   :  { %48730 = vmatpush3.msra.mxu0 %v52829_v16  ;;  %48724 = vmatprep.subr.mxu1 %v52814_v3 }
 0x11e   :  { %48731 = vmatprep.subr.mxu0 %v52833_v17  ;;  %48725 = vmatpush3.msra.mxu1 %v52814_v3 }
 0x11f   :  { %48726 = vmatprep.mubr.f32.mxu1 %v52957_v41  ;;  %48732 = vmatpush3.msra.mxu0 %v52833_v17 }
 0x120   :  { %48733 = vmatprep.mubr.f32.mxu0 %v52938_v19  ;;  %48727 = vmatmul.mubr.f32.vlgmr.msra.gmra.mxu1 %v52962_v42 }
 0x121   :  { %48734 = vmatmul.mubr.f32.vlgmr.msra.gmra.mxu0 %v52941_v18  ;;  %48736 = vmatprep.subr.mxu1 %v52812_v2 }
 0x122   :  { %48737 = vmatpush3.msra.mxu1 %v52812_v2  ;;  %48740 = vmatprep.mubr.f32.mxu1 %v52938_v19 }
 0x123   :  { %48738 = vmatprep.subr.mxu1 %v52814_v3  ;;  %48743 = vmatprep.subr.mxu0 %v57016_v38 }
 0x124   :  { %48739 = vmatpush3.msra.mxu1 %v52814_v3  ;;  %48747 = vmatprep.mubr.msk.f32.mxu0 %vm52763_vm1, %v57016_v38 }
 0x125   :  { %48741 = vmatmul.mubr.f32.vlgmr.msra.gmra.mxu1 %v52941_v18  ;;  %48750 = vmatprep.subr.mxu1 %v57016_v38 }
 0x126   :  { %48754 = vmatprep.mubr.msk.f32.mxu1 %vm52763_vm1, %v57016_v38 }
 0x1c3   :  { %v661_v49 = vpop.f32.mrf.mxu0 }
 0x1c5   :  { %v48665_v50 = vpop.f32.mrf.mxu0 }
 0x1c7   :  { %v818_v51 = vpop.f32.mrf.mxu0 }
 0x1c9   :  { %v48679_v52 = vpop.f32.mrf.mxu0 }
 0x1cb   :  { %v742_v53 = vpop.f32.mrf.mxu1 }
 0x1cc   :  { %v743_v55 = vadd.f32 %v742_v53, %v661_v49  ;;  %v74_v49 = vmul.f32 %v52826_v14, %v52826_v14 }
 0x1cd   :  { %v48672_v56 = vpop.f32.mrf.mxu1 }
 0x1ce   :  { %v819_v57 = vadd.f32 %v818_v51, %v743_v55  ;;  %v970_v58 = vpop.f32.mrf.mxu0  ;;  %v75_v51 = vmul.f32 %v52840_v20, %v52840_v20 }
 0x1cf   :  { %v893_v59 = vpop.f32.mrf.mxu1 }
 0x1d0   :  { %v894_v60 = vadd.f32 %v893_v59, %v819_v57  ;;  %v48693_v61 = vpop.f32.mrf.mxu0  ;;  %v2015_v57 = vsel %vm76_vm0, %v74_v49, 0 }
 0x1d1   :  { %v48686_v62 = vpop.f32.mrf.mxu1 }
 0x1d2   :  { %v971_v63 = vadd.f32 %v970_v58, %v894_v60  ;;  %v2018_v60 = vsel %vm76_vm0, %v75_v51, 0 }
 0x1d3   :  { %v53039_v14 = vand.u32 4294901760, %v2018_v60 }
 0x1d4   :  { %v1043_v0 = vpop.f32.mrf.mxu1 }
 0x1d5   :  { %v53028_v1 = vadd.f32 %v1043_v0, %v971_v63  ;;  %v48707_v4 = vpop.f32.mrf.mxu0  ;;  %v53036_v63 = vand.u32 4294901760, %v2015_v57 }
 0x1d6   :  { %v48700_v5 = vpop.f32.mrf.mxu1 }
 0x1d7   :  { %v1126_v6 = vpop.f32.mrf.mxu0 }
 0x1da   :  { %v48714_v7 = vpop.f32.mrf.mxu1 }
 0x1db   :  { %v1224_v8 = vadd.f32 %v48714_v7, %v48707_v4  ;;  %v48721_v11 = vpop.f32.mrf.mxu0  ;;  %v53050_v7 = vsub.f32 %v2018_v60, %v53039_v14 }
 0x1dc   :  { %v1217_v13 = vpop.f32.mrf.mxu1 }
 0x1dd   :  { %v1307_v15 = vadd.f32 %v48721_v11, %v1224_v8  ;;  %v1218_v21 = vadd.f32 %v1217_v13, %v1126_v6  ;;  %v1299_v22 = vpop.f32.mrf.mxu0  ;;  %v53046_v6 = vsub.f32 %v2015_v57, %v53036_v63 }
 0x1df   :  { %v1300_v23 = vadd.f32 %v1299_v22, %v1218_v21  ;;  %v53060_v21 = vand.u32 4294901760, %v53050_v7 }
 0x1e0   :  { %v48728_v24 = vpop.f32.mrf.mxu1 }
 0x1e1   :  { %v1390_v36 = vadd.f32 %v48728_v24, %v1307_v15  ;;  %v48735_v39 = vpop.f32.mrf.mxu0  ;;  %v53055_v15 = vand.u32 4294901760, %v53046_v6 }
 0x1e2   :  { %v1381_v40 = vpop.f32.mrf.mxu1 }
 0x1e3   :  { %v1473_v44 = vadd.f32 %v48735_v39, %v1390_v36  ;;  %v1382_v45 = vadd.f32 %v1381_v40, %v1300_v23  ;;  %v1466_v50 = vpop.f32.mrf.mxu0  ;;  %v2090_v22 = vsub.f32 %v53046_v6, %v53055_v15  ;;  %v2100_v23 = vsub.f32 %v53050_v7, %v53060_v21 }
 0x1e5   :  { %v1467_v52 = vadd.f32 %v1466_v50, %v1382_v45  ;;  %v48742_v53 = vpop.f32.mrf.mxu1  ;;  %v53077_v24 = vand.u32 4294901760, %v2090_v22  ;;  %v53081_v36 = vand.u32 4294901760, %v2100_v23 }
 0x1e6   :  { %v1552_v55 = vadd.f32 %v48742_v53, %v1473_v44 }
 0x1e7   :  { %v1545_v56 = vpop.f32.mrf.mxu1 }
 0x1e8   :  { %v1584_v58 = vand.u32 4294901760, %v1552_v55  ;;  %v1546_v59 = vadd.f32 %v1545_v56, %v1467_v52 }
 0x1ea   :  { %v1662_v61 = vsub.f32 %v1552_v55, %v1584_v58  ;;  %v1587_v62 = vand.u32 4294901760, %v1546_v59  ;;  %48744 = vmatpush3.msra.mxu0 %v1584_v58 }
 0x1eb   :  { %48745 = vmatprep.subr.mxu0 %v57016_v38 }
 0x1ec   :  { %v1663_v20 = vand.u32 4294901760, %v1662_v61  ;;  %v1669_v0 = vsub.f32 %v1546_v59, %v1587_v62  ;;  %48746 = vmatpush3.msra.mxu0 %v1587_v62 }
 0x1ed   :  { %48757 = vmatprep.subr.mxu0 %v57016_v38  ;;  %48748 = vmatmul.mubr.f32.vlgmr.msra.gmra.mxu0 %v52936_v12 }
 0x1ee   :  { %v1664_v4 = vsub.f32 %v1662_v61, %v1663_v20  ;;  %v1670_v5 = vand.u32 4294901760, %v1669_v0  ;;  %48758 = vmatpush3.msra.mxu0 %v1662_v61  ;;  %48761 = vmatprep.mubr.msk.f32.mxu0 %vm52763_vm1, %v57016_v38 }
 0x1ef   :  { %48759 = vmatprep.subr.mxu0 %v57016_v38 }
 0x1f0   :  { %48760 = vmatpush3.msra.mxu0 %v1669_v0  ;;  %v1665_v8 = vand.u32 4294901760, %v1664_v4  ;;  %v1671_v11 = vsub.f32 %v1669_v0, %v1670_v5 }
 0x1f1   :  { %48771 = vmatprep.subr.mxu0 %v57016_v38  ;;  %48762 = vmatmul.mubr.f32.vlgmr.msra.gmra.mxu0 %v52923_v47 }
 0x1f2   :  { %48751 = vmatpush3.msra.mxu1 %v1665_v8  ;;  %48772 = vmatpush3.msra.mxu0 %v1663_v20  ;;  %v1672_v13 = vand.u32 4294901760, %v1671_v11 }
 0x1f3   :  { %48752 = vmatprep.subr.mxu1 %v57016_v38  ;;  %48773 = vmatprep.subr.mxu0 %v57016_v38 }
 0x1f4   :  { %48753 = vmatpush3.msra.mxu1 %v1672_v13  ;;  %48774 = vmatpush3.msra.mxu0 %v1670_v5 }
 0x1f5   :  { %48755 = vmatmul.mubr.f32.vlgmr.msra.gmra.mxu1 %v52920_v43  ;;  %48764 = vmatprep.subr.mxu1 %v57016_v38 }
 0x1f6   :  { %48765 = vmatpush3.msra.mxu1 %v1584_v58  ;;  %48768 = vmatprep.mubr.msk.f32.mxu1 %vm52763_vm1, %v57016_v38 }
 0x1f7   :  { %48766 = vmatprep.subr.mxu1 %v57016_v38  ;;  %48775 = vmatprep.mubr.msk.f32.mxu0 %vm52763_vm1, %v57016_v38 }
 0x1f8   :  { %48767 = vmatpush3.msra.mxu1 %v1587_v62  ;;  %48776 = vmatmul.mubr.f32.vlgmr.msra.gmra.mxu0 %v52920_v43 }
 0x1f9   :  { %48769 = vmatmul.mubr.f32.vlgmr.msra.gmra.mxu1 %v52926_v54  ;;  %48778 = vmatprep.subr.mxu1 %v57016_v38 }
 0x1fa   :  { %48785 = vmatprep.subr.mxu0 %v52812_v2  ;;  %48779 = vmatpush3.msra.mxu1 %v1584_v58 }
 0x1fb   :  { %48786 = vmatpush3.msra.mxu0 %v52812_v2  ;;  %48780 = vmatprep.subr.mxu1 %v57016_v38 }
 0x1fc   :  { %48787 = vmatprep.subr.mxu0 %v52814_v3  ;;  %48781 = vmatpush3.msra.mxu1 %v1587_v62 }
 0x1fd   :  { %48782 = vmatprep.mubr.msk.f32.mxu1 %vm52763_vm1, %v57016_v38  ;;  %48788 = vmatpush3.msra.mxu0 %v52814_v3 }
 0x1fe   :  { %48789 = vmatprep.mubr.f32.mxu0 %v53077_v24  ;;  %48783 = vmatmul.mubr.f32.vlgmr.msra.gmra.mxu1 %v52920_v43 }
 0x1ff   :  { %48790 = vmatmul.mubr.f32.vlgmr.msra.gmra.mxu0 %v53081_v36  ;;  %48792 = vmatprep.subr.mxu1 %v52850_v25 }
 0x200   :  { %48799 = vmatprep.subr.mxu0 %v52818_v9  ;;  %48793 = vmatpush3.msra.mxu1 %v52850_v25 }
 0x201   :  { %48800 = vmatpush3.msra.mxu0 %v52818_v9  ;;  %48794 = vmatprep.subr.mxu1 %v52852_v26 }
 0x202   :  { %48801 = vmatprep.subr.mxu0 %v52821_v10  ;;  %48795 = vmatpush3.msra.mxu1 %v52852_v26 }
 0x203   :  { %48796 = vmatprep.mubr.f32.mxu1 %v53036_v63  ;;  %48802 = vmatpush3.msra.mxu0 %v52821_v10 }
 0x204   :  { %48803 = vmatprep.mubr.f32.mxu0 %v53046_v6  ;;  %48797 = vmatmul.mubr.f32.vlgmr.msra.gmra.mxu1 %v53039_v14 }
 0x205   :  { %48804 = vmatmul.mubr.f32.vlgmr.msra.gmra.mxu0 %v53050_v7  ;;  %48806 = vmatprep.subr.mxu1 %v52812_v2 }
 0x206   :  { %48813 = vmatprep.subr.mxu0 %v52829_v16  ;;  %48807 = vmatpush3.msra.mxu1 %v52812_v2 }
 0x207   :  { %48814 = vmatpush3.msra.mxu0 %v52829_v16  ;;  %48808 = vmatprep.subr.mxu1 %v52814_v3 }
 0x208   :  { %48815 = vmatprep.subr.mxu0 %v52833_v17  ;;  %48809 = vmatpush3.msra.mxu1 %v52814_v3 }
 0x209   :  { %48810 = vmatprep.mubr.f32.mxu1 %v53055_v15  ;;  %48816 = vmatpush3.msra.mxu0 %v52833_v17 }
 0x20a   :  { %48817 = vmatprep.mubr.f32.mxu0 %v53036_v63  ;;  %48811 = vmatmul.mubr.f32.vlgmr.msra.gmra.mxu1 %v53060_v21 }
 0x20b   :  { %48818 = vmatmul.mubr.f32.vlgmr.msra.gmra.mxu0 %v53039_v14  ;;  %48820 = vmatprep.subr.mxu1 %v52812_v2 }
 0x20c   :  { %48821 = vmatpush3.msra.mxu1 %v52812_v2  ;;  %48824 = vmatprep.mubr.f32.mxu1 %v53036_v63 }
 0x20d   :  { %48822 = vmatprep.subr.mxu1 %v52814_v3  ;;  %48827 = vmatprep.subr.mxu0 %v57016_v38 }
 0x20e   :  { %48823 = vmatpush3.msra.mxu1 %v52814_v3  ;;  %48831 = vmatprep.mubr.msk.f32.mxu0 %vm52763_vm1, %v57016_v38 }
 0x20f   :  { %48825 = vmatmul.mubr.f32.vlgmr.msra.gmra.mxu1 %v53039_v14  ;;  %48834 = vmatprep.subr.mxu1 %v57016_v38 }
 0x210   :  { %48838 = vmatprep.mubr.msk.f32.mxu1 %vm52763_vm1, %v57016_v38 }
 0x2ad   :  { %v1628_v39 = vpop.f32.mrf.mxu0 }
 0x2af   :  { %v48749_v40 = vpop.f32.mrf.mxu0 }
 0x2b1   :  { %v1785_v44 = vpop.f32.mrf.mxu0 }
 0x2b3   :  { %v48763_v45 = vpop.f32.mrf.mxu0 }
 0x2b5   :  { %v1709_v49 = vpop.f32.mrf.mxu1 }
 0x2b6   :  { %v1710_v50 = vadd.f32 %v1709_v49, %v1628_v39 }
 0x2b7   :  { %v48756_v51 = vpop.f32.mrf.mxu1 }
 0x2b8   :  { %v1786_v52 = vadd.f32 %v1785_v44, %v1710_v50  ;;  %v1937_v53 = vpop.f32.mrf.mxu0 }
 0x2b9   :  { %v1860_v55 = vpop.f32.mrf.mxu1 }
 0x2ba   :  { %v1861_v56 = vadd.f32 %v1860_v55, %v1786_v52  ;;  %v48777_v57 = vpop.f32.mrf.mxu0 }
 0x2bb   :  { %v48770_v58 = vpop.f32.mrf.mxu1 }
 0x2bc   :  { %v1938_v59 = vadd.f32 %v1937_v53, %v1861_v56  ;;  %v57_v58 = vld [vmem:[%s57014_s5 + $0x8] sm:$0xff] }
 0x2be   :  { %v2010_v60 = vpop.f32.mrf.mxu1 }
 0x2bf   :  { %v53126_v61 = vadd.f32 %v2010_v60, %v1938_v59  ;;  %v48791_v62 = vpop.f32.mrf.mxu0 }
 0x2c0   :  { %v48784_v20 = vpop.f32.mrf.mxu1 }
 0x2c1   :  { %v2093_v0 = vpop.f32.mrf.mxu0 }
 0x2c4   :  { %v48798_v4 = vpop.f32.mrf.mxu1 }
 0x2c5   :  { %v2191_v5 = vadd.f32 %v48798_v4, %v48791_v62  ;;  %v48805_v8 = vpop.f32.mrf.mxu0  ;;  %v56_v62 = vld [vmem:[%s57014_s5] sm:$0xff]  ;;  %v53134_v4 = vand.u32 4294901760, %v57_v58 }
 0x2c6   :  { %v2184_v11 = vpop.f32.mrf.mxu1 }
 0x2c7   :  { %v2274_v13 = vadd.f32 %v48805_v8, %v2191_v5  ;;  %v2185_v22 = vadd.f32 %v2184_v11, %v2093_v0  ;;  %v2266_v23 = vpop.f32.mrf.mxu0  ;;  %v53137_v11 = vand.u32 4294901760, %v56_v62 }
 0x2c9   :  { %v2267_v39 = vadd.f32 %v2266_v23, %v2185_v22  ;;  %v53145_v23 = vsub.f32 %v57_v58, %v53134_v4 }
 0x2ca   :  { %v48812_v40 = vpop.f32.mrf.mxu1 }
 0x2cb   :  { %v2357_v44 = vadd.f32 %v48812_v40, %v2274_v13  ;;  %v48819_v45 = vpop.f32.mrf.mxu0 }
 0x2cc   :  { %v2348_v49 = vpop.f32.mrf.mxu1 }
 0x2cd   :  { %v2440_v50 = vadd.f32 %v48819_v45, %v2357_v44  ;;  %v2349_v51 = vadd.f32 %v2348_v49, %v2267_v39  ;;  %v2433_v52 = vpop.f32.mrf.mxu0  ;;  %v53150_v44 = vsub.f32 %v56_v62, %v53137_v11  ;;  %v53155_v49 = vand.u32 4294901760, %v53145_v23 }
 0x2cf   :  { %v2434_v53 = vadd.f32 %v2433_v52, %v2349_v51  ;;  %v48826_v55 = vpop.f32.mrf.mxu1  ;;  %v3104_v51 = vsub.f32 %v53145_v23, %v53155_v49 }
 0x2d0   :  { %v2519_v56 = vadd.f32 %v48826_v55, %v2440_v50  ;;  %v53160_v50 = vand.u32 4294901760, %v53150_v44 }
 0x2d1   :  { %v2512_v57 = vpop.f32.mrf.mxu1 }
 0x2d2   :  { %v2551_v59 = vand.u32 4294901760, %v2519_v56  ;;  %v2513_v60 = vadd.f32 %v2512_v57, %v2434_v53  ;;  %v3111_v52 = vsub.f32 %v53150_v44, %v53160_v50  ;;  %v53177_v53 = vand.u32 4294901760, %v3104_v51 }
 0x2d4   :  { %v2629_v20 = vsub.f32 %v2519_v56, %v2551_v59  ;;  %v2554_v0 = vand.u32 4294901760, %v2513_v60  ;;  %48828 = vmatpush3.msra.mxu0 %v2551_v59  ;;  %v53183_v55 = vand.u32 4294901760, %v3111_v52 }
 0x2d5   :  { %48829 = vmatprep.subr.mxu0 %v57016_v38 }
 0x2d6   :  { %v2630_v5 = vand.u32 4294901760, %v2629_v20  ;;  %v2636_v8 = vsub.f32 %v2513_v60, %v2554_v0  ;;  %48830 = vmatpush3.msra.mxu0 %v2554_v0 }
 0x2d7   :  { %48841 = vmatprep.subr.mxu0 %v57016_v38  ;;  %48832 = vmatmul.mubr.f32.vlgmr.msra.gmra.mxu0 %v52936_v12 }
 0x2d8   :  { %v2631_v13 = vsub.f32 %v2629_v20, %v2630_v5  ;;  %v2637_v22 = vand.u32 4294901760, %v2636_v8  ;;  %48842 = vmatpush3.msra.mxu0 %v2629_v20  ;;  %48845 = vmatprep.mubr.msk.f32.mxu0 %vm52763_vm1, %v57016_v38 }
 0x2d9   :  { %48843 = vmatprep.subr.mxu0 %v57016_v38 }
 0x2da   :  { %48844 = vmatpush3.msra.mxu0 %v2636_v8  ;;  %v2632_v39 = vand.u32 4294901760, %v2631_v13  ;;  %v2638_v40 = vsub.f32 %v2636_v8, %v2637_v22 }
 0x2db   :  { %48855 = vmatprep.subr.mxu0 %v57016_v38  ;;  %48846 = vmatmul.mubr.f32.vlgmr.msra.gmra.mxu0 %v52923_v47 }
 0x2dc   :  { %48835 = vmatpush3.msra.mxu1 %v2632_v39  ;;  %48856 = vmatpush3.msra.mxu0 %v2630_v5  ;;  %v2639_v45 = vand.u32 4294901760, %v2638_v40 }
 0x2dd   :  { %48836 = vmatprep.subr.mxu1 %v57016_v38  ;;  %48857 = vmatprep.subr.mxu0 %v57016_v38 }
 0x2de   :  { %48837 = vmatpush3.msra.mxu1 %v2639_v45  ;;  %48858 = vmatpush3.msra.mxu0 %v2637_v22 }
 0x2df   :  { %48839 = vmatmul.mubr.f32.vlgmr.msra.gmra.mxu1 %v52920_v43  ;;  %48848 = vmatprep.subr.mxu1 %v57016_v38 }
 0x2e0   :  { %48849 = vmatpush3.msra.mxu1 %v2551_v59  ;;  %48852 = vmatprep.mubr.msk.f32.mxu1 %vm52763_vm1, %v57016_v38 }
 0x2e1   :  { %48850 = vmatprep.subr.mxu1 %v57016_v38  ;;  %48859 = vmatprep.mubr.msk.f32.mxu0 %vm52763_vm1, %v57016_v38 }
 0x2e2   :  { %48851 = vmatpush3.msra.mxu1 %v2554_v0  ;;  %48860 = vmatmul.mubr.f32.vlgmr.msra.gmra.mxu0 %v52920_v43 }
 0x2e3   :  { %48853 = vmatmul.mubr.f32.vlgmr.msra.gmra.mxu1 %v52926_v54  ;;  %48862 = vmatprep.subr.mxu1 %v57016_v38 }
 0x2e4   :  { %48869 = vmatprep.subr.mxu0 %v53134_v4  ;;  %48863 = vmatpush3.msra.mxu1 %v2551_v59 }
 0x2e5   :  { %48870 = vmatpush3.msra.mxu0 %v53134_v4  ;;  %48864 = vmatprep.subr.mxu1 %v57016_v38 }
 0x2e6   :  { %48871 = vmatprep.subr.mxu0 %v53137_v11  ;;  %48865 = vmatpush3.msra.mxu1 %v2554_v0 }
 0x2e7   :  { %48866 = vmatprep.mubr.msk.f32.mxu1 %vm52763_vm1, %v57016_v38  ;;  %48872 = vmatpush3.msra.mxu0 %v53137_v11 }
 0x2e8   :  { %48873 = vmatprep.mubr.f32.mxu0 %v52882_v35  ;;  %48867 = vmatmul.mubr.f32.vlgmr.msra.gmra.mxu1 %v52920_v43 }
 0x2e9   :  { %48874 = vmatmul.mubr.f32.vlgmr.msra.gmra.mxu0 %v52889_v37  ;;  %48876 = vmatprep.subr.mxu1 %v53177_v53 }
 0x2ea   :  { %48883 = vmatprep.subr.mxu0 %v53145_v23  ;;  %48877 = vmatpush3.msra.mxu1 %v53177_v53 }
 0x2eb   :  { %48884 = vmatpush3.msra.mxu0 %v53145_v23  ;;  %48878 = vmatprep.subr.mxu1 %v53183_v55 }
 0x2ec   :  { %48885 = vmatprep.subr.mxu0 %v53150_v44  ;;  %48879 = vmatpush3.msra.mxu1 %v53183_v55 }
 0x2ed   :  { %48880 = vmatprep.mubr.f32.mxu1 %v52854_v27  ;;  %48886 = vmatpush3.msra.mxu0 %v53150_v44 }
 0x2ee   :  { %48887 = vmatprep.mubr.f32.mxu0 %v52859_v29  ;;  %48881 = vmatmul.mubr.f32.vlgmr.msra.gmra.mxu1 %v52862_v30 }
 0x2ef   :  { %48888 = vmatmul.mubr.f32.vlgmr.msra.gmra.mxu0 %v52870_v32  ;;  %48890 = vmatprep.subr.mxu1 %v53134_v4 }
 0x2f0   :  { %48897 = vmatprep.subr.mxu0 %v53155_v49  ;;  %48891 = vmatpush3.msra.mxu1 %v53134_v4 }
 0x2f1   :  { %48898 = vmatpush3.msra.mxu0 %v53155_v49  ;;  %48892 = vmatprep.subr.mxu1 %v53137_v11 }
 0x2f2   :  { %48899 = vmatprep.subr.mxu0 %v53160_v50  ;;  %48893 = vmatpush3.msra.mxu1 %v53137_v11 }
 0x2f3   :  { %48894 = vmatprep.mubr.f32.mxu1 %v52867_v31  ;;  %48900 = vmatpush3.msra.mxu0 %v53160_v50 }
 0x2f4   :  { %48901 = vmatprep.mubr.f32.mxu0 %v52854_v27  ;;  %48895 = vmatmul.mubr.f32.vlgmr.msra.gmra.mxu1 %v52876_v34 }
 0x2f5   :  { %48902 = vmatmul.mubr.f32.vlgmr.msra.gmra.mxu0 %v52862_v30  ;;  %48904 = vmatprep.subr.mxu1 %v53134_v4 }
 0x2f6   :  { %48905 = vmatpush3.msra.mxu1 %v53134_v4  ;;  %48908 = vmatprep.mubr.f32.mxu1 %v52854_v27 }
 0x2f7   :  { %48906 = vmatprep.subr.mxu1 %v53137_v11  ;;  %48911 = vmatprep.subr.mxu0 %v57016_v38 }
 0x2f8   :  { %48907 = vmatpush3.msra.mxu1 %v53137_v11  ;;  %48915 = vmatprep.mubr.msk.f32.mxu0 %vm52763_vm1, %v57016_v38 }
 0x2f9   :  { %48909 = vmatmul.mubr.f32.vlgmr.msra.gmra.mxu1 %v52862_v30  ;;  %48918 = vmatprep.subr.mxu1 %v57016_v38  ;;  %v53_v30 = vld [vmem:[%s57013_s4] sm:$0x1f] }
 0x2fa   :  { %48922 = vmatprep.mubr.msk.f32.mxu1 %vm52763_vm1, %v57016_v38  ;;  %v3488_v22 = vsel %vm76_vm0, %v53_v30, 0 }
 0x2fb   :  { %v53231_v45 = vand.u32 4294901760, %v3488_v22 }
 0x397   :  { %v2595_v29 = vpop.f32.mrf.mxu0 }
 0x399   :  { %v48833_v31 = vpop.f32.mrf.mxu0 }
 0x39b   :  { %v2752_v32 = vpop.f32.mrf.mxu0 }
 0x39d   :  { %v48847_v27 = vpop.f32.mrf.mxu0 }
 0x39f   :  { %v2676_v34 = vpop.f32.mrf.mxu1 }
 0x3a0   :  { %v2677_v35 = vadd.f32 %v2676_v34, %v2595_v29 }
 0x3a1   :  { %v48840_v37 = vpop.f32.mrf.mxu1 }
 0x3a2   :  { %v2753_v56 = vadd.f32 %v2752_v32, %v2677_v35  ;;  %v2904_v57 = vpop.f32.mrf.mxu0  ;;  %v53234_v35 = vsub.f32 %v3488_v22, %v53231_v45 }
 0x3a3   :  { %v2827_v58 = vpop.f32.mrf.mxu1 }
 0x3a4   :  { %v2828_v59 = vadd.f32 %v2827_v58, %v2753_v56  ;;  %v48861_v60 = vpop.f32.mrf.mxu0 }
 0x3a5   :  { %v48854_v62 = vpop.f32.mrf.mxu1 }
 0x3a6   :  { %v2905_v20 = vadd.f32 %v2904_v57, %v2828_v59 }
 0x3a8   :  { %v2977_v0 = vpop.f32.mrf.mxu1 }
 0x3a9   :  { %v2978_v5 = vadd.f32 %v2977_v0, %v2905_v20  ;;  %v48875_v8 = vpop.f32.mrf.mxu0 }
 0x3aa   :  { %v48868_v13 = vpop.f32.mrf.mxu1 }
 0x3ab   :  { %v53229_v39 = vmul.f32 %v2978_v5, %v53126_v61  ;;  %v3058_v40 = vpop.f32.mrf.mxu0  ;;  %v53237_v61 = vand.u32 4294901760, %v53234_v35 }
 0x3ad   :  { %v3560_v5 = vsub.f32 %v53234_v35, %v53237_v61  ;;  %52660 = vrsqrt.f32 %v53229_v39 }
 0x3ae   :  { %v48882_v51 = vpop.f32.mrf.mxu1 }
 0x3af   :  { %v3156_v52 = vadd.f32 %v48882_v51, %v48875_v8  ;;  %v48889_v29 = vpop.f32.mrf.mxu0  ;;  %v53241_v51 = vand.u32 4294901760, %v3560_v5 }
 0x3b0   :  { %v3149_v31 = vpop.f32.mrf.mxu1 }
 0x3b1   :  { %v3239_v32 = vadd.f32 %v48889_v29, %v3156_v52  ;;  %v3150_v27 = vadd.f32 %v3149_v31, %v3058_v40  ;;  %v3231_v34 = vpop.f32.mrf.mxu0 }
 0x3b3   :  { %v3232_v37 = vadd.f32 %v3231_v34, %v3150_v27 }
 0x3b4   :  { %v48896_v56 = vpop.f32.mrf.mxu1 }
 0x3b5   :  { %v3322_v57 = vadd.f32 %v48896_v56, %v3239_v32  ;;  %v48903_v58 = vpop.f32.mrf.mxu0 }
 0x3b6   :  { %v3313_v59 = vpop.f32.mrf.mxu1 }
 0x3b7   :  { %v3405_v60 = vadd.f32 %v48903_v58, %v3322_v57  ;;  %v3314_v62 = vadd.f32 %v3313_v59, %v3232_v37  ;;  %v3398_v20 = vpop.f32.mrf.mxu0 }
 0x3b9   :  { %v3399_v30 = vadd.f32 %v3398_v20, %v3314_v62  ;;  %v48910_v0 = vpop.f32.mrf.mxu1 }
 0x3ba   :  { %v3484_v8 = vadd.f32 %v48910_v0, %v3405_v60 }
 0x3bb   :  { %v3477_v13 = vpop.f32.mrf.mxu1 }
 0x3bc   :  { %v3519_v22 = vand.u32 4294901760, %v3484_v8  ;;  %v3478_v40 = vadd.f32 %v3477_v13, %v3399_v30 }
 0x3be   :  { %v3597_v52 = vsub.f32 %v3484_v8, %v3519_v22  ;;  %v3522_v29 = vand.u32 4294901760, %v3478_v40  ;;  %48912 = vmatpush3.msra.mxu0 %v3519_v22 }
 0x3bf   :  { %48913 = vmatprep.subr.mxu0 %v57016_v38 }
 0x3c0   :  { %v3598_v31 = vand.u32 4294901760, %v3597_v52  ;;  %v3604_v32 = vsub.f32 %v3478_v40, %v3522_v29  ;;  %48914 = vmatpush3.msra.mxu0 %v3522_v29 }
 0x3c1   :  { %48925 = vmatprep.subr.mxu0 %v57016_v38  ;;  %48916 = vmatmul.mubr.f32.vlgmr.msra.gmra.mxu0 %v53241_v51 }
 0x3c2   :  { %v3599_v27 = vsub.f32 %v3597_v52, %v3598_v31  ;;  %v3605_v34 = vand.u32 4294901760, %v3604_v32  ;;  %48926 = vmatpush3.msra.mxu0 %v3597_v52  ;;  %48929 = vmatprep.mubr.msk.f32.mxu0 %vm52763_vm1, %v57016_v38 }
 0x3c3   :  { %48927 = vmatprep.subr.mxu0 %v57016_v38 }
 0x3c4   :  { %48928 = vmatpush3.msra.mxu0 %v3604_v32  ;;  %v3600_v37 = vand.u32 4294901760, %v3599_v27  ;;  %v3606_v56 = vsub.f32 %v3604_v32, %v3605_v34 }
 0x3c5   :  { %48939 = vmatprep.subr.mxu0 %v57016_v38  ;;  %48930 = vmatmul.mubr.f32.vlgmr.msra.gmra.mxu0 %v53234_v35 }
 0x3c6   :  { %48919 = vmatpush3.msra.mxu1 %v3600_v37  ;;  %48940 = vmatpush3.msra.mxu0 %v3598_v31  ;;  %v3607_v57 = vand.u32 4294901760, %v3606_v56 }
 0x3c7   :  { %48920 = vmatprep.subr.mxu1 %v57016_v38  ;;  %48941 = vmatprep.subr.mxu0 %v57016_v38 }
 0x3c8   :  { %48921 = vmatpush3.msra.mxu1 %v3607_v57  ;;  %48942 = vmatpush3.msra.mxu0 %v3605_v34 }
 0x3c9   :  { %48923 = vmatmul.mubr.f32.vlgmr.msra.gmra.mxu1 %v53231_v45  ;;  %48932 = vmatprep.subr.mxu1 %v57016_v38 }
 0x3ca   :  { %48933 = vmatpush3.msra.mxu1 %v3519_v22  ;;  %48936 = vmatprep.mubr.msk.f32.mxu1 %vm52763_vm1, %v57016_v38 }
 0x3cb   :  { %48934 = vmatprep.subr.mxu1 %v57016_v38  ;;  %48943 = vmatprep.mubr.msk.f32.mxu0 %vm52763_vm1, %v57016_v38 }
 0x3cc   :  { %48935 = vmatpush3.msra.mxu1 %v3522_v29  ;;  %48944 = vmatmul.mubr.f32.vlgmr.msra.gmra.mxu0 %v53231_v45 }
 0x3cd   :  { %48937 = vmatmul.mubr.f32.vlgmr.msra.gmra.mxu1 %v53237_v61  ;;  %48946 = vmatprep.subr.mxu1 %v57016_v38 }
 0x3ce   :  { %48953 = vmatprep.subr.mxu0 %v53134_v4  ;;  %48947 = vmatpush3.msra.mxu1 %v3519_v22 }
 0x3cf   :  { %48954 = vmatpush3.msra.mxu0 %v53134_v4  ;;  %48948 = vmatprep.subr.mxu1 %v57016_v38 }
 0x3d0   :  { %48955 = vmatprep.subr.mxu0 %v53137_v11  ;;  %48949 = vmatpush3.msra.mxu1 %v3522_v29 }
 0x3d1   :  { %48950 = vmatprep.mubr.msk.f32.mxu1 %vm52763_vm1, %v57016_v38  ;;  %48956 = vmatpush3.msra.mxu0 %v53137_v11 }
 0x3d2   :  { %48957 = vmatprep.mubr.f32.mxu0 %v52979_v46  ;;  %48951 = vmatmul.mubr.f32.vlgmr.msra.gmra.mxu1 %v53231_v45 }
 0x3d3   :  { %48958 = vmatmul.mubr.f32.vlgmr.msra.gmra.mxu0 %v52983_v48  ;;  %48960 = vmatprep.subr.mxu1 %v53177_v53 }
 0x3d4   :  { %48967 = vmatprep.subr.mxu0 %v53145_v23  ;;  %48961 = vmatpush3.msra.mxu1 %v53177_v53 }
 0x3d5   :  { %48968 = vmatpush3.msra.mxu0 %v53145_v23  ;;  %48962 = vmatprep.subr.mxu1 %v53183_v55 }
 0x3d6   :  { %48969 = vmatprep.subr.mxu0 %v53150_v44  ;;  %48963 = vmatpush3.msra.mxu1 %v53183_v55 }
 0x3d7   :  { %48964 = vmatprep.mubr.f32.mxu1 %v52938_v19  ;;  %48970 = vmatpush3.msra.mxu0 %v53150_v44 }
 0x3d8   :  { %48971 = vmatprep.mubr.f32.mxu0 %v52948_v28  ;;  %48965 = vmatmul.mubr.f32.vlgmr.msra.gmra.mxu1 %v52941_v18  ;;  %v52661_v28 = vpop.eup %52660 }
 0x3d9   :  { %48972 = vmatmul.mubr.f32.vlgmr.msra.gmra.mxu0 %v52952_v33  ;;  %48974 = vmatprep.subr.mxu1 %v53134_v4 }
 0x3da   :  { %48981 = vmatprep.subr.mxu0 %v53155_v49  ;;  %48975 = vmatpush3.msra.mxu1 %v53134_v4 }
 0x3db   :  { %48982 = vmatpush3.msra.mxu0 %v53155_v49  ;;  %48976 = vmatprep.subr.mxu1 %v53137_v11 }
 0x3dc   :  { %48983 = vmatprep.subr.mxu0 %v53160_v50  ;;  %48977 = vmatpush3.msra.mxu1 %v53137_v11 }
 0x3dd   :  { %48978 = vmatprep.mubr.f32.mxu1 %v52957_v41  ;;  %48984 = vmatpush3.msra.mxu0 %v53160_v50 }
 0x3de   :  { %48985 = vmatprep.mubr.f32.mxu0 %v52938_v19  ;;  %48979 = vmatmul.mubr.f32.vlgmr.msra.gmra.mxu1 %v52962_v42 }
 0x3df   :  { %48986 = vmatmul.mubr.f32.vlgmr.msra.gmra.mxu0 %v52941_v18  ;;  %48988 = vmatprep.subr.mxu1 %v53134_v4 }
 0x3e0   :  { %48989 = vmatpush3.msra.mxu1 %v53134_v4  ;;  %48992 = vmatprep.mubr.f32.mxu1 %v52938_v19  ;;  %v53311_v19 = vmul.f32 %v52661_v28, %v53028_v1 }
 0x3e1   :  { %48990 = vmatprep.subr.mxu1 %v53137_v11  ;;  %48995 = vmatprep.subr.mxu0 %v57016_v38 }
 0x3e2   :  { %48991 = vmatpush3.msra.mxu1 %v53137_v11  ;;  %48999 = vmatprep.mubr.msk.f32.mxu0 %vm52763_vm1, %v57016_v38  ;;  %57101 = vst [vmem:[#allocation19_spill] sm:$0xff] %v53311_v19 }
 0x3e3   :  { %48993 = vmatmul.mubr.f32.vlgmr.msra.gmra.mxu1 %v52941_v18  ;;  %49002 = vmatprep.subr.mxu1 %v57016_v38 }
 0x3e4   :  { %49006 = vmatprep.mubr.msk.f32.mxu1 %vm52763_vm1, %v57016_v38 }
 0x481   :  { %v3563_v33 = vpop.f32.mrf.mxu0 }
 0x483   :  { %v48917_v41 = vpop.f32.mrf.mxu0 }
 0x485   :  { %v3720_v42 = vpop.f32.mrf.mxu0 }
 0x487   :  { %v48931_v46 = vpop.f32.mrf.mxu0 }
 0x489   :  { %v3644_v48 = vpop.f32.mrf.mxu1 }
 0x48a   :  { %v3645_v58 = vadd.f32 %v3644_v48, %v3563_v33 }
 0x48b   :  { %v48924_v59 = vpop.f32.mrf.mxu1 }
 0x48c   :  { %v3721_v60 = vadd.f32 %v3720_v42, %v3645_v58  ;;  %v3872_v18 = vpop.f32.mrf.mxu0 }
 0x48d   :  { %v3795_v62 = vpop.f32.mrf.mxu1 }
 0x48e   :  { %v3796_v20 = vadd.f32 %v3795_v62, %v3721_v60  ;;  %v48945_v30 = vpop.f32.mrf.mxu0 }
 0x48f   :  { %v48938_v0 = vpop.f32.mrf.mxu1 }
 0x490   :  { %v3873_v5 = vadd.f32 %v3872_v18, %v3796_v20 }
 0x492   :  { %v3945_v8 = vpop.f32.mrf.mxu1 }
 0x493   :  { %v53313_v39 = vadd.f32 %v3945_v8, %v3873_v5  ;;  %v48959_v13 = vpop.f32.mrf.mxu0 }
 0x494   :  { %v48952_v1 = vpop.f32.mrf.mxu1 }
 0x495   :  { %v4022_v22 = vpop.f32.mrf.mxu0 }
 0x498   :  { %v48966_v40 = vpop.f32.mrf.mxu1 }
 0x499   :  { %v4120_v52 = vadd.f32 %v48966_v40, %v48959_v13  ;;  %v48973_v29 = vpop.f32.mrf.mxu0 }
 0x49a   :  { %v4113_v31 = vpop.f32.mrf.mxu1 }
 0x49b   :  { %v4203_v32 = vadd.f32 %v48973_v29, %v4120_v52  ;;  %v4114_v27 = vadd.f32 %v4113_v31, %v4022_v22  ;;  %v4195_v34 = vpop.f32.mrf.mxu0 }
 0x49d   :  { %v4196_v37 = vadd.f32 %v4195_v34, %v4114_v27 }
 0x49e   :  { %v48980_v56 = vpop.f32.mrf.mxu1 }
 0x49f   :  { %v4286_v57 = vadd.f32 %v48980_v56, %v4203_v32  ;;  %v48987_v28 = vpop.f32.mrf.mxu0 }
 0x4a0   :  { %v4277_v33 = vpop.f32.mrf.mxu1 }
 0x4a1   :  { %v4369_v41 = vadd.f32 %v48987_v28, %v4286_v57  ;;  %v4278_v42 = vadd.f32 %v4277_v33, %v4196_v37  ;;  %v4362_v46 = vpop.f32.mrf.mxu0 }
 0x4a3   :  { %v4363_v48 = vadd.f32 %v4362_v46, %v4278_v42  ;;  %v48994_v58 = vpop.f32.mrf.mxu1  ;;  %v5883_v42 = vld [vmem:[#allocation5 + $0x10] sm:$0xff]  ;;  %v5877_v46 = vld [vmem:[#allocation2 + $0x18] sm:$0xff] }
 0x4a4   :  { %v4448_v59 = vadd.f32 %v48994_v58, %v4369_v41  ;;  %v5876_v41 = vld [vmem:[#allocation2 + $0x10] sm:$0xff] }
 0x4a5   :  { %v4441_v60 = vpop.f32.mrf.mxu1 }
 0x4a6   :  { %v4480_v18 = vand.u32 4294901760, %v4448_v59  ;;  %v4442_v62 = vadd.f32 %v4441_v60, %v4363_v48  ;;  %v5884_v48 = vld [vmem:[#allocation5 + $0x18] sm:$0xff] }
 0x4a8   :  { %v4558_v20 = vsub.f32 %v4448_v59, %v4480_v18  ;;  %v4483_v30 = vand.u32 4294901760, %v4442_v62  ;;  %48996 = vmatpush3.msra.mxu0 %v4480_v18 }
 0x4a9   :  { %48997 = vmatprep.subr.mxu0 %v57016_v38 }
 0x4aa   :  { %v4559_v0 = vand.u32 4294901760, %v4558_v20  ;;  %v4565_v5 = vsub.f32 %v4442_v62, %v4483_v30  ;;  %48998 = vmatpush3.msra.mxu0 %v4483_v30  ;;  %v5885_v62 = vmax.f32 %v5883_v42, 1e-06 }
 0x4ab   :  { %49009 = vmatprep.subr.mxu0 %v57016_v38  ;;  %49000 = vmatmul.mubr.f32.vlgmr.msra.gmra.mxu0 %v53241_v51 }
 0x4ac   :  { %v4560_v8 = vsub.f32 %v4558_v20, %v4559_v0  ;;  %v4566_v13 = vand.u32 4294901760, %v4565_v5  ;;  %49010 = vmatpush3.msra.mxu0 %v4558_v20  ;;  %49013 = vmatprep.mubr.msk.f32.mxu0 %vm52763_vm1, %v57016_v38 }
 0x4ad   :  { %49011 = vmatprep.subr.mxu0 %v57016_v38 }
 0x4ae   :  { %49012 = vmatpush3.msra.mxu0 %v4565_v5  ;;  %v4561_v1 = vand.u32 4294901760, %v4560_v8  ;;  %v4567_v22 = vsub.f32 %v4565_v5, %v4566_v13 }
 0x4af   :  { %49023 = vmatprep.subr.mxu0 %v57016_v38  ;;  %49014 = vmatmul.mubr.f32.vlgmr.msra.gmra.mxu0 %v53234_v35 }
 0x4b0   :  { %49003 = vmatpush3.msra.mxu1 %v4561_v1  ;;  %49024 = vmatpush3.msra.mxu0 %v4559_v0  ;;  %v4568_v40 = vand.u32 4294901760, %v4567_v22  ;;  %v5886_v0 = vmax.f32 %v5884_v48, 1e-06 }
 0x4b1   :  { %49004 = vmatprep.subr.mxu1 %v57016_v38  ;;  %49025 = vmatprep.subr.mxu0 %v57016_v38 }
 0x4b2   :  { %49005 = vmatpush3.msra.mxu1 %v4568_v40  ;;  %49026 = vmatpush3.msra.mxu0 %v4566_v13  ;;  %v53385_v40 = vmin.f32 %v5885_v62, 0.999999 }
 0x4b3   :  { %49007 = vmatmul.mubr.f32.vlgmr.msra.gmra.mxu1 %v53231_v45  ;;  %49016 = vmatprep.subr.mxu1 %v57016_v38 }
 0x4b4   :  { %49017 = vmatpush3.msra.mxu1 %v4480_v18  ;;  %49020 = vmatprep.mubr.msk.f32.mxu1 %vm52763_vm1, %v57016_v38 }
 0x4b5   :  { %49018 = vmatprep.subr.mxu1 %v57016_v38  ;;  %49027 = vmatprep.mubr.msk.f32.mxu0 %vm52763_vm1, %v57016_v38 }
 0x4b6   :  { %49019 = vmatpush3.msra.mxu1 %v4483_v30  ;;  %49028 = vmatmul.mubr.f32.vlgmr.msra.gmra.mxu0 %v53231_v45 }
 0x4b7   :  { %49021 = vmatmul.mubr.f32.vlgmr.msra.gmra.mxu1 %v53237_v61  ;;  %49030 = vmatprep.subr.mxu1 %v57016_v38 }
 0x4b8   :  { %49037 = vmatprep.subr.mxu0 %v53134_v4  ;;  %49031 = vmatpush3.msra.mxu1 %v4480_v18  ;;  %v5878_v18 = vmax.f32 %v5876_v41, 1e-06 }
 0x4b9   :  { %49038 = vmatpush3.msra.mxu0 %v53134_v4  ;;  %49032 = vmatprep.subr.mxu1 %v57016_v38 }
 0x4ba   :  { %49039 = vmatprep.subr.mxu0 %v53137_v11  ;;  %49033 = vmatpush3.msra.mxu1 %v4483_v30  ;;  %v5879_v30 = vmax.f32 %v5877_v46, 1e-06  ;;  %v53383_v22 = vmin.f32 %v5878_v18, 0.999999 }
 0x4bb   :  { %49034 = vmatprep.mubr.msk.f32.mxu1 %vm52763_vm1, %v57016_v38  ;;  %49040 = vmatpush3.msra.mxu0 %v53137_v11 }
 0x4bc   :  { %49041 = vmatprep.mubr.f32.mxu0 %v53077_v24  ;;  %49035 = vmatmul.mubr.f32.vlgmr.msra.gmra.mxu1 %v53231_v45 }
 0x4bd   :  { %49042 = vmatmul.mubr.f32.vlgmr.msra.gmra.mxu0 %v53081_v36  ;;  %49044 = vmatprep.subr.mxu1 %v53177_v53 }
 0x4be   :  { %49051 = vmatprep.subr.mxu0 %v53145_v23  ;;  %49045 = vmatpush3.msra.mxu1 %v53177_v53 }
 0x4bf   :  { %49052 = vmatpush3.msra.mxu0 %v53145_v23  ;;  %49046 = vmatprep.subr.mxu1 %v53183_v55 }
 0x4c0   :  { %49053 = vmatprep.subr.mxu0 %v53150_v44  ;;  %49047 = vmatpush3.msra.mxu1 %v53183_v55 }
 0x4c1   :  { %49048 = vmatprep.mubr.f32.mxu1 %v53036_v63  ;;  %49054 = vmatpush3.msra.mxu0 %v53150_v44 }
 0x4c2   :  { %49055 = vmatprep.mubr.f32.mxu0 %v53046_v6  ;;  %49049 = vmatmul.mubr.f32.vlgmr.msra.gmra.mxu1 %v53039_v14 }
 0x4c3   :  { %49056 = vmatmul.mubr.f32.vlgmr.msra.gmra.mxu0 %v53050_v7  ;;  %49058 = vmatprep.subr.mxu1 %v53134_v4 }
 0x4c4   :  { %49065 = vmatprep.subr.mxu0 %v53155_v49  ;;  %49059 = vmatpush3.msra.mxu1 %v53134_v4 }
 0x4c5   :  { %49066 = vmatpush3.msra.mxu0 %v53155_v49  ;;  %49060 = vmatprep.subr.mxu1 %v53137_v11 }
 0x4c6   :  { %49067 = vmatprep.subr.mxu0 %v53160_v50  ;;  %49061 = vmatpush3.msra.mxu1 %v53137_v11 }
 0x4c7   :  { %49062 = vmatprep.mubr.f32.mxu1 %v53055_v15  ;;  %49068 = vmatpush3.msra.mxu0 %v53160_v50 }
 0x4c8   :  { %49069 = vmatprep.mubr.f32.mxu0 %v53036_v63  ;;  %49063 = vmatmul.mubr.f32.vlgmr.msra.gmra.mxu1 %v53060_v21 }
 0x4c9   :  { %49070 = vmatmul.mubr.f32.vlgmr.msra.gmra.mxu0 %v53039_v14  ;;  %49072 = vmatprep.subr.mxu1 %v53134_v4 }
 0x4ca   :  { %49073 = vmatpush3.msra.mxu1 %v53134_v4  ;;  %49076 = vmatprep.mubr.f32.mxu1 %v53036_v63 }
 0x4cb   :  { %49074 = vmatprep.subr.mxu1 %v53137_v11  ;;  %49079 = vmatprep.subr.mxu0 %v57016_v38 }
 0x4cc   :  { %49075 = vmatpush3.msra.mxu1 %v53137_v11  ;;  %49083 = vmatprep.mubr.msk.f32.mxu0 %vm52763_vm1, %v57016_v38 }
 0x4cd   :  { %49077 = vmatmul.mubr.f32.vlgmr.msra.gmra.mxu1 %v53039_v14  ;;  %49086 = vmatprep.subr.mxu1 %v57016_v38 }
 0x4ce   :  { %49090 = vmatprep.mubr.msk.f32.mxu1 %vm52763_vm1, %v57016_v38 }
 0x56b   :  { %v4524_v6 = vpop.f32.mrf.mxu0 }
 0x56d   :  { %v49001_v7 = vpop.f32.mrf.mxu0 }
 0x56e   :  { %v53387_v7 = vmin.f32 %v5879_v30, 0.999999 }
 0x56f   :  { %v4681_v15 = vpop.f32.mrf.mxu0 }
 0x571   :  { %v49015_v63 = vpop.f32.mrf.mxu0 }
 0x573   :  { %v4605_v21 = vpop.f32.mrf.mxu1 }
 0x574   :  { %v4606_v24 = vadd.f32 %v4605_v21, %v4524_v6 }
 0x575   :  { %v49008_v36 = vpop.f32.mrf.mxu1 }
 0x576   :  { %v4682_v52 = vadd.f32 %v4681_v15, %v4606_v24  ;;  %v4833_v29 = vpop.f32.mrf.mxu0  ;;  %v53389_v15 = vmin.f32 %v5886_v0, 0.999999 }
 0x577   :  { %v4756_v31 = vpop.f32.mrf.mxu1 }
 0x578   :  { %v4757_v32 = vadd.f32 %v4756_v31, %v4682_v52  ;;  %v49029_v27 = vpop.f32.mrf.mxu0 }
 0x579   :  { %v49022_v34 = vpop.f32.mrf.mxu1 }
 0x57a   :  { %v4834_v37 = vadd.f32 %v4833_v29, %v4757_v32  ;;  %v5889_v29 = vmul.f32 %v53385_v40, %v53383_v22  ;;  %v5890_v32 = vmul.f32 %v53389_v15, %v53387_v7 }
 0x57c   :  { %v4906_v14 = vpop.f32.mrf.mxu1  ;;  %v5899_v41 = vsel %vm76_vm0, %v5890_v32, 0 }
 0x57d   :  { %v53381_v56 = vadd.f32 %v4906_v14, %v4834_v37  ;;  %v49043_v57 = vpop.f32.mrf.mxu0 }
 0x57e   :  { %v49036_v28 = vpop.f32.mrf.mxu1 }
 0x57f   :  { %v4983_v33 = vpop.f32.mrf.mxu0 }
 0x582   :  { %v49050_v58 = vpop.f32.mrf.mxu1 }
 0x583   :  { %v5081_v59 = vadd.f32 %v49050_v58, %v49043_v57  ;;  %v49057_v60 = vpop.f32.mrf.mxu0  ;;  %v5896_v57 = vsel %vm76_vm0, %v5889_v29, 0  ;;  %v53400_v58 = vand.u32 4294901760, %v5899_v41 }
 0x584   :  { %v5074_v20 = vpop.f32.mrf.mxu1  ;;  %v53397_v48 = vand.u32 4294901760, %v5896_v57 }
 0x585   :  { %v5164_v5 = vadd.f32 %v49057_v60, %v5081_v59  ;;  %v5075_v8 = vadd.f32 %v5074_v20, %v4983_v33  ;;  %v5156_v13 = vpop.f32.mrf.mxu0  ;;  %v53411_v30 = vsub.f32 %v5899_v41, %v53400_v58 }
 0x586   :  { %v53407_v20 = vsub.f32 %v5896_v57, %v53397_v48 }
 0x587   :  { %v5157_v1 = vadd.f32 %v5156_v13, %v5075_v8 }
 0x588   :  { %v49064_v6 = vpop.f32.mrf.mxu1  ;;  %v53416_v13 = vand.u32 4294901760, %v53407_v20 }
 0x589   :  { %v5247_v63 = vadd.f32 %v49064_v6, %v5164_v5  ;;  %v49071_v21 = vpop.f32.mrf.mxu0 }
 0x58a   :  { %v5238_v24 = vpop.f32.mrf.mxu1  ;;  %v5971_v6 = vsub.f32 %v53407_v20, %v53416_v13 }
 0x58b   :  { %v5330_v36 = vadd.f32 %v49071_v21, %v5247_v63  ;;  %v5239_v52 = vadd.f32 %v5238_v24, %v5157_v1  ;;  %v5323_v31 = vpop.f32.mrf.mxu0  ;;  %v53421_v1 = vand.u32 4294901760, %v53411_v30 }
 0x58c   :  { %v53438_v21 = vand.u32 4294901760, %v5971_v6 }
 0x58d   :  { %v5324_v27 = vadd.f32 %v5323_v31, %v5239_v52  ;;  %v49078_v34 = vpop.f32.mrf.mxu1  ;;  %v5981_v63 = vsub.f32 %v53411_v30, %v53421_v1 }
 0x58e   :  { %v5409_v37 = vadd.f32 %v49078_v34, %v5330_v36 }
 0x58f   :  { %v5402_v14 = vpop.f32.mrf.mxu1  ;;  %v53442_v24 = vand.u32 4294901760, %v5981_v63 }
 0x590   :  { %v5441_v28 = vand.u32 4294901760, %v5409_v37  ;;  %v5403_v33 = vadd.f32 %v5402_v14, %v5324_v27 }
 0x592   :  { %v5519_v42 = vsub.f32 %v5409_v37, %v5441_v28  ;;  %v5444_v46 = vand.u32 4294901760, %v5403_v33  ;;  %49080 = vmatpush3.msra.mxu0 %v5441_v28 }
 0x593   :  { %49081 = vmatprep.subr.mxu0 %v57016_v38 }
 0x594   :  { %v5520_v59 = vand.u32 4294901760, %v5519_v42  ;;  %v5526_v60 = vsub.f32 %v5403_v33, %v5444_v46  ;;  %49082 = vmatpush3.msra.mxu0 %v5444_v46 }
 0x595   :  { %49093 = vmatprep.subr.mxu0 %v57016_v38  ;;  %49084 = vmatmul.mubr.f32.vlgmr.msra.gmra.mxu0 %v53241_v51 }
 0x596   :  { %v5521_v18 = vsub.f32 %v5519_v42, %v5520_v59  ;;  %v5527_v62 = vand.u32 4294901760, %v5526_v60  ;;  %49094 = vmatpush3.msra.mxu0 %v5519_v42  ;;  %49097 = vmatprep.mubr.msk.f32.mxu0 %vm52763_vm1, %v57016_v38 }
 0x597   :  { %49095 = vmatprep.subr.mxu0 %v57016_v38 }
 0x598   :  { %49096 = vmatpush3.msra.mxu0 %v5526_v60  ;;  %v5522_v0 = vand.u32 4294901760, %v5521_v18  ;;  %v5528_v5 = vsub.f32 %v5526_v60, %v5527_v62 }
 0x599   :  { %49107 = vmatprep.subr.mxu0 %v57016_v38  ;;  %49098 = vmatmul.mubr.f32.vlgmr.msra.gmra.mxu0 %v53234_v35 }
 0x59a   :  { %49087 = vmatpush3.msra.mxu1 %v5522_v0  ;;  %49108 = vmatpush3.msra.mxu0 %v5520_v59  ;;  %v5529_v8 = vand.u32 4294901760, %v5528_v5 }
 0x59b   :  { %49088 = vmatprep.subr.mxu1 %v57016_v38  ;;  %49109 = vmatprep.subr.mxu0 %v57016_v38 }
 0x59c   :  { %49089 = vmatpush3.msra.mxu1 %v5529_v8  ;;  %49110 = vmatpush3.msra.mxu0 %v5527_v62 }
 0x59d   :  { %49091 = vmatmul.mubr.f32.vlgmr.msra.gmra.mxu1 %v53231_v45  ;;  %49100 = vmatprep.subr.mxu1 %v57016_v38 }
 0x59e   :  { %49101 = vmatpush3.msra.mxu1 %v5441_v28  ;;  %49104 = vmatprep.mubr.msk.f32.mxu1 %vm52763_vm1, %v57016_v38 }
 0x59f   :  { %49102 = vmatprep.subr.mxu1 %v57016_v38  ;;  %49111 = vmatprep.mubr.msk.f32.mxu0 %vm52763_vm1, %v57016_v38 }
 0x5a0   :  { %49103 = vmatpush3.msra.mxu1 %v5444_v46  ;;  %49112 = vmatmul.mubr.f32.vlgmr.msra.gmra.mxu0 %v53231_v45 }
 0x5a1   :  { %49105 = vmatmul.mubr.f32.vlgmr.msra.gmra.mxu1 %v53237_v61  ;;  %49114 = vmatprep.subr.mxu1 %v57016_v38 }
 0x5a2   :  { %49121 = vmatprep.subr.mxu0 %v52812_v2  ;;  %49115 = vmatpush3.msra.mxu1 %v5441_v28 }
 0x5a3   :  { %49122 = vmatpush3.msra.mxu0 %v52812_v2  ;;  %49116 = vmatprep.subr.mxu1 %v57016_v38 }
 0x5a4   :  { %49123 = vmatprep.subr.mxu0 %v52814_v3  ;;  %49117 = vmatpush3.msra.mxu1 %v5444_v46 }
 0x5a5   :  { %49118 = vmatprep.mubr.msk.f32.mxu1 %vm52763_vm1, %v57016_v38  ;;  %49124 = vmatpush3.msra.mxu0 %v52814_v3 }
 0x5a6   :  { %49125 = vmatprep.mubr.f32.mxu0 %v53438_v21  ;;  %49119 = vmatmul.mubr.f32.vlgmr.msra.gmra.mxu1 %v53231_v45 }
 0x5a7   :  { %49126 = vmatmul.mubr.f32.vlgmr.msra.gmra.mxu0 %v53442_v24  ;;  %49128 = vmatprep.subr.mxu1 %v52850_v25 }
 0x5a8   :  { %49135 = vmatprep.subr.mxu0 %v52818_v9  ;;  %49129 = vmatpush3.msra.mxu1 %v52850_v25 }
 0x5a9   :  { %49136 = vmatpush3.msra.mxu0 %v52818_v9  ;;  %49130 = vmatprep.subr.mxu1 %v52852_v26 }
 0x5aa   :  { %49137 = vmatprep.subr.mxu0 %v52821_v10  ;;  %49131 = vmatpush3.msra.mxu1 %v52852_v26 }
 0x5ab   :  { %49132 = vmatprep.mubr.f32.mxu1 %v53397_v48  ;;  %49138 = vmatpush3.msra.mxu0 %v52821_v10 }
 0x5ac   :  { %49139 = vmatprep.mubr.f32.mxu0 %v53407_v20  ;;  %49133 = vmatmul.mubr.f32.vlgmr.msra.gmra.mxu1 %v53400_v58 }
 0x5ad   :  { %49140 = vmatmul.mubr.f32.vlgmr.msra.gmra.mxu0 %v53411_v30  ;;  %49142 = vmatprep.subr.mxu1 %v52812_v2 }
 0x5ae   :  { %49149 = vmatprep.subr.mxu0 %v52829_v16  ;;  %49143 = vmatpush3.msra.mxu1 %v52812_v2 }
 0x5af   :  { %49150 = vmatpush3.msra.mxu0 %v52829_v16  ;;  %49144 = vmatprep.subr.mxu1 %v52814_v3 }
 0x5b0   :  { %49151 = vmatprep.subr.mxu0 %v52833_v17  ;;  %49145 = vmatpush3.msra.mxu1 %v52814_v3 }
 0x5b1   :  { %49146 = vmatprep.mubr.f32.mxu1 %v53416_v13  ;;  %49152 = vmatpush3.msra.mxu0 %v52833_v17 }
 0x5b2   :  { %49153 = vmatprep.mubr.f32.mxu0 %v53397_v48  ;;  %49147 = vmatmul.mubr.f32.vlgmr.msra.gmra.mxu1 %v53421_v1 }
 0x5b3   :  { %49154 = vmatmul.mubr.f32.vlgmr.msra.gmra.mxu0 %v53400_v58  ;;  %49156 = vmatprep.subr.mxu1 %v52812_v2 }
 0x5b4   :  { %49157 = vmatpush3.msra.mxu1 %v52812_v2  ;;  %49160 = vmatprep.mubr.f32.mxu1 %v53397_v48 }
 0x5b5   :  { %49158 = vmatprep.subr.mxu1 %v52814_v3  ;;  %49163 = vmatprep.subr.mxu0 %v57016_v38 }
 0x5b6   :  { %49159 = vmatpush3.msra.mxu1 %v52814_v3  ;;  %49167 = vmatprep.mubr.msk.f32.mxu0 %vm52763_vm1, %v57016_v38 }
 0x5b7   :  { %49161 = vmatmul.mubr.f32.vlgmr.msra.gmra.mxu1 %v53400_v58  ;;  %49170 = vmatprep.subr.mxu1 %v57016_v38 }
 0x5b8   :  { %49174 = vmatprep.mubr.msk.f32.mxu1 %vm52763_vm1, %v57016_v38 }
 0x655   :  { %v5485_v36 = vpop.f32.mrf.mxu0 }
 0x657   :  { %v49085_v52 = vpop.f32.mrf.mxu0 }
 0x659   :  { %v5642_v29 = vpop.f32.mrf.mxu0 }
 0x65b   :  { %v49099_v31 = vpop.f32.mrf.mxu0 }
 0x65d   :  { %v5566_v32 = vpop.f32.mrf.mxu1 }
 0x65e   :  { %v5567_v27 = vadd.f32 %v5566_v32, %v5485_v36 }
 0x65f   :  { %v49092_v34 = vpop.f32.mrf.mxu1 }
 0x660   :  { %v5643_v37 = vadd.f32 %v5642_v29, %v5567_v27  ;;  %v5794_v14 = vpop.f32.mrf.mxu0 }
 0x661   :  { %v5717_v57 = vpop.f32.mrf.mxu1 }
 0x662   :  { %v5718_v28 = vadd.f32 %v5717_v57, %v5643_v37  ;;  %v49113_v33 = vpop.f32.mrf.mxu0 }
 0x663   :  { %v49106_v41 = vpop.f32.mrf.mxu1  ;;  %v5892_v33 = vmul.f32 %v53387_v7, %v53387_v7 }
 0x664   :  { %v5795_v42 = vadd.f32 %v5794_v14, %v5718_v28  ;;  %v5891_v28 = vmul.f32 %v53383_v22, %v53383_v22 }
 0x666   :  { %v5867_v46 = vpop.f32.mrf.mxu1 }
 0x667   :  { %v5868_v59 = vadd.f32 %v5867_v46, %v5795_v42  ;;  %v49127_v60 = vpop.f32.mrf.mxu0 }
 0x668   :  { %v49120_v18 = vpop.f32.mrf.mxu1 }
 0x669   :  { %v53488_v62 = vmul.f32 %v5868_v59, %v53381_v56  ;;  %v5974_v0 = vpop.f32.mrf.mxu0 }
 0x66b   :  { %52662 = vrsqrt.f32 %v53488_v62 }
 0x66c   :  { %v49134_v5 = vpop.f32.mrf.mxu1 }
 0x66d   :  { %v6072_v8 = vadd.f32 %v49134_v5, %v49127_v60  ;;  %v49141_v6 = vpop.f32.mrf.mxu0  ;;  %v6863_v60 = vsel %vm76_vm0, %v5891_v28, 0  ;;  %v6866_v5 = vsel %vm76_vm0, %v5892_v33, 0 }
 0x66e   :  { %v6065_v63 = vpop.f32.mrf.mxu1  ;;  %v53499_v22 = vand.u32 4294901760, %v6866_v5 }
 0x66f   :  { %v6155_v36 = vadd.f32 %v49141_v6, %v6072_v8  ;;  %v6066_v52 = vadd.f32 %v6065_v63, %v5974_v0  ;;  %v6147_v29 = vpop.f32.mrf.mxu0  ;;  %v53496_v63 = vand.u32 4294901760, %v6863_v60 }
 0x671   :  { %v6148_v31 = vadd.f32 %v6147_v29, %v6066_v52 }
 0x672   :  { %v49148_v32 = vpop.f32.mrf.mxu1 }
 0x673   :  { %v6238_v27 = vadd.f32 %v49148_v32, %v6155_v36  ;;  %v49155_v34 = vpop.f32.mrf.mxu0  ;;  %v53510_v32 = vsub.f32 %v6866_v5, %v53499_v22 }
 0x674   :  { %v6229_v37 = vpop.f32.mrf.mxu1 }
 0x675   :  { %v6321_v14 = vadd.f32 %v49155_v34, %v6238_v27  ;;  %v6230_v57 = vadd.f32 %v6229_v37, %v6148_v31  ;;  %v6314_v56 = vpop.f32.mrf.mxu0  ;;  %v53506_v31 = vsub.f32 %v6863_v60, %v53496_v63 }
 0x677   :  { %v6315_v41 = vadd.f32 %v6314_v56, %v6230_v57  ;;  %v49162_v42 = vpop.f32.mrf.mxu1  ;;  %v53520_v57 = vand.u32 4294901760, %v53510_v32 }
 0x678   :  { %v6400_v46 = vadd.f32 %v49162_v42, %v6321_v14  ;;  %v53515_v14 = vand.u32 4294901760, %v53506_v31  ;;  %v52663_v42 = vpop.eup %52662 }
 0x679   :  { %v6393_v59 = vpop.f32.mrf.mxu1  ;;  %v6948_v56 = vsub.f32 %v53510_v32, %v53520_v57 }
 0x67a   :  { %v6432_v18 = vand.u32 4294901760, %v6400_v46  ;;  %v6394_v0 = vadd.f32 %v6393_v59, %v6315_v41  ;;  %v6938_v28 = vsub.f32 %v53506_v31, %v53515_v14 }
 0x67b   :  { %v53541_v41 = vand.u32 4294901760, %v6948_v56 }
 0x67c   :  { %v6510_v8 = vsub.f32 %v6400_v46, %v6432_v18  ;;  %v6435_v6 = vand.u32 4294901760, %v6394_v0  ;;  %49164 = vmatpush3.msra.mxu0 %v6432_v18  ;;  %v53537_v33 = vand.u32 4294901760, %v6938_v28  ;;  %v53588_v46 = vmul.f32 %v52663_v42, %v53313_v39 }
 0x67d   :  { %49165 = vmatprep.subr.mxu0 %v57016_v38 }
 0x67e   :  { %v6511_v7 = vand.u32 4294901760, %v6510_v8  ;;  %v6517_v36 = vsub.f32 %v6394_v0, %v6435_v6  ;;  %49166 = vmatpush3.msra.mxu0 %v6435_v6  ;;  %57102 = vst [vmem:[#allocation20_spill] sm:$0xff] %v53588_v46 }
 0x67f   :  { %49177 = vmatprep.subr.mxu0 %v57016_v38  ;;  %49168 = vmatmul.mubr.f32.vlgmr.msra.gmra.mxu0 %v52936_v12 }
 0x680   :  { %v6512_v52 = vsub.f32 %v6510_v8, %v6511_v7  ;;  %v6518_v29 = vand.u32 4294901760, %v6517_v36  ;;  %49178 = vmatpush3.msra.mxu0 %v6510_v8  ;;  %49181 = vmatprep.mubr.msk.f32.mxu0 %vm52763_vm1, %v57016_v38 }
 0x681   :  { %49179 = vmatprep.subr.mxu0 %v57016_v38 }
 0x682   :  { %49180 = vmatpush3.msra.mxu0 %v6517_v36  ;;  %v6513_v27 = vand.u32 4294901760, %v6512_v52  ;;  %v6519_v34 = vsub.f32 %v6517_v36, %v6518_v29 }
 0x683   :  { %49191 = vmatprep.subr.mxu0 %v57016_v38  ;;  %49182 = vmatmul.mubr.f32.vlgmr.msra.gmra.mxu0 %v52923_v47 }
 0x684   :  { %49171 = vmatpush3.msra.mxu1 %v6513_v27  ;;  %49192 = vmatpush3.msra.mxu0 %v6511_v7  ;;  %v6520_v37 = vand.u32 4294901760, %v6519_v34 }
 0x685   :  { %49172 = vmatprep.subr.mxu1 %v57016_v38  ;;  %49193 = vmatprep.subr.mxu0 %v57016_v38 }
 0x686   :  { %49173 = vmatpush3.msra.mxu1 %v6520_v37  ;;  %49194 = vmatpush3.msra.mxu0 %v6518_v29 }
 0x687   :  { %49175 = vmatmul.mubr.f32.vlgmr.msra.gmra.mxu1 %v52920_v43  ;;  %49184 = vmatprep.subr.mxu1 %v57016_v38 }
 0x688   :  { %49185 = vmatpush3.msra.mxu1 %v6432_v18  ;;  %49188 = vmatprep.mubr.msk.f32.mxu1 %vm52763_vm1, %v57016_v38 }
 0x689   :  { %49186 = vmatprep.subr.mxu1 %v57016_v38  ;;  %49195 = vmatprep.mubr.msk.f32.mxu0 %vm52763_vm1, %v57016_v38 }
 0x68a   :  { %49187 = vmatpush3.msra.mxu1 %v6435_v6  ;;  %49196 = vmatmul.mubr.f32.vlgmr.msra.gmra.mxu0 %v52920_v43 }
 0x68b   :  { %49189 = vmatmul.mubr.f32.vlgmr.msra.gmra.mxu1 %v52926_v54  ;;  %49198 = vmatprep.subr.mxu1 %v57016_v38 }
 0x68c   :  { %49205 = vmatprep.subr.mxu0 %v52812_v2  ;;  %49199 = vmatpush3.msra.mxu1 %v6432_v18 }
 0x68d   :  { %49206 = vmatpush3.msra.mxu0 %v52812_v2  ;;  %49200 = vmatprep.subr.mxu1 %v57016_v38 }
 0x68e   :  { %49207 = vmatprep.subr.mxu0 %v52814_v3  ;;  %49201 = vmatpush3.msra.mxu1 %v6435_v6 }
 0x68f   :  { %49202 = vmatprep.mubr.msk.f32.mxu1 %vm52763_vm1, %v57016_v38  ;;  %49208 = vmatpush3.msra.mxu0 %v52814_v3 }
 0x690   :  { %49209 = vmatprep.mubr.f32.mxu0 %v53537_v33  ;;  %49203 = vmatmul.mubr.f32.vlgmr.msra.gmra.mxu1 %v52920_v43 }
 0x691   :  { %49210 = vmatmul.mubr.f32.vlgmr.msra.gmra.mxu0 %v53541_v41  ;;  %49212 = vmatprep.subr.mxu1 %v52850_v25 }
 0x692   :  { %49219 = vmatprep.subr.mxu0 %v52818_v9  ;;  %49213 = vmatpush3.msra.mxu1 %v52850_v25 }
 0x693   :  { %49220 = vmatpush3.msra.mxu0 %v52818_v9  ;;  %49214 = vmatprep.subr.mxu1 %v52852_v26 }
 0x694   :  { %49221 = vmatprep.subr.mxu0 %v52821_v10  ;;  %49215 = vmatpush3.msra.mxu1 %v52852_v26 }
 0x695   :  { %49216 = vmatprep.mubr.f32.mxu1 %v53496_v63  ;;  %49222 = vmatpush3.msra.mxu0 %v52821_v10 }
 0x696   :  { %49223 = vmatprep.mubr.f32.mxu0 %v53506_v31  ;;  %49217 = vmatmul.mubr.f32.vlgmr.msra.gmra.mxu1 %v53499_v22 }
 0x697   :  { %49224 = vmatmul.mubr.f32.vlgmr.msra.gmra.mxu0 %v53510_v32  ;;  %49226 = vmatprep.subr.mxu1 %v52812_v2 }
 0x698   :  { %49233 = vmatprep.subr.mxu0 %v52829_v16  ;;  %49227 = vmatpush3.msra.mxu1 %v52812_v2 }
 0x699   :  { %49234 = vmatpush3.msra.mxu0 %v52829_v16  ;;  %49228 = vmatprep.subr.mxu1 %v52814_v3 }
 0x69a   :  { %49235 = vmatprep.subr.mxu0 %v52833_v17  ;;  %49229 = vmatpush3.msra.mxu1 %v52814_v3 }
 0x69b   :  { %49230 = vmatprep.mubr.f32.mxu1 %v53515_v14  ;;  %49236 = vmatpush3.msra.mxu0 %v52833_v17 }
 0x69c   :  { %49237 = vmatprep.mubr.f32.mxu0 %v53496_v63  ;;  %49231 = vmatmul.mubr.f32.vlgmr.msra.gmra.mxu1 %v53520_v57 }
 0x69d   :  { %49238 = vmatmul.mubr.f32.vlgmr.msra.gmra.mxu0 %v53499_v22  ;;  %49240 = vmatprep.subr.mxu1 %v52812_v2 }
 0x69e   :  { %49241 = vmatpush3.msra.mxu1 %v52812_v2  ;;  %49244 = vmatprep.mubr.f32.mxu1 %v53496_v63 }
 0x69f   :  { %49242 = vmatprep.subr.mxu1 %v52814_v3  ;;  %49247 = vmatprep.subr.mxu0 %v57016_v38 }
 0x6a0   :  { %49243 = vmatpush3.msra.mxu1 %v52814_v3  ;;  %49251 = vmatprep.mubr.msk.f32.mxu0 %vm52763_vm1, %v57016_v38 }
 0x6a1   :  { %49245 = vmatmul.mubr.f32.vlgmr.msra.gmra.mxu1 %v53499_v22  ;;  %49254 = vmatprep.subr.mxu1 %v57016_v38 }
 0x6a2   :  { %49258 = vmatprep.mubr.msk.f32.mxu1 %vm52763_vm1, %v57016_v38 }
 0x73f   :  { %v6476_v59 = vpop.f32.mrf.mxu0 }
 0x741   :  { %v49169_v60 = vpop.f32.mrf.mxu0 }
 0x743   :  { %v6633_v18 = vpop.f32.mrf.mxu0 }
 0x745   :  { %v49183_v0 = vpop.f32.mrf.mxu0 }
 0x747   :  { %v6557_v5 = vpop.f32.mrf.mxu1 }
 0x748   :  { %v6558_v8 = vadd.f32 %v6557_v5, %v6476_v59 }
 0x749   :  { %v49176_v6 = vpop.f32.mrf.mxu1 }
 0x74a   :  { %v6634_v7 = vadd.f32 %v6633_v18, %v6558_v8  ;;  %v6785_v36 = vpop.f32.mrf.mxu0 }
 0x74b   :  { %v6708_v52 = vpop.f32.mrf.mxu1 }
 0x74c   :  { %v6709_v29 = vadd.f32 %v6708_v52, %v6634_v7  ;;  %v49197_v27 = vpop.f32.mrf.mxu0 }
 0x74d   :  { %v49190_v34 = vpop.f32.mrf.mxu1 }
 0x74e   :  { %v6786_v37 = vadd.f32 %v6785_v36, %v6709_v29  ;;  %v5893_v29 = vmul.f32 %v53385_v40, %v53385_v40  ;;  %v57103_v40 = vmov 0.0  }
 0x750   :  { %v6858_v28 = vpop.f32.mrf.mxu1 }
 0x751   :  { %v53590_v62 = vadd.f32 %v6858_v28, %v6786_v37  ;;  %v49211_v56 = vpop.f32.mrf.mxu0  ;;  %v5894_v37 = vmul.f32 %v53389_v15, %v53389_v15 }
 0x752   :  { %v49204_v39 = vpop.f32.mrf.mxu1 }
 0x753   :  { %v6941_v42 = vpop.f32.mrf.mxu0  ;;  %v7830_v39 = vsel %vm76_vm0, %v5893_v29, 0 }
 0x756   :  { %v49218_v38 = vpop.f32.mrf.mxu1 }
 0x757   :  { %v7039_v60 = vadd.f32 %v49218_v38, %v49211_v56  ;;  %v49225_v46 = vpop.f32.mrf.mxu0 }
 0x758   :  { %v7032_v0 = vpop.f32.mrf.mxu1 }
 0x759   :  { %v7122_v19 = vadd.f32 %v49225_v46, %v7039_v60  ;;  %v7033_v59 = vadd.f32 %v7032_v0, %v6941_v42  ;;  %v7114_v5 = vpop.f32.mrf.mxu0 }
 0x75b   :  { %v7115_v18 = vadd.f32 %v7114_v5, %v7033_v59  ;;  %v53598_v5 = vand.u32 4294901760, %v7830_v39 }
 0x75c   :  { %v49232_v8 = vpop.f32.mrf.mxu1 }
 0x75d   :  { %v7205_v6 = vadd.f32 %v49232_v8, %v7122_v19  ;;  %v49239_v7 = vpop.f32.mrf.mxu0  ;;  %v7833_v19 = vsel %vm76_vm0, %v5894_v37, 0 }
 0x75e   :  { %v7196_v52 = vpop.f32.mrf.mxu1 }
 0x75f   :  { %v7288_v27 = vadd.f32 %v49239_v7, %v7205_v6  ;;  %v7197_v36 = vadd.f32 %v7196_v52, %v7115_v18  ;;  %v7281_v34 = vpop.f32.mrf.mxu0  ;;  %v53601_v18 = vand.u32 4294901760, %v7833_v19  ;;  %v53608_v52 = vsub.f32 %v7830_v39, %v53598_v5 }
 0x761   :  { %v7282_v38 = vadd.f32 %v7281_v34, %v7197_v36  ;;  %v49246_v28 = vpop.f32.mrf.mxu1  ;;  %v53617_v37 = vand.u32 4294901760, %v53608_v52 }
 0x762   :  { %v7367_v56 = vadd.f32 %v49246_v28, %v7288_v27  ;;  %v53612_v27 = vsub.f32 %v7833_v19, %v53601_v18 }
 0x763   :  { %v7360_v46 = vpop.f32.mrf.mxu1  ;;  %57104 = vst [vmem:[#allocation21_spill] sm:$0xff] %v53617_v37  ;;  %v7905_v28 = vsub.f32 %v53608_v52, %v53617_v37 }
 0x764   :  { %v7399_v42 = vand.u32 4294901760, %v7367_v56  ;;  %v7361_v60 = vadd.f32 %v7360_v46, %v7282_v38  ;;  %v53622_v38 = vand.u32 4294901760, %v53612_v27 }
 0x765   :  { %v53639_v46 = vand.u32 4294901760, %v7905_v28 }
 0x766   :  { %v7477_v0 = vsub.f32 %v7367_v56, %v7399_v42  ;;  %v7402_v59 = vand.u32 4294901760, %v7361_v60  ;;  %49248 = vmatpush3.msra.mxu0 %v7399_v42  ;;  %57105 = vst [vmem:[#allocation22_spill] sm:$0xff] %v53622_v38  ;;  %v7915_v56 = vsub.f32 %v53612_v27, %v53622_v38 }
 0x767   :  { %49249 = vmatprep.subr.mxu0 %v57103_v40 }
 0x768   :  { %v7478_v15 = vand.u32 4294901760, %v7477_v0  ;;  %v7484_v8 = vsub.f32 %v7361_v60, %v7402_v59  ;;  %49250 = vmatpush3.msra.mxu0 %v7402_v59  ;;  %v53643_v39 = vand.u32 4294901760, %v7915_v56 }
 0x769   :  { %49261 = vmatprep.subr.mxu0 %v57103_v40  ;;  %49252 = vmatmul.mubr.f32.vlgmr.msra.gmra.mxu0 %v52936_v12 }
 0x76a   :  { %v7479_v6 = vsub.f32 %v7477_v0, %v7478_v15  ;;  %v7485_v7 = vand.u32 4294901760, %v7484_v8  ;;  %49262 = vmatpush3.msra.mxu0 %v7477_v0  ;;  %49265 = vmatprep.mubr.msk.f32.mxu0 %vm52763_vm1, %v57103_v40 }
 0x76b   :  { %49263 = vmatprep.subr.mxu0 %v57103_v40 }
 0x76c   :  { %49264 = vmatpush3.msra.mxu0 %v7484_v8  ;;  %v7480_v36 = vand.u32 4294901760, %v7479_v6  ;;  %v7486_v29 = vsub.f32 %v7484_v8, %v7485_v7 }
 0x76d   :  { %49275 = vmatprep.subr.mxu0 %v57103_v40  ;;  %49266 = vmatmul.mubr.f32.vlgmr.msra.gmra.mxu0 %v52923_v47 }
 0x76e   :  { %49255 = vmatpush3.msra.mxu1 %v7480_v36  ;;  %49276 = vmatpush3.msra.mxu0 %v7478_v15  ;;  %v7487_v34 = vand.u32 4294901760, %v7486_v29 }
 0x76f   :  { %49256 = vmatprep.subr.mxu1 %v57103_v40  ;;  %49277 = vmatprep.subr.mxu0 %v57103_v40 }
 0x770   :  { %49257 = vmatpush3.msra.mxu1 %v7487_v34  ;;  %49278 = vmatpush3.msra.mxu0 %v7485_v7 }
 0x771   :  { %49259 = vmatmul.mubr.f32.vlgmr.msra.gmra.mxu1 %v52920_v43  ;;  %49268 = vmatprep.subr.mxu1 %v57103_v40 }
 0x772   :  { %49269 = vmatpush3.msra.mxu1 %v7399_v42  ;;  %49272 = vmatprep.mubr.msk.f32.mxu1 %vm52763_vm1, %v57103_v40 }
 0x773   :  { %49270 = vmatprep.subr.mxu1 %v57103_v40  ;;  %49279 = vmatprep.mubr.msk.f32.mxu0 %vm52763_vm1, %v57103_v40 }
 0x774   :  { %49271 = vmatpush3.msra.mxu1 %v7402_v59  ;;  %49280 = vmatmul.mubr.f32.vlgmr.msra.gmra.mxu0 %v52920_v43 }
 0x775   :  { %49273 = vmatmul.mubr.f32.vlgmr.msra.gmra.mxu1 %v52926_v54  ;;  %49282 = vmatprep.subr.mxu1 %v57103_v40 }
 0x776   :  { %49289 = vmatprep.subr.mxu0 %v52812_v2  ;;  %49283 = vmatpush3.msra.mxu1 %v7399_v42 }
 0x777   :  { %49290 = vmatpush3.msra.mxu0 %v52812_v2  ;;  %49284 = vmatprep.subr.mxu1 %v57103_v40 }
 0x778   :  { %49291 = vmatprep.subr.mxu0 %v52814_v3  ;;  %49285 = vmatpush3.msra.mxu1 %v7402_v59 }
 0x779   :  { %49286 = vmatprep.mubr.msk.f32.mxu1 %vm52763_vm1, %v57103_v40  ;;  %49292 = vmatpush3.msra.mxu0 %v52814_v3 }
 0x77a   :  { %49293 = vmatprep.mubr.f32.mxu0 %v53639_v46  ;;  %49287 = vmatmul.mubr.f32.vlgmr.msra.gmra.mxu1 %v52920_v43 }
 0x77b   :  { %49294 = vmatmul.mubr.f32.vlgmr.msra.gmra.mxu0 %v53643_v39  ;;  %49296 = vmatprep.subr.mxu1 %v52850_v25 }
 0x77c   :  { %49303 = vmatprep.subr.mxu0 %v52818_v9  ;;  %49297 = vmatpush3.msra.mxu1 %v52850_v25 }
 0x77d   :  { %49304 = vmatpush3.msra.mxu0 %v52818_v9  ;;  %49298 = vmatprep.subr.mxu1 %v52852_v26 }
 0x77e   :  { %49305 = vmatprep.subr.mxu0 %v52821_v10  ;;  %49299 = vmatpush3.msra.mxu1 %v52852_v26 }
 0x77f   :  { %49300 = vmatprep.mubr.f32.mxu1 %v53598_v5  ;;  %49306 = vmatpush3.msra.mxu0 %v52821_v10 }
 0x780   :  { %49307 = vmatprep.mubr.f32.mxu0 %v53608_v52  ;;  %49301 = vmatmul.mubr.f32.vlgmr.msra.gmra.mxu1 %v53601_v18 }
 0x781   :  { %49308 = vmatmul.mubr.f32.vlgmr.msra.gmra.mxu0 %v53612_v27  ;;  %49310 = vmatprep.subr.mxu1 %v52812_v2 }
 0x782   :  { %49317 = vmatprep.subr.mxu0 %v52829_v16  ;;  %49311 = vmatpush3.msra.mxu1 %v52812_v2 }
 0x783   :  { %49318 = vmatpush3.msra.mxu0 %v52829_v16  ;;  %49312 = vmatprep.subr.mxu1 %v52814_v3 }
 0x784   :  { %49319 = vmatprep.subr.mxu0 %v52833_v17  ;;  %49313 = vmatpush3.msra.mxu1 %v52814_v3 }
 0x785   :  { %49314 = vmatprep.mubr.f32.mxu1 %v53617_v37  ;;  %49320 = vmatpush3.msra.mxu0 %v52833_v17 }
 0x786   :  { %49321 = vmatprep.mubr.f32.mxu0 %v53598_v5  ;;  %49315 = vmatmul.mubr.f32.vlgmr.msra.gmra.mxu1 %v53622_v38 }
 0x787   :  { %49322 = vmatmul.mubr.f32.vlgmr.msra.gmra.mxu0 %v53601_v18  ;;  %49324 = vmatprep.subr.mxu1 %v52812_v2 }
 0x788   :  { %49325 = vmatpush3.msra.mxu1 %v52812_v2  ;;  %49328 = vmatprep.mubr.f32.mxu1 %v53598_v5 }
 0x789   :  { %49326 = vmatprep.subr.mxu1 %v52814_v3  ;;  %49331 = vmatprep.subr.mxu0 %v57103_v40 }
 0x78a   :  { %49327 = vmatpush3.msra.mxu1 %v52814_v3  ;;  %49335 = vmatprep.mubr.msk.f32.mxu0 %vm52763_vm1, %v57103_v40 }
 0x78b   :  { %49329 = vmatmul.mubr.f32.vlgmr.msra.gmra.mxu1 %v53601_v18  ;;  %49338 = vmatprep.subr.mxu1 %v57103_v40 }
 0x78c   :  { %49342 = vmatprep.mubr.msk.f32.mxu1 %vm52763_vm1, %v57103_v40 }
 0x829   :  { %v7443_v42 = vpop.f32.mrf.mxu0 }
 0x82b   :  { %v49253_v60 = vpop.f32.mrf.mxu0 }
 0x82d   :  { %v7600_v19 = vpop.f32.mrf.mxu0 }
 0x82f   :  { %v49267_v0 = vpop.f32.mrf.mxu0 }
 0x831   :  { %v7524_v59 = vpop.f32.mrf.mxu1 }
 0x832   :  { %v7525_v15 = vadd.f32 %v7524_v59, %v7443_v42 }
 0x833   :  { %v49260_v8 = vpop.f32.mrf.mxu1 }
 0x834   :  { %v7601_v6 = vadd.f32 %v7600_v19, %v7525_v15  ;;  %v7752_v7 = vpop.f32.mrf.mxu0 }
 0x835   :  { %v7675_v36 = vpop.f32.mrf.mxu1 }
 0x836   :  { %v7676_v29 = vadd.f32 %v7675_v36, %v7601_v6  ;;  %v49281_v34 = vpop.f32.mrf.mxu0 }
 0x837   :  { %v49274_v28 = vpop.f32.mrf.mxu1 }
 0x838   :  { %v7753_v56 = vadd.f32 %v7752_v7, %v7676_v29 }
 0x83a   :  { %v7825_v17 = vpop.f32.mrf.mxu1 }
 0x83b   :  { %v53688_v16 = vadd.f32 %v7825_v17, %v7753_v56  ;;  %v49295_v10 = vpop.f32.mrf.mxu0 }
 0x83c   :  { %v49288_v26 = vpop.f32.mrf.mxu1 }
 0x83d   :  { %v7908_v9 = vpop.f32.mrf.mxu0 }
 0x840   :  { %v49302_v25 = vpop.f32.mrf.mxu1 }
 0x841   :  { %v8006_v60 = vadd.f32 %v49302_v25, %v49295_v10  ;;  %v49309_v3 = vpop.f32.mrf.mxu0 }
 0x842   :  { %v7999_v0 = vpop.f32.mrf.mxu1 }
 0x843   :  { %v8089_v2 = vadd.f32 %v49309_v3, %v8006_v60  ;;  %v8000_v42 = vadd.f32 %v7999_v0, %v7908_v9  ;;  %v8081_v59 = vpop.f32.mrf.mxu0 }
 0x845   :  { %v8082_v19 = vadd.f32 %v8081_v59, %v8000_v42 }
 0x846   :  { %v49316_v15 = vpop.f32.mrf.mxu1 }
 0x847   :  { %v8172_v8 = vadd.f32 %v49316_v15, %v8089_v2  ;;  %v49323_v6 = vpop.f32.mrf.mxu0 }
 0x848   :  { %v8163_v36 = vpop.f32.mrf.mxu1 }
 0x849   :  { %v8255_v34 = vadd.f32 %v49323_v6, %v8172_v8  ;;  %v8164_v7 = vadd.f32 %v8163_v36, %v8082_v19  ;;  %v8248_v29 = vpop.f32.mrf.mxu0 }
 0x84b   :  { %v8249_v17 = vadd.f32 %v8248_v29, %v8164_v7  ;;  %v49330_v28 = vpop.f32.mrf.mxu1 }
 0x84c   :  { %v8334_v56 = vadd.f32 %v49330_v28, %v8255_v34 }
 0x84d   :  { %v8327_v26 = vpop.f32.mrf.mxu1 }
 0x84e   :  { %v8366_v38 = vand.u32 4294901760, %v8334_v56  ;;  %v8328_v37 = vadd.f32 %v8327_v26, %v8249_v17 }
 0x850   :  { %v8444_v10 = vsub.f32 %v8334_v56, %v8366_v38  ;;  %v8369_v25 = vand.u32 4294901760, %v8328_v37  ;;  %49332 = vmatpush3.msra.mxu0 %v8366_v38 }
 0x851   :  { %49333 = vmatprep.subr.mxu0 %v57103_v40 }
 0x852   :  { %v8445_v3 = vand.u32 4294901760, %v8444_v10  ;;  %v8451_v9 = vsub.f32 %v8328_v37, %v8369_v25  ;;  %49334 = vmatpush3.msra.mxu0 %v8369_v25 }
 0x853   :  { %49345 = vmatprep.subr.mxu0 %v57103_v40  ;;  %49336 = vmatmul.mubr.f32.vlgmr.msra.gmra.mxu0 %v52936_v12 }
 0x854   :  { %v8446_v2 = vsub.f32 %v8444_v10, %v8445_v3  ;;  %v8452_v60 = vand.u32 4294901760, %v8451_v9  ;;  %49346 = vmatpush3.msra.mxu0 %v8444_v10  ;;  %49349 = vmatprep.mubr.msk.f32.mxu0 %vm52763_vm1, %v57103_v40 }
 0x855   :  { %49347 = vmatprep.subr.mxu0 %v57103_v40 }
 0x856   :  { %49348 = vmatpush3.msra.mxu0 %v8451_v9  ;;  %v8447_v0 = vand.u32 4294901760, %v8446_v2  ;;  %v8453_v42 = vsub.f32 %v8451_v9, %v8452_v60 }
 0x857   :  { %49359 = vmatprep.subr.mxu0 %v57103_v40  ;;  %49350 = vmatmul.mubr.f32.vlgmr.msra.gmra.mxu0 %v52923_v47 }
 0x858   :  { %49339 = vmatpush3.msra.mxu1 %v8447_v0  ;;  %49360 = vmatpush3.msra.mxu0 %v8445_v3  ;;  %v8454_v37 = vand.u32 4294901760, %v8453_v42 }
 0x859   :  { %49340 = vmatprep.subr.mxu1 %v57103_v40  ;;  %49361 = vmatprep.subr.mxu0 %v57103_v40 }
 0x85a   :  { %49341 = vmatpush3.msra.mxu1 %v8454_v37  ;;  %49362 = vmatpush3.msra.mxu0 %v8452_v60 }
 0x85b   :  { %49343 = vmatmul.mubr.f32.vlgmr.msra.gmra.mxu1 %v52920_v43  ;;  %49352 = vmatprep.subr.mxu1 %v57103_v40 }
 0x85c   :  { %49353 = vmatpush3.msra.mxu1 %v8366_v38  ;;  %49356 = vmatprep.mubr.msk.f32.mxu1 %vm52763_vm1, %v57103_v40 }
 0x85d   :  { %49354 = vmatprep.subr.mxu1 %v57103_v40  ;;  %49363 = vmatprep.mubr.msk.f32.mxu0 %vm52763_vm1, %v57103_v40 }
 0x85e   :  { %49355 = vmatpush3.msra.mxu1 %v8369_v25  ;;  %49364 = vmatmul.mubr.f32.vlgmr.msra.gmra.mxu0 %v52920_v43 }
 0x85f   :  { %49357 = vmatmul.mubr.f32.vlgmr.msra.gmra.mxu1 %v52926_v54  ;;  %49366 = vmatprep.subr.mxu1 %v57103_v40 }
 0x860   :  { %49373 = vmatprep.subr.mxu0 %v53134_v4  ;;  %49367 = vmatpush3.msra.mxu1 %v8366_v38 }
 0x861   :  { %49374 = vmatpush3.msra.mxu0 %v53134_v4  ;;  %49368 = vmatprep.subr.mxu1 %v57103_v40 }
 0x862   :  { %49375 = vmatprep.subr.mxu0 %v53137_v11  ;;  %49369 = vmatpush3.msra.mxu1 %v8369_v25 }
 0x863   :  { %49370 = vmatprep.mubr.msk.f32.mxu1 %vm52763_vm1, %v57103_v40  ;;  %49376 = vmatpush3.msra.mxu0 %v53137_v11 }
 0x864   :  { %49377 = vmatprep.mubr.f32.mxu0 %v53438_v21  ;;  %49371 = vmatmul.mubr.f32.vlgmr.msra.gmra.mxu1 %v52920_v43 }
 0x865   :  { %49378 = vmatmul.mubr.f32.vlgmr.msra.gmra.mxu0 %v53442_v24  ;;  %49380 = vmatprep.subr.mxu1 %v53177_v53 }
 0x866   :  { %49387 = vmatprep.subr.mxu0 %v53145_v23  ;;  %49381 = vmatpush3.msra.mxu1 %v53177_v53 }
 0x867   :  { %49388 = vmatpush3.msra.mxu0 %v53145_v23  ;;  %49382 = vmatprep.subr.mxu1 %v53183_v55 }
 0x868   :  { %49389 = vmatprep.subr.mxu0 %v53150_v44  ;;  %49383 = vmatpush3.msra.mxu1 %v53183_v55 }
 0x869   :  { %49384 = vmatprep.mubr.f32.mxu1 %v53397_v48  ;;  %49390 = vmatpush3.msra.mxu0 %v53150_v44 }
 0x86a   :  { %49391 = vmatprep.mubr.f32.mxu0 %v53407_v20  ;;  %49385 = vmatmul.mubr.f32.vlgmr.msra.gmra.mxu1 %v53400_v58 }
 0x86b   :  { %49392 = vmatmul.mubr.f32.vlgmr.msra.gmra.mxu0 %v53411_v30  ;;  %49394 = vmatprep.subr.mxu1 %v53134_v4 }
 0x86c   :  { %49401 = vmatprep.subr.mxu0 %v53155_v49  ;;  %49395 = vmatpush3.msra.mxu1 %v53134_v4 }
 0x86d   :  { %49402 = vmatpush3.msra.mxu0 %v53155_v49  ;;  %49396 = vmatprep.subr.mxu1 %v53137_v11 }
 0x86e   :  { %49403 = vmatprep.subr.mxu0 %v53160_v50  ;;  %49397 = vmatpush3.msra.mxu1 %v53137_v11 }
 0x86f   :  { %49398 = vmatprep.mubr.f32.mxu1 %v53416_v13  ;;  %49404 = vmatpush3.msra.mxu0 %v53160_v50 }
 0x870   :  { %49405 = vmatprep.mubr.f32.mxu0 %v53397_v48  ;;  %49399 = vmatmul.mubr.f32.vlgmr.msra.gmra.mxu1 %v53421_v1 }
 0x871   :  { %49406 = vmatmul.mubr.f32.vlgmr.msra.gmra.mxu0 %v53400_v58  ;;  %49408 = vmatprep.subr.mxu1 %v53134_v4 }
 0x872   :  { %49409 = vmatpush3.msra.mxu1 %v53134_v4  ;;  %49412 = vmatprep.mubr.f32.mxu1 %v53397_v48 }
 0x873   :  { %49410 = vmatprep.subr.mxu1 %v53137_v11  ;;  %49415 = vmatprep.subr.mxu0 %v57103_v40 }
 0x874   :  { %49411 = vmatpush3.msra.mxu1 %v53137_v11  ;;  %49419 = vmatprep.mubr.msk.f32.mxu0 %vm52763_vm1, %v57103_v40 }
 0x875   :  { %49413 = vmatmul.mubr.f32.vlgmr.msra.gmra.mxu1 %v53400_v58  ;;  %49422 = vmatprep.subr.mxu1 %v57103_v40 }
 0x876   :  { %49426 = vmatprep.mubr.msk.f32.mxu1 %vm52763_vm1, %v57103_v40 }
 0x913   :  { %v8410_v20 = vpop.f32.mrf.mxu0 }
 0x915   :  { %v49337_v30 = vpop.f32.mrf.mxu0 }
 0x917   :  { %v8567_v13 = vpop.f32.mrf.mxu0 }
 0x919   :  { %v49351_v48 = vpop.f32.mrf.mxu0 }
 0x91b   :  { %v8491_v1 = vpop.f32.mrf.mxu1 }
 0x91c   :  { %v8492_v21 = vadd.f32 %v8491_v1, %v8410_v20 }
 0x91d   :  { %v49344_v24 = vpop.f32.mrf.mxu1 }
 0x91e   :  { %v8568_v38 = vadd.f32 %v8567_v13, %v8492_v21  ;;  %v8719_v59 = vpop.f32.mrf.mxu0 }
 0x91f   :  { %v8642_v19 = vpop.f32.mrf.mxu1 }
 0x920   :  { %v8643_v15 = vadd.f32 %v8642_v19, %v8568_v38  ;;  %v49365_v8 = vpop.f32.mrf.mxu0 }
 0x921   :  { %v49358_v6 = vpop.f32.mrf.mxu1 }
 0x922   :  { %v8720_v36 = vadd.f32 %v8719_v59, %v8643_v15 }
 0x924   :  { %v8792_v58 = vpop.f32.mrf.mxu1 }
 0x925   :  { %v8793_v34 = vadd.f32 %v8792_v58, %v8720_v36  ;;  %v49379_v7 = vpop.f32.mrf.mxu0 }
 0x926   :  { %v49372_v29 = vpop.f32.mrf.mxu1 }
 0x927   :  { %v53757_v17 = vmul.f32 %v8793_v34, %v53688_v16  ;;  %v8873_v28 = vpop.f32.mrf.mxu0 }
 0x929   :  { %52664 = vrsqrt.f32 %v53757_v17 }
 0x92a   :  { %v49386_v56 = vpop.f32.mrf.mxu1 }
 0x92b   :  { %v8971_v26 = vadd.f32 %v49386_v56, %v49379_v7  ;;  %v49393_v10 = vpop.f32.mrf.mxu0 }
 0x92c   :  { %v8964_v25 = vpop.f32.mrf.mxu1 }
 0x92d   :  { %v9054_v3 = vadd.f32 %v49393_v10, %v8971_v26  ;;  %v8965_v9 = vadd.f32 %v8964_v25, %v8873_v28  ;;  %v9046_v2 = vpop.f32.mrf.mxu0 }
 0x92f   :  { %v9047_v60 = vadd.f32 %v9046_v2, %v8965_v9 }
 0x930   :  { %v49400_v0 = vpop.f32.mrf.mxu1 }
 0x931   :  { %v9137_v42 = vadd.f32 %v49400_v0, %v9054_v3  ;;  %v49407_v37 = vpop.f32.mrf.mxu0 }
 0x932   :  { %v9128_v20 = vpop.f32.mrf.mxu1 }
 0x933   :  { %v9220_v30 = vadd.f32 %v49407_v37, %v9137_v42  ;;  %v9129_v13 = vadd.f32 %v9128_v20, %v9047_v60  ;;  %v9213_v48 = vpop.f32.mrf.mxu0 }
 0x935   :  { %v9214_v1 = vadd.f32 %v9213_v48, %v9129_v13  ;;  %v49414_v21 = vpop.f32.mrf.mxu1 }
 0x936   :  { %v9299_v16 = vadd.f32 %v49414_v21, %v9220_v30 }
 0x937   :  { %v9292_v24 = vpop.f32.mrf.mxu1 }
 0x938   :  { %v9331_v38 = vand.u32 4294901760, %v9299_v16  ;;  %v9293_v59 = vadd.f32 %v9292_v24, %v9214_v1 }
 0x93a   :  { %v9409_v19 = vsub.f32 %v9299_v16, %v9331_v38  ;;  %v9334_v15 = vand.u32 4294901760, %v9293_v59  ;;  %49416 = vmatpush3.msra.mxu0 %v9331_v38 }
 0x93b   :  { %49417 = vmatprep.subr.mxu0 %v57103_v40 }
 0x93c   :  { %v9410_v8 = vand.u32 4294901760, %v9409_v19  ;;  %v9416_v6 = vsub.f32 %v9293_v59, %v9334_v15  ;;  %49418 = vmatpush3.msra.mxu0 %v9334_v15 }
 0x93d   :  { %49429 = vmatprep.subr.mxu0 %v57103_v40  ;;  %49420 = vmatmul.mubr.f32.vlgmr.msra.gmra.mxu0 %v53241_v51 }
 0x93e   :  { %v9411_v36 = vsub.f32 %v9409_v19, %v9410_v8  ;;  %v9417_v58 = vand.u32 4294901760, %v9416_v6  ;;  %49430 = vmatpush3.msra.mxu0 %v9409_v19  ;;  %49433 = vmatprep.mubr.msk.f32.mxu0 %vm52763_vm1, %v57103_v40 }
 0x93f   :  { %49431 = vmatprep.subr.mxu0 %v57103_v40 }
 0x940   :  { %49432 = vmatpush3.msra.mxu0 %v9416_v6  ;;  %v9412_v34 = vand.u32 4294901760, %v9411_v36  ;;  %v9418_v7 = vsub.f32 %v9416_v6, %v9417_v58 }
 0x941   :  { %49443 = vmatprep.subr.mxu0 %v57103_v40  ;;  %49434 = vmatmul.mubr.f32.vlgmr.msra.gmra.mxu0 %v53234_v35 }
 0x942   :  { %49423 = vmatpush3.msra.mxu1 %v9412_v34  ;;  %49444 = vmatpush3.msra.mxu0 %v9410_v8  ;;  %v9419_v29 = vand.u32 4294901760, %v9418_v7 }
 0x943   :  { %49424 = vmatprep.subr.mxu1 %v57103_v40  ;;  %49445 = vmatprep.subr.mxu0 %v57103_v40 }
 0x944   :  { %49425 = vmatpush3.msra.mxu1 %v9419_v29  ;;  %49446 = vmatpush3.msra.mxu0 %v9417_v58 }
 0x945   :  { %49427 = vmatmul.mubr.f32.vlgmr.msra.gmra.mxu1 %v53231_v45  ;;  %49436 = vmatprep.subr.mxu1 %v57103_v40 }
 0x946   :  { %49437 = vmatpush3.msra.mxu1 %v9331_v38  ;;  %49440 = vmatprep.mubr.msk.f32.mxu1 %vm52763_vm1, %v57103_v40 }
 0x947   :  { %49438 = vmatprep.subr.mxu1 %v57103_v40  ;;  %49447 = vmatprep.mubr.msk.f32.mxu0 %vm52763_vm1, %v57103_v40 }
 0x948   :  { %49439 = vmatpush3.msra.mxu1 %v9334_v15  ;;  %49448 = vmatmul.mubr.f32.vlgmr.msra.gmra.mxu0 %v53231_v45 }
 0x949   :  { %49441 = vmatmul.mubr.f32.vlgmr.msra.gmra.mxu1 %v53237_v61  ;;  %49450 = vmatprep.subr.mxu1 %v57103_v40 }
 0x94a   :  { %49457 = vmatprep.subr.mxu0 %v53134_v4  ;;  %49451 = vmatpush3.msra.mxu1 %v9331_v38 }
 0x94b   :  { %49458 = vmatpush3.msra.mxu0 %v53134_v4  ;;  %49452 = vmatprep.subr.mxu1 %v57103_v40 }
 0x94c   :  { %49459 = vmatprep.subr.mxu0 %v53137_v11  ;;  %49453 = vmatpush3.msra.mxu1 %v9334_v15 }
 0x94d   :  { %49454 = vmatprep.mubr.msk.f32.mxu1 %vm52763_vm1, %v57103_v40  ;;  %49460 = vmatpush3.msra.mxu0 %v53137_v11 }
 0x94e   :  { %49461 = vmatprep.mubr.f32.mxu0 %v53537_v33  ;;  %49455 = vmatmul.mubr.f32.vlgmr.msra.gmra.mxu1 %v53231_v45 }
 0x94f   :  { %49462 = vmatmul.mubr.f32.vlgmr.msra.gmra.mxu0 %v53541_v41  ;;  %49464 = vmatprep.subr.mxu1 %v53177_v53 }
 0x950   :  { %49471 = vmatprep.subr.mxu0 %v53145_v23  ;;  %49465 = vmatpush3.msra.mxu1 %v53177_v53 }
 0x951   :  { %49472 = vmatpush3.msra.mxu0 %v53145_v23  ;;  %49466 = vmatprep.subr.mxu1 %v53183_v55 }
 0x952   :  { %49473 = vmatprep.subr.mxu0 %v53150_v44  ;;  %49467 = vmatpush3.msra.mxu1 %v53183_v55 }
 0x953   :  { %49468 = vmatprep.mubr.f32.mxu1 %v53496_v63  ;;  %49474 = vmatpush3.msra.mxu0 %v53150_v44 }
 0x954   :  { %49475 = vmatprep.mubr.f32.mxu0 %v53506_v31  ;;  %49469 = vmatmul.mubr.f32.vlgmr.msra.gmra.mxu1 %v53499_v22  ;;  %v52665_v31 = vpop.eup %52664 }
 0x955   :  { %49476 = vmatmul.mubr.f32.vlgmr.msra.gmra.mxu0 %v53510_v32  ;;  %49478 = vmatprep.subr.mxu1 %v53134_v4  ;;  %v57106_v32 = vld [vmem:[#allocation19_spill] sm:$0xff] }
 0x956   :  { %49485 = vmatprep.subr.mxu0 %v53155_v49  ;;  %49479 = vmatpush3.msra.mxu1 %v53134_v4 }
 0x957   :  { %49486 = vmatpush3.msra.mxu0 %v53155_v49  ;;  %49480 = vmatprep.subr.mxu1 %v53137_v11 }
 0x958   :  { %49487 = vmatprep.subr.mxu0 %v53160_v50  ;;  %49481 = vmatpush3.msra.mxu1 %v53137_v11 }
 0x959   :  { %49482 = vmatprep.mubr.f32.mxu1 %v53515_v14  ;;  %49488 = vmatpush3.msra.mxu0 %v53160_v50 }
 0x95a   :  { %49489 = vmatprep.mubr.f32.mxu0 %v53496_v63  ;;  %49483 = vmatmul.mubr.f32.vlgmr.msra.gmra.mxu1 %v53520_v57 }
 0x95b   :  { %49490 = vmatmul.mubr.f32.vlgmr.msra.gmra.mxu0 %v53499_v22  ;;  %49492 = vmatprep.subr.mxu1 %v53134_v4 }
 0x95c   :  { %49493 = vmatpush3.msra.mxu1 %v53134_v4  ;;  %49496 = vmatprep.mubr.f32.mxu1 %v53496_v63  ;;  %v8798_v63 = vmul.f32 %v52665_v31, %v53590_v62 }
 0x95d   :  { %49494 = vmatprep.subr.mxu1 %v53137_v11  ;;  %49499 = vmatprep.subr.mxu0 %v57103_v40 }
 0x95e   :  { %49495 = vmatpush3.msra.mxu1 %v53137_v11  ;;  %49503 = vmatprep.mubr.msk.f32.mxu0 %vm52763_vm1, %v57103_v40  ;;  %v53828_v14 = vadd.f32 %v8798_v63, %v57106_v32 }
 0x95f   :  { %49497 = vmatmul.mubr.f32.vlgmr.msra.gmra.mxu1 %v53499_v22  ;;  %49506 = vmatprep.subr.mxu1 %v57103_v40 }
 0x960   :  { %49510 = vmatprep.mubr.msk.f32.mxu1 %vm52763_vm1, %v57103_v40  ;;  %57107 = vst [vmem:[#allocation19_spill] sm:$0xff] %v53828_v14 }
 0x9fd   :  { %v9375_v57 = vpop.f32.mrf.mxu0 }
 0x9ff   :  { %v49421_v33 = vpop.f32.mrf.mxu0 }
 0xa01   :  { %v9532_v41 = vpop.f32.mrf.mxu0 }
 0xa03   :  { %v49435_v28 = vpop.f32.mrf.mxu0 }
 0xa05   :  { %v9456_v56 = vpop.f32.mrf.mxu1 }
 0xa06   :  { %v9457_v26 = vadd.f32 %v9456_v56, %v9375_v57 }
 0xa07   :  { %v49428_v22 = vpop.f32.mrf.mxu1 }
 0xa08   :  { %v9533_v10 = vadd.f32 %v9532_v41, %v9457_v26  ;;  %v9684_v25 = vpop.f32.mrf.mxu0 }
 0xa09   :  { %v9607_v3 = vpop.f32.mrf.mxu1 }
 0xa0a   :  { %v9608_v9 = vadd.f32 %v9607_v3, %v9533_v10  ;;  %v49449_v2 = vpop.f32.mrf.mxu0 }
 0xa0b   :  { %v49442_v60 = vpop.f32.mrf.mxu1 }
 0xa0c   :  { %v9685_v17 = vadd.f32 %v9684_v25, %v9608_v9 }
 0xa0e   :  { %v9757_v0 = vpop.f32.mrf.mxu1 }
 0xa0f   :  { %v53830_v42 = vadd.f32 %v9757_v0, %v9685_v17  ;;  %v49463_v62 = vpop.f32.mrf.mxu0 }
 0xa10   :  { %v49456_v37 = vpop.f32.mrf.mxu1 }
 0xa11   :  { %v9834_v20 = vpop.f32.mrf.mxu0 }
 0xa14   :  { %v49470_v30 = vpop.f32.mrf.mxu1 }
 0xa15   :  { %v9932_v13 = vadd.f32 %v49470_v30, %v49463_v62  ;;  %v49477_v48 = vpop.f32.mrf.mxu0 }
 0xa16   :  { %v9925_v1 = vpop.f32.mrf.mxu1 }
 0xa17   :  { %v10015_v21 = vadd.f32 %v49477_v48, %v9932_v13  ;;  %v9926_v16 = vadd.f32 %v9925_v1, %v9834_v20  ;;  %v10007_v24 = vpop.f32.mrf.mxu0 }
 0xa19   :  { %v10008_v38 = vadd.f32 %v10007_v24, %v9926_v16  ;;  %v11688_v24 = vld [vmem:[#allocation2 + $0x20] sm:$0xff] }
 0xa1a   :  { %v49484_v59 = vpop.f32.mrf.mxu1 }
 0xa1b   :  { %v10098_v19 = vadd.f32 %v49484_v59, %v10015_v21  ;;  %v49491_v15 = vpop.f32.mrf.mxu0  ;;  %v11689_v59 = vld [vmem:[#allocation2 + $0x28] sm:$0xff] }
 0xa1c   :  { %v10089_v8 = vpop.f32.mrf.mxu1 }
 0xa1d   :  { %v10181_v6 = vadd.f32 %v49491_v15, %v10098_v19  ;;  %v10090_v36 = vadd.f32 %v10089_v8, %v10008_v38  ;;  %v10174_v58 = vpop.f32.mrf.mxu0  ;;  %v11695_v38 = vld [vmem:[#allocation5 + $0x20] sm:$0xff]  ;;  %v11696_v19 = vld [vmem:[#allocation5 + $0x28] sm:$0xff] }
 0xa1f   :  { %v10175_v34 = vadd.f32 %v10174_v58, %v10090_v36  ;;  %v49498_v7 = vpop.f32.mrf.mxu1  ;;  %v11690_v36 = vmax.f32 %v11688_v24, 1e-06  ;;  %v11697_v58 = vmax.f32 %v11695_v38, 1e-06 }
 0xa20   :  { %v10260_v29 = vadd.f32 %v49498_v7, %v10181_v6  ;;  %v11691_v7 = vmax.f32 %v11689_v59, 1e-06 }
 0xa21   :  { %v10253_v31 = vpop.f32.mrf.mxu1 }
 0xa22   :  { %v10292_v63 = vand.u32 4294901760, %v10260_v29  ;;  %v10254_v32 = vadd.f32 %v10253_v31, %v10175_v34 }
 0xa24   :  { %v10370_v57 = vsub.f32 %v10260_v29, %v10292_v63  ;;  %v10295_v33 = vand.u32 4294901760, %v10254_v32  ;;  %49500 = vmatpush3.msra.mxu0 %v10292_v63  ;;  %v11698_v29 = vmax.f32 %v11696_v19, 1e-06 }
 0xa25   :  { %49501 = vmatprep.subr.mxu0 %v57103_v40 }
 0xa26   :  { %v10371_v41 = vand.u32 4294901760, %v10370_v57  ;;  %v10377_v28 = vsub.f32 %v10254_v32, %v10295_v33  ;;  %49502 = vmatpush3.msra.mxu0 %v10295_v33 }
 0xa27   :  { %49513 = vmatprep.subr.mxu0 %v57103_v40  ;;  %49504 = vmatmul.mubr.f32.vlgmr.msra.gmra.mxu0 %v53241_v51 }
 0xa28   :  { %v10372_v56 = vsub.f32 %v10370_v57, %v10371_v41  ;;  %v10378_v26 = vand.u32 4294901760, %v10377_v28  ;;  %49514 = vmatpush3.msra.mxu0 %v10370_v57  ;;  %49517 = vmatprep.mubr.msk.f32.mxu0 %vm52763_vm1, %v57103_v40 }
 0xa29   :  { %49515 = vmatprep.subr.mxu0 %v57103_v40 }
 0xa2a   :  { %49516 = vmatpush3.msra.mxu0 %v10377_v28  ;;  %v10373_v22 = vand.u32 4294901760, %v10372_v56  ;;  %v10379_v10 = vsub.f32 %v10377_v28, %v10378_v26  ;;  %v53904_v56 = vmin.f32 %v11691_v7, 0.999999  ;;  %v57110_v7 = vld [vmem:[#allocation11_spill] sm:$0xff] }
 0xa2b   :  { %49527 = vmatprep.subr.mxu0 %v57103_v40  ;;  %49518 = vmatmul.mubr.f32.vlgmr.msra.gmra.mxu0 %v53234_v35 }
 0xa2c   :  { %49507 = vmatpush3.msra.mxu1 %v10373_v22  ;;  %49528 = vmatpush3.msra.mxu0 %v10371_v41  ;;  %v10380_v25 = vand.u32 4294901760, %v10379_v10  ;;  %v53902_v41 = vmin.f32 %v11697_v58, 0.999999 }
 0xa2d   :  { %49508 = vmatprep.subr.mxu1 %v57103_v40  ;;  %49529 = vmatprep.subr.mxu0 %v57103_v40 }
 0xa2e   :  { %49509 = vmatpush3.msra.mxu1 %v10380_v25  ;;  %49530 = vmatpush3.msra.mxu0 %v10378_v26  ;;  %v53906_v26 = vmin.f32 %v11698_v29, 0.999999 }
 0xa2f   :  { %49511 = vmatmul.mubr.f32.vlgmr.msra.gmra.mxu1 %v53231_v45  ;;  %49520 = vmatprep.subr.mxu1 %v57103_v40 }
 0xa30   :  { %49521 = vmatpush3.msra.mxu1 %v10292_v63  ;;  %49524 = vmatprep.mubr.msk.f32.mxu1 %vm52763_vm1, %v57103_v40 }
 0xa31   :  { %49522 = vmatprep.subr.mxu1 %v57103_v40  ;;  %49531 = vmatprep.mubr.msk.f32.mxu0 %vm52763_vm1, %v57103_v40 }
 0xa32   :  { %49523 = vmatpush3.msra.mxu1 %v10295_v33  ;;  %49532 = vmatmul.mubr.f32.vlgmr.msra.gmra.mxu0 %v53231_v45 }
 0xa33   :  { %49525 = vmatmul.mubr.f32.vlgmr.msra.gmra.mxu1 %v53237_v61  ;;  %49534 = vmatprep.subr.mxu1 %v57103_v40 }
 0xa34   :  { %49541 = vmatprep.subr.mxu0 %v53134_v4  ;;  %49535 = vmatpush3.msra.mxu1 %v10292_v63 }
 0xa35   :  { %49542 = vmatpush3.msra.mxu0 %v53134_v4  ;;  %49536 = vmatprep.subr.mxu1 %v57103_v40 }
 0xa36   :  { %49543 = vmatprep.subr.mxu0 %v53137_v11  ;;  %49537 = vmatpush3.msra.mxu1 %v10295_v33  ;;  %v53900_v33 = vmin.f32 %v11690_v36, 0.999999 }
 0xa37   :  { %49538 = vmatprep.mubr.msk.f32.mxu1 %vm52763_vm1, %v57103_v40  ;;  %49544 = vmatpush3.msra.mxu0 %v53137_v11 }
 0xa38   :  { %49545 = vmatprep.mubr.f32.mxu0 %v53639_v46  ;;  %49539 = vmatmul.mubr.f32.vlgmr.msra.gmra.mxu1 %v53231_v45  ;;  %v57108_v46 = vld [vmem:[#allocation21_spill] sm:$0xff] }
 0xa39   :  { %49546 = vmatmul.mubr.f32.vlgmr.msra.gmra.mxu0 %v53643_v39  ;;  %49548 = vmatprep.subr.mxu1 %v53177_v53 }
 0xa3a   :  { %49555 = vmatprep.subr.mxu0 %v53145_v23  ;;  %49549 = vmatpush3.msra.mxu1 %v53177_v53 }
 0xa3b   :  { %49556 = vmatpush3.msra.mxu0 %v53145_v23  ;;  %49550 = vmatprep.subr.mxu1 %v53183_v55 }
 0xa3c   :  { %49557 = vmatprep.subr.mxu0 %v53150_v44  ;;  %49551 = vmatpush3.msra.mxu1 %v53183_v55 }
 0xa3d   :  { %49552 = vmatprep.mubr.f32.mxu1 %v53598_v5  ;;  %49558 = vmatpush3.msra.mxu0 %v53150_v44 }
 0xa3e   :  { %49559 = vmatprep.mubr.f32.mxu0 %v53608_v52  ;;  %49553 = vmatmul.mubr.f32.vlgmr.msra.gmra.mxu1 %v53601_v18  ;;  %v57109_v52 = vld [vmem:[#allocation22_spill] sm:$0xff] }
 0xa3f   :  { %49560 = vmatmul.mubr.f32.vlgmr.msra.gmra.mxu0 %v53612_v27  ;;  %49562 = vmatprep.subr.mxu1 %v53134_v4 }
 0xa40   :  { %49569 = vmatprep.subr.mxu0 %v53155_v49  ;;  %49563 = vmatpush3.msra.mxu1 %v53134_v4 }
 0xa41   :  { %49570 = vmatpush3.msra.mxu0 %v53155_v49  ;;  %49564 = vmatprep.subr.mxu1 %v53137_v11 }
 0xa42   :  { %49571 = vmatprep.subr.mxu0 %v53160_v50  ;;  %49565 = vmatpush3.msra.mxu1 %v53137_v11 }
 0xa43   :  { %49566 = vmatprep.mubr.f32.mxu1 %v57108_v46  ;;  %49572 = vmatpush3.msra.mxu0 %v53160_v50 }
 0xa44   :  { %49573 = vmatprep.mubr.f32.mxu0 %v53598_v5  ;;  %49567 = vmatmul.mubr.f32.vlgmr.msra.gmra.mxu1 %v57109_v52 }
 0xa45   :  { %49574 = vmatmul.mubr.f32.vlgmr.msra.gmra.mxu0 %v53601_v18  ;;  %49576 = vmatprep.subr.mxu1 %v53134_v4 }
 0xa46   :  { %49577 = vmatpush3.msra.mxu1 %v53134_v4  ;;  %49580 = vmatprep.mubr.f32.mxu1 %v53598_v5 }
 0xa47   :  { %49578 = vmatprep.subr.mxu1 %v53137_v11  ;;  %49583 = vmatprep.subr.mxu0 %v57103_v40 }
 0xa48   :  { %49579 = vmatpush3.msra.mxu1 %v53137_v11  ;;  %49587 = vmatprep.mubr.msk.f32.mxu0 %vm52763_vm1, %v57103_v40 }
 0xa49   :  { %49581 = vmatmul.mubr.f32.vlgmr.msra.gmra.mxu1 %v53601_v18  ;;  %49590 = vmatprep.subr.mxu1 %v57103_v40 }
 0xa4a   :  { %49594 = vmatprep.mubr.msk.f32.mxu1 %vm52763_vm1, %v57103_v40 }
 0xae7   :  { %v10336_v27 = vpop.f32.mrf.mxu0 }
 0xae9   :  { %v49505_v39 = vpop.f32.mrf.mxu0 }
 0xaeb   :  { %v10493_v3 = vpop.f32.mrf.mxu0 }
 0xaed   :  { %v49519_v5 = vpop.f32.mrf.mxu0 }
 0xaef   :  { %v10417_v9 = vpop.f32.mrf.mxu1 }
 0xaf0   :  { %v10418_v2 = vadd.f32 %v10417_v9, %v10336_v27  ;;  %v11701_v27 = vmul.f32 %v53902_v41, %v53900_v33 }
 0xaf1   :  { %v49512_v60 = vpop.f32.mrf.mxu1 }
 0xaf2   :  { %v10494_v17 = vadd.f32 %v10493_v3, %v10418_v2  ;;  %v10645_v0 = vpop.f32.mrf.mxu0  ;;  %v11702_v3 = vmul.f32 %v53906_v26, %v53904_v56 }
 0xaf3   :  { %v10568_v62 = vpop.f32.mrf.mxu1 }
 0xaf4   :  { %v10569_v37 = vadd.f32 %v10568_v62, %v10494_v17  ;;  %v49533_v20 = vpop.f32.mrf.mxu0  ;;  %v11708_v17 = vsel %vm76_vm0, %v11701_v27, 0 }
 0xaf5   :  { %v49526_v30 = vpop.f32.mrf.mxu1 }
 0xaf6   :  { %v10646_v13 = vadd.f32 %v10645_v0, %v10569_v37  ;;  %v11711_v37 = vsel %vm76_vm0, %v11702_v3, 0 }
 0xaf8   :  { %v10718_v18 = vpop.f32.mrf.mxu1 }
 0xaf9   :  { %v53898_v48 = vadd.f32 %v10718_v18, %v10646_v13  ;;  %v49547_v1 = vpop.f32.mrf.mxu0  ;;  %v53914_v13 = vand.u32 4294901760, %v11708_v17  ;;  %v53917_v18 = vand.u32 4294901760, %v11711_v37 }
 0xafa   :  { %v49540_v21 = vpop.f32.mrf.mxu1 }
 0xafb   :  { %v10795_v16 = vpop.f32.mrf.mxu0  ;;  %v53924_v38 = vsub.f32 %v11708_v17, %v53914_v13  ;;  %v53928_v59 = vsub.f32 %v11711_v37, %v53917_v18 }
 0xafd   :  { %v53938_v36 = vand.u32 4294901760, %v53928_v59 }
 0xafe   :  { %v49554_v15 = vpop.f32.mrf.mxu1 }
 0xaff   :  { %v10893_v8 = vadd.f32 %v49554_v15, %v49547_v1  ;;  %v49561_v6 = vpop.f32.mrf.mxu0 }
 0xb00   :  { %v10886_v34 = vpop.f32.mrf.mxu1 }
 0xb01   :  { %v10976_v31 = vadd.f32 %v49561_v6, %v10893_v8  ;;  %v10887_v63 = vadd.f32 %v10886_v34, %v10795_v16  ;;  %v10968_v32 = vpop.f32.mrf.mxu0  ;;  %v53933_v6 = vand.u32 4294901760, %v53924_v38  ;;  %v11793_v34 = vsub.f32 %v53928_v59, %v53938_v36 }
 0xb03   :  { %v10969_v57 = vadd.f32 %v10968_v32, %v10887_v63  ;;  %v11783_v58 = vsub.f32 %v53924_v38, %v53933_v6  ;;  %v57111_v63 = vld [vmem:[#allocation12_spill] sm:$0xff]  ;;  %v57112_v32 = vld [vmem:[#allocation17_spill] sm:$0xff] }
 0xb04   :  { %v49568_v28 = vpop.f32.mrf.mxu1 }
 0xb05   :  { %v11059_v22 = vadd.f32 %v49568_v28, %v10976_v31  ;;  %v49575_v10 = vpop.f32.mrf.mxu0  ;;  %v53955_v29 = vand.u32 4294901760, %v11783_v58  ;;  %v53959_v31 = vand.u32 4294901760, %v11793_v34  ;;  %v57114_v28 = vld [vmem:[#allocation18_spill] sm:$0xff] }
 0xb06   :  { %v11050_v25 = vpop.f32.mrf.mxu1 }
 0xb07   :  { %v11142_v46 = vadd.f32 %v49575_v10, %v11059_v22  ;;  %v11051_v52 = vadd.f32 %v11050_v25, %v10969_v57  ;;  %v11135_v39 = vpop.f32.mrf.mxu0  ;;  %v57113_v57 = vld [vmem:[#allocation13_spill] sm:$0xff]  ;;  %v57115_v22 = vld [vmem:[#allocation14_spill] sm:$0xff]  ;;  %v57116_v10 = vld [vmem:[#allocation15_spill] sm:$0xff] }
 0xb08   :  { %v57117_v25 = vld [vmem:[#allocation16_spill] sm:$0xff] }
 0xb09   :  { %v11136_v5 = vadd.f32 %v11135_v39, %v11051_v52  ;;  %v49582_v9 = vpop.f32.mrf.mxu1 }
 0xb0a   :  { %v11221_v2 = vadd.f32 %v49582_v9, %v11142_v46 }
 0xb0b   :  { %v11214_v60 = vpop.f32.mrf.mxu1 }
 0xb0c   :  { %v11253_v0 = vand.u32 4294901760, %v11221_v2  ;;  %v11215_v62 = vadd.f32 %v11214_v60, %v11136_v5 }
 0xb0e   :  { %v11331_v20 = vsub.f32 %v11221_v2, %v11253_v0  ;;  %v11256_v30 = vand.u32 4294901760, %v11215_v62  ;;  %49584 = vmatpush3.msra.mxu0 %v11253_v0 }
 0xb0f   :  { %49585 = vmatprep.subr.mxu0 %v57103_v40 }
 0xb10   :  { %v11332_v1 = vand.u32 4294901760, %v11331_v20  ;;  %v11338_v21 = vsub.f32 %v11215_v62, %v11256_v30  ;;  %49586 = vmatpush3.msra.mxu0 %v11256_v30 }
 0xb11   :  { %49597 = vmatprep.subr.mxu0 %v57103_v40  ;;  %49588 = vmatmul.mubr.f32.vlgmr.msra.gmra.mxu0 %v53241_v51 }
 0xb12   :  { %v11333_v16 = vsub.f32 %v11331_v20, %v11332_v1  ;;  %v11339_v24 = vand.u32 4294901760, %v11338_v21  ;;  %49598 = vmatpush3.msra.mxu0 %v11331_v20  ;;  %49601 = vmatprep.mubr.msk.f32.mxu0 %vm52763_vm1, %v57103_v40 }
 0xb13   :  { %49599 = vmatprep.subr.mxu0 %v57103_v40 }
 0xb14   :  { %49600 = vmatpush3.msra.mxu0 %v11338_v21  ;;  %v11334_v19 = vand.u32 4294901760, %v11333_v16  ;;  %v11340_v15 = vsub.f32 %v11338_v21, %v11339_v24 }
 0xb15   :  { %49611 = vmatprep.subr.mxu0 %v57103_v40  ;;  %49602 = vmatmul.mubr.f32.vlgmr.msra.gmra.mxu0 %v53234_v35 }
 0xb16   :  { %49591 = vmatpush3.msra.mxu1 %v11334_v19  ;;  %49612 = vmatpush3.msra.mxu0 %v11332_v1  ;;  %v11341_v8 = vand.u32 4294901760, %v11340_v15 }
 0xb17   :  { %49592 = vmatprep.subr.mxu1 %v57103_v40  ;;  %49613 = vmatprep.subr.mxu0 %v57103_v40 }
 0xb18   :  { %49593 = vmatpush3.msra.mxu1 %v11341_v8  ;;  %49614 = vmatpush3.msra.mxu0 %v11339_v24 }
 0xb19   :  { %49595 = vmatmul.mubr.f32.vlgmr.msra.gmra.mxu1 %v53231_v45  ;;  %49604 = vmatprep.subr.mxu1 %v57103_v40 }
 0xb1a   :  { %49605 = vmatpush3.msra.mxu1 %v11253_v0  ;;  %49608 = vmatprep.mubr.msk.f32.mxu1 %vm52763_vm1, %v57103_v40 }
 0xb1b   :  { %49606 = vmatprep.subr.mxu1 %v57103_v40  ;;  %49615 = vmatprep.mubr.msk.f32.mxu0 %vm52763_vm1, %v57103_v40 }
 0xb1c   :  { %49607 = vmatpush3.msra.mxu1 %v11256_v30  ;;  %49616 = vmatmul.mubr.f32.vlgmr.msra.gmra.mxu0 %v53231_v45 }
 0xb1d   :  { %49609 = vmatmul.mubr.f32.vlgmr.msra.gmra.mxu1 %v53237_v61  ;;  %49618 = vmatprep.subr.mxu1 %v57103_v40 }
 0xb1e   :  { %49625 = vmatprep.subr.mxu0 %v57110_v7  ;;  %49619 = vmatpush3.msra.mxu1 %v11253_v0 }
 0xb1f   :  { %49626 = vmatpush3.msra.mxu0 %v57110_v7  ;;  %49620 = vmatprep.subr.mxu1 %v57103_v40 }
 0xb20   :  { %49627 = vmatprep.subr.mxu0 %v57111_v63  ;;  %49621 = vmatpush3.msra.mxu1 %v11256_v30 }
 0xb21   :  { %49622 = vmatprep.mubr.msk.f32.mxu1 %vm52763_vm1, %v57103_v40  ;;  %49628 = vmatpush3.msra.mxu0 %v57111_v63 }
 0xb22   :  { %49629 = vmatprep.mubr.f32.mxu0 %v53955_v29  ;;  %49623 = vmatmul.mubr.f32.vlgmr.msra.gmra.mxu1 %v53231_v45 }
 0xb23   :  { %49630 = vmatmul.mubr.f32.vlgmr.msra.gmra.mxu0 %v53959_v31  ;;  %49632 = vmatprep.subr.mxu1 %v57112_v32 }
 0xb24   :  { %49639 = vmatprep.subr.mxu0 %v57113_v57  ;;  %49633 = vmatpush3.msra.mxu1 %v57112_v32 }
 0xb25   :  { %49640 = vmatpush3.msra.mxu0 %v57113_v57  ;;  %49634 = vmatprep.subr.mxu1 %v57114_v28 }
 0xb26   :  { %49641 = vmatprep.subr.mxu0 %v57115_v22  ;;  %49635 = vmatpush3.msra.mxu1 %v57114_v28 }
 0xb27   :  { %49636 = vmatprep.mubr.f32.mxu1 %v53914_v13  ;;  %49642 = vmatpush3.msra.mxu0 %v57115_v22 }
 0xb28   :  { %49643 = vmatprep.mubr.f32.mxu0 %v53924_v38  ;;  %49637 = vmatmul.mubr.f32.vlgmr.msra.gmra.mxu1 %v53917_v18 }
 0xb29   :  { %49644 = vmatmul.mubr.f32.vlgmr.msra.gmra.mxu0 %v53928_v59  ;;  %49646 = vmatprep.subr.mxu1 %v57110_v7 }
 0xb2a   :  { %49653 = vmatprep.subr.mxu0 %v57116_v10  ;;  %49647 = vmatpush3.msra.mxu1 %v57110_v7 }
 0xb2b   :  { %49654 = vmatpush3.msra.mxu0 %v57116_v10  ;;  %49648 = vmatprep.subr.mxu1 %v57111_v63 }
 0xb2c   :  { %49655 = vmatprep.subr.mxu0 %v57117_v25  ;;  %49649 = vmatpush3.msra.mxu1 %v57111_v63 }
 0xb2d   :  { %49650 = vmatprep.mubr.f32.mxu1 %v53933_v6  ;;  %49656 = vmatpush3.msra.mxu0 %v57117_v25 }
 0xb2e   :  { %49657 = vmatprep.mubr.f32.mxu0 %v53914_v13  ;;  %49651 = vmatmul.mubr.f32.vlgmr.msra.gmra.mxu1 %v53938_v36 }
 0xb2f   :  { %49658 = vmatmul.mubr.f32.vlgmr.msra.gmra.mxu0 %v53917_v18  ;;  %49660 = vmatprep.subr.mxu1 %v57110_v7 }
 0xb30   :  { %49661 = vmatpush3.msra.mxu1 %v57110_v7  ;;  %49664 = vmatprep.mubr.f32.mxu1 %v53914_v13 }
 0xb31   :  { %49662 = vmatprep.subr.mxu1 %v57111_v63  ;;  %49667 = vmatprep.subr.mxu0 %v57103_v40 }
 0xb32   :  { %49663 = vmatpush3.msra.mxu1 %v57111_v63  ;;  %49671 = vmatprep.mubr.msk.f32.mxu0 %vm52763_vm1, %v57103_v40 }
 0xb33   :  { %49665 = vmatmul.mubr.f32.vlgmr.msra.gmra.mxu1 %v53917_v18  ;;  %49674 = vmatprep.subr.mxu1 %v57103_v40 }
 0xb34   :  { %49678 = vmatprep.mubr.msk.f32.mxu1 %vm52763_vm1, %v57103_v40 }
 0xbd1   :  { %v11297_v46 = vpop.f32.mrf.mxu0 }
 0xbd3   :  { %v49589_v52 = vpop.f32.mrf.mxu0 }
 0xbd5   :  { %v11454_v27 = vpop.f32.mrf.mxu0 }
 0xbd7   :  { %v49603_v39 = vpop.f32.mrf.mxu0 }
 0xbd9   :  { %v11378_v3 = vpop.f32.mrf.mxu1 }
 0xbda   :  { %v11379_v5 = vadd.f32 %v11378_v3, %v11297_v46 }
 0xbdb   :  { %v49596_v9 = vpop.f32.mrf.mxu1 }
 0xbdc   :  { %v11455_v2 = vadd.f32 %v11454_v27, %v11379_v5  ;;  %v11606_v60 = vpop.f32.mrf.mxu0 }
 0xbdd   :  { %v11529_v17 = vpop.f32.mrf.mxu1 }
 0xbde   :  { %v11530_v0 = vadd.f32 %v11529_v17, %v11455_v2  ;;  %v49617_v62 = vpop.f32.mrf.mxu0 }
 0xbdf   :  { %v49610_v37 = vpop.f32.mrf.mxu1  ;;  %v11704_v62 = vmul.f32 %v53904_v56, %v53904_v56 }
 0xbe0   :  { %v11607_v20 = vadd.f32 %v11606_v60, %v11530_v0  ;;  %v11703_v0 = vmul.f32 %v53900_v33, %v53900_v33 }
 0xbe2   :  { %v11679_v30 = vpop.f32.mrf.mxu1 }
 0xbe3   :  { %v11680_v1 = vadd.f32 %v11679_v30, %v11607_v20  ;;  %v49631_v21 = vpop.f32.mrf.mxu0 }
 0xbe4   :  { %v49624_v16 = vpop.f32.mrf.mxu1 }
 0xbe5   :  { %v54005_v24 = vmul.f32 %v11680_v1, %v53898_v48  ;;  %v11786_v19 = vpop.f32.mrf.mxu0 }
 0xbe7   :  { %52666 = vrsqrt.f32 %v54005_v24 }
 0xbe8   :  { %v49638_v15 = vpop.f32.mrf.mxu1 }
 0xbe9   :  { %v11884_v8 = vadd.f32 %v49638_v15, %v49631_v21  ;;  %v49645_v58 = vpop.f32.mrf.mxu0  ;;  %v12675_v21 = vsel %vm76_vm0, %v11703_v0, 0  ;;  %v12678_v15 = vsel %vm76_vm0, %v11704_v62, 0 }
 0xbea   :  { %v11877_v34 = vpop.f32.mrf.mxu1  ;;  %v54016_v33 = vand.u32 4294901760, %v12678_v15 }
 0xbeb   :  { %v11967_v46 = vadd.f32 %v49645_v58, %v11884_v8  ;;  %v11878_v52 = vadd.f32 %v11877_v34, %v11786_v19  ;;  %v11959_v27 = vpop.f32.mrf.mxu0  ;;  %v54013_v34 = vand.u32 4294901760, %v12675_v21 }
 0xbed   :  { %v11960_v39 = vadd.f32 %v11959_v27, %v11878_v52 }
 0xbee   :  { %v49652_v3 = vpop.f32.mrf.mxu1 }
 0xbef   :  { %v12050_v5 = vadd.f32 %v49652_v3, %v11967_v46  ;;  %v49659_v9 = vpop.f32.mrf.mxu0  ;;  %v54027_v3 = vsub.f32 %v12678_v15, %v54016_v33 }
 0xbf0   :  { %v12041_v2 = vpop.f32.mrf.mxu1 }
 0xbf1   :  { %v12133_v60 = vadd.f32 %v49659_v9, %v12050_v5  ;;  %v12042_v17 = vadd.f32 %v12041_v2, %v11960_v39  ;;  %v12126_v48 = vpop.f32.mrf.mxu0  ;;  %v54023_v39 = vsub.f32 %v12675_v21, %v54013_v34 }
 0xbf3   :  { %v12127_v37 = vadd.f32 %v12126_v48, %v12042_v17  ;;  %v49666_v20 = vpop.f32.mrf.mxu1  ;;  %v54037_v17 = vand.u32 4294901760, %v54027_v3 }
 0xbf4   :  { %v12212_v30 = vadd.f32 %v49666_v20, %v12133_v60  ;;  %v54032_v60 = vand.u32 4294901760, %v54023_v39  ;;  %v52667_v20 = vpop.eup %52666 }
 0xbf5   :  { %v12205_v1 = vpop.f32.mrf.mxu1  ;;  %57118 = vst [vmem:[#allocation21_spill] sm:$0xff] %v54037_v17  ;;  %v12760_v48 = vsub.f32 %v54027_v3, %v54037_v17 }
 0xbf6   :  { %v12244_v16 = vand.u32 4294901760, %v12212_v30  ;;  %v12206_v19 = vadd.f32 %v12205_v1, %v12127_v37  ;;  %v12750_v0 = vsub.f32 %v54023_v39, %v54032_v60  ;;  %v57119_v1 = vld [vmem:[#allocation20_spill] sm:$0xff] }
 0xbf7   :  { %v54058_v37 = vand.u32 4294901760, %v12760_v48 }
 0xbf8   :  { %v12322_v8 = vsub.f32 %v12212_v30, %v12244_v16  ;;  %v12247_v58 = vand.u32 4294901760, %v12206_v19  ;;  %49668 = vmatpush3.msra.mxu0 %v12244_v16  ;;  %v54054_v62 = vand.u32 4294901760, %v12750_v0  ;;  %v11685_v30 = vmul.f32 %v52667_v20, %v53830_v42 }
 0xbf9   :  { %49669 = vmatprep.subr.mxu0 %v57103_v40 }
 0xbfa   :  { %v12323_v56 = vand.u32 4294901760, %v12322_v8  ;;  %v12329_v46 = vsub.f32 %v12206_v19, %v12247_v58  ;;  %49670 = vmatpush3.msra.mxu0 %v12247_v58  ;;  %v54106_v21 = vadd.f32 %v11685_v30, %v57119_v1 }
 0xbfb   :  { %49681 = vmatprep.subr.mxu0 %v57103_v40  ;;  %49672 = vmatmul.mubr.f32.vlgmr.msra.gmra.mxu0 %v52936_v12 }
 0xbfc   :  { %v12324_v52 = vsub.f32 %v12322_v8, %v12323_v56  ;;  %v12330_v27 = vand.u32 4294901760, %v12329_v46  ;;  %49682 = vmatpush3.msra.mxu0 %v12322_v8  ;;  %49685 = vmatprep.mubr.msk.f32.mxu0 %vm52763_vm1, %v57103_v40  ;;  %57120 = vst [vmem:[#allocation22_spill] sm:$0xff] %v54106_v21 }
 0xbfd   :  { %49683 = vmatprep.subr.mxu0 %v57103_v40 }
 0xbfe   :  { %49684 = vmatpush3.msra.mxu0 %v12329_v46  ;;  %v12325_v5 = vand.u32 4294901760, %v12324_v52  ;;  %v12331_v9 = vsub.f32 %v12329_v46, %v12330_v27 }
 0xbff   :  { %49695 = vmatprep.subr.mxu0 %v57103_v40  ;;  %49686 = vmatmul.mubr.f32.vlgmr.msra.gmra.mxu0 %v52923_v47 }
 0xc00   :  { %49675 = vmatpush3.msra.mxu1 %v12325_v5  ;;  %49696 = vmatpush3.msra.mxu0 %v12323_v56  ;;  %v12332_v2 = vand.u32 4294901760, %v12331_v9 }
 0xc01   :  { %49676 = vmatprep.subr.mxu1 %v57103_v40  ;;  %49697 = vmatprep.subr.mxu0 %v57103_v40 }
 0xc02   :  { %49677 = vmatpush3.msra.mxu1 %v12332_v2  ;;  %49698 = vmatpush3.msra.mxu0 %v12330_v27 }
 0xc03   :  { %49679 = vmatmul.mubr.f32.vlgmr.msra.gmra.mxu1 %v52920_v43  ;;  %49688 = vmatprep.subr.mxu1 %v57103_v40 }
 0xc04   :  { %49689 = vmatpush3.msra.mxu1 %v12244_v16  ;;  %49692 = vmatprep.mubr.msk.f32.mxu1 %vm52763_vm1, %v57103_v40 }
 0xc05   :  { %49690 = vmatprep.subr.mxu1 %v57103_v40  ;;  %49699 = vmatprep.mubr.msk.f32.mxu0 %vm52763_vm1, %v57103_v40 }
 0xc06   :  { %49691 = vmatpush3.msra.mxu1 %v12247_v58  ;;  %49700 = vmatmul.mubr.f32.vlgmr.msra.gmra.mxu0 %v52920_v43 }
 0xc07   :  { %49693 = vmatmul.mubr.f32.vlgmr.msra.gmra.mxu1 %v52926_v54  ;;  %49702 = vmatprep.subr.mxu1 %v57103_v40 }
 0xc08   :  { %49709 = vmatprep.subr.mxu0 %v57110_v7  ;;  %49703 = vmatpush3.msra.mxu1 %v12244_v16 }
 0xc09   :  { %49710 = vmatpush3.msra.mxu0 %v57110_v7  ;;  %49704 = vmatprep.subr.mxu1 %v57103_v40 }
 0xc0a   :  { %49711 = vmatprep.subr.mxu0 %v57111_v63  ;;  %49705 = vmatpush3.msra.mxu1 %v12247_v58 }
 0xc0b   :  { %49706 = vmatprep.mubr.msk.f32.mxu1 %vm52763_vm1, %v57103_v40  ;;  %49712 = vmatpush3.msra.mxu0 %v57111_v63 }
 0xc0c   :  { %49713 = vmatprep.mubr.f32.mxu0 %v54054_v62  ;;  %49707 = vmatmul.mubr.f32.vlgmr.msra.gmra.mxu1 %v52920_v43 }
 0xc0d   :  { %49714 = vmatmul.mubr.f32.vlgmr.msra.gmra.mxu0 %v54058_v37  ;;  %49716 = vmatprep.subr.mxu1 %v57112_v32 }
 0xc0e   :  { %49723 = vmatprep.subr.mxu0 %v57113_v57  ;;  %49717 = vmatpush3.msra.mxu1 %v57112_v32 }
 0xc0f   :  { %49724 = vmatpush3.msra.mxu0 %v57113_v57  ;;  %49718 = vmatprep.subr.mxu1 %v57114_v28 }
 0xc10   :  { %49725 = vmatprep.subr.mxu0 %v57115_v22  ;;  %49719 = vmatpush3.msra.mxu1 %v57114_v28 }
 0xc11   :  { %49720 = vmatprep.mubr.f32.mxu1 %v54013_v34  ;;  %49726 = vmatpush3.msra.mxu0 %v57115_v22 }
 0xc12   :  { %49727 = vmatprep.mubr.f32.mxu0 %v54023_v39  ;;  %49721 = vmatmul.mubr.f32.vlgmr.msra.gmra.mxu1 %v54016_v33 }
 0xc13   :  { %49728 = vmatmul.mubr.f32.vlgmr.msra.gmra.mxu0 %v54027_v3  ;;  %49730 = vmatprep.subr.mxu1 %v57110_v7 }
 0xc14   :  { %49737 = vmatprep.subr.mxu0 %v57116_v10  ;;  %49731 = vmatpush3.msra.mxu1 %v57110_v7 }
 0xc15   :  { %49738 = vmatpush3.msra.mxu0 %v57116_v10  ;;  %49732 = vmatprep.subr.mxu1 %v57111_v63 }
 0xc16   :  { %49739 = vmatprep.subr.mxu0 %v57117_v25  ;;  %49733 = vmatpush3.msra.mxu1 %v57111_v63 }
 0xc17   :  { %49734 = vmatprep.mubr.f32.mxu1 %v54032_v60  ;;  %49740 = vmatpush3.msra.mxu0 %v57117_v25 }
 0xc18   :  { %49741 = vmatprep.mubr.f32.mxu0 %v54013_v34  ;;  %49735 = vmatmul.mubr.f32.vlgmr.msra.gmra.mxu1 %v54037_v17 }
 0xc19   :  { %49742 = vmatmul.mubr.f32.vlgmr.msra.gmra.mxu0 %v54016_v33  ;;  %49744 = vmatprep.subr.mxu1 %v57110_v7 }
 0xc1a   :  { %49745 = vmatpush3.msra.mxu1 %v57110_v7  ;;  %49748 = vmatprep.mubr.f32.mxu1 %v54013_v34 }
 0xc1b   :  { %49746 = vmatprep.subr.mxu1 %v57111_v63  ;;  %49751 = vmatprep.subr.mxu0 %v57103_v40 }
 0xc1c   :  { %49747 = vmatpush3.msra.mxu1 %v57111_v63  ;;  %49755 = vmatprep.mubr.msk.f32.mxu0 %vm52763_vm1, %v57103_v40 }
 0xc1d   :  { %49749 = vmatmul.mubr.f32.vlgmr.msra.gmra.mxu1 %v54016_v33  ;;  %49758 = vmatprep.subr.mxu1 %v57103_v40 }
 0xc1e   :  { %49762 = vmatprep.mubr.msk.f32.mxu1 %vm52763_vm1, %v57103_v40 }
 0xcbb   :  { %v12288_v16 = vpop.f32.mrf.mxu0 }
 0xcbd   :  { %v49673_v19 = vpop.f32.mrf.mxu0 }
 0xcbf   :  { %v12445_v15 = vpop.f32.mrf.mxu0 }
 0xcc1   :  { %v49687_v8 = vpop.f32.mrf.mxu0 }
 0xcc3   :  { %v12369_v58 = vpop.f32.mrf.mxu1 }
 0xcc4   :  { %v12370_v56 = vadd.f32 %v12369_v58, %v12288_v16 }
 0xcc5   :  { %v49680_v46 = vpop.f32.mrf.mxu1 }
 0xcc6   :  { %v12446_v52 = vadd.f32 %v12445_v15, %v12370_v56  ;;  %v12597_v27 = vpop.f32.mrf.mxu0 }
 0xcc7   :  { %v12520_v5 = vpop.f32.mrf.mxu1 }
 0xcc8   :  { %v12521_v9 = vadd.f32 %v12520_v5, %v12446_v52  ;;  %v49701_v2 = vpop.f32.mrf.mxu0 }
 0xcc9   :  { %v49694_v0 = vpop.f32.mrf.mxu1 }
 0xcca   :  { %v12598_v24 = vadd.f32 %v12597_v27, %v12521_v9  ;;  %v11705_v9 = vmul.f32 %v53902_v41, %v53902_v41 }
 0xccc   :  { %v12670_v48 = vpop.f32.mrf.mxu1 }
 0xccd   :  { %v54108_v14 = vadd.f32 %v12670_v48, %v12598_v24  ;;  %v49715_v42 = vpop.f32.mrf.mxu0  ;;  %v11706_v24 = vmul.f32 %v53906_v26, %v53906_v26 }
 0xcce   :  { %v49708_v20 = vpop.f32.mrf.mxu1 }
 0xccf   :  { %v12753_v30 = vpop.f32.mrf.mxu0 }
 0xcd2   :  { %v49722_v1 = vpop.f32.mrf.mxu1 }
 0xcd3   :  { %v12851_v19 = vadd.f32 %v49722_v1, %v49715_v42  ;;  %v49729_v21 = vpop.f32.mrf.mxu0 }
 0xcd4   :  { %v12844_v8 = vpop.f32.mrf.mxu1 }
 0xcd5   :  { %v12934_v17 = vadd.f32 %v49729_v21, %v12851_v19  ;;  %v12845_v16 = vadd.f32 %v12844_v8, %v12753_v30  ;;  %v12926_v58 = vpop.f32.mrf.mxu0  ;;  %v13642_v30 = vsel %vm76_vm0, %v11705_v9, 0 }
 0xcd7   :  { %v12927_v15 = vadd.f32 %v12926_v58, %v12845_v16  ;;  %v54116_v58 = vand.u32 4294901760, %v13642_v30 }
 0xcd8   :  { %v49736_v56 = vpop.f32.mrf.mxu1 }
 0xcd9   :  { %v13017_v46 = vadd.f32 %v49736_v56, %v12934_v17  ;;  %v49743_v52 = vpop.f32.mrf.mxu0  ;;  %v13645_v17 = vsel %vm76_vm0, %v11706_v24, 0 }
 0xcda   :  { %v13008_v5 = vpop.f32.mrf.mxu1  ;;  %v54119_v41 = vand.u32 4294901760, %v13645_v17 }
 0xcdb   :  { %v13100_v2 = vadd.f32 %v49743_v52, %v13017_v46  ;;  %v13009_v27 = vadd.f32 %v13008_v5, %v12927_v15  ;;  %v13093_v0 = vpop.f32.mrf.mxu0  ;;  %v54126_v52 = vsub.f32 %v13642_v30, %v54116_v58 }
 0xcdc   :  { %v54130_v5 = vsub.f32 %v13645_v17, %v54119_v41 }
 0xcdd   :  { %v13094_v48 = vadd.f32 %v13093_v0, %v13009_v27  ;;  %v49750_v42 = vpop.f32.mrf.mxu1  ;;  %v54135_v0 = vand.u32 4294901760, %v54126_v52 }
 0xcde   :  { %v13179_v20 = vadd.f32 %v49750_v42, %v13100_v2  ;;  %v54140_v24 = vand.u32 4294901760, %v54130_v5 }
 0xcdf   :  { %v13172_v21 = vpop.f32.mrf.mxu1 }
 0xce0   :  { %v13211_v1 = vand.u32 4294901760, %v13179_v20  ;;  %v13173_v19 = vadd.f32 %v13172_v21, %v13094_v48  ;;  %57121 = vst [vmem:[#allocation20_spill] sm:$0xff] %v54140_v24  ;;  %v13717_v48 = vsub.f32 %v54126_v52, %v54135_v0  ;;  %v13727_v42 = vsub.f32 %v54130_v5, %v54140_v24 }
 0xce2   :  { %v13289_v8 = vsub.f32 %v13179_v20, %v13211_v1  ;;  %v13214_v16 = vand.u32 4294901760, %v13173_v19  ;;  %49752 = vmatpush3.msra.mxu0 %v13211_v1  ;;  %v54157_v20 = vand.u32 4294901760, %v13717_v48  ;;  %v54161_v21 = vand.u32 4294901760, %v13727_v42 }
 0xce3   :  { %49753 = vmatprep.subr.mxu0 %v57103_v40 }
 0xce4   :  { %v13290_v26 = vand.u32 4294901760, %v13289_v8  ;;  %v13296_v15 = vsub.f32 %v13173_v19, %v13214_v16  ;;  %49754 = vmatpush3.msra.mxu0 %v13214_v16 }
 0xce5   :  { %49765 = vmatprep.subr.mxu0 %v57103_v40  ;;  %49756 = vmatmul.mubr.f32.vlgmr.msra.gmra.mxu0 %v52936_v12 }
 0xce6   :  { %v13291_v56 = vsub.f32 %v13289_v8, %v13290_v26  ;;  %v13297_v46 = vand.u32 4294901760, %v13296_v15  ;;  %49766 = vmatpush3.msra.mxu0 %v13289_v8  ;;  %49769 = vmatprep.mubr.msk.f32.mxu0 %vm52763_vm1, %v57103_v40 }
 0xce7   :  { %49767 = vmatprep.subr.mxu0 %v57103_v40 }
 0xce8   :  { %49768 = vmatpush3.msra.mxu0 %v13296_v15  ;;  %v13292_v2 = vand.u32 4294901760, %v13291_v56  ;;  %v13298_v27 = vsub.f32 %v13296_v15, %v13297_v46 }
 0xce9   :  { %49779 = vmatprep.subr.mxu0 %v57103_v40  ;;  %49770 = vmatmul.mubr.f32.vlgmr.msra.gmra.mxu0 %v52923_v47 }
 0xcea   :  { %49759 = vmatpush3.msra.mxu1 %v13292_v2  ;;  %49780 = vmatpush3.msra.mxu0 %v13290_v26  ;;  %v13299_v9 = vand.u32 4294901760, %v13298_v27 }
 0xceb   :  { %49760 = vmatprep.subr.mxu1 %v57103_v40  ;;  %49781 = vmatprep.subr.mxu0 %v57103_v40 }
 0xcec   :  { %49761 = vmatpush3.msra.mxu1 %v13299_v9  ;;  %49782 = vmatpush3.msra.mxu0 %v13297_v46 }
 0xced   :  { %49763 = vmatmul.mubr.f32.vlgmr.msra.gmra.mxu1 %v52920_v43  ;;  %49772 = vmatprep.subr.mxu1 %v57103_v40 }
 0xcee   :  { %49773 = vmatpush3.msra.mxu1 %v13211_v1  ;;  %49776 = vmatprep.mubr.msk.f32.mxu1 %vm52763_vm1, %v57103_v40 }
 0xcef   :  { %49774 = vmatprep.subr.mxu1 %v57103_v40  ;;  %49783 = vmatprep.mubr.msk.f32.mxu0 %vm52763_vm1, %v57103_v40 }
 0xcf0   :  { %49775 = vmatpush3.msra.mxu1 %v13214_v16  ;;  %49784 = vmatmul.mubr.f32.vlgmr.msra.gmra.mxu0 %v52920_v43 }
 0xcf1   :  { %49777 = vmatmul.mubr.f32.vlgmr.msra.gmra.mxu1 %v52926_v54  ;;  %49786 = vmatprep.subr.mxu1 %v57103_v40 }
 0xcf2   :  { %49793 = vmatprep.subr.mxu0 %v57110_v7  ;;  %49787 = vmatpush3.msra.mxu1 %v13211_v1 }
 0xcf3   :  { %49794 = vmatpush3.msra.mxu0 %v57110_v7  ;;  %49788 = vmatprep.subr.mxu1 %v57103_v40 }
 0xcf4   :  { %49795 = vmatprep.subr.mxu0 %v57111_v63  ;;  %49789 = vmatpush3.msra.mxu1 %v13214_v16 }
 0xcf5   :  { %49790 = vmatprep.mubr.msk.f32.mxu1 %vm52763_vm1, %v57103_v40  ;;  %49796 = vmatpush3.msra.mxu0 %v57111_v63 }
 0xcf6   :  { %49797 = vmatprep.mubr.f32.mxu0 %v54157_v20  ;;  %49791 = vmatmul.mubr.f32.vlgmr.msra.gmra.mxu1 %v52920_v43 }
 0xcf7   :  { %49798 = vmatmul.mubr.f32.vlgmr.msra.gmra.mxu0 %v54161_v21  ;;  %49800 = vmatprep.subr.mxu1 %v57112_v32 }
 0xcf8   :  { %49807 = vmatprep.subr.mxu0 %v57113_v57  ;;  %49801 = vmatpush3.msra.mxu1 %v57112_v32 }
 0xcf9   :  { %49808 = vmatpush3.msra.mxu0 %v57113_v57  ;;  %49802 = vmatprep.subr.mxu1 %v57114_v28 }
 0xcfa   :  { %49809 = vmatprep.subr.mxu0 %v57115_v22  ;;  %49803 = vmatpush3.msra.mxu1 %v57114_v28 }
 0xcfb   :  { %49804 = vmatprep.mubr.f32.mxu1 %v54116_v58  ;;  %49810 = vmatpush3.msra.mxu0 %v57115_v22 }
 0xcfc   :  { %49811 = vmatprep.mubr.f32.mxu0 %v54126_v52  ;;  %49805 = vmatmul.mubr.f32.vlgmr.msra.gmra.mxu1 %v54119_v41 }
 0xcfd   :  { %49812 = vmatmul.mubr.f32.vlgmr.msra.gmra.mxu0 %v54130_v5  ;;  %49814 = vmatprep.subr.mxu1 %v57110_v7 }
 0xcfe   :  { %49821 = vmatprep.subr.mxu0 %v57116_v10  ;;  %49815 = vmatpush3.msra.mxu1 %v57110_v7 }
 0xcff   :  { %49822 = vmatpush3.msra.mxu0 %v57116_v10  ;;  %49816 = vmatprep.subr.mxu1 %v57111_v63 }
 0xd00   :  { %49823 = vmatprep.subr.mxu0 %v57117_v25  ;;  %49817 = vmatpush3.msra.mxu1 %v57111_v63 }
 0xd01   :  { %49818 = vmatprep.mubr.f32.mxu1 %v54135_v0  ;;  %49824 = vmatpush3.msra.mxu0 %v57117_v25 }
 0xd02   :  { %49825 = vmatprep.mubr.f32.mxu0 %v54116_v58  ;;  %49819 = vmatmul.mubr.f32.vlgmr.msra.gmra.mxu1 %v54140_v24 }
 0xd03   :  { %49826 = vmatmul.mubr.f32.vlgmr.msra.gmra.mxu0 %v54119_v41  ;;  %49828 = vmatprep.subr.mxu1 %v57110_v7 }
 0xd04   :  { %49829 = vmatpush3.msra.mxu1 %v57110_v7  ;;  %49832 = vmatprep.mubr.f32.mxu1 %v54116_v58 }
 0xd05   :  { %49830 = vmatprep.subr.mxu1 %v57111_v63  ;;  %49835 = vmatprep.subr.mxu0 %v57103_v40 }
 0xd06   :  { %49831 = vmatpush3.msra.mxu1 %v57111_v63  ;;  %49839 = vmatprep.mubr.msk.f32.mxu0 %vm52763_vm1, %v57103_v40 }
 0xd07   :  { %49833 = vmatmul.mubr.f32.vlgmr.msra.gmra.mxu1 %v54119_v41  ;;  %49842 = vmatprep.subr.mxu1 %v57103_v40 }
 0xd08   :  { %49846 = vmatprep.mubr.msk.f32.mxu1 %vm52763_vm1, %v57103_v40 }
 0xda5   :  { %v13255_v30 = vpop.f32.mrf.mxu0 }
 0xda7   :  { %v49757_v1 = vpop.f32.mrf.mxu0 }
 0xda9   :  { %v13412_v19 = vpop.f32.mrf.mxu0 }
 0xdab   :  { %v49771_v17 = vpop.f32.mrf.mxu0 }
 0xdad   :  { %v13336_v8 = vpop.f32.mrf.mxu1 }
 0xdae   :  { %v13337_v16 = vadd.f32 %v13336_v8, %v13255_v30 }
 0xdaf   :  { %v49764_v26 = vpop.f32.mrf.mxu1 }
 0xdb0   :  { %v13413_v15 = vadd.f32 %v13412_v19, %v13337_v16  ;;  %v13564_v56 = vpop.f32.mrf.mxu0 }
 0xdb1   :  { %v13487_v46 = vpop.f32.mrf.mxu1 }
 0xdb2   :  { %v13488_v2 = vadd.f32 %v13487_v46, %v13413_v15  ;;  %v49785_v27 = vpop.f32.mrf.mxu0 }
 0xdb3   :  { %v49778_v9 = vpop.f32.mrf.mxu1 }
 0xdb4   :  { %v13565_v48 = vadd.f32 %v13564_v56, %v13488_v2 }
 0xdb6   :  { %v13637_v42 = vpop.f32.mrf.mxu1 }
 0xdb7   :  { %v54206_v25 = vadd.f32 %v13637_v42, %v13565_v48  ;;  %v49799_v10 = vpop.f32.mrf.mxu0 }
 0xdb8   :  { %v49792_v22 = vpop.f32.mrf.mxu1 }
 0xdb9   :  { %v13720_v28 = vpop.f32.mrf.mxu0 }
 0xdbc   :  { %v49806_v57 = vpop.f32.mrf.mxu1 }
 0xdbd   :  { %v13818_v1 = vadd.f32 %v49806_v57, %v49799_v10  ;;  %v49813_v32 = vpop.f32.mrf.mxu0 }
 0xdbe   :  { %v13811_v17 = vpop.f32.mrf.mxu1 }
 0xdbf   :  { %v13901_v63 = vadd.f32 %v49813_v32, %v13818_v1  ;;  %v13812_v30 = vadd.f32 %v13811_v17, %v13720_v28  ;;  %v13893_v8 = vpop.f32.mrf.mxu0 }
 0xdc1   :  { %v13894_v19 = vadd.f32 %v13893_v8, %v13812_v30 }
 0xdc2   :  { %v49820_v16 = vpop.f32.mrf.mxu1 }
 0xdc3   :  { %v13984_v26 = vadd.f32 %v49820_v16, %v13901_v63  ;;  %v49827_v15 = vpop.f32.mrf.mxu0 }
 0xdc4   :  { %v13975_v46 = vpop.f32.mrf.mxu1 }
 0xdc5   :  { %v14067_v27 = vadd.f32 %v49827_v15, %v13984_v26  ;;  %v13976_v56 = vadd.f32 %v13975_v46, %v13894_v19  ;;  %v14060_v2 = vpop.f32.mrf.mxu0 }
 0xdc7   :  { %v14061_v9 = vadd.f32 %v14060_v2, %v13976_v56  ;;  %v49834_v48 = vpop.f32.mrf.mxu1 }
 0xdc8   :  { %v14146_v42 = vadd.f32 %v49834_v48, %v14067_v27 }
 0xdc9   :  { %v14139_v22 = vpop.f32.mrf.mxu1 }
 0xdca   :  { %v14178_v7 = vand.u32 4294901760, %v14146_v42  ;;  %v14140_v24 = vadd.f32 %v14139_v22, %v14061_v9 }
 0xdcc   :  { %v14256_v57 = vsub.f32 %v14146_v42, %v14178_v7  ;;  %v14181_v10 = vand.u32 4294901760, %v14140_v24  ;;  %49836 = vmatpush3.msra.mxu0 %v14178_v7 }
 0xdcd   :  { %49837 = vmatprep.subr.mxu0 %v57103_v40 }
 0xdce   :  { %v14257_v32 = vand.u32 4294901760, %v14256_v57  ;;  %v14263_v28 = vsub.f32 %v14140_v24, %v14181_v10  ;;  %49838 = vmatpush3.msra.mxu0 %v14181_v10 }
 0xdcf   :  { %49849 = vmatprep.subr.mxu0 %v57103_v40  ;;  %49840 = vmatmul.mubr.f32.vlgmr.msra.gmra.mxu0 %v52936_v12 }
 0xdd0   :  { %v14258_v63 = vsub.f32 %v14256_v57, %v14257_v32  ;;  %v14264_v1 = vand.u32 4294901760, %v14263_v28  ;;  %49850 = vmatpush3.msra.mxu0 %v14256_v57  ;;  %49853 = vmatprep.mubr.msk.f32.mxu0 %vm52763_vm1, %v57103_v40 }
 0xdd1   :  { %49851 = vmatprep.subr.mxu0 %v57103_v40 }
 0xdd2   :  { %49852 = vmatpush3.msra.mxu0 %v14263_v28  ;;  %v14259_v17 = vand.u32 4294901760, %v14258_v63  ;;  %v14265_v30 = vsub.f32 %v14263_v28, %v14264_v1 }
 0xdd3   :  { %49863 = vmatprep.subr.mxu0 %v57103_v40  ;;  %49854 = vmatmul.mubr.f32.vlgmr.msra.gmra.mxu0 %v52923_v47 }
 0xdd4   :  { %49843 = vmatpush3.msra.mxu1 %v14259_v17  ;;  %49864 = vmatpush3.msra.mxu0 %v14257_v32  ;;  %v14266_v24 = vand.u32 4294901760, %v14265_v30 }
 0xdd5   :  { %49844 = vmatprep.subr.mxu1 %v57103_v40  ;;  %49865 = vmatprep.subr.mxu0 %v57103_v40 }
 0xdd6   :  { %49845 = vmatpush3.msra.mxu1 %v14266_v24  ;;  %49866 = vmatpush3.msra.mxu0 %v14264_v1 }
 0xdd7   :  { %49847 = vmatmul.mubr.f32.vlgmr.msra.gmra.mxu1 %v52920_v43  ;;  %49856 = vmatprep.subr.mxu1 %v57103_v40 }
 0xdd8   :  { %49857 = vmatpush3.msra.mxu1 %v14178_v7  ;;  %49860 = vmatprep.mubr.msk.f32.mxu1 %vm52763_vm1, %v57103_v40 }
 0xdd9   :  { %49858 = vmatprep.subr.mxu1 %v57103_v40  ;;  %49867 = vmatprep.mubr.msk.f32.mxu0 %vm52763_vm1, %v57103_v40 }
 0xdda   :  { %49859 = vmatpush3.msra.mxu1 %v14181_v10  ;;  %49868 = vmatmul.mubr.f32.vlgmr.msra.gmra.mxu0 %v52920_v43 }
 0xddb   :  { %49861 = vmatmul.mubr.f32.vlgmr.msra.gmra.mxu1 %v52926_v54  ;;  %49870 = vmatprep.subr.mxu1 %v57103_v40 }
 0xddc   :  { %49877 = vmatprep.subr.mxu0 %v53134_v4  ;;  %49871 = vmatpush3.msra.mxu1 %v14178_v7 }
 0xddd   :  { %49878 = vmatpush3.msra.mxu0 %v53134_v4  ;;  %49872 = vmatprep.subr.mxu1 %v57103_v40 }
 0xdde   :  { %49879 = vmatprep.subr.mxu0 %v53137_v11  ;;  %49873 = vmatpush3.msra.mxu1 %v14181_v10 }
 0xddf   :  { %49874 = vmatprep.mubr.msk.f32.mxu1 %vm52763_vm1, %v57103_v40  ;;  %49880 = vmatpush3.msra.mxu0 %v53137_v11 }
 0xde0   :  { %49881 = vmatprep.mubr.f32.mxu0 %v53955_v29  ;;  %49875 = vmatmul.mubr.f32.vlgmr.msra.gmra.mxu1 %v52920_v43 }
 0xde1   :  { %49882 = vmatmul.mubr.f32.vlgmr.msra.gmra.mxu0 %v53959_v31  ;;  %49884 = vmatprep.subr.mxu1 %v53177_v53 }
 0xde2   :  { %49891 = vmatprep.subr.mxu0 %v53145_v23  ;;  %49885 = vmatpush3.msra.mxu1 %v53177_v53 }
 0xde3   :  { %49892 = vmatpush3.msra.mxu0 %v53145_v23  ;;  %49886 = vmatprep.subr.mxu1 %v53183_v55 }
 0xde4   :  { %49893 = vmatprep.subr.mxu0 %v53150_v44  ;;  %49887 = vmatpush3.msra.mxu1 %v53183_v55 }
 0xde5   :  { %49888 = vmatprep.mubr.f32.mxu1 %v53914_v13  ;;  %49894 = vmatpush3.msra.mxu0 %v53150_v44 }
 0xde6   :  { %49895 = vmatprep.mubr.f32.mxu0 %v53924_v38  ;;  %49889 = vmatmul.mubr.f32.vlgmr.msra.gmra.mxu1 %v53917_v18 }
 0xde7   :  { %49896 = vmatmul.mubr.f32.vlgmr.msra.gmra.mxu0 %v53928_v59  ;;  %49898 = vmatprep.subr.mxu1 %v53134_v4 }
 0xde8   :  { %49905 = vmatprep.subr.mxu0 %v53155_v49  ;;  %49899 = vmatpush3.msra.mxu1 %v53134_v4 }
 0xde9   :  { %49906 = vmatpush3.msra.mxu0 %v53155_v49  ;;  %49900 = vmatprep.subr.mxu1 %v53137_v11 }
 0xdea   :  { %49907 = vmatprep.subr.mxu0 %v53160_v50  ;;  %49901 = vmatpush3.msra.mxu1 %v53137_v11 }
 0xdeb   :  { %49902 = vmatprep.mubr.f32.mxu1 %v53933_v6  ;;  %49908 = vmatpush3.msra.mxu0 %v53160_v50 }
 0xdec   :  { %49909 = vmatprep.mubr.f32.mxu0 %v53914_v13  ;;  %49903 = vmatmul.mubr.f32.vlgmr.msra.gmra.mxu1 %v53938_v36 }
 0xded   :  { %49910 = vmatmul.mubr.f32.vlgmr.msra.gmra.mxu0 %v53917_v18  ;;  %49912 = vmatprep.subr.mxu1 %v53134_v4 }
 0xdee   :  { %49913 = vmatpush3.msra.mxu1 %v53134_v4  ;;  %49916 = vmatprep.mubr.f32.mxu1 %v53914_v13 }
 0xdef   :  { %49914 = vmatprep.subr.mxu1 %v53137_v11  ;;  %49919 = vmatprep.subr.mxu0 %v57103_v40 }
 0xdf0   :  { %49915 = vmatpush3.msra.mxu1 %v53137_v11  ;;  %49923 = vmatprep.mubr.msk.f32.mxu0 %vm52763_vm1, %v57103_v40 }
 0xdf1   :  { %49917 = vmatmul.mubr.f32.vlgmr.msra.gmra.mxu1 %v53917_v18  ;;  %49926 = vmatprep.subr.mxu1 %v57103_v40 }
 0xdf2   :  { %49930 = vmatprep.mubr.msk.f32.mxu1 %vm52763_vm1, %v57103_v40 }
 0xe8f   :  { %v14222_v38 = vpop.f32.mrf.mxu0 }
 0xe91   :  { %v49841_v59 = vpop.f32.mrf.mxu0 }
 0xe93   :  { %v14379_v6 = vpop.f32.mrf.mxu0 }
 0xe95   :  { %v49855_v13 = vpop.f32.mrf.mxu0 }
 0xe97   :  { %v14303_v36 = vpop.f32.mrf.mxu1 }
 0xe98   :  { %v14304_v7 = vadd.f32 %v14303_v36, %v14222_v38 }
 0xe99   :  { %v49848_v29 = vpop.f32.mrf.mxu1 }
 0xe9a   :  { %v14380_v31 = vadd.f32 %v14379_v6, %v14304_v7  ;;  %v14531_v8 = vpop.f32.mrf.mxu0 }
 0xe9b   :  { %v14454_v19 = vpop.f32.mrf.mxu1 }
 0xe9c   :  { %v14455_v16 = vadd.f32 %v14454_v19, %v14380_v31  ;;  %v49869_v26 = vpop.f32.mrf.mxu0 }
 0xe9d   :  { %v49862_v15 = vpop.f32.mrf.mxu1 }
 0xe9e   :  { %v14532_v46 = vadd.f32 %v14531_v8, %v14455_v16 }
 0xea0   :  { %v14604_v18 = vpop.f32.mrf.mxu1 }
 0xea1   :  { %v14605_v27 = vadd.f32 %v14604_v18, %v14532_v46  ;;  %v49883_v56 = vpop.f32.mrf.mxu0 }
 0xea2   :  { %v49876_v2 = vpop.f32.mrf.mxu1 }
 0xea3   :  { %v54275_v9 = vmul.f32 %v14605_v27, %v54206_v25  ;;  %v14685_v48 = vpop.f32.mrf.mxu0 }
 0xea5   :  { %52668 = vrsqrt.f32 %v54275_v9 }
 0xea6   :  { %v49890_v42 = vpop.f32.mrf.mxu1 }
 0xea7   :  { %v14783_v22 = vadd.f32 %v49890_v42, %v49883_v56  ;;  %v49897_v57 = vpop.f32.mrf.mxu0 }
 0xea8   :  { %v14776_v10 = vpop.f32.mrf.mxu1 }
 0xea9   :  { %v14866_v32 = vadd.f32 %v49897_v57, %v14783_v22  ;;  %v14777_v28 = vadd.f32 %v14776_v10, %v14685_v48  ;;  %v14858_v63 = vpop.f32.mrf.mxu0 }
 0xeab   :  { %v14859_v1 = vadd.f32 %v14858_v63, %v14777_v28 }
 0xeac   :  { %v49904_v17 = vpop.f32.mrf.mxu1 }
 0xead   :  { %v14949_v30 = vadd.f32 %v49904_v17, %v14866_v32  ;;  %v49911_v24 = vpop.f32.mrf.mxu0 }
 0xeae   :  { %v14940_v38 = vpop.f32.mrf.mxu1 }
 0xeaf   :  { %v15032_v59 = vadd.f32 %v49911_v24, %v14949_v30  ;;  %v14941_v6 = vadd.f32 %v14940_v38, %v14859_v1  ;;  %v15025_v13 = vpop.f32.mrf.mxu0 }
 0xeb1   :  { %v15026_v36 = vadd.f32 %v15025_v13, %v14941_v6  ;;  %v49918_v7 = vpop.f32.mrf.mxu1 }
 0xeb2   :  { %v15111_v25 = vadd.f32 %v49918_v7, %v15032_v59 }
 0xeb3   :  { %v15104_v29 = vpop.f32.mrf.mxu1 }
 0xeb4   :  { %v15143_v31 = vand.u32 4294901760, %v15111_v25  ;;  %v15105_v8 = vadd.f32 %v15104_v29, %v15026_v36 }
 0xeb6   :  { %v15221_v19 = vsub.f32 %v15111_v25, %v15143_v31  ;;  %v15146_v16 = vand.u32 4294901760, %v15105_v8  ;;  %49920 = vmatpush3.msra.mxu0 %v15143_v31 }
 0xeb7   :  { %49921 = vmatprep.subr.mxu0 %v57103_v40 }
 0xeb8   :  { %v15222_v26 = vand.u32 4294901760, %v15221_v19  ;;  %v15228_v15 = vsub.f32 %v15105_v8, %v15146_v16  ;;  %49922 = vmatpush3.msra.mxu0 %v15146_v16 }
 0xeb9   :  { %49933 = vmatprep.subr.mxu0 %v57103_v40  ;;  %49924 = vmatmul.mubr.f32.vlgmr.msra.gmra.mxu0 %v53241_v51 }
 0xeba   :  { %v15223_v46 = vsub.f32 %v15221_v19, %v15222_v26  ;;  %v15229_v18 = vand.u32 4294901760, %v15228_v15  ;;  %49934 = vmatpush3.msra.mxu0 %v15221_v19  ;;  %49937 = vmatprep.mubr.msk.f32.mxu0 %vm52763_vm1, %v57103_v40 }
 0xebb   :  { %49935 = vmatprep.subr.mxu0 %v57103_v40 }
 0xebc   :  { %49936 = vmatpush3.msra.mxu0 %v15228_v15  ;;  %v15224_v27 = vand.u32 4294901760, %v15223_v46  ;;  %v15230_v56 = vsub.f32 %v15228_v15, %v15229_v18 }
 0xebd   :  { %49947 = vmatprep.subr.mxu0 %v57103_v40  ;;  %49938 = vmatmul.mubr.f32.vlgmr.msra.gmra.mxu0 %v53234_v35 }
 0xebe   :  { %49927 = vmatpush3.msra.mxu1 %v15224_v27  ;;  %49948 = vmatpush3.msra.mxu0 %v15222_v26  ;;  %v15231_v2 = vand.u32 4294901760, %v15230_v56 }
 0xebf   :  { %49928 = vmatprep.subr.mxu1 %v57103_v40  ;;  %49949 = vmatprep.subr.mxu0 %v57103_v40 }
 0xec0   :  { %49929 = vmatpush3.msra.mxu1 %v15231_v2  ;;  %49950 = vmatpush3.msra.mxu0 %v15229_v18 }
 0xec1   :  { %49931 = vmatmul.mubr.f32.vlgmr.msra.gmra.mxu1 %v53231_v45  ;;  %49940 = vmatprep.subr.mxu1 %v57103_v40 }
 0xec2   :  { %49941 = vmatpush3.msra.mxu1 %v15143_v31  ;;  %49944 = vmatprep.mubr.msk.f32.mxu1 %vm52763_vm1, %v57103_v40 }
 0xec3   :  { %49942 = vmatprep.subr.mxu1 %v57103_v40  ;;  %49951 = vmatprep.mubr.msk.f32.mxu0 %vm52763_vm1, %v57103_v40 }
 0xec4   :  { %49943 = vmatpush3.msra.mxu1 %v15146_v16  ;;  %49952 = vmatmul.mubr.f32.vlgmr.msra.gmra.mxu0 %v53231_v45 }
 0xec5   :  { %49945 = vmatmul.mubr.f32.vlgmr.msra.gmra.mxu1 %v53237_v61  ;;  %49954 = vmatprep.subr.mxu1 %v57103_v40 }
 0xec6   :  { %49961 = vmatprep.subr.mxu0 %v53134_v4  ;;  %49955 = vmatpush3.msra.mxu1 %v15143_v31 }
 0xec7   :  { %49962 = vmatpush3.msra.mxu0 %v53134_v4  ;;  %49956 = vmatprep.subr.mxu1 %v57103_v40 }
 0xec8   :  { %49963 = vmatprep.subr.mxu0 %v53137_v11  ;;  %49957 = vmatpush3.msra.mxu1 %v15146_v16 }
 0xec9   :  { %49958 = vmatprep.mubr.msk.f32.mxu1 %vm52763_vm1, %v57103_v40  ;;  %49964 = vmatpush3.msra.mxu0 %v53137_v11 }
 0xeca   :  { %49965 = vmatprep.mubr.f32.mxu0 %v54054_v62  ;;  %49959 = vmatmul.mubr.f32.vlgmr.msra.gmra.mxu1 %v53231_v45 }
 0xecb   :  { %49966 = vmatmul.mubr.f32.vlgmr.msra.gmra.mxu0 %v54058_v37  ;;  %49968 = vmatprep.subr.mxu1 %v53177_v53 }
 0xecc   :  { %49975 = vmatprep.subr.mxu0 %v53145_v23  ;;  %49969 = vmatpush3.msra.mxu1 %v53177_v53 }
 0xecd   :  { %49976 = vmatpush3.msra.mxu0 %v53145_v23  ;;  %49970 = vmatprep.subr.mxu1 %v53183_v55 }
 0xece   :  { %49977 = vmatprep.subr.mxu0 %v53150_v44  ;;  %49971 = vmatpush3.msra.mxu1 %v53183_v55 }
 0xecf   :  { %49972 = vmatprep.mubr.f32.mxu1 %v54013_v34  ;;  %49978 = vmatpush3.msra.mxu0 %v53150_v44 }
 0xed0   :  { %49979 = vmatprep.mubr.f32.mxu0 %v54023_v39  ;;  %49973 = vmatmul.mubr.f32.vlgmr.msra.gmra.mxu1 %v54016_v33  ;;  %v57122_v39 = vld [vmem:[#allocation21_spill] sm:$0xff] }
 0xed1   :  { %49980 = vmatmul.mubr.f32.vlgmr.msra.gmra.mxu0 %v54027_v3  ;;  %49982 = vmatprep.subr.mxu1 %v53134_v4  ;;  %v52669_v3 = vpop.eup %52668 }
 0xed2   :  { %49989 = vmatprep.subr.mxu0 %v53155_v49  ;;  %49983 = vmatpush3.msra.mxu1 %v53134_v4 }
 0xed3   :  { %49990 = vmatpush3.msra.mxu0 %v53155_v49  ;;  %49984 = vmatprep.subr.mxu1 %v53137_v11 }
 0xed4   :  { %49991 = vmatprep.subr.mxu0 %v53160_v50  ;;  %49985 = vmatpush3.msra.mxu1 %v53137_v11 }
 0xed5   :  { %49986 = vmatprep.mubr.f32.mxu1 %v54032_v60  ;;  %49992 = vmatpush3.msra.mxu0 %v53160_v50  ;;  %v57123_v60 = vld [vmem:[#allocation19_spill] sm:$0xff] }
 0xed6   :  { %49993 = vmatprep.mubr.f32.mxu0 %v54013_v34  ;;  %49987 = vmatmul.mubr.f32.vlgmr.msra.gmra.mxu1 %v57122_v39 }
 0xed7   :  { %49994 = vmatmul.mubr.f32.vlgmr.msra.gmra.mxu0 %v54016_v33  ;;  %49996 = vmatprep.subr.mxu1 %v53134_v4 }
 0xed8   :  { %49997 = vmatpush3.msra.mxu1 %v53134_v4  ;;  %50000 = vmatprep.mubr.f32.mxu1 %v54013_v34  ;;  %v14610_v34 = vmul.f32 %v52669_v3, %v54108_v14 }
 0xed9   :  { %49998 = vmatprep.subr.mxu1 %v53137_v11  ;;  %50003 = vmatprep.subr.mxu0 %v57103_v40 }
 0xeda   :  { %49999 = vmatpush3.msra.mxu1 %v53137_v11  ;;  %50007 = vmatprep.mubr.msk.f32.mxu0 %vm52763_vm1, %v57103_v40  ;;  %v54346_v62 = vadd.f32 %v14610_v34, %v57123_v60 }
 0xedb   :  { %50001 = vmatmul.mubr.f32.vlgmr.msra.gmra.mxu1 %v54016_v33  ;;  %50010 = vmatprep.subr.mxu1 %v57103_v40 }
 0xedc   :  { %50014 = vmatprep.mubr.msk.f32.mxu1 %vm52763_vm1, %v57103_v40 }
 0xf79   :  { %v15187_v37 = vpop.f32.mrf.mxu0 }
 0xf7b   :  { %v49925_v48 = vpop.f32.mrf.mxu0 }
 0xf7d   :  { %v15344_v42 = vpop.f32.mrf.mxu0 }
 0xf7f   :  { %v49939_v22 = vpop.f32.mrf.mxu0 }
 0xf81   :  { %v15268_v57 = vpop.f32.mrf.mxu1 }
 0xf82   :  { %v15269_v10 = vadd.f32 %v15268_v57, %v15187_v37 }
 0xf83   :  { %v49932_v33 = vpop.f32.mrf.mxu1 }
 0xf84   :  { %v15345_v32 = vadd.f32 %v15344_v42, %v15269_v10  ;;  %v15496_v28 = vpop.f32.mrf.mxu0 }
 0xf85   :  { %v15419_v63 = vpop.f32.mrf.mxu1 }
 0xf86   :  { %v15420_v9 = vadd.f32 %v15419_v63, %v15345_v32  ;;  %v49953_v1 = vpop.f32.mrf.mxu0 }
 0xf87   :  { %v49946_v17 = vpop.f32.mrf.mxu1 }
 0xf88   :  { %v15497_v30 = vadd.f32 %v15496_v28, %v15420_v9 }
 0xf8a   :  { %v15569_v24 = vpop.f32.mrf.mxu1 }
 0xf8b   :  { %v54348_v38 = vadd.f32 %v15569_v24, %v15497_v30  ;;  %v49967_v14 = vpop.f32.mrf.mxu0 }
 0xf8c   :  { %v49960_v59 = vpop.f32.mrf.mxu1 }
 0xf8d   :  { %v15646_v6 = vpop.f32.mrf.mxu0 }
 0xf90   :  { %v49974_v13 = vpop.f32.mrf.mxu1 }
 0xf91   :  { %v15744_v36 = vadd.f32 %v49974_v13, %v49967_v14  ;;  %v49981_v7 = vpop.f32.mrf.mxu0 }
 0xf92   :  { %v15737_v25 = vpop.f32.mrf.mxu1 }
 0xf93   :  { %v15827_v29 = vadd.f32 %v49981_v7, %v15744_v36  ;;  %v15738_v31 = vadd.f32 %v15737_v25, %v15646_v6  ;;  %v15819_v8 = vpop.f32.mrf.mxu0 }
 0xf95   :  { %v15820_v19 = vadd.f32 %v15819_v8, %v15738_v31  ;;  %v17500_v31 = vld [vmem:[#allocation2 + $0x30] sm:$0xff] }
 0xf96   :  { %v49988_v16 = vpop.f32.mrf.mxu1  ;;  %v17507_v8 = vld [vmem:[#allocation5 + $0x30] sm:$0xff] }
 0xf97   :  { %v15910_v26 = vadd.f32 %v49988_v16, %v15827_v29  ;;  %v49995_v15 = vpop.f32.mrf.mxu0  ;;  %v17508_v16 = vld [vmem:[#allocation5 + $0x38] sm:$0xff] }
 0xf98   :  { %v15901_v46 = vpop.f32.mrf.mxu1 }
 0xf99   :  { %v15993_v18 = vadd.f32 %v49995_v15, %v15910_v26  ;;  %v15902_v27 = vadd.f32 %v15901_v46, %v15820_v19  ;;  %v15986_v56 = vpop.f32.mrf.mxu0  ;;  %v17501_v19 = vld [vmem:[#allocation2 + $0x38] sm:$0xff] }
 0xf9b   :  { %v15987_v2 = vadd.f32 %v15986_v56, %v15902_v27  ;;  %v50002_v39 = vpop.f32.mrf.mxu1  ;;  %v17509_v27 = vmax.f32 %v17507_v8, 1e-06 }
 0xf9c   :  { %v16072_v3 = vadd.f32 %v50002_v39, %v15993_v18  ;;  %v17502_v18 = vmax.f32 %v17500_v31, 1e-06  ;;  %v17510_v39 = vmax.f32 %v17508_v16, 1e-06 }
 0xf9d   :  { %v16065_v34 = vpop.f32.mrf.mxu1 }
 0xf9e   :  { %v16104_v60 = vand.u32 4294901760, %v16072_v3  ;;  %v16066_v37 = vadd.f32 %v16065_v34, %v15987_v2  ;;  %v17503_v2 = vmax.f32 %v17501_v19, 1e-06 }
 0xfa0   :  { %v16182_v48 = vsub.f32 %v16072_v3, %v16104_v60  ;;  %v16107_v42 = vand.u32 4294901760, %v16066_v37  ;;  %50004 = vmatpush3.msra.mxu0 %v16104_v60 }
 0xfa1   :  { %50005 = vmatprep.subr.mxu0 %v57103_v40 }
 0xfa2   :  { %v16183_v22 = vand.u32 4294901760, %v16182_v48  ;;  %v16189_v57 = vsub.f32 %v16066_v37, %v16107_v42  ;;  %50006 = vmatpush3.msra.mxu0 %v16107_v42 }
 0xfa3   :  { %50017 = vmatprep.subr.mxu0 %v57103_v40  ;;  %50008 = vmatmul.mubr.f32.vlgmr.msra.gmra.mxu0 %v53241_v51 }
 0xfa4   :  { %v16184_v10 = vsub.f32 %v16182_v48, %v16183_v22  ;;  %v16190_v33 = vand.u32 4294901760, %v16189_v57  ;;  %50018 = vmatpush3.msra.mxu0 %v16182_v48  ;;  %50021 = vmatprep.mubr.msk.f32.mxu0 %vm52763_vm1, %v57103_v40  ;;  %v54418_v48 = vmin.f32 %v17502_v18, 0.999999 }
 0xfa5   :  { %50019 = vmatprep.subr.mxu0 %v57103_v40 }
 0xfa6   :  { %50020 = vmatpush3.msra.mxu0 %v16189_v57  ;;  %v16185_v32 = vand.u32 4294901760, %v16184_v10  ;;  %v16191_v28 = vsub.f32 %v16189_v57, %v16190_v33  ;;  %v54422_v57 = vmin.f32 %v17503_v2, 0.999999  ;;  %v54424_v10 = vmin.f32 %v17510_v39, 0.999999  ;;  %v57125_v2 = vld [vmem:[#allocation11_spill] sm:$0xff] }
 0xfa7   :  { %50031 = vmatprep.subr.mxu0 %v57103_v40  ;;  %50022 = vmatmul.mubr.f32.vlgmr.msra.gmra.mxu0 %v53234_v35 }
 0xfa8   :  { %50011 = vmatpush3.msra.mxu1 %v16185_v32  ;;  %50032 = vmatpush3.msra.mxu0 %v16183_v22  ;;  %v16192_v63 = vand.u32 4294901760, %v16191_v28 }
 0xfa9   :  { %50012 = vmatprep.subr.mxu1 %v57103_v40  ;;  %50033 = vmatprep.subr.mxu0 %v57103_v40 }
 0xfaa   :  { %50013 = vmatpush3.msra.mxu1 %v16192_v63  ;;  %50034 = vmatpush3.msra.mxu0 %v16190_v33 }
 0xfab   :  { %50015 = vmatmul.mubr.f32.vlgmr.msra.gmra.mxu1 %v53231_v45  ;;  %50024 = vmatprep.subr.mxu1 %v57103_v40 }
 0xfac   :  { %50025 = vmatpush3.msra.mxu1 %v16104_v60  ;;  %50028 = vmatprep.mubr.msk.f32.mxu1 %vm52763_vm1, %v57103_v40 }
 0xfad   :  { %50026 = vmatprep.subr.mxu1 %v57103_v40  ;;  %50035 = vmatprep.mubr.msk.f32.mxu0 %vm52763_vm1, %v57103_v40 }
 0xfae   :  { %50027 = vmatpush3.msra.mxu1 %v16107_v42  ;;  %50036 = vmatmul.mubr.f32.vlgmr.msra.gmra.mxu0 %v53231_v45 }
 0xfaf   :  { %50029 = vmatmul.mubr.f32.vlgmr.msra.gmra.mxu1 %v53237_v61  ;;  %50038 = vmatprep.subr.mxu1 %v57103_v40 }
 0xfb0   :  { %50045 = vmatprep.subr.mxu0 %v53134_v4  ;;  %50039 = vmatpush3.msra.mxu1 %v16104_v60 }
 0xfb1   :  { %50046 = vmatpush3.msra.mxu0 %v53134_v4  ;;  %50040 = vmatprep.subr.mxu1 %v57103_v40 }
 0xfb2   :  { %50047 = vmatprep.subr.mxu0 %v53137_v11  ;;  %50041 = vmatpush3.msra.mxu1 %v16107_v42  ;;  %v54420_v42 = vmin.f32 %v17509_v27, 0.999999 }
 0xfb3   :  { %50042 = vmatprep.mubr.msk.f32.mxu1 %vm52763_vm1, %v57103_v40  ;;  %50048 = vmatpush3.msra.mxu0 %v53137_v11 }
 0xfb4   :  { %50049 = vmatprep.mubr.f32.mxu0 %v54157_v20  ;;  %50043 = vmatmul.mubr.f32.vlgmr.msra.gmra.mxu1 %v53231_v45 }
 0xfb5   :  { %50050 = vmatmul.mubr.f32.vlgmr.msra.gmra.mxu0 %v54161_v21  ;;  %50052 = vmatprep.subr.mxu1 %v53177_v53 }
 0xfb6   :  { %50059 = vmatprep.subr.mxu0 %v53145_v23  ;;  %50053 = vmatpush3.msra.mxu1 %v53177_v53 }
 0xfb7   :  { %50060 = vmatpush3.msra.mxu0 %v53145_v23  ;;  %50054 = vmatprep.subr.mxu1 %v53183_v55 }
 0xfb8   :  { %50061 = vmatprep.subr.mxu0 %v53150_v44  ;;  %50055 = vmatpush3.msra.mxu1 %v53183_v55 }
 0xfb9   :  { %50056 = vmatprep.mubr.f32.mxu1 %v54116_v58  ;;  %50062 = vmatpush3.msra.mxu0 %v53150_v44 }
 0xfba   :  { %50063 = vmatprep.mubr.f32.mxu0 %v54126_v52  ;;  %50057 = vmatmul.mubr.f32.vlgmr.msra.gmra.mxu1 %v54119_v41  ;;  %v57124_v52 = vld [vmem:[#allocation20_spill] sm:$0xff] }
 0xfbb   :  { %50064 = vmatmul.mubr.f32.vlgmr.msra.gmra.mxu0 %v54130_v5  ;;  %50066 = vmatprep.subr.mxu1 %v53134_v4 }
 0xfbc   :  { %50073 = vmatprep.subr.mxu0 %v53155_v49  ;;  %50067 = vmatpush3.msra.mxu1 %v53134_v4 }
 0xfbd   :  { %50074 = vmatpush3.msra.mxu0 %v53155_v49  ;;  %50068 = vmatprep.subr.mxu1 %v53137_v11 }
 0xfbe   :  { %50075 = vmatprep.subr.mxu0 %v53160_v50  ;;  %50069 = vmatpush3.msra.mxu1 %v53137_v11 }
 0xfbf   :  { %50070 = vmatprep.mubr.f32.mxu1 %v54135_v0  ;;  %50076 = vmatpush3.msra.mxu0 %v53160_v50 }
 0xfc0   :  { %50077 = vmatprep.mubr.f32.mxu0 %v54116_v58  ;;  %50071 = vmatmul.mubr.f32.vlgmr.msra.gmra.mxu1 %v57124_v52 }
 0xfc1   :  { %50078 = vmatmul.mubr.f32.vlgmr.msra.gmra.mxu0 %v54119_v41  ;;  %50080 = vmatprep.subr.mxu1 %v53134_v4 }
 0xfc2   :  { %50081 = vmatpush3.msra.mxu1 %v53134_v4  ;;  %50084 = vmatprep.mubr.f32.mxu1 %v54116_v58 }
 0xfc3   :  { %50082 = vmatprep.subr.mxu1 %v53137_v11  ;;  %50087 = vmatprep.subr.mxu0 %v57103_v40 }
 0xfc4   :  { %50083 = vmatpush3.msra.mxu1 %v53137_v11  ;;  %50091 = vmatprep.mubr.msk.f32.mxu0 %vm52763_vm1, %v57103_v40 }
 0xfc5   :  { %50085 = vmatmul.mubr.f32.vlgmr.msra.gmra.mxu1 %v54119_v41  ;;  %50094 = vmatprep.subr.mxu1 %v57103_v40 }
 0xfc6   :  { %50098 = vmatprep.mubr.msk.f32.mxu1 %vm52763_vm1, %v57103_v40 }
0x1063   :  { %v16148_v5 = vpop.f32.mrf.mxu0 }
0x1065   :  { %v50009_v0 = vpop.f32.mrf.mxu0 }
0x1067   :  { %v16305_v20 = vpop.f32.mrf.mxu0 }
0x1069   :  { %v50023_v58 = vpop.f32.mrf.mxu0 }
0x106b   :  { %v16229_v21 = vpop.f32.mrf.mxu1 }
0x106c   :  { %v16230_v9 = vadd.f32 %v16229_v21, %v16148_v5  ;;  %v17513_v5 = vmul.f32 %v54420_v42, %v54418_v48 }
0x106d   :  { %v50016_v1 = vpop.f32.mrf.mxu1 }
0x106e   :  { %v16306_v17 = vadd.f32 %v16305_v20, %v16230_v9  ;;  %v16457_v30 = vpop.f32.mrf.mxu0  ;;  %v17514_v20 = vmul.f32 %v54424_v10, %v54422_v57 }
0x106f   :  { %v16380_v24 = vpop.f32.mrf.mxu1 }
0x1070   :  { %v16381_v14 = vadd.f32 %v16380_v24, %v16306_v17  ;;  %v50037_v59 = vpop.f32.mrf.mxu0  ;;  %v17520_v17 = vsel %vm76_vm0, %v17513_v5, 0 }
0x1071   :  { %v50030_v6 = vpop.f32.mrf.mxu1 }
0x1072   :  { %v16458_v13 = vadd.f32 %v16457_v30, %v16381_v14  ;;  %v17523_v14 = vsel %vm76_vm0, %v17514_v20, 0 }
0x1074   :  { %v16530_v41 = vpop.f32.mrf.mxu1 }
0x1075   :  { %v54416_v36 = vadd.f32 %v16530_v41, %v16458_v13  ;;  %v50051_v7 = vpop.f32.mrf.mxu0  ;;  %v54432_v13 = vand.u32 4294901760, %v17520_v17  ;;  %v54435_v41 = vand.u32 4294901760, %v17523_v14 }
0x1076   :  { %v50044_v25 = vpop.f32.mrf.mxu1 }
0x1077   :  { %v16607_v29 = vpop.f32.mrf.mxu0  ;;  %v54442_v8 = vsub.f32 %v17520_v17, %v54432_v13  ;;  %v54446_v19 = vsub.f32 %v17523_v14, %v54435_v41 }
0x1079   :  { %v54456_v18 = vand.u32 4294901760, %v54446_v19 }
0x107a   :  { %v50058_v26 = vpop.f32.mrf.mxu1 }
0x107b   :  { %v16705_v15 = vadd.f32 %v50058_v26, %v50051_v7  ;;  %v50065_v46 = vpop.f32.mrf.mxu0 }
0x107c   :  { %v16698_v56 = vpop.f32.mrf.mxu1 }
0x107d   :  { %v16788_v3 = vadd.f32 %v50065_v46, %v16705_v15  ;;  %v16699_v34 = vadd.f32 %v16698_v56, %v16607_v29  ;;  %v16780_v60 = vpop.f32.mrf.mxu0  ;;  %v54451_v46 = vand.u32 4294901760, %v54442_v8  ;;  %v17605_v56 = vsub.f32 %v54446_v19, %v54456_v18 }
0x107f   :  { %v16781_v37 = vadd.f32 %v16780_v60, %v16699_v34  ;;  %v17595_v27 = vsub.f32 %v54442_v8, %v54451_v46  ;;  %v57126_v34 = vld [vmem:[#allocation12_spill] sm:$0xff]  ;;  %v57127_v60 = vld [vmem:[#allocation17_spill] sm:$0xff] }
0x1080   :  { %v50072_v22 = vpop.f32.mrf.mxu1 }
0x1081   :  { %v16871_v33 = vadd.f32 %v50072_v22, %v16788_v3  ;;  %v50079_v32 = vpop.f32.mrf.mxu0  ;;  %v54473_v39 = vand.u32 4294901760, %v17595_v27  ;;  %v54477_v3 = vand.u32 4294901760, %v17605_v56  ;;  %v57129_v22 = vld [vmem:[#allocation18_spill] sm:$0xff] }
0x1082   :  { %v16862_v28 = vpop.f32.mrf.mxu1 }
0x1083   :  { %v16954_v63 = vadd.f32 %v50079_v32, %v16871_v33  ;;  %v16863_v52 = vadd.f32 %v16862_v28, %v16781_v37  ;;  %v16947_v0 = vpop.f32.mrf.mxu0  ;;  %v57128_v37 = vld [vmem:[#allocation13_spill] sm:$0xff]  ;;  %v57130_v33 = vld [vmem:[#allocation14_spill] sm:$0xff]  ;;  %v57131_v32 = vld [vmem:[#allocation15_spill] sm:$0xff] }
0x1084   :  { %v57132_v28 = vld [vmem:[#allocation16_spill] sm:$0xff] }
0x1085   :  { %v16948_v58 = vadd.f32 %v16947_v0, %v16863_v52  ;;  %v50086_v21 = vpop.f32.mrf.mxu1 }
0x1086   :  { %v17033_v9 = vadd.f32 %v50086_v21, %v16954_v63 }
0x1087   :  { %v17026_v1 = vpop.f32.mrf.mxu1 }
0x1088   :  { %v17065_v30 = vand.u32 4294901760, %v17033_v9  ;;  %v17027_v24 = vadd.f32 %v17026_v1, %v16948_v58 }
0x108a   :  { %v17143_v59 = vsub.f32 %v17033_v9, %v17065_v30  ;;  %v17068_v6 = vand.u32 4294901760, %v17027_v24  ;;  %50088 = vmatpush3.msra.mxu0 %v17065_v30 }
0x108b   :  { %50089 = vmatprep.subr.mxu0 %v57103_v40 }
0x108c   :  { %v17144_v7 = vand.u32 4294901760, %v17143_v59  ;;  %v17150_v25 = vsub.f32 %v17027_v24, %v17068_v6  ;;  %50090 = vmatpush3.msra.mxu0 %v17068_v6 }
0x108d   :  { %50101 = vmatprep.subr.mxu0 %v57103_v40  ;;  %50092 = vmatmul.mubr.f32.vlgmr.msra.gmra.mxu0 %v53241_v51 }
0x108e   :  { %v17145_v29 = vsub.f32 %v17143_v59, %v17144_v7  ;;  %v17151_v31 = vand.u32 4294901760, %v17150_v25  ;;  %50102 = vmatpush3.msra.mxu0 %v17143_v59  ;;  %50105 = vmatprep.mubr.msk.f32.mxu0 %vm52763_vm1, %v57103_v40 }
0x108f   :  { %50103 = vmatprep.subr.mxu0 %v57103_v40 }
0x1090   :  { %50104 = vmatpush3.msra.mxu0 %v17150_v25  ;;  %v17146_v16 = vand.u32 4294901760, %v17145_v29  ;;  %v17152_v26 = vsub.f32 %v17150_v25, %v17151_v31 }
0x1091   :  { %50115 = vmatprep.subr.mxu0 %v57103_v40  ;;  %50106 = vmatmul.mubr.f32.vlgmr.msra.gmra.mxu0 %v53234_v35 }
0x1092   :  { %50095 = vmatpush3.msra.mxu1 %v17146_v16  ;;  %50116 = vmatpush3.msra.mxu0 %v17144_v7  ;;  %v17153_v15 = vand.u32 4294901760, %v17152_v26 }
0x1093   :  { %50096 = vmatprep.subr.mxu1 %v57103_v40  ;;  %50117 = vmatprep.subr.mxu0 %v57103_v40 }
0x1094   :  { %50097 = vmatpush3.msra.mxu1 %v17153_v15  ;;  %50118 = vmatpush3.msra.mxu0 %v17151_v31 }
0x1095   :  { %50099 = vmatmul.mubr.f32.vlgmr.msra.gmra.mxu1 %v53231_v45  ;;  %50108 = vmatprep.subr.mxu1 %v57103_v40 }
0x1096   :  { %50109 = vmatpush3.msra.mxu1 %v17065_v30  ;;  %50112 = vmatprep.mubr.msk.f32.mxu1 %vm52763_vm1, %v57103_v40 }
0x1097   :  { %50110 = vmatprep.subr.mxu1 %v57103_v40  ;;  %50119 = vmatprep.mubr.msk.f32.mxu0 %vm52763_vm1, %v57103_v40 }
0x1098   :  { %50111 = vmatpush3.msra.mxu1 %v17068_v6  ;;  %50120 = vmatmul.mubr.f32.vlgmr.msra.gmra.mxu0 %v53231_v45 }
0x1099   :  { %50113 = vmatmul.mubr.f32.vlgmr.msra.gmra.mxu1 %v53237_v61  ;;  %50122 = vmatprep.subr.mxu1 %v57103_v40 }
0x109a   :  { %50129 = vmatprep.subr.mxu0 %v57125_v2  ;;  %50123 = vmatpush3.msra.mxu1 %v17065_v30 }
0x109b   :  { %50130 = vmatpush3.msra.mxu0 %v57125_v2  ;;  %50124 = vmatprep.subr.mxu1 %v57103_v40 }
0x109c   :  { %50131 = vmatprep.subr.mxu0 %v57126_v34  ;;  %50125 = vmatpush3.msra.mxu1 %v17068_v6 }
0x109d   :  { %50126 = vmatprep.mubr.msk.f32.mxu1 %vm52763_vm1, %v57103_v40  ;;  %50132 = vmatpush3.msra.mxu0 %v57126_v34 }
0x109e   :  { %50133 = vmatprep.mubr.f32.mxu0 %v54473_v39  ;;  %50127 = vmatmul.mubr.f32.vlgmr.msra.gmra.mxu1 %v53231_v45 }
0x109f   :  { %50134 = vmatmul.mubr.f32.vlgmr.msra.gmra.mxu0 %v54477_v3  ;;  %50136 = vmatprep.subr.mxu1 %v57127_v60 }
0x10a0   :  { %50143 = vmatprep.subr.mxu0 %v57128_v37  ;;  %50137 = vmatpush3.msra.mxu1 %v57127_v60 }
0x10a1   :  { %50144 = vmatpush3.msra.mxu0 %v57128_v37  ;;  %50138 = vmatprep.subr.mxu1 %v57129_v22 }
0x10a2   :  { %50145 = vmatprep.subr.mxu0 %v57130_v33  ;;  %50139 = vmatpush3.msra.mxu1 %v57129_v22 }
0x10a3   :  { %50140 = vmatprep.mubr.f32.mxu1 %v54432_v13  ;;  %50146 = vmatpush3.msra.mxu0 %v57130_v33 }
0x10a4   :  { %50147 = vmatprep.mubr.f32.mxu0 %v54442_v8  ;;  %50141 = vmatmul.mubr.f32.vlgmr.msra.gmra.mxu1 %v54435_v41 }
0x10a5   :  { %50148 = vmatmul.mubr.f32.vlgmr.msra.gmra.mxu0 %v54446_v19  ;;  %50150 = vmatprep.subr.mxu1 %v57125_v2 }
0x10a6   :  { %50157 = vmatprep.subr.mxu0 %v57131_v32  ;;  %50151 = vmatpush3.msra.mxu1 %v57125_v2 }
0x10a7   :  { %50158 = vmatpush3.msra.mxu0 %v57131_v32  ;;  %50152 = vmatprep.subr.mxu1 %v57126_v34 }
0x10a8   :  { %50159 = vmatprep.subr.mxu0 %v57132_v28  ;;  %50153 = vmatpush3.msra.mxu1 %v57126_v34 }
0x10a9   :  { %50154 = vmatprep.mubr.f32.mxu1 %v54451_v46  ;;  %50160 = vmatpush3.msra.mxu0 %v57132_v28 }
0x10aa   :  { %50161 = vmatprep.mubr.f32.mxu0 %v54432_v13  ;;  %50155 = vmatmul.mubr.f32.vlgmr.msra.gmra.mxu1 %v54456_v18 }
0x10ab   :  { %50162 = vmatmul.mubr.f32.vlgmr.msra.gmra.mxu0 %v54435_v41  ;;  %50164 = vmatprep.subr.mxu1 %v57125_v2 }
0x10ac   :  { %50165 = vmatpush3.msra.mxu1 %v57125_v2  ;;  %50168 = vmatprep.mubr.f32.mxu1 %v54432_v13 }
0x10ad   :  { %50166 = vmatprep.subr.mxu1 %v57126_v34  ;;  %50171 = vmatprep.subr.mxu0 %v57103_v40 }
0x10ae   :  { %50167 = vmatpush3.msra.mxu1 %v57126_v34  ;;  %50175 = vmatprep.mubr.msk.f32.mxu0 %vm52763_vm1, %v57103_v40 }
0x10af   :  { %50169 = vmatmul.mubr.f32.vlgmr.msra.gmra.mxu1 %v54435_v41  ;;  %50178 = vmatprep.subr.mxu1 %v57103_v40 }
0x10b0   :  { %50182 = vmatprep.mubr.msk.f32.mxu1 %vm52763_vm1, %v57103_v40 }
0x114d   :  { %v17109_v63 = vpop.f32.mrf.mxu0 }
0x114f   :  { %v50093_v52 = vpop.f32.mrf.mxu0 }
0x1151   :  { %v17266_v5 = vpop.f32.mrf.mxu0 }
0x1153   :  { %v50107_v0 = vpop.f32.mrf.mxu0 }
0x1155   :  { %v17190_v20 = vpop.f32.mrf.mxu1 }
0x1156   :  { %v17191_v58 = vadd.f32 %v17190_v20, %v17109_v63 }
0x1157   :  { %v50100_v21 = vpop.f32.mrf.mxu1 }
0x1158   :  { %v17267_v9 = vadd.f32 %v17266_v5, %v17191_v58  ;;  %v17418_v1 = vpop.f32.mrf.mxu0 }
0x1159   :  { %v17341_v17 = vpop.f32.mrf.mxu1 }
0x115a   :  { %v17342_v30 = vadd.f32 %v17341_v17, %v17267_v9  ;;  %v50121_v24 = vpop.f32.mrf.mxu0 }
0x115b   :  { %v50114_v14 = vpop.f32.mrf.mxu1  ;;  %v17516_v24 = vmul.f32 %v54422_v57, %v54422_v57 }
0x115c   :  { %v17419_v59 = vadd.f32 %v17418_v1, %v17342_v30  ;;  %v17515_v30 = vmul.f32 %v54418_v48, %v54418_v48 }
0x115e   :  { %v17491_v6 = vpop.f32.mrf.mxu1 }
0x115f   :  { %v17492_v7 = vadd.f32 %v17491_v6, %v17419_v59  ;;  %v50135_v25 = vpop.f32.mrf.mxu0 }
0x1160   :  { %v50128_v29 = vpop.f32.mrf.mxu1 }
0x1161   :  { %v54523_v31 = vmul.f32 %v17492_v7, %v54416_v36  ;;  %v17598_v16 = vpop.f32.mrf.mxu0 }
0x1163   :  { %52670 = vrsqrt.f32 %v54523_v31 }
0x1164   :  { %v50142_v26 = vpop.f32.mrf.mxu1 }
0x1165   :  { %v17696_v15 = vadd.f32 %v50142_v26, %v50135_v25  ;;  %v50149_v27 = vpop.f32.mrf.mxu0  ;;  %v18487_v25 = vsel %vm76_vm0, %v17515_v30, 0  ;;  %v18490_v26 = vsel %vm76_vm0, %v17516_v24, 0 }
0x1166   :  { %v17689_v56 = vpop.f32.mrf.mxu1  ;;  %v54534_v48 = vand.u32 4294901760, %v18490_v26 }
0x1167   :  { %v17779_v63 = vadd.f32 %v50149_v27, %v17696_v15  ;;  %v17690_v52 = vadd.f32 %v17689_v56, %v17598_v16  ;;  %v17771_v5 = vpop.f32.mrf.mxu0  ;;  %v54531_v56 = vand.u32 4294901760, %v18487_v25 }
0x1169   :  { %v17772_v0 = vadd.f32 %v17771_v5, %v17690_v52 }
0x116a   :  { %v50156_v20 = vpop.f32.mrf.mxu1 }
0x116b   :  { %v17862_v58 = vadd.f32 %v50156_v20, %v17779_v63  ;;  %v50163_v21 = vpop.f32.mrf.mxu0  ;;  %v54545_v20 = vsub.f32 %v18490_v26, %v54534_v48 }
0x116c   :  { %v17853_v9 = vpop.f32.mrf.mxu1 }
0x116d   :  { %v17945_v1 = vadd.f32 %v50163_v21, %v17862_v58  ;;  %v17854_v17 = vadd.f32 %v17853_v9, %v17772_v0  ;;  %v17938_v36 = vpop.f32.mrf.mxu0  ;;  %v54541_v0 = vsub.f32 %v18487_v25, %v54531_v56 }
0x116f   :  { %v17939_v14 = vadd.f32 %v17938_v36, %v17854_v17  ;;  %v50170_v59 = vpop.f32.mrf.mxu1  ;;  %v54555_v17 = vand.u32 4294901760, %v54545_v20 }
0x1170   :  { %v18024_v6 = vadd.f32 %v50170_v59, %v17945_v1  ;;  %v54550_v1 = vand.u32 4294901760, %v54541_v0  ;;  %v52671_v31 = vpop.eup %52670 }
0x1171   :  { %v18017_v7 = vpop.f32.mrf.mxu1  ;;  %57134 = vst [vmem:[#allocation19_spill] sm:$0xff] %v54555_v17  ;;  %v18572_v36 = vsub.f32 %v54545_v20, %v54555_v17  ;;  %v17497_v59 = vmul.f32 %v52671_v31, %v54348_v38 }
0x1172   :  { %v18056_v29 = vand.u32 4294901760, %v18024_v6  ;;  %v18018_v16 = vadd.f32 %v18017_v7, %v17939_v14  ;;  %57133 = vst [vmem:[#allocation21_spill] sm:$0xff] %v54550_v1  ;;  %v18562_v30 = vsub.f32 %v54541_v0, %v54550_v1 }
0x1173   :  { %v54576_v14 = vand.u32 4294901760, %v18572_v36 }
0x1174   :  { %v18134_v15 = vsub.f32 %v18024_v6, %v18056_v29  ;;  %v18059_v27 = vand.u32 4294901760, %v18018_v16  ;;  %50172 = vmatpush3.msra.mxu0 %v18056_v29  ;;  %v54572_v24 = vand.u32 4294901760, %v18562_v30  ;;  %v57135_v6 = vld [vmem:[#allocation22_spill] sm:$0xff] }
0x1175   :  { %50173 = vmatprep.subr.mxu0 %v57103_v40  ;;  %v54624_v7 = vadd.f32 %v17497_v59, %v57135_v6 }
0x1176   :  { %v18135_v57 = vand.u32 4294901760, %v18134_v15  ;;  %v18141_v63 = vsub.f32 %v18018_v16, %v18059_v27  ;;  %50174 = vmatpush3.msra.mxu0 %v18059_v27 }
0x1177   :  { %50185 = vmatprep.subr.mxu0 %v57103_v40  ;;  %50176 = vmatmul.mubr.f32.vlgmr.msra.gmra.mxu0 %v52936_v12  ;;  %57136 = vst [vmem:[#allocation20_spill] sm:$0xff] %v54624_v7 }
0x1178   :  { %v18136_v52 = vsub.f32 %v18134_v15, %v18135_v57  ;;  %v18142_v5 = vand.u32 4294901760, %v18141_v63  ;;  %50186 = vmatpush3.msra.mxu0 %v18134_v15  ;;  %50189 = vmatprep.mubr.msk.f32.mxu0 %vm52763_vm1, %v57103_v40 }
0x1179   :  { %50187 = vmatprep.subr.mxu0 %v57103_v40 }
0x117a   :  { %50188 = vmatpush3.msra.mxu0 %v18141_v63  ;;  %v18137_v58 = vand.u32 4294901760, %v18136_v52  ;;  %v18143_v21 = vsub.f32 %v18141_v63, %v18142_v5 }
0x117b   :  { %50199 = vmatprep.subr.mxu0 %v57103_v40  ;;  %50190 = vmatmul.mubr.f32.vlgmr.msra.gmra.mxu0 %v52923_v47 }
0x117c   :  { %50179 = vmatpush3.msra.mxu1 %v18137_v58  ;;  %50200 = vmatpush3.msra.mxu0 %v18135_v57  ;;  %v18144_v9 = vand.u32 4294901760, %v18143_v21 }
0x117d   :  { %50180 = vmatprep.subr.mxu1 %v57103_v40  ;;  %50201 = vmatprep.subr.mxu0 %v57103_v40 }
0x117e   :  { %50181 = vmatpush3.msra.mxu1 %v18144_v9  ;;  %50202 = vmatpush3.msra.mxu0 %v18142_v5 }
0x117f   :  { %50183 = vmatmul.mubr.f32.vlgmr.msra.gmra.mxu1 %v52920_v43  ;;  %50192 = vmatprep.subr.mxu1 %v57103_v40 }
0x1180   :  { %50193 = vmatpush3.msra.mxu1 %v18056_v29  ;;  %50196 = vmatprep.mubr.msk.f32.mxu1 %vm52763_vm1, %v57103_v40 }
0x1181   :  { %50194 = vmatprep.subr.mxu1 %v57103_v40  ;;  %50203 = vmatprep.mubr.msk.f32.mxu0 %vm52763_vm1, %v57103_v40 }
0x1182   :  { %50195 = vmatpush3.msra.mxu1 %v18059_v27  ;;  %50204 = vmatmul.mubr.f32.vlgmr.msra.gmra.mxu0 %v52920_v43 }
0x1183   :  { %50197 = vmatmul.mubr.f32.vlgmr.msra.gmra.mxu1 %v52926_v54  ;;  %50206 = vmatprep.subr.mxu1 %v57103_v40 }
0x1184   :  { %50213 = vmatprep.subr.mxu0 %v57125_v2  ;;  %50207 = vmatpush3.msra.mxu1 %v18056_v29 }
0x1185   :  { %50214 = vmatpush3.msra.mxu0 %v57125_v2  ;;  %50208 = vmatprep.subr.mxu1 %v57103_v40 }
0x1186   :  { %50215 = vmatprep.subr.mxu0 %v57126_v34  ;;  %50209 = vmatpush3.msra.mxu1 %v18059_v27 }
0x1187   :  { %50210 = vmatprep.mubr.msk.f32.mxu1 %vm52763_vm1, %v57103_v40  ;;  %50216 = vmatpush3.msra.mxu0 %v57126_v34 }
0x1188   :  { %50217 = vmatprep.mubr.f32.mxu0 %v54572_v24  ;;  %50211 = vmatmul.mubr.f32.vlgmr.msra.gmra.mxu1 %v52920_v43 }
0x1189   :  { %50218 = vmatmul.mubr.f32.vlgmr.msra.gmra.mxu0 %v54576_v14  ;;  %50220 = vmatprep.subr.mxu1 %v57127_v60 }
0x118a   :  { %50227 = vmatprep.subr.mxu0 %v57128_v37  ;;  %50221 = vmatpush3.msra.mxu1 %v57127_v60 }
0x118b   :  { %50228 = vmatpush3.msra.mxu0 %v57128_v37  ;;  %50222 = vmatprep.subr.mxu1 %v57129_v22 }
0x118c   :  { %50229 = vmatprep.subr.mxu0 %v57130_v33  ;;  %50223 = vmatpush3.msra.mxu1 %v57129_v22 }
0x118d   :  { %50224 = vmatprep.mubr.f32.mxu1 %v54531_v56  ;;  %50230 = vmatpush3.msra.mxu0 %v57130_v33 }
0x118e   :  { %50231 = vmatprep.mubr.f32.mxu0 %v54541_v0  ;;  %50225 = vmatmul.mubr.f32.vlgmr.msra.gmra.mxu1 %v54534_v48 }
0x118f   :  { %50232 = vmatmul.mubr.f32.vlgmr.msra.gmra.mxu0 %v54545_v20  ;;  %50234 = vmatprep.subr.mxu1 %v57125_v2 }
0x1190   :  { %50241 = vmatprep.subr.mxu0 %v57131_v32  ;;  %50235 = vmatpush3.msra.mxu1 %v57125_v2 }
0x1191   :  { %50242 = vmatpush3.msra.mxu0 %v57131_v32  ;;  %50236 = vmatprep.subr.mxu1 %v57126_v34 }
0x1192   :  { %50243 = vmatprep.subr.mxu0 %v57132_v28  ;;  %50237 = vmatpush3.msra.mxu1 %v57126_v34 }
0x1193   :  { %50238 = vmatprep.mubr.f32.mxu1 %v54550_v1  ;;  %50244 = vmatpush3.msra.mxu0 %v57132_v28 }
0x1194   :  { %50245 = vmatprep.mubr.f32.mxu0 %v54531_v56  ;;  %50239 = vmatmul.mubr.f32.vlgmr.msra.gmra.mxu1 %v54555_v17 }
0x1195   :  { %50246 = vmatmul.mubr.f32.vlgmr.msra.gmra.mxu0 %v54534_v48  ;;  %50248 = vmatprep.subr.mxu1 %v57125_v2 }
0x1196   :  { %50249 = vmatpush3.msra.mxu1 %v57125_v2  ;;  %50252 = vmatprep.mubr.f32.mxu1 %v54531_v56 }
0x1197   :  { %50250 = vmatprep.subr.mxu1 %v57126_v34  ;;  %50255 = vmatprep.subr.mxu0 %v57103_v40 }
0x1198   :  { %50251 = vmatpush3.msra.mxu1 %v57126_v34  ;;  %50259 = vmatprep.mubr.msk.f32.mxu0 %vm52763_vm1, %v57103_v40 }
0x1199   :  { %50253 = vmatmul.mubr.f32.vlgmr.msra.gmra.mxu1 %v54534_v48  ;;  %50262 = vmatprep.subr.mxu1 %v57103_v40 }
0x119a   :  { %50266 = vmatprep.mubr.msk.f32.mxu1 %vm52763_vm1, %v57103_v40 }
0x1237   :  { %v18100_v25 = vpop.f32.mrf.mxu0 }
0x1239   :  { %v50177_v29 = vpop.f32.mrf.mxu0 }
0x123b   :  { %v18257_v16 = vpop.f32.mrf.mxu0 }
0x123d   :  { %v50191_v26 = vpop.f32.mrf.mxu0 }
0x123f   :  { %v18181_v15 = vpop.f32.mrf.mxu1 }
0x1240   :  { %v18182_v27 = vadd.f32 %v18181_v15, %v18100_v25 }
0x1241   :  { %v50184_v57 = vpop.f32.mrf.mxu1 }
0x1242   :  { %v18258_v63 = vadd.f32 %v18257_v16, %v18182_v27  ;;  %v18409_v52 = vpop.f32.mrf.mxu0 }
0x1243   :  { %v18332_v5 = vpop.f32.mrf.mxu1 }
0x1244   :  { %v18333_v58 = vadd.f32 %v18332_v5, %v18258_v63  ;;  %v50205_v21 = vpop.f32.mrf.mxu0 }
0x1245   :  { %v50198_v9 = vpop.f32.mrf.mxu1 }
0x1246   :  { %v18410_v30 = vadd.f32 %v18409_v52, %v18333_v58  ;;  %v17517_v58 = vmul.f32 %v54420_v42, %v54420_v42 }
0x1248   :  { %v18482_v36 = vpop.f32.mrf.mxu1 }
0x1249   :  { %v54626_v17 = vadd.f32 %v18482_v36, %v18410_v30  ;;  %v50219_v38 = vpop.f32.mrf.mxu0  ;;  %v17518_v30 = vmul.f32 %v54424_v10, %v54424_v10 }
0x124a   :  { %v50212_v31 = vpop.f32.mrf.mxu1 }
0x124b   :  { %v18565_v59 = vpop.f32.mrf.mxu0 }
0x124e   :  { %v50226_v6 = vpop.f32.mrf.mxu1 }
0x124f   :  { %v18663_v29 = vadd.f32 %v50226_v6, %v50219_v38  ;;  %v50233_v7 = vpop.f32.mrf.mxu0 }
0x1250   :  { %v18656_v26 = vpop.f32.mrf.mxu1 }
0x1251   :  { %v18746_v1 = vadd.f32 %v50233_v7, %v18663_v29  ;;  %v18657_v25 = vadd.f32 %v18656_v26, %v18565_v59  ;;  %v18738_v15 = vpop.f32.mrf.mxu0  ;;  %v19454_v59 = vsel %vm76_vm0, %v17517_v58, 0 }
0x1253   :  { %v18739_v16 = vadd.f32 %v18738_v15, %v18657_v25  ;;  %v54634_v15 = vand.u32 4294901760, %v19454_v59 }
0x1254   :  { %v50240_v27 = vpop.f32.mrf.mxu1 }
0x1255   :  { %v18829_v57 = vadd.f32 %v50240_v27, %v18746_v1  ;;  %v50247_v63 = vpop.f32.mrf.mxu0  ;;  %v19457_v1 = vsel %vm76_vm0, %v17518_v30, 0 }
0x1256   :  { %v18820_v5 = vpop.f32.mrf.mxu1  ;;  %v54637_v42 = vand.u32 4294901760, %v19457_v1 }
0x1257   :  { %v18912_v21 = vadd.f32 %v50247_v63, %v18829_v57  ;;  %v18821_v52 = vadd.f32 %v18820_v5, %v18739_v16  ;;  %v18905_v9 = vpop.f32.mrf.mxu0  ;;  %v54644_v63 = vsub.f32 %v19454_v59, %v54634_v15 }
0x1258   :  { %v54648_v5 = vsub.f32 %v19457_v1, %v54637_v42 }
0x1259   :  { %v18906_v36 = vadd.f32 %v18905_v9, %v18821_v52  ;;  %v50254_v38 = vpop.f32.mrf.mxu1  ;;  %v54653_v9 = vand.u32 4294901760, %v54644_v63 }
0x125a   :  { %v18991_v31 = vadd.f32 %v50254_v38, %v18912_v21  ;;  %v54658_v30 = vand.u32 4294901760, %v54648_v5 }
0x125b   :  { %v18984_v7 = vpop.f32.mrf.mxu1 }
0x125c   :  { %v19023_v6 = vand.u32 4294901760, %v18991_v31  ;;  %v18985_v29 = vadd.f32 %v18984_v7, %v18906_v36  ;;  %57137 = vst [vmem:[#allocation22_spill] sm:$0xff] %v54658_v30  ;;  %v19529_v36 = vsub.f32 %v54644_v63, %v54653_v9  ;;  %v19539_v38 = vsub.f32 %v54648_v5, %v54658_v30 }
0x125e   :  { %v19101_v26 = vsub.f32 %v18991_v31, %v19023_v6  ;;  %v19026_v25 = vand.u32 4294901760, %v18985_v29  ;;  %50256 = vmatpush3.msra.mxu0 %v19023_v6  ;;  %v54675_v31 = vand.u32 4294901760, %v19529_v36  ;;  %v54679_v7 = vand.u32 4294901760, %v19539_v38 }
0x125f   :  { %50257 = vmatprep.subr.mxu0 %v57103_v40 }
0x1260   :  { %v19102_v10 = vand.u32 4294901760, %v19101_v26  ;;  %v19108_v16 = vsub.f32 %v18985_v29, %v19026_v25  ;;  %50258 = vmatpush3.msra.mxu0 %v19026_v25 }
0x1261   :  { %50269 = vmatprep.subr.mxu0 %v57103_v40  ;;  %50260 = vmatmul.mubr.f32.vlgmr.msra.gmra.mxu0 %v52936_v12 }
0x1262   :  { %v19103_v27 = vsub.f32 %v19101_v26, %v19102_v10  ;;  %v19109_v57 = vand.u32 4294901760, %v19108_v16  ;;  %50270 = vmatpush3.msra.mxu0 %v19101_v26  ;;  %50273 = vmatprep.mubr.msk.f32.mxu0 %vm52763_vm1, %v57103_v40 }
0x1263   :  { %50271 = vmatprep.subr.mxu0 %v57103_v40 }
0x1264   :  { %50272 = vmatpush3.msra.mxu0 %v19108_v16  ;;  %v19104_v21 = vand.u32 4294901760, %v19103_v27  ;;  %v19110_v52 = vsub.f32 %v19108_v16, %v19109_v57 }
0x1265   :  { %50283 = vmatprep.subr.mxu0 %v57103_v40  ;;  %50274 = vmatmul.mubr.f32.vlgmr.msra.gmra.mxu0 %v52923_v47 }
0x1266   :  { %50263 = vmatpush3.msra.mxu1 %v19104_v21  ;;  %50284 = vmatpush3.msra.mxu0 %v19102_v10  ;;  %v19111_v58 = vand.u32 4294901760, %v19110_v52 }
0x1267   :  { %50264 = vmatprep.subr.mxu1 %v57103_v40  ;;  %50285 = vmatprep.subr.mxu0 %v57103_v40 }
0x1268   :  { %50265 = vmatpush3.msra.mxu1 %v19111_v58  ;;  %50286 = vmatpush3.msra.mxu0 %v19109_v57 }
0x1269   :  { %50267 = vmatmul.mubr.f32.vlgmr.msra.gmra.mxu1 %v52920_v43  ;;  %50276 = vmatprep.subr.mxu1 %v57103_v40 }
0x126a   :  { %50277 = vmatpush3.msra.mxu1 %v19023_v6  ;;  %50280 = vmatprep.mubr.msk.f32.mxu1 %vm52763_vm1, %v57103_v40 }
0x126b   :  { %50278 = vmatprep.subr.mxu1 %v57103_v40  ;;  %50287 = vmatprep.mubr.msk.f32.mxu0 %vm52763_vm1, %v57103_v40 }
0x126c   :  { %50279 = vmatpush3.msra.mxu1 %v19026_v25  ;;  %50288 = vmatmul.mubr.f32.vlgmr.msra.gmra.mxu0 %v52920_v43 }
0x126d   :  { %50281 = vmatmul.mubr.f32.vlgmr.msra.gmra.mxu1 %v52926_v54  ;;  %50290 = vmatprep.subr.mxu1 %v57103_v40 }
0x126e   :  { %50297 = vmatprep.subr.mxu0 %v57125_v2  ;;  %50291 = vmatpush3.msra.mxu1 %v19023_v6 }
0x126f   :  { %50298 = vmatpush3.msra.mxu0 %v57125_v2  ;;  %50292 = vmatprep.subr.mxu1 %v57103_v40 }
0x1270   :  { %50299 = vmatprep.subr.mxu0 %v57126_v34  ;;  %50293 = vmatpush3.msra.mxu1 %v19026_v25 }
0x1271   :  { %50294 = vmatprep.mubr.msk.f32.mxu1 %vm52763_vm1, %v57103_v40  ;;  %50300 = vmatpush3.msra.mxu0 %v57126_v34 }
0x1272   :  { %50301 = vmatprep.mubr.f32.mxu0 %v54675_v31  ;;  %50295 = vmatmul.mubr.f32.vlgmr.msra.gmra.mxu1 %v52920_v43 }
0x1273   :  { %50302 = vmatmul.mubr.f32.vlgmr.msra.gmra.mxu0 %v54679_v7  ;;  %50304 = vmatprep.subr.mxu1 %v57127_v60 }
0x1274   :  { %50311 = vmatprep.subr.mxu0 %v57128_v37  ;;  %50305 = vmatpush3.msra.mxu1 %v57127_v60 }
0x1275   :  { %50312 = vmatpush3.msra.mxu0 %v57128_v37  ;;  %50306 = vmatprep.subr.mxu1 %v57129_v22 }
0x1276   :  { %50313 = vmatprep.subr.mxu0 %v57130_v33  ;;  %50307 = vmatpush3.msra.mxu1 %v57129_v22 }
0x1277   :  { %50308 = vmatprep.mubr.f32.mxu1 %v54634_v15  ;;  %50314 = vmatpush3.msra.mxu0 %v57130_v33 }
0x1278   :  { %50315 = vmatprep.mubr.f32.mxu0 %v54644_v63  ;;  %50309 = vmatmul.mubr.f32.vlgmr.msra.gmra.mxu1 %v54637_v42 }
0x1279   :  { %50316 = vmatmul.mubr.f32.vlgmr.msra.gmra.mxu0 %v54648_v5  ;;  %50318 = vmatprep.subr.mxu1 %v57125_v2 }
0x127a   :  { %50325 = vmatprep.subr.mxu0 %v57131_v32  ;;  %50319 = vmatpush3.msra.mxu1 %v57125_v2 }
0x127b   :  { %50326 = vmatpush3.msra.mxu0 %v57131_v32  ;;  %50320 = vmatprep.subr.mxu1 %v57126_v34 }
0x127c   :  { %50327 = vmatprep.subr.mxu0 %v57132_v28  ;;  %50321 = vmatpush3.msra.mxu1 %v57126_v34 }
0x127d   :  { %50322 = vmatprep.mubr.f32.mxu1 %v54653_v9  ;;  %50328 = vmatpush3.msra.mxu0 %v57132_v28 }
0x127e   :  { %50329 = vmatprep.mubr.f32.mxu0 %v54634_v15  ;;  %50323 = vmatmul.mubr.f32.vlgmr.msra.gmra.mxu1 %v54658_v30 }
0x127f   :  { %50330 = vmatmul.mubr.f32.vlgmr.msra.gmra.mxu0 %v54637_v42  ;;  %50332 = vmatprep.subr.mxu1 %v57125_v2 }
0x1280   :  { %50333 = vmatpush3.msra.mxu1 %v57125_v2  ;;  %50336 = vmatprep.mubr.f32.mxu1 %v54634_v15 }
0x1281   :  { %50334 = vmatprep.subr.mxu1 %v57126_v34  ;;  %50339 = vmatprep.subr.mxu0 %v57103_v40 }
0x1282   :  { %50335 = vmatpush3.msra.mxu1 %v57126_v34  ;;  %50343 = vmatprep.mubr.msk.f32.mxu0 %vm52763_vm1, %v57103_v40 }
0x1283   :  { %50337 = vmatmul.mubr.f32.vlgmr.msra.gmra.mxu1 %v54637_v42  ;;  %50346 = vmatprep.subr.mxu1 %v57103_v40 }
0x1284   :  { %50350 = vmatprep.mubr.msk.f32.mxu1 %vm52763_vm1, %v57103_v40 }
0x1321   :  { %v19067_v59 = vpop.f32.mrf.mxu0 }
0x1323   :  { %v50261_v6 = vpop.f32.mrf.mxu0 }
0x1325   :  { %v19224_v29 = vpop.f32.mrf.mxu0 }
0x1327   :  { %v50275_v1 = vpop.f32.mrf.mxu0 }
0x1329   :  { %v19148_v26 = vpop.f32.mrf.mxu1 }
0x132a   :  { %v19149_v25 = vadd.f32 %v19148_v26, %v19067_v59 }
0x132b   :  { %v50268_v10 = vpop.f32.mrf.mxu1 }
0x132c   :  { %v19225_v16 = vadd.f32 %v19224_v29, %v19149_v25  ;;  %v19376_v27 = vpop.f32.mrf.mxu0 }
0x132d   :  { %v19299_v57 = vpop.f32.mrf.mxu1 }
0x132e   :  { %v19300_v21 = vadd.f32 %v19299_v57, %v19225_v16  ;;  %v50289_v52 = vpop.f32.mrf.mxu0 }
0x132f   :  { %v50282_v58 = vpop.f32.mrf.mxu1 }
0x1330   :  { %v19377_v36 = vadd.f32 %v19376_v27, %v19300_v21 }
0x1332   :  { %v19449_v38 = vpop.f32.mrf.mxu1 }
0x1333   :  { %v54724_v28 = vadd.f32 %v19449_v38, %v19377_v36  ;;  %v50303_v32 = vpop.f32.mrf.mxu0 }
0x1334   :  { %v50296_v33 = vpop.f32.mrf.mxu1 }
0x1335   :  { %v19532_v22 = vpop.f32.mrf.mxu0 }
0x1338   :  { %v50310_v37 = vpop.f32.mrf.mxu1 }
0x1339   :  { %v19630_v6 = vadd.f32 %v50310_v37, %v50303_v32  ;;  %v50317_v60 = vpop.f32.mrf.mxu0 }
0x133a   :  { %v19623_v1 = vpop.f32.mrf.mxu1 }
0x133b   :  { %v19713_v34 = vadd.f32 %v50317_v60, %v19630_v6  ;;  %v19624_v59 = vadd.f32 %v19623_v1, %v19532_v22  ;;  %v19705_v26 = vpop.f32.mrf.mxu0 }
0x133d   :  { %v19706_v29 = vadd.f32 %v19705_v26, %v19624_v59 }
0x133e   :  { %v50324_v25 = vpop.f32.mrf.mxu1 }
0x133f   :  { %v19796_v10 = vadd.f32 %v50324_v25, %v19713_v34  ;;  %v50331_v16 = vpop.f32.mrf.mxu0 }
0x1340   :  { %v19787_v57 = vpop.f32.mrf.mxu1 }
0x1341   :  { %v19879_v52 = vadd.f32 %v50331_v16, %v19796_v10  ;;  %v19788_v27 = vadd.f32 %v19787_v57, %v19706_v29  ;;  %v19872_v21 = vpop.f32.mrf.mxu0 }
0x1343   :  { %v19873_v58 = vadd.f32 %v19872_v21, %v19788_v27  ;;  %v50338_v36 = vpop.f32.mrf.mxu1 }
0x1344   :  { %v19958_v38 = vadd.f32 %v50338_v36, %v19879_v52 }
0x1345   :  { %v19951_v33 = vpop.f32.mrf.mxu1 }
0x1346   :  { %v19990_v2 = vand.u32 4294901760, %v19958_v38  ;;  %v19952_v30 = vadd.f32 %v19951_v33, %v19873_v58 }
0x1348   :  { %v20068_v37 = vsub.f32 %v19958_v38, %v19990_v2  ;;  %v19993_v32 = vand.u32 4294901760, %v19952_v30  ;;  %50340 = vmatpush3.msra.mxu0 %v19990_v2 }
0x1349   :  { %50341 = vmatprep.subr.mxu0 %v57103_v40 }
0x134a   :  { %v20069_v60 = vand.u32 4294901760, %v20068_v37  ;;  %v20075_v22 = vsub.f32 %v19952_v30, %v19993_v32  ;;  %50342 = vmatpush3.msra.mxu0 %v19993_v32 }
0x134b   :  { %50353 = vmatprep.subr.mxu0 %v57103_v40  ;;  %50344 = vmatmul.mubr.f32.vlgmr.msra.gmra.mxu0 %v52936_v12 }
0x134c   :  { %v20070_v34 = vsub.f32 %v20068_v37, %v20069_v60  ;;  %v20076_v6 = vand.u32 4294901760, %v20075_v22  ;;  %50354 = vmatpush3.msra.mxu0 %v20068_v37  ;;  %50357 = vmatprep.mubr.msk.f32.mxu0 %vm52763_vm1, %v57103_v40 }
0x134d   :  { %50355 = vmatprep.subr.mxu0 %v57103_v40 }
0x134e   :  { %50356 = vmatpush3.msra.mxu0 %v20075_v22  ;;  %v20071_v1 = vand.u32 4294901760, %v20070_v34  ;;  %v20077_v59 = vsub.f32 %v20075_v22, %v20076_v6 }
0x134f   :  { %50367 = vmatprep.subr.mxu0 %v57103_v40  ;;  %50358 = vmatmul.mubr.f32.vlgmr.msra.gmra.mxu0 %v52923_v47 }
0x1350   :  { %50347 = vmatpush3.msra.mxu1 %v20071_v1  ;;  %50368 = vmatpush3.msra.mxu0 %v20069_v60  ;;  %v20078_v30 = vand.u32 4294901760, %v20077_v59 }
0x1351   :  { %50348 = vmatprep.subr.mxu1 %v57103_v40  ;;  %50369 = vmatprep.subr.mxu0 %v57103_v40 }
0x1352   :  { %50349 = vmatpush3.msra.mxu1 %v20078_v30  ;;  %50370 = vmatpush3.msra.mxu0 %v20076_v6 }
0x1353   :  { %50351 = vmatmul.mubr.f32.vlgmr.msra.gmra.mxu1 %v52920_v43  ;;  %50360 = vmatprep.subr.mxu1 %v57103_v40 }
0x1354   :  { %50361 = vmatpush3.msra.mxu1 %v19990_v2  ;;  %50364 = vmatprep.mubr.msk.f32.mxu1 %vm52763_vm1, %v57103_v40 }
0x1355   :  { %50362 = vmatprep.subr.mxu1 %v57103_v40  ;;  %50371 = vmatprep.mubr.msk.f32.mxu0 %vm52763_vm1, %v57103_v40 }
0x1356   :  { %50363 = vmatpush3.msra.mxu1 %v19993_v32  ;;  %50372 = vmatmul.mubr.f32.vlgmr.msra.gmra.mxu0 %v52920_v43 }
0x1357   :  { %50365 = vmatmul.mubr.f32.vlgmr.msra.gmra.mxu1 %v52926_v54  ;;  %50374 = vmatprep.subr.mxu1 %v57103_v40 }
0x1358   :  { %50381 = vmatprep.subr.mxu0 %v53134_v4  ;;  %50375 = vmatpush3.msra.mxu1 %v19990_v2 }
0x1359   :  { %50382 = vmatpush3.msra.mxu0 %v53134_v4  ;;  %50376 = vmatprep.subr.mxu1 %v57103_v40 }
0x135a   :  { %50383 = vmatprep.subr.mxu0 %v53137_v11  ;;  %50377 = vmatpush3.msra.mxu1 %v19993_v32 }
0x135b   :  { %50378 = vmatprep.mubr.msk.f32.mxu1 %vm52763_vm1, %v57103_v40  ;;  %50384 = vmatpush3.msra.mxu0 %v53137_v11 }
0x135c   :  { %50385 = vmatprep.mubr.f32.mxu0 %v54473_v39  ;;  %50379 = vmatmul.mubr.f32.vlgmr.msra.gmra.mxu1 %v52920_v43 }
0x135d   :  { %50386 = vmatmul.mubr.f32.vlgmr.msra.gmra.mxu0 %v54477_v3  ;;  %50388 = vmatprep.subr.mxu1 %v53177_v53 }
0x135e   :  { %50395 = vmatprep.subr.mxu0 %v53145_v23  ;;  %50389 = vmatpush3.msra.mxu1 %v53177_v53 }
0x135f   :  { %50396 = vmatpush3.msra.mxu0 %v53145_v23  ;;  %50390 = vmatprep.subr.mxu1 %v53183_v55 }
0x1360   :  { %50397 = vmatprep.subr.mxu0 %v53150_v44  ;;  %50391 = vmatpush3.msra.mxu1 %v53183_v55 }
0x1361   :  { %50392 = vmatprep.mubr.f32.mxu1 %v54432_v13  ;;  %50398 = vmatpush3.msra.mxu0 %v53150_v44 }
0x1362   :  { %50399 = vmatprep.mubr.f32.mxu0 %v54442_v8  ;;  %50393 = vmatmul.mubr.f32.vlgmr.msra.gmra.mxu1 %v54435_v41 }
0x1363   :  { %50400 = vmatmul.mubr.f32.vlgmr.msra.gmra.mxu0 %v54446_v19  ;;  %50402 = vmatprep.subr.mxu1 %v53134_v4 }
0x1364   :  { %50409 = vmatprep.subr.mxu0 %v53155_v49  ;;  %50403 = vmatpush3.msra.mxu1 %v53134_v4 }
0x1365   :  { %50410 = vmatpush3.msra.mxu0 %v53155_v49  ;;  %50404 = vmatprep.subr.mxu1 %v53137_v11 }
0x1366   :  { %50411 = vmatprep.subr.mxu0 %v53160_v50  ;;  %50405 = vmatpush3.msra.mxu1 %v53137_v11 }
0x1367   :  { %50406 = vmatprep.mubr.f32.mxu1 %v54451_v46  ;;  %50412 = vmatpush3.msra.mxu0 %v53160_v50 }
0x1368   :  { %50413 = vmatprep.mubr.f32.mxu0 %v54432_v13  ;;  %50407 = vmatmul.mubr.f32.vlgmr.msra.gmra.mxu1 %v54456_v18 }
0x1369   :  { %50414 = vmatmul.mubr.f32.vlgmr.msra.gmra.mxu0 %v54435_v41  ;;  %50416 = vmatprep.subr.mxu1 %v53134_v4 }
0x136a   :  { %50417 = vmatpush3.msra.mxu1 %v53134_v4  ;;  %50420 = vmatprep.mubr.f32.mxu1 %v54432_v13 }
0x136b   :  { %50418 = vmatprep.subr.mxu1 %v53137_v11  ;;  %50423 = vmatprep.subr.mxu0 %v57103_v40 }
0x136c   :  { %50419 = vmatpush3.msra.mxu1 %v53137_v11  ;;  %50427 = vmatprep.mubr.msk.f32.mxu0 %vm52763_vm1, %v57103_v40 }
0x136d   :  { %50421 = vmatmul.mubr.f32.vlgmr.msra.gmra.mxu1 %v54435_v41  ;;  %50430 = vmatprep.subr.mxu1 %v57103_v40 }
0x136e   :  { %50434 = vmatprep.mubr.msk.f32.mxu1 %vm52763_vm1, %v57103_v40 }
0x140b   :  { %v20034_v8 = vpop.f32.mrf.mxu0 }
0x140d   :  { %v50345_v19 = vpop.f32.mrf.mxu0 }
0x140f   :  { %v20191_v46 = vpop.f32.mrf.mxu0 }
0x1411   :  { %v50359_v13 = vpop.f32.mrf.mxu0 }
0x1413   :  { %v20115_v18 = vpop.f32.mrf.mxu1 }
0x1414   :  { %v20116_v2 = vadd.f32 %v20115_v18, %v20034_v8 }
0x1415   :  { %v50352_v39 = vpop.f32.mrf.mxu1 }
0x1416   :  { %v20192_v3 = vadd.f32 %v20191_v46, %v20116_v2  ;;  %v20343_v26 = vpop.f32.mrf.mxu0 }
0x1417   :  { %v20266_v29 = vpop.f32.mrf.mxu1 }
0x1418   :  { %v20267_v25 = vadd.f32 %v20266_v29, %v20192_v3  ;;  %v50373_v10 = vpop.f32.mrf.mxu0 }
0x1419   :  { %v50366_v16 = vpop.f32.mrf.mxu1 }
0x141a   :  { %v20344_v57 = vadd.f32 %v20343_v26, %v20267_v25 }
0x141c   :  { %v20416_v41 = vpop.f32.mrf.mxu1 }
0x141d   :  { %v20417_v52 = vadd.f32 %v20416_v41, %v20344_v57  ;;  %v50387_v27 = vpop.f32.mrf.mxu0 }
0x141e   :  { %v50380_v21 = vpop.f32.mrf.mxu1 }
0x141f   :  { %v20420_v58 = vmul.f32 %v20417_v52, %v54724_v28  ;;  %v20497_v36 = vpop.f32.mrf.mxu0 }
0x1421   :  { %52672 = vrsqrt.f32 %v20420_v58 }
0x1422   :  { %v50394_v38 = vpop.f32.mrf.mxu1 }
0x1423   :  { %v20595_v33 = vadd.f32 %v50394_v38, %v50387_v27  ;;  %v50401_v37 = vpop.f32.mrf.mxu0 }
0x1424   :  { %v20588_v32 = vpop.f32.mrf.mxu1 }
0x1425   :  { %v20678_v60 = vadd.f32 %v50401_v37, %v20595_v33  ;;  %v20589_v22 = vadd.f32 %v20588_v32, %v20497_v36  ;;  %v20670_v34 = vpop.f32.mrf.mxu0 }
0x1427   :  { %v20671_v6 = vadd.f32 %v20670_v34, %v20589_v22 }
0x1428   :  { %v50408_v1 = vpop.f32.mrf.mxu1 }
0x1429   :  { %v20761_v59 = vadd.f32 %v50408_v1, %v20678_v60  ;;  %v50415_v30 = vpop.f32.mrf.mxu0 }
0x142a   :  { %v20752_v8 = vpop.f32.mrf.mxu1 }
0x142b   :  { %v20844_v19 = vadd.f32 %v50415_v30, %v20761_v59  ;;  %v20753_v46 = vadd.f32 %v20752_v8, %v20671_v6  ;;  %v20837_v13 = vpop.f32.mrf.mxu0 }
0x142d   :  { %v20838_v18 = vadd.f32 %v20837_v13, %v20753_v46  ;;  %v50422_v2 = vpop.f32.mrf.mxu1 }
0x142e   :  { %v20923_v39 = vadd.f32 %v50422_v2, %v20844_v19  ;;  %v52673_v58 = vpop.eup %52672 }
0x142f   :  { %v20916_v28 = vpop.f32.mrf.mxu1  ;;  %v20422_v36 = vmul.f32 %v52673_v58, %v54626_v17 }
0x1430   :  { %v20955_v3 = vand.u32 4294901760, %v20923_v39  ;;  %v20917_v26 = vadd.f32 %v20916_v28, %v20838_v18 }
0x1431   :  { %v54824_v38 = vadd.f32 %v20422_v36, %v54346_v62  ;;  %v57138_v62 = vld [vmem:[#allocation21_spill] sm:$0xff] }
0x1432   :  { %v21033_v29 = vsub.f32 %v20923_v39, %v20955_v3  ;;  %v20958_v25 = vand.u32 4294901760, %v20917_v26  ;;  %50424 = vmatpush3.msra.mxu0 %v20955_v3 }
0x1433   :  { %50425 = vmatprep.subr.mxu0 %v57103_v40 }
0x1434   :  { %v21034_v10 = vand.u32 4294901760, %v21033_v29  ;;  %v21040_v16 = vsub.f32 %v20917_v26, %v20958_v25  ;;  %50426 = vmatpush3.msra.mxu0 %v20958_v25 }
0x1435   :  { %50437 = vmatprep.subr.mxu0 %v57103_v40  ;;  %50428 = vmatmul.mubr.f32.vlgmr.msra.gmra.mxu0 %v53241_v51 }
0x1436   :  { %v21035_v57 = vsub.f32 %v21033_v29, %v21034_v10  ;;  %v21041_v41 = vand.u32 4294901760, %v21040_v16  ;;  %50438 = vmatpush3.msra.mxu0 %v21033_v29  ;;  %50441 = vmatprep.mubr.msk.f32.mxu0 %vm52763_vm1, %v57103_v40 }
0x1437   :  { %50439 = vmatprep.subr.mxu0 %v57103_v40 }
0x1438   :  { %50440 = vmatpush3.msra.mxu0 %v21040_v16  ;;  %v21036_v52 = vand.u32 4294901760, %v21035_v57  ;;  %v21042_v27 = vsub.f32 %v21040_v16, %v21041_v41 }
0x1439   :  { %50451 = vmatprep.subr.mxu0 %v57103_v40  ;;  %50442 = vmatmul.mubr.f32.vlgmr.msra.gmra.mxu0 %v53234_v35 }
0x143a   :  { %50431 = vmatpush3.msra.mxu1 %v21036_v52  ;;  %50452 = vmatpush3.msra.mxu0 %v21034_v10  ;;  %v21043_v21 = vand.u32 4294901760, %v21042_v27 }
0x143b   :  { %50432 = vmatprep.subr.mxu1 %v57103_v40  ;;  %50453 = vmatprep.subr.mxu0 %v57103_v40 }
0x143c   :  { %50433 = vmatpush3.msra.mxu1 %v21043_v21  ;;  %50454 = vmatpush3.msra.mxu0 %v21041_v41 }
0x143d   :  { %50435 = vmatmul.mubr.f32.vlgmr.msra.gmra.mxu1 %v53231_v45  ;;  %50444 = vmatprep.subr.mxu1 %v57103_v40 }
0x143e   :  { %50445 = vmatpush3.msra.mxu1 %v20955_v3  ;;  %50448 = vmatprep.mubr.msk.f32.mxu1 %vm52763_vm1, %v57103_v40 }
0x143f   :  { %50446 = vmatprep.subr.mxu1 %v57103_v40  ;;  %50455 = vmatprep.mubr.msk.f32.mxu0 %vm52763_vm1, %v57103_v40 }
0x1440   :  { %50447 = vmatpush3.msra.mxu1 %v20958_v25  ;;  %50456 = vmatmul.mubr.f32.vlgmr.msra.gmra.mxu0 %v53231_v45 }
0x1441   :  { %50449 = vmatmul.mubr.f32.vlgmr.msra.gmra.mxu1 %v53237_v61  ;;  %50458 = vmatprep.subr.mxu1 %v57103_v40 }
0x1442   :  { %50465 = vmatprep.subr.mxu0 %v53134_v4  ;;  %50459 = vmatpush3.msra.mxu1 %v20955_v3 }
0x1443   :  { %50466 = vmatpush3.msra.mxu0 %v53134_v4  ;;  %50460 = vmatprep.subr.mxu1 %v57103_v40 }
0x1444   :  { %50467 = vmatprep.subr.mxu0 %v53137_v11  ;;  %50461 = vmatpush3.msra.mxu1 %v20958_v25 }
0x1445   :  { %50462 = vmatprep.mubr.msk.f32.mxu1 %vm52763_vm1, %v57103_v40  ;;  %50468 = vmatpush3.msra.mxu0 %v53137_v11 }
0x1446   :  { %50469 = vmatprep.mubr.f32.mxu0 %v54572_v24  ;;  %50463 = vmatmul.mubr.f32.vlgmr.msra.gmra.mxu1 %v53231_v45 }
0x1447   :  { %50470 = vmatmul.mubr.f32.vlgmr.msra.gmra.mxu0 %v54576_v14  ;;  %50472 = vmatprep.subr.mxu1 %v53177_v53 }
0x1448   :  { %50479 = vmatprep.subr.mxu0 %v53145_v23  ;;  %50473 = vmatpush3.msra.mxu1 %v53177_v53 }
0x1449   :  { %50480 = vmatpush3.msra.mxu0 %v53145_v23  ;;  %50474 = vmatprep.subr.mxu1 %v53183_v55 }
0x144a   :  { %50481 = vmatprep.subr.mxu0 %v53150_v44  ;;  %50475 = vmatpush3.msra.mxu1 %v53183_v55 }
0x144b   :  { %50476 = vmatprep.mubr.f32.mxu1 %v54531_v56  ;;  %50482 = vmatpush3.msra.mxu0 %v53150_v44 }
0x144c   :  { %50483 = vmatprep.mubr.f32.mxu0 %v54541_v0  ;;  %50477 = vmatmul.mubr.f32.vlgmr.msra.gmra.mxu1 %v54534_v48  ;;  %v57139_v0 = vld [vmem:[#allocation19_spill] sm:$0xff] }
0x144d   :  { %50484 = vmatmul.mubr.f32.vlgmr.msra.gmra.mxu0 %v54545_v20  ;;  %50486 = vmatprep.subr.mxu1 %v53134_v4 }
0x144e   :  { %50493 = vmatprep.subr.mxu0 %v53155_v49  ;;  %50487 = vmatpush3.msra.mxu1 %v53134_v4 }
0x144f   :  { %50494 = vmatpush3.msra.mxu0 %v53155_v49  ;;  %50488 = vmatprep.subr.mxu1 %v53137_v11 }
0x1450   :  { %50495 = vmatprep.subr.mxu0 %v53160_v50  ;;  %50489 = vmatpush3.msra.mxu1 %v53137_v11 }
0x1451   :  { %50490 = vmatprep.mubr.f32.mxu1 %v57138_v62  ;;  %50496 = vmatpush3.msra.mxu0 %v53160_v50 }
0x1452   :  { %50497 = vmatprep.mubr.f32.mxu0 %v54531_v56  ;;  %50491 = vmatmul.mubr.f32.vlgmr.msra.gmra.mxu1 %v57139_v0 }
0x1453   :  { %50498 = vmatmul.mubr.f32.vlgmr.msra.gmra.mxu0 %v54534_v48  ;;  %50500 = vmatprep.subr.mxu1 %v53134_v4 }
0x1454   :  { %50501 = vmatpush3.msra.mxu1 %v53134_v4  ;;  %50504 = vmatprep.mubr.f32.mxu1 %v54531_v56 }
0x1455   :  { %50502 = vmatprep.subr.mxu1 %v53137_v11  ;;  %50507 = vmatprep.subr.mxu0 %v57103_v40 }
0x1456   :  { %50503 = vmatpush3.msra.mxu1 %v53137_v11  ;;  %50511 = vmatprep.mubr.msk.f32.mxu0 %vm52763_vm1, %v57103_v40 }
0x1457   :  { %50505 = vmatmul.mubr.f32.vlgmr.msra.gmra.mxu1 %v54534_v48  ;;  %50514 = vmatprep.subr.mxu1 %v57103_v40 }
0x1458   :  { %50518 = vmatprep.mubr.msk.f32.mxu1 %vm52763_vm1, %v57103_v40 }
0x14f5   :  { %v20999_v20 = vpop.f32.mrf.mxu0 }
0x14f7   :  { %v50429_v17 = vpop.f32.mrf.mxu0 }
0x14f9   :  { %v21156_v24 = vpop.f32.mrf.mxu0 }
0x14fb   :  { %v50443_v56 = vpop.f32.mrf.mxu0 }
0x14fd   :  { %v21080_v14 = vpop.f32.mrf.mxu1 }
0x14fe   :  { %v21081_v33 = vadd.f32 %v21080_v14, %v20999_v20 }
0x14ff   :  { %v50436_v37 = vpop.f32.mrf.mxu1 }
0x1500   :  { %v21157_v32 = vadd.f32 %v21156_v24, %v21081_v33  ;;  %v21308_v60 = vpop.f32.mrf.mxu0 }
0x1501   :  { %v21231_v22 = vpop.f32.mrf.mxu1 }
0x1502   :  { %v21232_v34 = vadd.f32 %v21231_v22, %v21157_v32  ;;  %v50457_v6 = vpop.f32.mrf.mxu0 }
0x1503   :  { %v50450_v1 = vpop.f32.mrf.mxu1 }
0x1504   :  { %v21309_v59 = vadd.f32 %v21308_v60, %v21232_v34 }
0x1506   :  { %v21381_v48 = vpop.f32.mrf.mxu1 }
0x1507   :  { %v54863_v30 = vadd.f32 %v21381_v48, %v21309_v59  ;;  %v50471_v8 = vpop.f32.mrf.mxu0 }
0x1508   :  { %v50464_v19 = vpop.f32.mrf.mxu1 }
0x1509   :  { %v21458_v46 = vpop.f32.mrf.mxu0 }
0x150c   :  { %v50478_v13 = vpop.f32.mrf.mxu1 }
0x150d   :  { %v21556_v18 = vadd.f32 %v50478_v13, %v50471_v8  ;;  %v50485_v2 = vpop.f32.mrf.mxu0 }
0x150e   :  { %v21549_v39 = vpop.f32.mrf.mxu1 }
0x150f   :  { %v21639_v28 = vadd.f32 %v50485_v2, %v21556_v18  ;;  %v21550_v3 = vadd.f32 %v21549_v39, %v21458_v46  ;;  %v21631_v26 = vpop.f32.mrf.mxu0 }
0x1511   :  { %v21632_v29 = vadd.f32 %v21631_v26, %v21550_v3  ;;  %v23312_v3 = vld [vmem:[#allocation2 + $0x40] sm:$0xff] }
0x1512   :  { %v50492_v25 = vpop.f32.mrf.mxu1  ;;  %v23319_v26 = vld [vmem:[#allocation5 + $0x40] sm:$0xff] }
0x1513   :  { %v21722_v10 = vadd.f32 %v50492_v25, %v21639_v28  ;;  %v50499_v16 = vpop.f32.mrf.mxu0  ;;  %v23320_v25 = vld [vmem:[#allocation5 + $0x48] sm:$0xff] }
0x1514   :  { %v21713_v57 = vpop.f32.mrf.mxu1 }
0x1515   :  { %v21805_v41 = vadd.f32 %v50499_v16, %v21722_v10  ;;  %v21714_v52 = vadd.f32 %v21713_v57, %v21632_v29  ;;  %v21798_v27 = vpop.f32.mrf.mxu0  ;;  %v23313_v29 = vld [vmem:[#allocation2 + $0x48] sm:$0xff] }
0x1517   :  { %v21799_v21 = vadd.f32 %v21798_v27, %v21714_v52  ;;  %v50506_v58 = vpop.f32.mrf.mxu1  ;;  %v23321_v52 = vmax.f32 %v23319_v26, 1e-06 }
0x1518   :  { %v21884_v36 = vadd.f32 %v50506_v58, %v21805_v41  ;;  %v23314_v41 = vmax.f32 %v23312_v3, 1e-06  ;;  %v23322_v58 = vmax.f32 %v23320_v25, 1e-06 }
0x1519   :  { %v21877_v62 = vpop.f32.mrf.mxu1 }
0x151a   :  { %v21916_v0 = vand.u32 4294901760, %v21884_v36  ;;  %v21878_v20 = vadd.f32 %v21877_v62, %v21799_v21  ;;  %v23315_v21 = vmax.f32 %v23313_v29, 1e-06 }
0x151c   :  { %v21994_v17 = vsub.f32 %v21884_v36, %v21916_v0  ;;  %v21919_v24 = vand.u32 4294901760, %v21878_v20  ;;  %50508 = vmatpush3.msra.mxu0 %v21916_v0 }
0x151d   :  { %50509 = vmatprep.subr.mxu0 %v57103_v40 }
0x151e   :  { %v21995_v56 = vand.u32 4294901760, %v21994_v17  ;;  %v22001_v14 = vsub.f32 %v21878_v20, %v21919_v24  ;;  %50510 = vmatpush3.msra.mxu0 %v21919_v24 }
0x151f   :  { %50521 = vmatprep.subr.mxu0 %v57103_v40  ;;  %50512 = vmatmul.mubr.f32.vlgmr.msra.gmra.mxu0 %v53241_v51 }
0x1520   :  { %v21996_v33 = vsub.f32 %v21994_v17, %v21995_v56  ;;  %v22002_v37 = vand.u32 4294901760, %v22001_v14  ;;  %50522 = vmatpush3.msra.mxu0 %v21994_v17  ;;  %50525 = vmatprep.mubr.msk.f32.mxu0 %vm52763_vm1, %v57103_v40  ;;  %v54933_v17 = vmin.f32 %v23314_v41, 0.999999 }
0x1521   :  { %50523 = vmatprep.subr.mxu0 %v57103_v40 }
0x1522   :  { %50524 = vmatpush3.msra.mxu0 %v22001_v14  ;;  %v21997_v32 = vand.u32 4294901760, %v21996_v33  ;;  %v22003_v60 = vsub.f32 %v22001_v14, %v22002_v37  ;;  %v54937_v14 = vmin.f32 %v23315_v21, 0.999999  ;;  %v54939_v33 = vmin.f32 %v23322_v58, 0.999999  ;;  %v57141_v21 = vld [vmem:[#allocation11_spill] sm:$0xff] }
0x1523   :  { %50535 = vmatprep.subr.mxu0 %v57103_v40  ;;  %50526 = vmatmul.mubr.f32.vlgmr.msra.gmra.mxu0 %v53234_v35 }
0x1524   :  { %50515 = vmatpush3.msra.mxu1 %v21997_v32  ;;  %50536 = vmatpush3.msra.mxu0 %v21995_v56  ;;  %v22004_v22 = vand.u32 4294901760, %v22003_v60 }
0x1525   :  { %50516 = vmatprep.subr.mxu1 %v57103_v40  ;;  %50537 = vmatprep.subr.mxu0 %v57103_v40 }
0x1526   :  { %50517 = vmatpush3.msra.mxu1 %v22004_v22  ;;  %50538 = vmatpush3.msra.mxu0 %v22002_v37 }
0x1527   :  { %50519 = vmatmul.mubr.f32.vlgmr.msra.gmra.mxu1 %v53231_v45  ;;  %50528 = vmatprep.subr.mxu1 %v57103_v40 }
0x1528   :  { %50529 = vmatpush3.msra.mxu1 %v21916_v0  ;;  %50532 = vmatprep.mubr.msk.f32.mxu1 %vm52763_vm1, %v57103_v40 }
0x1529   :  { %50530 = vmatprep.subr.mxu1 %v57103_v40  ;;  %50539 = vmatprep.mubr.msk.f32.mxu0 %vm52763_vm1, %v57103_v40 }
0x152a   :  { %50531 = vmatpush3.msra.mxu1 %v21919_v24  ;;  %50540 = vmatmul.mubr.f32.vlgmr.msra.gmra.mxu0 %v53231_v45 }
0x152b   :  { %50533 = vmatmul.mubr.f32.vlgmr.msra.gmra.mxu1 %v53237_v61  ;;  %50542 = vmatprep.subr.mxu1 %v57103_v40 }
0x152c   :  { %50549 = vmatprep.subr.mxu0 %v53134_v4  ;;  %50543 = vmatpush3.msra.mxu1 %v21916_v0 }
0x152d   :  { %50550 = vmatpush3.msra.mxu0 %v53134_v4  ;;  %50544 = vmatprep.subr.mxu1 %v57103_v40 }
0x152e   :  { %50551 = vmatprep.subr.mxu0 %v53137_v11  ;;  %50545 = vmatpush3.msra.mxu1 %v21919_v24  ;;  %v54935_v24 = vmin.f32 %v23321_v52, 0.999999 }
0x152f   :  { %50546 = vmatprep.mubr.msk.f32.mxu1 %vm52763_vm1, %v57103_v40  ;;  %50552 = vmatpush3.msra.mxu0 %v53137_v11 }
0x1530   :  { %50553 = vmatprep.mubr.f32.mxu0 %v54675_v31  ;;  %50547 = vmatmul.mubr.f32.vlgmr.msra.gmra.mxu1 %v53231_v45 }
0x1531   :  { %50554 = vmatmul.mubr.f32.vlgmr.msra.gmra.mxu0 %v54679_v7  ;;  %50556 = vmatprep.subr.mxu1 %v53177_v53 }
0x1532   :  { %50563 = vmatprep.subr.mxu0 %v53145_v23  ;;  %50557 = vmatpush3.msra.mxu1 %v53177_v53 }
0x1533   :  { %50564 = vmatpush3.msra.mxu0 %v53145_v23  ;;  %50558 = vmatprep.subr.mxu1 %v53183_v55 }
0x1534   :  { %50565 = vmatprep.subr.mxu0 %v53150_v44  ;;  %50559 = vmatpush3.msra.mxu1 %v53183_v55 }
0x1535   :  { %50560 = vmatprep.mubr.f32.mxu1 %v54634_v15  ;;  %50566 = vmatpush3.msra.mxu0 %v53150_v44 }
0x1536   :  { %50567 = vmatprep.mubr.f32.mxu0 %v54644_v63  ;;  %50561 = vmatmul.mubr.f32.vlgmr.msra.gmra.mxu1 %v54637_v42  ;;  %v57140_v63 = vld [vmem:[#allocation22_spill] sm:$0xff] }
0x1537   :  { %50568 = vmatmul.mubr.f32.vlgmr.msra.gmra.mxu0 %v54648_v5  ;;  %50570 = vmatprep.subr.mxu1 %v53134_v4 }
0x1538   :  { %50577 = vmatprep.subr.mxu0 %v53155_v49  ;;  %50571 = vmatpush3.msra.mxu1 %v53134_v4 }
0x1539   :  { %50578 = vmatpush3.msra.mxu0 %v53155_v49  ;;  %50572 = vmatprep.subr.mxu1 %v53137_v11 }
0x153a   :  { %50579 = vmatprep.subr.mxu0 %v53160_v50  ;;  %50573 = vmatpush3.msra.mxu1 %v53137_v11 }
0x153b   :  { %50574 = vmatprep.mubr.f32.mxu1 %v54653_v9  ;;  %50580 = vmatpush3.msra.mxu0 %v53160_v50 }
0x153c   :  { %50581 = vmatprep.mubr.f32.mxu0 %v54634_v15  ;;  %50575 = vmatmul.mubr.f32.vlgmr.msra.gmra.mxu1 %v57140_v63 }
0x153d   :  { %50582 = vmatmul.mubr.f32.vlgmr.msra.gmra.mxu0 %v54637_v42  ;;  %50584 = vmatprep.subr.mxu1 %v53134_v4 }
0x153e   :  { %50585 = vmatpush3.msra.mxu1 %v53134_v4  ;;  %50588 = vmatprep.mubr.f32.mxu1 %v54634_v15 }
0x153f   :  { %50586 = vmatprep.subr.mxu1 %v53137_v11  ;;  %50591 = vmatprep.subr.mxu0 %v57103_v40 }
0x1540   :  { %50587 = vmatpush3.msra.mxu1 %v53137_v11  ;;  %50595 = vmatprep.mubr.msk.f32.mxu0 %vm52763_vm1, %v57103_v40 }
0x1541   :  { %50589 = vmatmul.mubr.f32.vlgmr.msra.gmra.mxu1 %v54637_v42  ;;  %50598 = vmatprep.subr.mxu1 %v57103_v40 }
0x1542   :  { %50602 = vmatprep.mubr.msk.f32.mxu1 %vm52763_vm1, %v57103_v40 }
0x15df   :  { %v21960_v5 = vpop.f32.mrf.mxu0 }
0x15e1   :  { %v50513_v9 = vpop.f32.mrf.mxu0 }
0x15e3   :  { %v22117_v31 = vpop.f32.mrf.mxu0 }
0x15e5   :  { %v50527_v15 = vpop.f32.mrf.mxu0 }
0x15e7   :  { %v22041_v7 = vpop.f32.mrf.mxu1 }
0x15e8   :  { %v22042_v34 = vadd.f32 %v22041_v7, %v21960_v5  ;;  %v23325_v5 = vmul.f32 %v54935_v24, %v54933_v17 }
0x15e9   :  { %v50520_v6 = vpop.f32.mrf.mxu1 }
0x15ea   :  { %v22118_v1 = vadd.f32 %v22117_v31, %v22042_v34  ;;  %v22269_v59 = vpop.f32.mrf.mxu0  ;;  %v23326_v31 = vmul.f32 %v54939_v33, %v54937_v14 }
0x15eb   :  { %v22192_v48 = vpop.f32.mrf.mxu1 }
0x15ec   :  { %v22193_v8 = vadd.f32 %v22192_v48, %v22118_v1  ;;  %v50541_v19 = vpop.f32.mrf.mxu0  ;;  %v23332_v1 = vsel %vm76_vm0, %v23325_v5, 0 }
0x15ed   :  { %v50534_v46 = vpop.f32.mrf.mxu1 }
0x15ee   :  { %v22270_v13 = vadd.f32 %v22269_v59, %v22193_v8  ;;  %v23335_v8 = vsel %vm76_vm0, %v23326_v31, 0 }
0x15f0   :  { %v22342_v42 = vpop.f32.mrf.mxu1 }
0x15f1   :  { %v54931_v18 = vadd.f32 %v22342_v42, %v22270_v13  ;;  %v50555_v2 = vpop.f32.mrf.mxu0  ;;  %v54947_v13 = vand.u32 4294901760, %v23332_v1  ;;  %v54950_v42 = vand.u32 4294901760, %v23335_v8 }
0x15f2   :  { %v50548_v39 = vpop.f32.mrf.mxu1 }
0x15f3   :  { %v22419_v28 = vpop.f32.mrf.mxu0  ;;  %v54957_v26 = vsub.f32 %v23332_v1, %v54947_v13  ;;  %v54961_v29 = vsub.f32 %v23335_v8, %v54950_v42 }
0x15f5   :  { %v54971_v41 = vand.u32 4294901760, %v54961_v29 }
0x15f6   :  { %v50562_v10 = vpop.f32.mrf.mxu1 }
0x15f7   :  { %v22517_v16 = vadd.f32 %v50562_v10, %v50555_v2  ;;  %v50569_v57 = vpop.f32.mrf.mxu0 }
0x15f8   :  { %v22510_v27 = vpop.f32.mrf.mxu1 }
0x15f9   :  { %v22600_v36 = vadd.f32 %v50569_v57, %v22517_v16  ;;  %v22511_v62 = vadd.f32 %v22510_v27, %v22419_v28  ;;  %v22592_v0 = vpop.f32.mrf.mxu0  ;;  %v54966_v57 = vand.u32 4294901760, %v54957_v26  ;;  %v23417_v27 = vsub.f32 %v54961_v29, %v54971_v41 }
0x15fb   :  { %v22593_v20 = vadd.f32 %v22592_v0, %v22511_v62  ;;  %v23407_v52 = vsub.f32 %v54957_v26, %v54966_v57  ;;  %v57142_v62 = vld [vmem:[#allocation12_spill] sm:$0xff]  ;;  %v57143_v0 = vld [vmem:[#allocation17_spill] sm:$0xff] }
0x15fc   :  { %v50576_v56 = vpop.f32.mrf.mxu1 }
0x15fd   :  { %v22683_v37 = vadd.f32 %v50576_v56, %v22600_v36  ;;  %v50583_v32 = vpop.f32.mrf.mxu0  ;;  %v54988_v58 = vand.u32 4294901760, %v23407_v52  ;;  %v54992_v36 = vand.u32 4294901760, %v23417_v27  ;;  %v57145_v56 = vld [vmem:[#allocation18_spill] sm:$0xff] }
0x15fe   :  { %v22674_v60 = vpop.f32.mrf.mxu1 }
0x15ff   :  { %v22766_v22 = vadd.f32 %v50583_v32, %v22683_v37  ;;  %v22675_v63 = vadd.f32 %v22674_v60, %v22593_v20  ;;  %v22759_v9 = vpop.f32.mrf.mxu0  ;;  %v57144_v20 = vld [vmem:[#allocation13_spill] sm:$0xff]  ;;  %v57146_v37 = vld [vmem:[#allocation14_spill] sm:$0xff]  ;;  %v57147_v32 = vld [vmem:[#allocation15_spill] sm:$0xff] }
0x1600   :  { %v57148_v60 = vld [vmem:[#allocation16_spill] sm:$0xff] }
0x1601   :  { %v22760_v15 = vadd.f32 %v22759_v9, %v22675_v63  ;;  %v50590_v7 = vpop.f32.mrf.mxu1 }
0x1602   :  { %v22845_v34 = vadd.f32 %v50590_v7, %v22766_v22 }
0x1603   :  { %v22838_v6 = vpop.f32.mrf.mxu1 }
0x1604   :  { %v22877_v59 = vand.u32 4294901760, %v22845_v34  ;;  %v22839_v48 = vadd.f32 %v22838_v6, %v22760_v15 }
0x1606   :  { %v22955_v19 = vsub.f32 %v22845_v34, %v22877_v59  ;;  %v22880_v46 = vand.u32 4294901760, %v22839_v48  ;;  %50592 = vmatpush3.msra.mxu0 %v22877_v59 }
0x1607   :  { %50593 = vmatprep.subr.mxu0 %v57103_v40 }
0x1608   :  { %v22956_v2 = vand.u32 4294901760, %v22955_v19  ;;  %v22962_v39 = vsub.f32 %v22839_v48, %v22880_v46  ;;  %50594 = vmatpush3.msra.mxu0 %v22880_v46 }
0x1609   :  { %50605 = vmatprep.subr.mxu0 %v57103_v40  ;;  %50596 = vmatmul.mubr.f32.vlgmr.msra.gmra.mxu0 %v53241_v51 }
0x160a   :  { %v22957_v28 = vsub.f32 %v22955_v19, %v22956_v2  ;;  %v22963_v3 = vand.u32 4294901760, %v22962_v39  ;;  %50606 = vmatpush3.msra.mxu0 %v22955_v19  ;;  %50609 = vmatprep.mubr.msk.f32.mxu0 %vm52763_vm1, %v57103_v40 }
0x160b   :  { %50607 = vmatprep.subr.mxu0 %v57103_v40 }
0x160c   :  { %50608 = vmatpush3.msra.mxu0 %v22962_v39  ;;  %v22958_v25 = vand.u32 4294901760, %v22957_v28  ;;  %v22964_v10 = vsub.f32 %v22962_v39, %v22963_v3 }
0x160d   :  { %50619 = vmatprep.subr.mxu0 %v57103_v40  ;;  %50610 = vmatmul.mubr.f32.vlgmr.msra.gmra.mxu0 %v53234_v35 }
0x160e   :  { %50599 = vmatpush3.msra.mxu1 %v22958_v25  ;;  %50620 = vmatpush3.msra.mxu0 %v22956_v2  ;;  %v22965_v16 = vand.u32 4294901760, %v22964_v10 }
0x160f   :  { %50600 = vmatprep.subr.mxu1 %v57103_v40  ;;  %50621 = vmatprep.subr.mxu0 %v57103_v40 }
0x1610   :  { %50601 = vmatpush3.msra.mxu1 %v22965_v16  ;;  %50622 = vmatpush3.msra.mxu0 %v22963_v3 }
0x1611   :  { %50603 = vmatmul.mubr.f32.vlgmr.msra.gmra.mxu1 %v53231_v45  ;;  %50612 = vmatprep.subr.mxu1 %v57103_v40 }
0x1612   :  { %50613 = vmatpush3.msra.mxu1 %v22877_v59  ;;  %50616 = vmatprep.mubr.msk.f32.mxu1 %vm52763_vm1, %v57103_v40 }
0x1613   :  { %50614 = vmatprep.subr.mxu1 %v57103_v40  ;;  %50623 = vmatprep.mubr.msk.f32.mxu0 %vm52763_vm1, %v57103_v40 }
0x1614   :  { %50615 = vmatpush3.msra.mxu1 %v22880_v46  ;;  %50624 = vmatmul.mubr.f32.vlgmr.msra.gmra.mxu0 %v53231_v45 }
0x1615   :  { %50617 = vmatmul.mubr.f32.vlgmr.msra.gmra.mxu1 %v53237_v61  ;;  %50626 = vmatprep.subr.mxu1 %v57103_v40 }
0x1616   :  { %50633 = vmatprep.subr.mxu0 %v57141_v21  ;;  %50627 = vmatpush3.msra.mxu1 %v22877_v59 }
0x1617   :  { %50634 = vmatpush3.msra.mxu0 %v57141_v21  ;;  %50628 = vmatprep.subr.mxu1 %v57103_v40 }
0x1618   :  { %50635 = vmatprep.subr.mxu0 %v57142_v62  ;;  %50629 = vmatpush3.msra.mxu1 %v22880_v46 }
0x1619   :  { %50630 = vmatprep.mubr.msk.f32.mxu1 %vm52763_vm1, %v57103_v40  ;;  %50636 = vmatpush3.msra.mxu0 %v57142_v62 }
0x161a   :  { %50637 = vmatprep.mubr.f32.mxu0 %v54988_v58  ;;  %50631 = vmatmul.mubr.f32.vlgmr.msra.gmra.mxu1 %v53231_v45 }
0x161b   :  { %50638 = vmatmul.mubr.f32.vlgmr.msra.gmra.mxu0 %v54992_v36  ;;  %50640 = vmatprep.subr.mxu1 %v57143_v0 }
0x161c   :  { %50647 = vmatprep.subr.mxu0 %v57144_v20  ;;  %50641 = vmatpush3.msra.mxu1 %v57143_v0 }
0x161d   :  { %50648 = vmatpush3.msra.mxu0 %v57144_v20  ;;  %50642 = vmatprep.subr.mxu1 %v57145_v56 }
0x161e   :  { %50649 = vmatprep.subr.mxu0 %v57146_v37  ;;  %50643 = vmatpush3.msra.mxu1 %v57145_v56 }
0x161f   :  { %50644 = vmatprep.mubr.f32.mxu1 %v54947_v13  ;;  %50650 = vmatpush3.msra.mxu0 %v57146_v37 }
0x1620   :  { %50651 = vmatprep.mubr.f32.mxu0 %v54957_v26  ;;  %50645 = vmatmul.mubr.f32.vlgmr.msra.gmra.mxu1 %v54950_v42 }
0x1621   :  { %50652 = vmatmul.mubr.f32.vlgmr.msra.gmra.mxu0 %v54961_v29  ;;  %50654 = vmatprep.subr.mxu1 %v57141_v21 }
0x1622   :  { %50661 = vmatprep.subr.mxu0 %v57147_v32  ;;  %50655 = vmatpush3.msra.mxu1 %v57141_v21 }
0x1623   :  { %50662 = vmatpush3.msra.mxu0 %v57147_v32  ;;  %50656 = vmatprep.subr.mxu1 %v57142_v62 }
0x1624   :  { %50663 = vmatprep.subr.mxu0 %v57148_v60  ;;  %50657 = vmatpush3.msra.mxu1 %v57142_v62 }
0x1625   :  { %50658 = vmatprep.mubr.f32.mxu1 %v54966_v57  ;;  %50664 = vmatpush3.msra.mxu0 %v57148_v60 }
0x1626   :  { %50665 = vmatprep.mubr.f32.mxu0 %v54947_v13  ;;  %50659 = vmatmul.mubr.f32.vlgmr.msra.gmra.mxu1 %v54971_v41 }
0x1627   :  { %50666 = vmatmul.mubr.f32.vlgmr.msra.gmra.mxu0 %v54950_v42  ;;  %50668 = vmatprep.subr.mxu1 %v57141_v21 }
0x1628   :  { %50669 = vmatpush3.msra.mxu1 %v57141_v21  ;;  %50672 = vmatprep.mubr.f32.mxu1 %v54947_v13 }
0x1629   :  { %50670 = vmatprep.subr.mxu1 %v57142_v62  ;;  %50675 = vmatprep.subr.mxu0 %v57103_v40 }
0x162a   :  { %50671 = vmatpush3.msra.mxu1 %v57142_v62  ;;  %50679 = vmatprep.mubr.msk.f32.mxu0 %vm52763_vm1, %v57103_v40 }
0x162b   :  { %50673 = vmatmul.mubr.f32.vlgmr.msra.gmra.mxu1 %v54950_v42  ;;  %50682 = vmatprep.subr.mxu1 %v57103_v40 }
0x162c   :  { %50686 = vmatprep.mubr.msk.f32.mxu1 %vm52763_vm1, %v57103_v40 }
0x16c9   :  { %v22921_v22 = vpop.f32.mrf.mxu0 }
0x16cb   :  { %v50597_v63 = vpop.f32.mrf.mxu0 }
0x16cd   :  { %v23078_v5 = vpop.f32.mrf.mxu0 }
0x16cf   :  { %v50611_v9 = vpop.f32.mrf.mxu0 }
0x16d1   :  { %v23002_v31 = vpop.f32.mrf.mxu1 }
0x16d2   :  { %v23003_v15 = vadd.f32 %v23002_v31, %v22921_v22 }
0x16d3   :  { %v50604_v7 = vpop.f32.mrf.mxu1 }
0x16d4   :  { %v23079_v34 = vadd.f32 %v23078_v5, %v23003_v15  ;;  %v23230_v6 = vpop.f32.mrf.mxu0 }
0x16d5   :  { %v23153_v1 = vpop.f32.mrf.mxu1 }
0x16d6   :  { %v23154_v59 = vadd.f32 %v23153_v1, %v23079_v34  ;;  %v50625_v48 = vpop.f32.mrf.mxu0 }
0x16d7   :  { %v50618_v8 = vpop.f32.mrf.mxu1 }
0x16d8   :  { %v23231_v19 = vadd.f32 %v23230_v6, %v23154_v59  ;;  %v23327_v59 = vmul.f32 %v54933_v17, %v54933_v17 }
0x16da   :  { %v23303_v46 = vpop.f32.mrf.mxu1 }
0x16db   :  { %v23304_v2 = vadd.f32 %v23303_v46, %v23231_v19  ;;  %v50639_v39 = vpop.f32.mrf.mxu0 }
0x16dc   :  { %v50632_v28 = vpop.f32.mrf.mxu1 }
0x16dd   :  { %v23307_v3 = vmul.f32 %v23304_v2, %v54931_v18  ;;  %v23410_v25 = vpop.f32.mrf.mxu0  ;;  %v23328_v18 = vmul.f32 %v54937_v14, %v54937_v14 }
0x16df   :  { %52674 = vrsqrt.f32 %v23307_v3 }
0x16e0   :  { %v50646_v10 = vpop.f32.mrf.mxu1 }
0x16e1   :  { %v23508_v16 = vadd.f32 %v50646_v10, %v50639_v39  ;;  %v50653_v52 = vpop.f32.mrf.mxu0  ;;  %v24299_v39 = vsel %vm76_vm0, %v23327_v59, 0  ;;  %v24302_v10 = vsel %vm76_vm0, %v23328_v18, 0 }
0x16e2   :  { %v23501_v27 = vpop.f32.mrf.mxu1  ;;  %v55047_v17 = vand.u32 4294901760, %v24302_v10 }
0x16e3   :  { %v23591_v22 = vadd.f32 %v50653_v52, %v23508_v16  ;;  %v23502_v63 = vadd.f32 %v23501_v27, %v23410_v25  ;;  %v23583_v5 = vpop.f32.mrf.mxu0  ;;  %v55044_v27 = vand.u32 4294901760, %v24299_v39 }
0x16e5   :  { %v23584_v9 = vadd.f32 %v23583_v5, %v23502_v63  ;;  %v55054_v5 = vsub.f32 %v24299_v39, %v55044_v27 }
0x16e6   :  { %v50660_v31 = vpop.f32.mrf.mxu1 }
0x16e7   :  { %v23674_v15 = vadd.f32 %v50660_v31, %v23591_v22  ;;  %v50667_v7 = vpop.f32.mrf.mxu0 }
0x16e8   :  { %v23665_v34 = vpop.f32.mrf.mxu1 }
0x16e9   :  { %v23757_v6 = vadd.f32 %v50667_v7, %v23674_v15  ;;  %v23666_v1 = vadd.f32 %v23665_v34, %v23584_v9  ;;  %v23750_v48 = vpop.f32.mrf.mxu0  ;;  %v55058_v9 = vsub.f32 %v24302_v10, %v55047_v17  ;;  %v55063_v34 = vand.u32 4294901760, %v55054_v5 }
0x16eb   :  { %v23751_v8 = vadd.f32 %v23750_v48, %v23666_v1  ;;  %v50674_v19 = vpop.f32.mrf.mxu1  ;;  %57149 = vst [vmem:[#allocation21_spill] sm:$0xff] %v55063_v34  ;;  %v55068_v1 = vand.u32 4294901760, %v55058_v9  ;;  %v24374_v59 = vsub.f32 %v55054_v5, %v55063_v34 }
0x16ec   :  { %v23836_v46 = vadd.f32 %v50674_v19, %v23757_v6  ;;  %v52675_v6 = vpop.eup %52674 }
0x16ed   :  { %v23829_v2 = vpop.f32.mrf.mxu1  ;;  %57150 = vst [vmem:[#allocation19_spill] sm:$0xff] %v55068_v1  ;;  %v23309_v48 = vmul.f32 %v52675_v6, %v54863_v30  ;;  %v24384_v18 = vsub.f32 %v55058_v9, %v55068_v1  ;;  %v55089_v30 = vand.u32 4294901760, %v24374_v59 }
0x16ee   :  { %v23868_v28 = vand.u32 4294901760, %v23836_v46  ;;  %v23830_v25 = vadd.f32 %v23829_v2, %v23751_v8  ;;  %v57151_v8 = vld [vmem:[#allocation20_spill] sm:$0xff] }
0x16ef   :  { %v55084_v19 = vadd.f32 %v23309_v48, %v57151_v8 }
0x16f0   :  { %v23946_v16 = vsub.f32 %v23836_v46, %v23868_v28  ;;  %v23871_v52 = vand.u32 4294901760, %v23830_v25  ;;  %50676 = vmatpush3.msra.mxu0 %v23868_v28  ;;  %v55093_v46 = vand.u32 4294901760, %v24384_v18 }
0x16f1   :  { %50677 = vmatprep.subr.mxu0 %v57103_v40  ;;  %57152 = vst [vmem:[#allocation22_spill] sm:$0xff] %v55084_v19 }
0x16f2   :  { %v23947_v14 = vand.u32 4294901760, %v23946_v16  ;;  %v23953_v22 = vsub.f32 %v23830_v25, %v23871_v52  ;;  %50678 = vmatpush3.msra.mxu0 %v23871_v52 }
0x16f3   :  { %50689 = vmatprep.subr.mxu0 %v57103_v40  ;;  %50680 = vmatmul.mubr.f32.vlgmr.msra.gmra.mxu0 %v52936_v12 }
0x16f4   :  { %v23948_v3 = vsub.f32 %v23946_v16, %v23947_v14  ;;  %v23954_v63 = vand.u32 4294901760, %v23953_v22  ;;  %50690 = vmatpush3.msra.mxu0 %v23946_v16  ;;  %50693 = vmatprep.mubr.msk.f32.mxu0 %vm52763_vm1, %v57103_v40 }
0x16f5   :  { %50691 = vmatprep.subr.mxu0 %v57103_v40 }
0x16f6   :  { %50692 = vmatpush3.msra.mxu0 %v23953_v22  ;;  %v23949_v31 = vand.u32 4294901760, %v23948_v3  ;;  %v23955_v15 = vsub.f32 %v23953_v22, %v23954_v63 }
0x16f7   :  { %50703 = vmatprep.subr.mxu0 %v57103_v40  ;;  %50694 = vmatmul.mubr.f32.vlgmr.msra.gmra.mxu0 %v52923_v47 }
0x16f8   :  { %50683 = vmatpush3.msra.mxu1 %v23949_v31  ;;  %50704 = vmatpush3.msra.mxu0 %v23947_v14  ;;  %v23956_v7 = vand.u32 4294901760, %v23955_v15 }
0x16f9   :  { %50684 = vmatprep.subr.mxu1 %v57103_v40  ;;  %50705 = vmatprep.subr.mxu0 %v57103_v40 }
0x16fa   :  { %50685 = vmatpush3.msra.mxu1 %v23956_v7  ;;  %50706 = vmatpush3.msra.mxu0 %v23954_v63 }
0x16fb   :  { %50687 = vmatmul.mubr.f32.vlgmr.msra.gmra.mxu1 %v52920_v43  ;;  %50696 = vmatprep.subr.mxu1 %v57103_v40 }
0x16fc   :  { %50697 = vmatpush3.msra.mxu1 %v23868_v28  ;;  %50700 = vmatprep.mubr.msk.f32.mxu1 %vm52763_vm1, %v57103_v40 }
0x16fd   :  { %50698 = vmatprep.subr.mxu1 %v57103_v40  ;;  %50707 = vmatprep.mubr.msk.f32.mxu0 %vm52763_vm1, %v57103_v40 }
0x16fe   :  { %50699 = vmatpush3.msra.mxu1 %v23871_v52  ;;  %50708 = vmatmul.mubr.f32.vlgmr.msra.gmra.mxu0 %v52920_v43 }
0x16ff   :  { %50701 = vmatmul.mubr.f32.vlgmr.msra.gmra.mxu1 %v52926_v54  ;;  %50710 = vmatprep.subr.mxu1 %v57103_v40 }
0x1700   :  { %50717 = vmatprep.subr.mxu0 %v57141_v21  ;;  %50711 = vmatpush3.msra.mxu1 %v23868_v28 }
0x1701   :  { %50718 = vmatpush3.msra.mxu0 %v57141_v21  ;;  %50712 = vmatprep.subr.mxu1 %v57103_v40 }
0x1702   :  { %50719 = vmatprep.subr.mxu0 %v57142_v62  ;;  %50713 = vmatpush3.msra.mxu1 %v23871_v52 }
0x1703   :  { %50714 = vmatprep.mubr.msk.f32.mxu1 %vm52763_vm1, %v57103_v40  ;;  %50720 = vmatpush3.msra.mxu0 %v57142_v62 }
0x1704   :  { %50721 = vmatprep.mubr.f32.mxu0 %v55089_v30  ;;  %50715 = vmatmul.mubr.f32.vlgmr.msra.gmra.mxu1 %v52920_v43 }
0x1705   :  { %50722 = vmatmul.mubr.f32.vlgmr.msra.gmra.mxu0 %v55093_v46  ;;  %50724 = vmatprep.subr.mxu1 %v57143_v0 }
0x1706   :  { %50731 = vmatprep.subr.mxu0 %v57144_v20  ;;  %50725 = vmatpush3.msra.mxu1 %v57143_v0 }
0x1707   :  { %50732 = vmatpush3.msra.mxu0 %v57144_v20  ;;  %50726 = vmatprep.subr.mxu1 %v57145_v56 }
0x1708   :  { %50733 = vmatprep.subr.mxu0 %v57146_v37  ;;  %50727 = vmatpush3.msra.mxu1 %v57145_v56 }
0x1709   :  { %50728 = vmatprep.mubr.f32.mxu1 %v55044_v27  ;;  %50734 = vmatpush3.msra.mxu0 %v57146_v37 }
0x170a   :  { %50735 = vmatprep.mubr.f32.mxu0 %v55054_v5  ;;  %50729 = vmatmul.mubr.f32.vlgmr.msra.gmra.mxu1 %v55047_v17 }
0x170b   :  { %50736 = vmatmul.mubr.f32.vlgmr.msra.gmra.mxu0 %v55058_v9  ;;  %50738 = vmatprep.subr.mxu1 %v57141_v21 }
0x170c   :  { %50745 = vmatprep.subr.mxu0 %v57147_v32  ;;  %50739 = vmatpush3.msra.mxu1 %v57141_v21 }
0x170d   :  { %50746 = vmatpush3.msra.mxu0 %v57147_v32  ;;  %50740 = vmatprep.subr.mxu1 %v57142_v62 }
0x170e   :  { %50747 = vmatprep.subr.mxu0 %v57148_v60  ;;  %50741 = vmatpush3.msra.mxu1 %v57142_v62 }
0x170f   :  { %50742 = vmatprep.mubr.f32.mxu1 %v55063_v34  ;;  %50748 = vmatpush3.msra.mxu0 %v57148_v60 }
0x1710   :  { %50749 = vmatprep.mubr.f32.mxu0 %v55044_v27  ;;  %50743 = vmatmul.mubr.f32.vlgmr.msra.gmra.mxu1 %v55068_v1 }
0x1711   :  { %50750 = vmatmul.mubr.f32.vlgmr.msra.gmra.mxu0 %v55047_v17  ;;  %50752 = vmatprep.subr.mxu1 %v57141_v21 }
0x1712   :  { %50753 = vmatpush3.msra.mxu1 %v57141_v21  ;;  %50756 = vmatprep.mubr.f32.mxu1 %v55044_v27 }
0x1713   :  { %50754 = vmatprep.subr.mxu1 %v57142_v62  ;;  %50759 = vmatprep.subr.mxu0 %v57103_v40 }
0x1714   :  { %50755 = vmatpush3.msra.mxu1 %v57142_v62  ;;  %50763 = vmatprep.mubr.msk.f32.mxu0 %vm52763_vm1, %v57103_v40 }
0x1715   :  { %50757 = vmatmul.mubr.f32.vlgmr.msra.gmra.mxu1 %v55047_v17  ;;  %50766 = vmatprep.subr.mxu1 %v57103_v40 }
0x1716   :  { %50770 = vmatprep.mubr.msk.f32.mxu1 %vm52763_vm1, %v57103_v40 }
0x17b3   :  { %v23912_v2 = vpop.f32.mrf.mxu0 }
0x17b5   :  { %v50681_v39 = vpop.f32.mrf.mxu0 }
0x17b7   :  { %v24069_v28 = vpop.f32.mrf.mxu0 }
0x17b9   :  { %v50695_v25 = vpop.f32.mrf.mxu0 }
0x17bb   :  { %v23993_v10 = vpop.f32.mrf.mxu1 }
0x17bc   :  { %v23994_v16 = vadd.f32 %v23993_v10, %v23912_v2 }
0x17bd   :  { %v50688_v52 = vpop.f32.mrf.mxu1 }
0x17be   :  { %v24070_v14 = vadd.f32 %v24069_v28, %v23994_v16  ;;  %v24221_v22 = vpop.f32.mrf.mxu0 }
0x17bf   :  { %v24144_v3 = vpop.f32.mrf.mxu1 }
0x17c0   :  { %v24145_v63 = vadd.f32 %v24144_v3, %v24070_v14  ;;  %v50709_v31 = vpop.f32.mrf.mxu0 }
0x17c1   :  { %v50702_v15 = vpop.f32.mrf.mxu1 }
0x17c2   :  { %v24222_v7 = vadd.f32 %v24221_v22, %v24145_v63  ;;  %v23329_v63 = vmul.f32 %v54935_v24, %v54935_v24 }
0x17c4   :  { %v24294_v6 = vpop.f32.mrf.mxu1 }
0x17c5   :  { %v55138_v59 = vadd.f32 %v24294_v6, %v24222_v7  ;;  %v50723_v48 = vpop.f32.mrf.mxu0  ;;  %v23330_v7 = vmul.f32 %v54939_v33, %v54939_v33 }
0x17c6   :  { %v50716_v18 = vpop.f32.mrf.mxu1 }
0x17c7   :  { %v24377_v8 = vpop.f32.mrf.mxu0  ;;  %v25266_v18 = vsel %vm76_vm0, %v23329_v63, 0 }
0x17ca   :  { %v50730_v19 = vpop.f32.mrf.mxu1 }
0x17cb   :  { %v24475_v39 = vadd.f32 %v50730_v19, %v50723_v48  ;;  %v50737_v1 = vpop.f32.mrf.mxu0 }
0x17cc   :  { %v24468_v25 = vpop.f32.mrf.mxu1 }
0x17cd   :  { %v24558_v34 = vadd.f32 %v50737_v1, %v24475_v39  ;;  %v24469_v2 = vadd.f32 %v24468_v25, %v24377_v8  ;;  %v24550_v10 = vpop.f32.mrf.mxu0 }
0x17cf   :  { %v24551_v28 = vadd.f32 %v24550_v10, %v24469_v2  ;;  %v55146_v10 = vand.u32 4294901760, %v25266_v18 }
0x17d0   :  { %v50744_v16 = vpop.f32.mrf.mxu1 }
0x17d1   :  { %v24641_v52 = vadd.f32 %v50744_v16, %v24558_v34  ;;  %v50751_v14 = vpop.f32.mrf.mxu0  ;;  %v25269_v34 = vsel %vm76_vm0, %v23330_v7, 0 }
0x17d2   :  { %v24632_v3 = vpop.f32.mrf.mxu1  ;;  %v55149_v24 = vand.u32 4294901760, %v25269_v34 }
0x17d3   :  { %v24724_v31 = vadd.f32 %v50751_v14, %v24641_v52  ;;  %v24633_v22 = vadd.f32 %v24632_v3, %v24551_v28  ;;  %v24717_v15 = vpop.f32.mrf.mxu0  ;;  %v55156_v14 = vsub.f32 %v25266_v18, %v55146_v10 }
0x17d4   :  { %v55160_v3 = vsub.f32 %v25269_v34, %v55149_v24 }
0x17d5   :  { %v24718_v19 = vadd.f32 %v24717_v15, %v24633_v22  ;;  %v50758_v6 = vpop.f32.mrf.mxu1  ;;  %v55165_v15 = vand.u32 4294901760, %v55156_v14 }
0x17d6   :  { %v24803_v48 = vadd.f32 %v50758_v6, %v24724_v31  ;;  %v55170_v7 = vand.u32 4294901760, %v55160_v3 }
0x17d7   :  { %v24796_v1 = vpop.f32.mrf.mxu1 }
0x17d8   :  { %v24835_v8 = vand.u32 4294901760, %v24803_v48  ;;  %v24797_v39 = vadd.f32 %v24796_v1, %v24718_v19  ;;  %57153 = vst [vmem:[#allocation20_spill] sm:$0xff] %v55170_v7  ;;  %v25341_v19 = vsub.f32 %v55156_v14, %v55165_v15  ;;  %v25351_v6 = vsub.f32 %v55160_v3, %v55170_v7 }
0x17da   :  { %v24913_v25 = vsub.f32 %v24803_v48, %v24835_v8  ;;  %v24838_v2 = vand.u32 4294901760, %v24797_v39  ;;  %50760 = vmatpush3.msra.mxu0 %v24835_v8  ;;  %v55187_v48 = vand.u32 4294901760, %v25341_v19  ;;  %v55191_v1 = vand.u32 4294901760, %v25351_v6 }
0x17db   :  { %50761 = vmatprep.subr.mxu0 %v57103_v40 }
0x17dc   :  { %v24914_v33 = vand.u32 4294901760, %v24913_v25  ;;  %v24920_v28 = vsub.f32 %v24797_v39, %v24838_v2  ;;  %50762 = vmatpush3.msra.mxu0 %v24838_v2 }
0x17dd   :  { %50773 = vmatprep.subr.mxu0 %v57103_v40  ;;  %50764 = vmatmul.mubr.f32.vlgmr.msra.gmra.mxu0 %v52936_v12 }
0x17de   :  { %v24915_v16 = vsub.f32 %v24913_v25, %v24914_v33  ;;  %v24921_v52 = vand.u32 4294901760, %v24920_v28  ;;  %50774 = vmatpush3.msra.mxu0 %v24913_v25  ;;  %50777 = vmatprep.mubr.msk.f32.mxu0 %vm52763_vm1, %v57103_v40 }
0x17df   :  { %50775 = vmatprep.subr.mxu0 %v57103_v40 }
0x17e0   :  { %50776 = vmatpush3.msra.mxu0 %v24920_v28  ;;  %v24916_v31 = vand.u32 4294901760, %v24915_v16  ;;  %v24922_v22 = vsub.f32 %v24920_v28, %v24921_v52 }
0x17e1   :  { %50787 = vmatprep.subr.mxu0 %v57103_v40  ;;  %50778 = vmatmul.mubr.f32.vlgmr.msra.gmra.mxu0 %v52923_v47 }
0x17e2   :  { %50767 = vmatpush3.msra.mxu1 %v24916_v31  ;;  %50788 = vmatpush3.msra.mxu0 %v24914_v33  ;;  %v24923_v63 = vand.u32 4294901760, %v24922_v22 }
0x17e3   :  { %50768 = vmatprep.subr.mxu1 %v57103_v40  ;;  %50789 = vmatprep.subr.mxu0 %v57103_v40 }
0x17e4   :  { %50769 = vmatpush3.msra.mxu1 %v24923_v63  ;;  %50790 = vmatpush3.msra.mxu0 %v24921_v52 }
0x17e5   :  { %50771 = vmatmul.mubr.f32.vlgmr.msra.gmra.mxu1 %v52920_v43  ;;  %50780 = vmatprep.subr.mxu1 %v57103_v40 }
0x17e6   :  { %50781 = vmatpush3.msra.mxu1 %v24835_v8  ;;  %50784 = vmatprep.mubr.msk.f32.mxu1 %vm52763_vm1, %v57103_v40 }
0x17e7   :  { %50782 = vmatprep.subr.mxu1 %v57103_v40  ;;  %50791 = vmatprep.mubr.msk.f32.mxu0 %vm52763_vm1, %v57103_v40 }
0x17e8   :  { %50783 = vmatpush3.msra.mxu1 %v24838_v2  ;;  %50792 = vmatmul.mubr.f32.vlgmr.msra.gmra.mxu0 %v52920_v43 }
0x17e9   :  { %50785 = vmatmul.mubr.f32.vlgmr.msra.gmra.mxu1 %v52926_v54  ;;  %50794 = vmatprep.subr.mxu1 %v57103_v40 }
0x17ea   :  { %50801 = vmatprep.subr.mxu0 %v57141_v21  ;;  %50795 = vmatpush3.msra.mxu1 %v24835_v8 }
0x17eb   :  { %50802 = vmatpush3.msra.mxu0 %v57141_v21  ;;  %50796 = vmatprep.subr.mxu1 %v57103_v40 }
0x17ec   :  { %50803 = vmatprep.subr.mxu0 %v57142_v62  ;;  %50797 = vmatpush3.msra.mxu1 %v24838_v2 }
0x17ed   :  { %50798 = vmatprep.mubr.msk.f32.mxu1 %vm52763_vm1, %v57103_v40  ;;  %50804 = vmatpush3.msra.mxu0 %v57142_v62 }
0x17ee   :  { %50805 = vmatprep.mubr.f32.mxu0 %v55187_v48  ;;  %50799 = vmatmul.mubr.f32.vlgmr.msra.gmra.mxu1 %v52920_v43 }
0x17ef   :  { %50806 = vmatmul.mubr.f32.vlgmr.msra.gmra.mxu0 %v55191_v1  ;;  %50808 = vmatprep.subr.mxu1 %v57143_v0 }
0x17f0   :  { %50815 = vmatprep.subr.mxu0 %v57144_v20  ;;  %50809 = vmatpush3.msra.mxu1 %v57143_v0 }
0x17f1   :  { %50816 = vmatpush3.msra.mxu0 %v57144_v20  ;;  %50810 = vmatprep.subr.mxu1 %v57145_v56 }
0x17f2   :  { %50817 = vmatprep.subr.mxu0 %v57146_v37  ;;  %50811 = vmatpush3.msra.mxu1 %v57145_v56 }
0x17f3   :  { %50812 = vmatprep.mubr.f32.mxu1 %v55146_v10  ;;  %50818 = vmatpush3.msra.mxu0 %v57146_v37 }
0x17f4   :  { %50819 = vmatprep.mubr.f32.mxu0 %v55156_v14  ;;  %50813 = vmatmul.mubr.f32.vlgmr.msra.gmra.mxu1 %v55149_v24 }
0x17f5   :  { %50820 = vmatmul.mubr.f32.vlgmr.msra.gmra.mxu0 %v55160_v3  ;;  %50822 = vmatprep.subr.mxu1 %v57141_v21 }
0x17f6   :  { %50829 = vmatprep.subr.mxu0 %v57147_v32  ;;  %50823 = vmatpush3.msra.mxu1 %v57141_v21 }
0x17f7   :  { %50830 = vmatpush3.msra.mxu0 %v57147_v32  ;;  %50824 = vmatprep.subr.mxu1 %v57142_v62 }
0x17f8   :  { %50831 = vmatprep.subr.mxu0 %v57148_v60  ;;  %50825 = vmatpush3.msra.mxu1 %v57142_v62 }
0x17f9   :  { %50826 = vmatprep.mubr.f32.mxu1 %v55165_v15  ;;  %50832 = vmatpush3.msra.mxu0 %v57148_v60 }
0x17fa   :  { %50833 = vmatprep.mubr.f32.mxu0 %v55146_v10  ;;  %50827 = vmatmul.mubr.f32.vlgmr.msra.gmra.mxu1 %v55170_v7 }
0x17fb   :  { %50834 = vmatmul.mubr.f32.vlgmr.msra.gmra.mxu0 %v55149_v24  ;;  %50836 = vmatprep.subr.mxu1 %v57141_v21 }
0x17fc   :  { %50837 = vmatpush3.msra.mxu1 %v57141_v21  ;;  %50840 = vmatprep.mubr.f32.mxu1 %v55146_v10 }
0x17fd   :  { %50838 = vmatprep.subr.mxu1 %v57142_v62  ;;  %50843 = vmatprep.subr.mxu0 %v57103_v40 }
0x17fe   :  { %50839 = vmatpush3.msra.mxu1 %v57142_v62  ;;  %50847 = vmatprep.mubr.msk.f32.mxu0 %vm52763_vm1, %v57103_v40 }
0x17ff   :  { %50841 = vmatmul.mubr.f32.vlgmr.msra.gmra.mxu1 %v55149_v24  ;;  %50850 = vmatprep.subr.mxu1 %v57103_v40 }
0x1800   :  { %50854 = vmatprep.mubr.msk.f32.mxu1 %vm52763_vm1, %v57103_v40 }
0x189d   :  { %v24879_v18 = vpop.f32.mrf.mxu0 }
0x189f   :  { %v50765_v8 = vpop.f32.mrf.mxu0 }
0x18a1   :  { %v25036_v39 = vpop.f32.mrf.mxu0 }
0x18a3   :  { %v50779_v34 = vpop.f32.mrf.mxu0 }
0x18a5   :  { %v24960_v25 = vpop.f32.mrf.mxu1 }
0x18a6   :  { %v24961_v2 = vadd.f32 %v24960_v25, %v24879_v18 }
0x18a7   :  { %v50772_v33 = vpop.f32.mrf.mxu1 }
0x18a8   :  { %v25037_v28 = vadd.f32 %v25036_v39, %v24961_v2  ;;  %v25188_v16 = vpop.f32.mrf.mxu0 }
0x18a9   :  { %v25111_v52 = vpop.f32.mrf.mxu1 }
0x18aa   :  { %v25112_v31 = vadd.f32 %v25111_v52, %v25037_v28  ;;  %v50793_v22 = vpop.f32.mrf.mxu0 }
0x18ab   :  { %v50786_v63 = vpop.f32.mrf.mxu1 }
0x18ac   :  { %v25189_v19 = vadd.f32 %v25188_v16, %v25112_v31 }
0x18ae   :  { %v25261_v6 = vpop.f32.mrf.mxu1 }
0x18af   :  { %v55236_v60 = vadd.f32 %v25261_v6, %v25189_v19  ;;  %v50807_v32 = vpop.f32.mrf.mxu0 }
0x18b0   :  { %v50800_v37 = vpop.f32.mrf.mxu1 }
0x18b1   :  { %v25344_v56 = vpop.f32.mrf.mxu0 }
0x18b4   :  { %v50814_v20 = vpop.f32.mrf.mxu1 }
0x18b5   :  { %v25442_v8 = vadd.f32 %v50814_v20, %v50807_v32  ;;  %v50821_v0 = vpop.f32.mrf.mxu0 }
0x18b6   :  { %v25435_v34 = vpop.f32.mrf.mxu1 }
0x18b7   :  { %v25525_v62 = vadd.f32 %v50821_v0, %v25442_v8  ;;  %v25436_v18 = vadd.f32 %v25435_v34, %v25344_v56  ;;  %v25517_v25 = vpop.f32.mrf.mxu0 }
0x18b9   :  { %v25518_v39 = vadd.f32 %v25517_v25, %v25436_v18 }
0x18ba   :  { %v50828_v2 = vpop.f32.mrf.mxu1 }
0x18bb   :  { %v25608_v33 = vadd.f32 %v50828_v2, %v25525_v62  ;;  %v50835_v28 = vpop.f32.mrf.mxu0 }
0x18bc   :  { %v25599_v52 = vpop.f32.mrf.mxu1 }
0x18bd   :  { %v25691_v22 = vadd.f32 %v50835_v28, %v25608_v33  ;;  %v25600_v16 = vadd.f32 %v25599_v52, %v25518_v39  ;;  %v25684_v31 = vpop.f32.mrf.mxu0 }
0x18bf   :  { %v25685_v63 = vadd.f32 %v25684_v31, %v25600_v16  ;;  %v50842_v19 = vpop.f32.mrf.mxu1 }
0x18c0   :  { %v25770_v6 = vadd.f32 %v50842_v19, %v25691_v22 }
0x18c1   :  { %v25763_v37 = vpop.f32.mrf.mxu1 }
0x18c2   :  { %v25802_v21 = vand.u32 4294901760, %v25770_v6  ;;  %v25764_v7 = vadd.f32 %v25763_v37, %v25685_v63 }
0x18c4   :  { %v25880_v20 = vsub.f32 %v25770_v6, %v25802_v21  ;;  %v25805_v32 = vand.u32 4294901760, %v25764_v7  ;;  %50844 = vmatpush3.msra.mxu0 %v25802_v21 }
0x18c5   :  { %50845 = vmatprep.subr.mxu0 %v57103_v40 }
0x18c6   :  { %v25881_v0 = vand.u32 4294901760, %v25880_v20  ;;  %v25887_v56 = vsub.f32 %v25764_v7, %v25805_v32  ;;  %50846 = vmatpush3.msra.mxu0 %v25805_v32 }
0x18c7   :  { %50857 = vmatprep.subr.mxu0 %v57103_v40  ;;  %50848 = vmatmul.mubr.f32.vlgmr.msra.gmra.mxu0 %v52936_v12 }
0x18c8   :  { %v25882_v62 = vsub.f32 %v25880_v20, %v25881_v0  ;;  %v25888_v8 = vand.u32 4294901760, %v25887_v56  ;;  %50858 = vmatpush3.msra.mxu0 %v25880_v20  ;;  %50861 = vmatprep.mubr.msk.f32.mxu0 %vm52763_vm1, %v57103_v40 }
0x18c9   :  { %50859 = vmatprep.subr.mxu0 %v57103_v40 }
0x18ca   :  { %50860 = vmatpush3.msra.mxu0 %v25887_v56  ;;  %v25883_v34 = vand.u32 4294901760, %v25882_v62  ;;  %v25889_v18 = vsub.f32 %v25887_v56, %v25888_v8 }
0x18cb   :  { %50871 = vmatprep.subr.mxu0 %v57103_v40  ;;  %50862 = vmatmul.mubr.f32.vlgmr.msra.gmra.mxu0 %v52923_v47 }
0x18cc   :  { %50851 = vmatpush3.msra.mxu1 %v25883_v34  ;;  %50872 = vmatpush3.msra.mxu0 %v25881_v0  ;;  %v25890_v7 = vand.u32 4294901760, %v25889_v18 }
0x18cd   :  { %50852 = vmatprep.subr.mxu1 %v57103_v40  ;;  %50873 = vmatprep.subr.mxu0 %v57103_v40 }
0x18ce   :  { %50853 = vmatpush3.msra.mxu1 %v25890_v7  ;;  %50874 = vmatpush3.msra.mxu0 %v25888_v8 }
0x18cf   :  { %50855 = vmatmul.mubr.f32.vlgmr.msra.gmra.mxu1 %v52920_v43  ;;  %50864 = vmatprep.subr.mxu1 %v57103_v40 }
0x18d0   :  { %50865 = vmatpush3.msra.mxu1 %v25802_v21  ;;  %50868 = vmatprep.mubr.msk.f32.mxu1 %vm52763_vm1, %v57103_v40 }
0x18d1   :  { %50866 = vmatprep.subr.mxu1 %v57103_v40  ;;  %50875 = vmatprep.mubr.msk.f32.mxu0 %vm52763_vm1, %v57103_v40 }
0x18d2   :  { %50867 = vmatpush3.msra.mxu1 %v25805_v32  ;;  %50876 = vmatmul.mubr.f32.vlgmr.msra.gmra.mxu0 %v52920_v43 }
0x18d3   :  { %50869 = vmatmul.mubr.f32.vlgmr.msra.gmra.mxu1 %v52926_v54  ;;  %50878 = vmatprep.subr.mxu1 %v57103_v40 }
0x18d4   :  { %50885 = vmatprep.subr.mxu0 %v53134_v4  ;;  %50879 = vmatpush3.msra.mxu1 %v25802_v21 }
0x18d5   :  { %50886 = vmatpush3.msra.mxu0 %v53134_v4  ;;  %50880 = vmatprep.subr.mxu1 %v57103_v40 }
0x18d6   :  { %50887 = vmatprep.subr.mxu0 %v53137_v11  ;;  %50881 = vmatpush3.msra.mxu1 %v25805_v32 }
0x18d7   :  { %50882 = vmatprep.mubr.msk.f32.mxu1 %vm52763_vm1, %v57103_v40  ;;  %50888 = vmatpush3.msra.mxu0 %v53137_v11 }
0x18d8   :  { %50889 = vmatprep.mubr.f32.mxu0 %v54988_v58  ;;  %50883 = vmatmul.mubr.f32.vlgmr.msra.gmra.mxu1 %v52920_v43 }
0x18d9   :  { %50890 = vmatmul.mubr.f32.vlgmr.msra.gmra.mxu0 %v54992_v36  ;;  %50892 = vmatprep.subr.mxu1 %v53177_v53 }
0x18da   :  { %50899 = vmatprep.subr.mxu0 %v53145_v23  ;;  %50893 = vmatpush3.msra.mxu1 %v53177_v53 }
0x18db   :  { %50900 = vmatpush3.msra.mxu0 %v53145_v23  ;;  %50894 = vmatprep.subr.mxu1 %v53183_v55 }
0x18dc   :  { %50901 = vmatprep.subr.mxu0 %v53150_v44  ;;  %50895 = vmatpush3.msra.mxu1 %v53183_v55 }
0x18dd   :  { %50896 = vmatprep.mubr.f32.mxu1 %v54947_v13  ;;  %50902 = vmatpush3.msra.mxu0 %v53150_v44 }
0x18de   :  { %50903 = vmatprep.mubr.f32.mxu0 %v54957_v26  ;;  %50897 = vmatmul.mubr.f32.vlgmr.msra.gmra.mxu1 %v54950_v42 }
0x18df   :  { %50904 = vmatmul.mubr.f32.vlgmr.msra.gmra.mxu0 %v54961_v29  ;;  %50906 = vmatprep.subr.mxu1 %v53134_v4 }
0x18e0   :  { %50913 = vmatprep.subr.mxu0 %v53155_v49  ;;  %50907 = vmatpush3.msra.mxu1 %v53134_v4 }
0x18e1   :  { %50914 = vmatpush3.msra.mxu0 %v53155_v49  ;;  %50908 = vmatprep.subr.mxu1 %v53137_v11 }
0x18e2   :  { %50915 = vmatprep.subr.mxu0 %v53160_v50  ;;  %50909 = vmatpush3.msra.mxu1 %v53137_v11 }
0x18e3   :  { %50910 = vmatprep.mubr.f32.mxu1 %v54966_v57  ;;  %50916 = vmatpush3.msra.mxu0 %v53160_v50 }
0x18e4   :  { %50917 = vmatprep.mubr.f32.mxu0 %v54947_v13  ;;  %50911 = vmatmul.mubr.f32.vlgmr.msra.gmra.mxu1 %v54971_v41 }
0x18e5   :  { %50918 = vmatmul.mubr.f32.vlgmr.msra.gmra.mxu0 %v54950_v42  ;;  %50920 = vmatprep.subr.mxu1 %v53134_v4 }
0x18e6   :  { %50921 = vmatpush3.msra.mxu1 %v53134_v4  ;;  %50924 = vmatprep.mubr.f32.mxu1 %v54947_v13 }
0x18e7   :  { %50922 = vmatprep.subr.mxu1 %v53137_v11  ;;  %50927 = vmatprep.subr.mxu0 %v57103_v40 }
0x18e8   :  { %50923 = vmatpush3.msra.mxu1 %v53137_v11  ;;  %50931 = vmatprep.mubr.msk.f32.mxu0 %vm52763_vm1, %v57103_v40 }
0x18e9   :  { %50925 = vmatmul.mubr.f32.vlgmr.msra.gmra.mxu1 %v54950_v42  ;;  %50934 = vmatprep.subr.mxu1 %v57103_v40 }
0x18ea   :  { %50938 = vmatprep.mubr.msk.f32.mxu1 %vm52763_vm1, %v57103_v40 }
0x1987   :  { %v25846_v26 = vpop.f32.mrf.mxu0 }
0x1989   :  { %v50849_v29 = vpop.f32.mrf.mxu0 }
0x198b   :  { %v26003_v57 = vpop.f32.mrf.mxu0 }
0x198d   :  { %v50863_v13 = vpop.f32.mrf.mxu0 }
0x198f   :  { %v25927_v41 = vpop.f32.mrf.mxu1 }
0x1990   :  { %v25928_v21 = vadd.f32 %v25927_v41, %v25846_v26 }
0x1991   :  { %v50856_v58 = vpop.f32.mrf.mxu1 }
0x1992   :  { %v26004_v36 = vadd.f32 %v26003_v57, %v25928_v21  ;;  %v26155_v25 = vpop.f32.mrf.mxu0 }
0x1993   :  { %v26078_v39 = vpop.f32.mrf.mxu1 }
0x1994   :  { %v26079_v2 = vadd.f32 %v26078_v39, %v26004_v36  ;;  %v50877_v33 = vpop.f32.mrf.mxu0 }
0x1995   :  { %v50870_v28 = vpop.f32.mrf.mxu1 }
0x1996   :  { %v26156_v52 = vadd.f32 %v26155_v25, %v26079_v2 }
0x1998   :  { %v26228_v42 = vpop.f32.mrf.mxu1 }
0x1999   :  { %v26229_v22 = vadd.f32 %v26228_v42, %v26156_v52  ;;  %v50891_v16 = vpop.f32.mrf.mxu0 }
0x199a   :  { %v50884_v31 = vpop.f32.mrf.mxu1 }
0x199b   :  { %v26232_v63 = vmul.f32 %v26229_v22, %v55236_v60  ;;  %v26309_v19 = vpop.f32.mrf.mxu0 }
0x199d   :  { %52676 = vrsqrt.f32 %v26232_v63 }
0x199e   :  { %v50898_v6 = vpop.f32.mrf.mxu1 }
0x199f   :  { %v26407_v37 = vadd.f32 %v50898_v6, %v50891_v16  ;;  %v50905_v20 = vpop.f32.mrf.mxu0 }
0x19a0   :  { %v26400_v32 = vpop.f32.mrf.mxu1 }
0x19a1   :  { %v26490_v0 = vadd.f32 %v50905_v20, %v26407_v37  ;;  %v26401_v56 = vadd.f32 %v26400_v32, %v26309_v19  ;;  %v26482_v62 = vpop.f32.mrf.mxu0 }
0x19a3   :  { %v26483_v8 = vadd.f32 %v26482_v62, %v26401_v56 }
0x19a4   :  { %v50912_v34 = vpop.f32.mrf.mxu1 }
0x19a5   :  { %v26573_v18 = vadd.f32 %v50912_v34, %v26490_v0  ;;  %v50919_v7 = vpop.f32.mrf.mxu0 }
0x19a6   :  { %v26564_v26 = vpop.f32.mrf.mxu1 }
0x19a7   :  { %v26656_v29 = vadd.f32 %v50919_v7, %v26573_v18  ;;  %v26565_v57 = vadd.f32 %v26564_v26, %v26483_v8  ;;  %v26649_v13 = vpop.f32.mrf.mxu0 }
0x19a9   :  { %v26650_v41 = vadd.f32 %v26649_v13, %v26565_v57  ;;  %v50926_v21 = vpop.f32.mrf.mxu1 }
0x19aa   :  { %v52677_v60 = vpop.eup %52676  ;;  %v26735_v58 = vadd.f32 %v50926_v21, %v26656_v29 }
0x19ab   :  { %v26728_v36 = vpop.f32.mrf.mxu1  ;;  %v26234_v25 = vmul.f32 %v52677_v60, %v55138_v59 }
0x19ac   :  { %v26767_v39 = vand.u32 4294901760, %v26735_v58  ;;  %v26729_v2 = vadd.f32 %v26728_v36, %v26650_v41 }
0x19ad   :  { %v55307_v33 = vadd.f32 %v26234_v25, %v54824_v38 }
0x19ae   :  { %v26845_v28 = vsub.f32 %v26735_v58, %v26767_v39  ;;  %v26770_v52 = vand.u32 4294901760, %v26729_v2  ;;  %50928 = vmatpush3.msra.mxu0 %v26767_v39 }
0x19af   :  { %50929 = vmatprep.subr.mxu0 %v57103_v40 }
0x19b0   :  { %v26846_v42 = vand.u32 4294901760, %v26845_v28  ;;  %v26852_v22 = vsub.f32 %v26729_v2, %v26770_v52  ;;  %50930 = vmatpush3.msra.mxu0 %v26770_v52 }
0x19b1   :  { %50941 = vmatprep.subr.mxu0 %v57103_v40  ;;  %50932 = vmatmul.mubr.f32.vlgmr.msra.gmra.mxu0 %v53241_v51 }
0x19b2   :  { %v26847_v16 = vsub.f32 %v26845_v28, %v26846_v42  ;;  %v26853_v31 = vand.u32 4294901760, %v26852_v22  ;;  %50942 = vmatpush3.msra.mxu0 %v26845_v28  ;;  %50945 = vmatprep.mubr.msk.f32.mxu0 %vm52763_vm1, %v57103_v40 }
0x19b3   :  { %50943 = vmatprep.subr.mxu0 %v57103_v40 }
0x19b4   :  { %50944 = vmatpush3.msra.mxu0 %v26852_v22  ;;  %v26848_v38 = vand.u32 4294901760, %v26847_v16  ;;  %v26854_v59 = vsub.f32 %v26852_v22, %v26853_v31 }
0x19b5   :  { %50955 = vmatprep.subr.mxu0 %v57103_v40  ;;  %50946 = vmatmul.mubr.f32.vlgmr.msra.gmra.mxu0 %v53234_v35 }
0x19b6   :  { %50935 = vmatpush3.msra.mxu1 %v26848_v38  ;;  %50956 = vmatpush3.msra.mxu0 %v26846_v42  ;;  %v26855_v63 = vand.u32 4294901760, %v26854_v59 }
0x19b7   :  { %50936 = vmatprep.subr.mxu1 %v57103_v40  ;;  %50957 = vmatprep.subr.mxu0 %v57103_v40 }
0x19b8   :  { %50937 = vmatpush3.msra.mxu1 %v26855_v63  ;;  %50958 = vmatpush3.msra.mxu0 %v26853_v31 }
0x19b9   :  { %50939 = vmatmul.mubr.f32.vlgmr.msra.gmra.mxu1 %v53231_v45  ;;  %50948 = vmatprep.subr.mxu1 %v57103_v40 }
0x19ba   :  { %50949 = vmatpush3.msra.mxu1 %v26767_v39  ;;  %50952 = vmatprep.mubr.msk.f32.mxu1 %vm52763_vm1, %v57103_v40 }
0x19bb   :  { %50950 = vmatprep.subr.mxu1 %v57103_v40  ;;  %50959 = vmatprep.mubr.msk.f32.mxu0 %vm52763_vm1, %v57103_v40 }
0x19bc   :  { %50951 = vmatpush3.msra.mxu1 %v26770_v52  ;;  %50960 = vmatmul.mubr.f32.vlgmr.msra.gmra.mxu0 %v53231_v45 }
0x19bd   :  { %50953 = vmatmul.mubr.f32.vlgmr.msra.gmra.mxu1 %v53237_v61  ;;  %50962 = vmatprep.subr.mxu1 %v57103_v40 }
0x19be   :  { %50969 = vmatprep.subr.mxu0 %v53134_v4  ;;  %50963 = vmatpush3.msra.mxu1 %v26767_v39 }
0x19bf   :  { %50970 = vmatpush3.msra.mxu0 %v53134_v4  ;;  %50964 = vmatprep.subr.mxu1 %v57103_v40 }
0x19c0   :  { %50971 = vmatprep.subr.mxu0 %v53137_v11  ;;  %50965 = vmatpush3.msra.mxu1 %v26770_v52 }
0x19c1   :  { %50966 = vmatprep.mubr.msk.f32.mxu1 %vm52763_vm1, %v57103_v40  ;;  %50972 = vmatpush3.msra.mxu0 %v53137_v11 }
0x19c2   :  { %50973 = vmatprep.mubr.f32.mxu0 %v55089_v30  ;;  %50967 = vmatmul.mubr.f32.vlgmr.msra.gmra.mxu1 %v53231_v45  ;;  %v57154_v30 = vld [vmem:[#allocation21_spill] sm:$0xff] }
0x19c3   :  { %50974 = vmatmul.mubr.f32.vlgmr.msra.gmra.mxu0 %v55093_v46  ;;  %50976 = vmatprep.subr.mxu1 %v53177_v53 }
0x19c4   :  { %50983 = vmatprep.subr.mxu0 %v53145_v23  ;;  %50977 = vmatpush3.msra.mxu1 %v53177_v53 }
0x19c5   :  { %50984 = vmatpush3.msra.mxu0 %v53145_v23  ;;  %50978 = vmatprep.subr.mxu1 %v53183_v55 }
0x19c6   :  { %50985 = vmatprep.subr.mxu0 %v53150_v44  ;;  %50979 = vmatpush3.msra.mxu1 %v53183_v55 }
0x19c7   :  { %50980 = vmatprep.mubr.f32.mxu1 %v55044_v27  ;;  %50986 = vmatpush3.msra.mxu0 %v53150_v44 }
0x19c8   :  { %50987 = vmatprep.mubr.f32.mxu0 %v55054_v5  ;;  %50981 = vmatmul.mubr.f32.vlgmr.msra.gmra.mxu1 %v55047_v17  ;;  %v57155_v5 = vld [vmem:[#allocation19_spill] sm:$0xff] }
0x19c9   :  { %50988 = vmatmul.mubr.f32.vlgmr.msra.gmra.mxu0 %v55058_v9  ;;  %50990 = vmatprep.subr.mxu1 %v53134_v4 }
0x19ca   :  { %50997 = vmatprep.subr.mxu0 %v53155_v49  ;;  %50991 = vmatpush3.msra.mxu1 %v53134_v4 }
0x19cb   :  { %50998 = vmatpush3.msra.mxu0 %v53155_v49  ;;  %50992 = vmatprep.subr.mxu1 %v53137_v11 }
0x19cc   :  { %50999 = vmatprep.subr.mxu0 %v53160_v50  ;;  %50993 = vmatpush3.msra.mxu1 %v53137_v11 }
0x19cd   :  { %50994 = vmatprep.mubr.f32.mxu1 %v57154_v30  ;;  %51000 = vmatpush3.msra.mxu0 %v53160_v50 }
0x19ce   :  { %51001 = vmatprep.mubr.f32.mxu0 %v55044_v27  ;;  %50995 = vmatmul.mubr.f32.vlgmr.msra.gmra.mxu1 %v57155_v5 }
0x19cf   :  { %51002 = vmatmul.mubr.f32.vlgmr.msra.gmra.mxu0 %v55047_v17  ;;  %51004 = vmatprep.subr.mxu1 %v53134_v4 }
0x19d0   :  { %51005 = vmatpush3.msra.mxu1 %v53134_v4  ;;  %51008 = vmatprep.mubr.f32.mxu1 %v55044_v27 }
0x19d1   :  { %51006 = vmatprep.subr.mxu1 %v53137_v11  ;;  %51011 = vmatprep.subr.mxu0 %v57103_v40 }
0x19d2   :  { %51007 = vmatpush3.msra.mxu1 %v53137_v11  ;;  %51015 = vmatprep.mubr.msk.f32.mxu0 %vm52763_vm1, %v57103_v40 }
0x19d3   :  { %51009 = vmatmul.mubr.f32.vlgmr.msra.gmra.mxu1 %v55047_v17  ;;  %51018 = vmatprep.subr.mxu1 %v57103_v40 }
0x19d4   :  { %51022 = vmatprep.mubr.msk.f32.mxu1 %vm52763_vm1, %v57103_v40 }
0x1a71   :  { %v26811_v9 = vpop.f32.mrf.mxu0 }
0x1a73   :  { %v50933_v46 = vpop.f32.mrf.mxu0 }
0x1a75   :  { %v26968_v19 = vpop.f32.mrf.mxu0 }
0x1a77   :  { %v50947_v27 = vpop.f32.mrf.mxu0 }
0x1a79   :  { %v26892_v6 = vpop.f32.mrf.mxu1 }
0x1a7a   :  { %v26893_v37 = vadd.f32 %v26892_v6, %v26811_v9 }
0x1a7b   :  { %v50940_v20 = vpop.f32.mrf.mxu1 }
0x1a7c   :  { %v26969_v32 = vadd.f32 %v26968_v19, %v26893_v37  ;;  %v27120_v0 = vpop.f32.mrf.mxu0 }
0x1a7d   :  { %v27043_v56 = vpop.f32.mrf.mxu1 }
0x1a7e   :  { %v27044_v62 = vadd.f32 %v27043_v56, %v26969_v32  ;;  %v50961_v8 = vpop.f32.mrf.mxu0 }
0x1a7f   :  { %v50954_v34 = vpop.f32.mrf.mxu1 }
0x1a80   :  { %v27121_v18 = vadd.f32 %v27120_v0, %v27044_v62 }
0x1a82   :  { %v27193_v17 = vpop.f32.mrf.mxu1 }
0x1a83   :  { %v55375_v7 = vadd.f32 %v27193_v17, %v27121_v18  ;;  %v50975_v26 = vpop.f32.mrf.mxu0 }
0x1a84   :  { %v50968_v29 = vpop.f32.mrf.mxu1 }
0x1a85   :  { %v27270_v57 = vpop.f32.mrf.mxu0 }
0x1a88   :  { %v50982_v13 = vpop.f32.mrf.mxu1 }
0x1a89   :  { %v27368_v41 = vadd.f32 %v50982_v13, %v50975_v26  ;;  %v50989_v21 = vpop.f32.mrf.mxu0 }
0x1a8a   :  { %v27361_v60 = vpop.f32.mrf.mxu1 }
0x1a8b   :  { %v27451_v58 = vadd.f32 %v50989_v21, %v27368_v41  ;;  %v27362_v36 = vadd.f32 %v27361_v60, %v27270_v57  ;;  %v27443_v25 = vpop.f32.mrf.mxu0 }
0x1a8d   :  { %v27444_v39 = vadd.f32 %v27443_v25, %v27362_v36  ;;  %v29124_v36 = vld [vmem:[#allocation2 + $0x50] sm:$0xff] }
0x1a8e   :  { %v50996_v2 = vpop.f32.mrf.mxu1  ;;  %v29131_v25 = vld [vmem:[#allocation5 + $0x50] sm:$0xff] }
0x1a8f   :  { %v27534_v28 = vadd.f32 %v50996_v2, %v27451_v58  ;;  %v51003_v52 = vpop.f32.mrf.mxu0  ;;  %v29132_v2 = vld [vmem:[#allocation5 + $0x58] sm:$0xff] }
0x1a90   :  { %v27525_v42 = vpop.f32.mrf.mxu1 }
0x1a91   :  { %v27617_v22 = vadd.f32 %v51003_v52, %v27534_v28  ;;  %v27526_v16 = vadd.f32 %v27525_v42, %v27444_v39  ;;  %v27610_v31 = vpop.f32.mrf.mxu0  ;;  %v29125_v39 = vld [vmem:[#allocation2 + $0x58] sm:$0xff] }
0x1a93   :  { %v27611_v38 = vadd.f32 %v27610_v31, %v27526_v16  ;;  %v51010_v59 = vpop.f32.mrf.mxu1  ;;  %v29133_v16 = vmax.f32 %v29131_v25, 1e-06 }
0x1a94   :  { %v27696_v63 = vadd.f32 %v51010_v59, %v27617_v22  ;;  %v29126_v22 = vmax.f32 %v29124_v36, 1e-06  ;;  %v29134_v59 = vmax.f32 %v29132_v2, 1e-06 }
0x1a95   :  { %v27689_v30 = vpop.f32.mrf.mxu1 }
0x1a96   :  { %v27728_v5 = vand.u32 4294901760, %v27696_v63  ;;  %v27690_v9 = vadd.f32 %v27689_v30, %v27611_v38  ;;  %v29127_v38 = vmax.f32 %v29125_v39, 1e-06 }
0x1a98   :  { %v27806_v46 = vsub.f32 %v27696_v63, %v27728_v5  ;;  %v27731_v19 = vand.u32 4294901760, %v27690_v9  ;;  %51012 = vmatpush3.msra.mxu0 %v27728_v5 }
0x1a99   :  { %51013 = vmatprep.subr.mxu0 %v57103_v40 }
0x1a9a   :  { %v27807_v27 = vand.u32 4294901760, %v27806_v46  ;;  %v27813_v6 = vsub.f32 %v27690_v9, %v27731_v19  ;;  %51014 = vmatpush3.msra.mxu0 %v27731_v19 }
0x1a9b   :  { %51025 = vmatprep.subr.mxu0 %v57103_v40  ;;  %51016 = vmatmul.mubr.f32.vlgmr.msra.gmra.mxu0 %v53241_v51 }
0x1a9c   :  { %v27808_v37 = vsub.f32 %v27806_v46, %v27807_v27  ;;  %v27814_v20 = vand.u32 4294901760, %v27813_v6  ;;  %51026 = vmatpush3.msra.mxu0 %v27806_v46  ;;  %51029 = vmatprep.mubr.msk.f32.mxu0 %vm52763_vm1, %v57103_v40  ;;  %v55445_v46 = vmin.f32 %v29126_v22, 0.999999 }
0x1a9d   :  { %51027 = vmatprep.subr.mxu0 %v57103_v40 }
0x1a9e   :  { %51028 = vmatpush3.msra.mxu0 %v27813_v6  ;;  %v27809_v32 = vand.u32 4294901760, %v27808_v37  ;;  %v27815_v0 = vsub.f32 %v27813_v6, %v27814_v20  ;;  %v55449_v6 = vmin.f32 %v29127_v38, 0.999999  ;;  %v55451_v37 = vmin.f32 %v29134_v59, 0.999999  ;;  %v57157_v38 = vld [vmem:[#allocation11_spill] sm:$0xff] }
0x1a9f   :  { %51039 = vmatprep.subr.mxu0 %v57103_v40  ;;  %51030 = vmatmul.mubr.f32.vlgmr.msra.gmra.mxu0 %v53234_v35 }
0x1aa0   :  { %51019 = vmatpush3.msra.mxu1 %v27809_v32  ;;  %51040 = vmatpush3.msra.mxu0 %v27807_v27  ;;  %v27816_v56 = vand.u32 4294901760, %v27815_v0 }
0x1aa1   :  { %51020 = vmatprep.subr.mxu1 %v57103_v40  ;;  %51041 = vmatprep.subr.mxu0 %v57103_v40 }
0x1aa2   :  { %51021 = vmatpush3.msra.mxu1 %v27816_v56  ;;  %51042 = vmatpush3.msra.mxu0 %v27814_v20 }
0x1aa3   :  { %51023 = vmatmul.mubr.f32.vlgmr.msra.gmra.mxu1 %v53231_v45  ;;  %51032 = vmatprep.subr.mxu1 %v57103_v40 }
0x1aa4   :  { %51033 = vmatpush3.msra.mxu1 %v27728_v5  ;;  %51036 = vmatprep.mubr.msk.f32.mxu1 %vm52763_vm1, %v57103_v40 }
0x1aa5   :  { %51034 = vmatprep.subr.mxu1 %v57103_v40  ;;  %51043 = vmatprep.mubr.msk.f32.mxu0 %vm52763_vm1, %v57103_v40 }
0x1aa6   :  { %51035 = vmatpush3.msra.mxu1 %v27731_v19  ;;  %51044 = vmatmul.mubr.f32.vlgmr.msra.gmra.mxu0 %v53231_v45 }
0x1aa7   :  { %51037 = vmatmul.mubr.f32.vlgmr.msra.gmra.mxu1 %v53237_v61  ;;  %51046 = vmatprep.subr.mxu1 %v57103_v40 }
0x1aa8   :  { %51053 = vmatprep.subr.mxu0 %v53134_v4  ;;  %51047 = vmatpush3.msra.mxu1 %v27728_v5 }
0x1aa9   :  { %51054 = vmatpush3.msra.mxu0 %v53134_v4  ;;  %51048 = vmatprep.subr.mxu1 %v57103_v40 }
0x1aaa   :  { %51055 = vmatprep.subr.mxu0 %v53137_v11  ;;  %51049 = vmatpush3.msra.mxu1 %v27731_v19  ;;  %v55447_v19 = vmin.f32 %v29133_v16, 0.999999 }
0x1aab   :  { %51050 = vmatprep.mubr.msk.f32.mxu1 %vm52763_vm1, %v57103_v40  ;;  %51056 = vmatpush3.msra.mxu0 %v53137_v11 }
0x1aac   :  { %51057 = vmatprep.mubr.f32.mxu0 %v55187_v48  ;;  %51051 = vmatmul.mubr.f32.vlgmr.msra.gmra.mxu1 %v53231_v45 }
0x1aad   :  { %51058 = vmatmul.mubr.f32.vlgmr.msra.gmra.mxu0 %v55191_v1  ;;  %51060 = vmatprep.subr.mxu1 %v53177_v53 }
0x1aae   :  { %51067 = vmatprep.subr.mxu0 %v53145_v23  ;;  %51061 = vmatpush3.msra.mxu1 %v53177_v53 }
0x1aaf   :  { %51068 = vmatpush3.msra.mxu0 %v53145_v23  ;;  %51062 = vmatprep.subr.mxu1 %v53183_v55 }
0x1ab0   :  { %51069 = vmatprep.subr.mxu0 %v53150_v44  ;;  %51063 = vmatpush3.msra.mxu1 %v53183_v55 }
0x1ab1   :  { %51064 = vmatprep.mubr.f32.mxu1 %v55146_v10  ;;  %51070 = vmatpush3.msra.mxu0 %v53150_v44 }
0x1ab2   :  { %51071 = vmatprep.mubr.f32.mxu0 %v55156_v14  ;;  %51065 = vmatmul.mubr.f32.vlgmr.msra.gmra.mxu1 %v55149_v24  ;;  %v57156_v14 = vld [vmem:[#allocation20_spill] sm:$0xff] }
0x1ab3   :  { %51072 = vmatmul.mubr.f32.vlgmr.msra.gmra.mxu0 %v55160_v3  ;;  %51074 = vmatprep.subr.mxu1 %v53134_v4 }
0x1ab4   :  { %51081 = vmatprep.subr.mxu0 %v53155_v49  ;;  %51075 = vmatpush3.msra.mxu1 %v53134_v4 }
0x1ab5   :  { %51082 = vmatpush3.msra.mxu0 %v53155_v49  ;;  %51076 = vmatprep.subr.mxu1 %v53137_v11 }
0x1ab6   :  { %51083 = vmatprep.subr.mxu0 %v53160_v50  ;;  %51077 = vmatpush3.msra.mxu1 %v53137_v11 }
0x1ab7   :  { %51078 = vmatprep.mubr.f32.mxu1 %v55165_v15  ;;  %51084 = vmatpush3.msra.mxu0 %v53160_v50 }
0x1ab8   :  { %51085 = vmatprep.mubr.f32.mxu0 %v55146_v10  ;;  %51079 = vmatmul.mubr.f32.vlgmr.msra.gmra.mxu1 %v57156_v14 }
0x1ab9   :  { %51086 = vmatmul.mubr.f32.vlgmr.msra.gmra.mxu0 %v55149_v24  ;;  %51088 = vmatprep.subr.mxu1 %v53134_v4 }
0x1aba   :  { %51089 = vmatpush3.msra.mxu1 %v53134_v4  ;;  %51092 = vmatprep.mubr.f32.mxu1 %v55146_v10 }
0x1abb   :  { %51090 = vmatprep.subr.mxu1 %v53137_v11  ;;  %51095 = vmatprep.subr.mxu0 %v57103_v40 }
0x1abc   :  { %51091 = vmatpush3.msra.mxu1 %v53137_v11  ;;  %51099 = vmatprep.mubr.msk.f32.mxu0 %vm52763_vm1, %v57103_v40 }
0x1abd   :  { %51093 = vmatmul.mubr.f32.vlgmr.msra.gmra.mxu1 %v55149_v24  ;;  %51102 = vmatprep.subr.mxu1 %v57103_v40 }
0x1abe   :  { %51106 = vmatprep.mubr.msk.f32.mxu1 %vm52763_vm1, %v57103_v40 }
0x1b5b   :  { %v27772_v3 = vpop.f32.mrf.mxu0 }
0x1b5d   :  { %v51017_v15 = vpop.f32.mrf.mxu0 }
0x1b5f   :  { %v27929_v48 = vpop.f32.mrf.mxu0 }
0x1b61   :  { %v51031_v10 = vpop.f32.mrf.mxu0 }
0x1b63   :  { %v27853_v1 = vpop.f32.mrf.mxu1 }
0x1b64   :  { %v27854_v62 = vadd.f32 %v27853_v1, %v27772_v3  ;;  %v29137_v3 = vmul.f32 %v55447_v19, %v55445_v46 }
0x1b65   :  { %v51024_v8 = vpop.f32.mrf.mxu1 }
0x1b66   :  { %v27930_v34 = vadd.f32 %v27929_v48, %v27854_v62  ;;  %v28081_v18 = vpop.f32.mrf.mxu0  ;;  %v29138_v48 = vmul.f32 %v55451_v37, %v55449_v6 }
0x1b67   :  { %v28004_v17 = vpop.f32.mrf.mxu1 }
0x1b68   :  { %v28005_v26 = vadd.f32 %v28004_v17, %v27930_v34  ;;  %v51045_v29 = vpop.f32.mrf.mxu0  ;;  %v29144_v34 = vsel %vm76_vm0, %v29137_v3, 0 }
0x1b69   :  { %v51038_v57 = vpop.f32.mrf.mxu1 }
0x1b6a   :  { %v28082_v13 = vadd.f32 %v28081_v18, %v28005_v26  ;;  %v29147_v26 = vsel %vm76_vm0, %v29138_v48, 0 }
0x1b6c   :  { %v28154_v24 = vpop.f32.mrf.mxu1 }
0x1b6d   :  { %v55443_v41 = vadd.f32 %v28154_v24, %v28082_v13  ;;  %v51059_v21 = vpop.f32.mrf.mxu0  ;;  %v55459_v13 = vand.u32 4294901760, %v29144_v34  ;;  %v55462_v24 = vand.u32 4294901760, %v29147_v26 }
0x1b6e   :  { %v51052_v60 = vpop.f32.mrf.mxu1 }
0x1b6f   :  { %v28231_v58 = vpop.f32.mrf.mxu0  ;;  %v55469_v25 = vsub.f32 %v29144_v34, %v55459_v13  ;;  %v55473_v39 = vsub.f32 %v29147_v26, %v55462_v24 }
0x1b71   :  { %v55483_v22 = vand.u32 4294901760, %v55473_v39 }
0x1b72   :  { %v51066_v28 = vpop.f32.mrf.mxu1 }
0x1b73   :  { %v28329_v52 = vadd.f32 %v51066_v28, %v51059_v21  ;;  %v51073_v42 = vpop.f32.mrf.mxu0 }
0x1b74   :  { %v28322_v31 = vpop.f32.mrf.mxu1 }
0x1b75   :  { %v28412_v63 = vadd.f32 %v51073_v42, %v28329_v52  ;;  %v28323_v30 = vadd.f32 %v28322_v31, %v28231_v58  ;;  %v28404_v5 = vpop.f32.mrf.mxu0  ;;  %v55478_v42 = vand.u32 4294901760, %v55469_v25  ;;  %v29229_v31 = vsub.f32 %v55473_v39, %v55483_v22 }
0x1b77   :  { %v28405_v9 = vadd.f32 %v28404_v5, %v28323_v30  ;;  %v29219_v16 = vsub.f32 %v55469_v25, %v55478_v42  ;;  %v57158_v30 = vld [vmem:[#allocation12_spill] sm:$0xff]  ;;  %v57159_v5 = vld [vmem:[#allocation17_spill] sm:$0xff] }
0x1b78   :  { %v51080_v27 = vpop.f32.mrf.mxu1 }
0x1b79   :  { %v28495_v20 = vadd.f32 %v51080_v27, %v28412_v63  ;;  %v51087_v32 = vpop.f32.mrf.mxu0  ;;  %v55500_v59 = vand.u32 4294901760, %v29219_v16  ;;  %v55504_v63 = vand.u32 4294901760, %v29229_v31  ;;  %v57161_v27 = vld [vmem:[#allocation18_spill] sm:$0xff] }
0x1b7a   :  { %v28486_v0 = vpop.f32.mrf.mxu1 }
0x1b7b   :  { %v28578_v56 = vadd.f32 %v51087_v32, %v28495_v20  ;;  %v28487_v14 = vadd.f32 %v28486_v0, %v28405_v9  ;;  %v28571_v15 = vpop.f32.mrf.mxu0  ;;  %v57160_v9 = vld [vmem:[#allocation13_spill] sm:$0xff]  ;;  %v57162_v20 = vld [vmem:[#allocation14_spill] sm:$0xff]  ;;  %v57163_v32 = vld [vmem:[#allocation15_spill] sm:$0xff] }
0x1b7c   :  { %v57164_v0 = vld [vmem:[#allocation16_spill] sm:$0xff] }
0x1b7d   :  { %v28572_v10 = vadd.f32 %v28571_v15, %v28487_v14  ;;  %v51094_v1 = vpop.f32.mrf.mxu1 }
0x1b7e   :  { %v28657_v62 = vadd.f32 %v51094_v1, %v28578_v56 }
0x1b7f   :  { %v28650_v8 = vpop.f32.mrf.mxu1 }
0x1b80   :  { %v28689_v18 = vand.u32 4294901760, %v28657_v62  ;;  %v28651_v17 = vadd.f32 %v28650_v8, %v28572_v10 }
0x1b82   :  { %v28767_v29 = vsub.f32 %v28657_v62, %v28689_v18  ;;  %v28692_v57 = vand.u32 4294901760, %v28651_v17  ;;  %51096 = vmatpush3.msra.mxu0 %v28689_v18 }
0x1b83   :  { %51097 = vmatprep.subr.mxu0 %v57103_v40 }
0x1b84   :  { %v28768_v21 = vand.u32 4294901760, %v28767_v29  ;;  %v28774_v60 = vsub.f32 %v28651_v17, %v28692_v57  ;;  %51098 = vmatpush3.msra.mxu0 %v28692_v57 }
0x1b85   :  { %51109 = vmatprep.subr.mxu0 %v57103_v40  ;;  %51100 = vmatmul.mubr.f32.vlgmr.msra.gmra.mxu0 %v53241_v51 }
0x1b86   :  { %v28769_v58 = vsub.f32 %v28767_v29, %v28768_v21  ;;  %v28775_v36 = vand.u32 4294901760, %v28774_v60  ;;  %51110 = vmatpush3.msra.mxu0 %v28767_v29  ;;  %51113 = vmatprep.mubr.msk.f32.mxu0 %vm52763_vm1, %v57103_v40 }
0x1b87   :  { %51111 = vmatprep.subr.mxu0 %v57103_v40 }
0x1b88   :  { %51112 = vmatpush3.msra.mxu0 %v28774_v60  ;;  %v28770_v2 = vand.u32 4294901760, %v28769_v58  ;;  %v28776_v28 = vsub.f32 %v28774_v60, %v28775_v36 }
0x1b89   :  { %51123 = vmatprep.subr.mxu0 %v57103_v40  ;;  %51114 = vmatmul.mubr.f32.vlgmr.msra.gmra.mxu0 %v53234_v35 }
0x1b8a   :  { %51103 = vmatpush3.msra.mxu1 %v28770_v2  ;;  %51124 = vmatpush3.msra.mxu0 %v28768_v21  ;;  %v28777_v52 = vand.u32 4294901760, %v28776_v28 }
0x1b8b   :  { %51104 = vmatprep.subr.mxu1 %v57103_v40  ;;  %51125 = vmatprep.subr.mxu0 %v57103_v40 }
0x1b8c   :  { %51105 = vmatpush3.msra.mxu1 %v28777_v52  ;;  %51126 = vmatpush3.msra.mxu0 %v28775_v36 }
0x1b8d   :  { %51107 = vmatmul.mubr.f32.vlgmr.msra.gmra.mxu1 %v53231_v45  ;;  %51116 = vmatprep.subr.mxu1 %v57103_v40 }
0x1b8e   :  { %51117 = vmatpush3.msra.mxu1 %v28689_v18  ;;  %51120 = vmatprep.mubr.msk.f32.mxu1 %vm52763_vm1, %v57103_v40 }
0x1b8f   :  { %51118 = vmatprep.subr.mxu1 %v57103_v40  ;;  %51127 = vmatprep.mubr.msk.f32.mxu0 %vm52763_vm1, %v57103_v40 }
0x1b90   :  { %51119 = vmatpush3.msra.mxu1 %v28692_v57  ;;  %51128 = vmatmul.mubr.f32.vlgmr.msra.gmra.mxu0 %v53231_v45 }
0x1b91   :  { %51121 = vmatmul.mubr.f32.vlgmr.msra.gmra.mxu1 %v53237_v61  ;;  %51130 = vmatprep.subr.mxu1 %v57103_v40 }
0x1b92   :  { %51137 = vmatprep.subr.mxu0 %v57157_v38  ;;  %51131 = vmatpush3.msra.mxu1 %v28689_v18 }
0x1b93   :  { %51138 = vmatpush3.msra.mxu0 %v57157_v38  ;;  %51132 = vmatprep.subr.mxu1 %v57103_v40 }
0x1b94   :  { %51139 = vmatprep.subr.mxu0 %v57158_v30  ;;  %51133 = vmatpush3.msra.mxu1 %v28692_v57 }
0x1b95   :  { %51134 = vmatprep.mubr.msk.f32.mxu1 %vm52763_vm1, %v57103_v40  ;;  %51140 = vmatpush3.msra.mxu0 %v57158_v30 }
0x1b96   :  { %51141 = vmatprep.mubr.f32.mxu0 %v55500_v59  ;;  %51135 = vmatmul.mubr.f32.vlgmr.msra.gmra.mxu1 %v53231_v45 }
0x1b97   :  { %51142 = vmatmul.mubr.f32.vlgmr.msra.gmra.mxu0 %v55504_v63  ;;  %51144 = vmatprep.subr.mxu1 %v57159_v5 }
0x1b98   :  { %51151 = vmatprep.subr.mxu0 %v57160_v9  ;;  %51145 = vmatpush3.msra.mxu1 %v57159_v5 }
0x1b99   :  { %51152 = vmatpush3.msra.mxu0 %v57160_v9  ;;  %51146 = vmatprep.subr.mxu1 %v57161_v27 }
0x1b9a   :  { %51153 = vmatprep.subr.mxu0 %v57162_v20  ;;  %51147 = vmatpush3.msra.mxu1 %v57161_v27 }
0x1b9b   :  { %51148 = vmatprep.mubr.f32.mxu1 %v55459_v13  ;;  %51154 = vmatpush3.msra.mxu0 %v57162_v20 }
0x1b9c   :  { %51155 = vmatprep.mubr.f32.mxu0 %v55469_v25  ;;  %51149 = vmatmul.mubr.f32.vlgmr.msra.gmra.mxu1 %v55462_v24 }
0x1b9d   :  { %51156 = vmatmul.mubr.f32.vlgmr.msra.gmra.mxu0 %v55473_v39  ;;  %51158 = vmatprep.subr.mxu1 %v57157_v38 }
0x1b9e   :  { %51165 = vmatprep.subr.mxu0 %v57163_v32  ;;  %51159 = vmatpush3.msra.mxu1 %v57157_v38 }
0x1b9f   :  { %51166 = vmatpush3.msra.mxu0 %v57163_v32  ;;  %51160 = vmatprep.subr.mxu1 %v57158_v30 }
0x1ba0   :  { %51167 = vmatprep.subr.mxu0 %v57164_v0  ;;  %51161 = vmatpush3.msra.mxu1 %v57158_v30 }
0x1ba1   :  { %51162 = vmatprep.mubr.f32.mxu1 %v55478_v42  ;;  %51168 = vmatpush3.msra.mxu0 %v57164_v0 }
0x1ba2   :  { %51169 = vmatprep.mubr.f32.mxu0 %v55459_v13  ;;  %51163 = vmatmul.mubr.f32.vlgmr.msra.gmra.mxu1 %v55483_v22 }
0x1ba3   :  { %51170 = vmatmul.mubr.f32.vlgmr.msra.gmra.mxu0 %v55462_v24  ;;  %51172 = vmatprep.subr.mxu1 %v57157_v38 }
0x1ba4   :  { %51173 = vmatpush3.msra.mxu1 %v57157_v38  ;;  %51176 = vmatprep.mubr.f32.mxu1 %v55459_v13 }
0x1ba5   :  { %51174 = vmatprep.subr.mxu1 %v57158_v30  ;;  %51179 = vmatprep.subr.mxu0 %v57103_v40 }
0x1ba6   :  { %51175 = vmatpush3.msra.mxu1 %v57158_v30  ;;  %51183 = vmatprep.mubr.msk.f32.mxu0 %vm52763_vm1, %v57103_v40 }
0x1ba7   :  { %51177 = vmatmul.mubr.f32.vlgmr.msra.gmra.mxu1 %v55462_v24  ;;  %51186 = vmatprep.subr.mxu1 %v57103_v40 }
0x1ba8   :  { %51190 = vmatprep.mubr.msk.f32.mxu1 %vm52763_vm1, %v57103_v40 }
0x1c45   :  { %v28733_v56 = vpop.f32.mrf.mxu0 }
0x1c47   :  { %v51101_v14 = vpop.f32.mrf.mxu0 }
0x1c49   :  { %v28890_v3 = vpop.f32.mrf.mxu0 }
0x1c4b   :  { %v51115_v15 = vpop.f32.mrf.mxu0 }
0x1c4d   :  { %v28814_v48 = vpop.f32.mrf.mxu1 }
0x1c4e   :  { %v28815_v10 = vadd.f32 %v28814_v48, %v28733_v56 }
0x1c4f   :  { %v51108_v1 = vpop.f32.mrf.mxu1 }
0x1c50   :  { %v28891_v62 = vadd.f32 %v28890_v3, %v28815_v10  ;;  %v29042_v8 = vpop.f32.mrf.mxu0 }
0x1c51   :  { %v28965_v34 = vpop.f32.mrf.mxu1 }
0x1c52   :  { %v28966_v18 = vadd.f32 %v28965_v34, %v28891_v62  ;;  %v51129_v17 = vpop.f32.mrf.mxu0 }
0x1c53   :  { %v51122_v26 = vpop.f32.mrf.mxu1  ;;  %v29140_v17 = vmul.f32 %v55449_v6, %v55449_v6 }
0x1c54   :  { %v29043_v29 = vadd.f32 %v29042_v8, %v28966_v18  ;;  %v29139_v18 = vmul.f32 %v55445_v46, %v55445_v46 }
0x1c56   :  { %v29115_v57 = vpop.f32.mrf.mxu1 }
0x1c57   :  { %v29116_v21 = vadd.f32 %v29115_v57, %v29043_v29  ;;  %v51143_v60 = vpop.f32.mrf.mxu0 }
0x1c58   :  { %v51136_v58 = vpop.f32.mrf.mxu1 }
0x1c59   :  { %v29119_v36 = vmul.f32 %v29116_v21, %v55443_v41  ;;  %v29222_v2 = vpop.f32.mrf.mxu0  ;;  %v30111_v58 = vsel %vm76_vm0, %v29139_v18, 0 }
0x1c5a   :  { %v55560_v6 = vand.u32 4294901760, %v30111_v58 }
0x1c5b   :  { %52678 = vrsqrt.f32 %v29119_v36 }
0x1c5c   :  { %v51150_v28 = vpop.f32.mrf.mxu1 }
0x1c5d   :  { %v29320_v52 = vadd.f32 %v51150_v28, %v51143_v60  ;;  %v51157_v16 = vpop.f32.mrf.mxu0 }
0x1c5e   :  { %v29313_v31 = vpop.f32.mrf.mxu1 }
0x1c5f   :  { %v29403_v56 = vadd.f32 %v51157_v16, %v29320_v52  ;;  %v29314_v14 = vadd.f32 %v29313_v31, %v29222_v2  ;;  %v29395_v3 = vpop.f32.mrf.mxu0  ;;  %v30114_v52 = vsel %vm76_vm0, %v29140_v17, 0  ;;  %v57165_v16 = vld [vmem:[#allocation22_spill] sm:$0xff] }
0x1c61   :  { %v29396_v15 = vadd.f32 %v29395_v3, %v29314_v14  ;;  %v55563_v14 = vand.u32 4294901760, %v30114_v52 }
0x1c62   :  { %v51164_v48 = vpop.f32.mrf.mxu1 }
0x1c63   :  { %v29486_v10 = vadd.f32 %v51164_v48, %v29403_v56  ;;  %v51171_v1 = vpop.f32.mrf.mxu0 }
0x1c64   :  { %v29477_v62 = vpop.f32.mrf.mxu1 }
0x1c65   :  { %v29569_v8 = vadd.f32 %v51171_v1, %v29486_v10  ;;  %v29478_v34 = vadd.f32 %v29477_v62, %v29396_v15  ;;  %v29562_v41 = vpop.f32.mrf.mxu0  ;;  %v55570_v10 = vsub.f32 %v30111_v58, %v55560_v6  ;;  %v55574_v1 = vsub.f32 %v30114_v52, %v55563_v14 }
0x1c67   :  { %v29563_v26 = vadd.f32 %v29562_v41, %v29478_v34  ;;  %v51178_v29 = vpop.f32.mrf.mxu1  ;;  %v55579_v18 = vand.u32 4294901760, %v55570_v10  ;;  %v55584_v41 = vand.u32 4294901760, %v55574_v1 }
0x1c68   :  { %v52679_v57 = vpop.eup %52678  ;;  %v29648_v21 = vadd.f32 %v51178_v29, %v29569_v8 }
0x1c69   :  { %v29641_v60 = vpop.f32.mrf.mxu1  ;;  %v29121_v36 = vmul.f32 %v52679_v57, %v55375_v7  ;;  %57167 = vst [vmem:[#allocation19_spill] sm:$0xff] %v55579_v18  ;;  %57168 = vst [vmem:[#allocation20_spill] sm:$0xff] %v55584_v41  ;;  %v30186_v17 = vsub.f32 %v55570_v10, %v55579_v18 }
0x1c6a   :  { %v29680_v2 = vand.u32 4294901760, %v29648_v21  ;;  %v29642_v28 = vadd.f32 %v29641_v60, %v29563_v26  ;;  %v30196_v26 = vsub.f32 %v55574_v1, %v55584_v41 }
0x1c6b   :  { %v55558_v31 = vadd.f32 %v29121_v36, %v57165_v16  ;;  %v55601_v29 = vand.u32 4294901760, %v30186_v17 }
0x1c6c   :  { %v29758_v46 = vsub.f32 %v29648_v21, %v29680_v2  ;;  %v29683_v56 = vand.u32 4294901760, %v29642_v28  ;;  %51180 = vmatpush3.msra.mxu0 %v29680_v2  ;;  %v55605_v57 = vand.u32 4294901760, %v30196_v26 }
0x1c6d   :  { %57166 = vst [vmem:[#allocation21_spill] sm:$0xff] %v55558_v31  ;;  %51181 = vmatprep.subr.mxu0 %v57103_v40 }
0x1c6e   :  { %v29759_v3 = vand.u32 4294901760, %v29758_v46  ;;  %v29765_v15 = vsub.f32 %v29642_v28, %v29683_v56  ;;  %51182 = vmatpush3.msra.mxu0 %v29683_v56 }
0x1c6f   :  { %51193 = vmatprep.subr.mxu0 %v57103_v40  ;;  %51184 = vmatmul.mubr.f32.vlgmr.msra.gmra.mxu0 %v52936_v12 }
0x1c70   :  { %v29760_v7 = vsub.f32 %v29758_v46, %v29759_v3  ;;  %v29766_v48 = vand.u32 4294901760, %v29765_v15  ;;  %51194 = vmatpush3.msra.mxu0 %v29758_v46  ;;  %51197 = vmatprep.mubr.msk.f32.mxu0 %vm52763_vm1, %v57103_v40 }
0x1c71   :  { %51195 = vmatprep.subr.mxu0 %v57103_v40 }
0x1c72   :  { %51196 = vmatpush3.msra.mxu0 %v29765_v15  ;;  %v29761_v62 = vand.u32 4294901760, %v29760_v7  ;;  %v29767_v8 = vsub.f32 %v29765_v15, %v29766_v48 }
0x1c73   :  { %51207 = vmatprep.subr.mxu0 %v57103_v40  ;;  %51198 = vmatmul.mubr.f32.vlgmr.msra.gmra.mxu0 %v52923_v47 }
0x1c74   :  { %51187 = vmatpush3.msra.mxu1 %v29761_v62  ;;  %51208 = vmatpush3.msra.mxu0 %v29759_v3  ;;  %v29768_v34 = vand.u32 4294901760, %v29767_v8 }
0x1c75   :  { %51188 = vmatprep.subr.mxu1 %v57103_v40  ;;  %51209 = vmatprep.subr.mxu0 %v57103_v40 }
0x1c76   :  { %51189 = vmatpush3.msra.mxu1 %v29768_v34  ;;  %51210 = vmatpush3.msra.mxu0 %v29766_v48 }
0x1c77   :  { %51191 = vmatmul.mubr.f32.vlgmr.msra.gmra.mxu1 %v52920_v43  ;;  %51200 = vmatprep.subr.mxu1 %v57103_v40 }
0x1c78   :  { %51201 = vmatpush3.msra.mxu1 %v29680_v2  ;;  %51204 = vmatprep.mubr.msk.f32.mxu1 %vm52763_vm1, %v57103_v40 }
0x1c79   :  { %51202 = vmatprep.subr.mxu1 %v57103_v40  ;;  %51211 = vmatprep.mubr.msk.f32.mxu0 %vm52763_vm1, %v57103_v40 }
0x1c7a   :  { %51203 = vmatpush3.msra.mxu1 %v29683_v56  ;;  %51212 = vmatmul.mubr.f32.vlgmr.msra.gmra.mxu0 %v52920_v43 }
0x1c7b   :  { %51205 = vmatmul.mubr.f32.vlgmr.msra.gmra.mxu1 %v52926_v54  ;;  %51214 = vmatprep.subr.mxu1 %v57103_v40 }
0x1c7c   :  { %51221 = vmatprep.subr.mxu0 %v57157_v38  ;;  %51215 = vmatpush3.msra.mxu1 %v29680_v2 }
0x1c7d   :  { %51222 = vmatpush3.msra.mxu0 %v57157_v38  ;;  %51216 = vmatprep.subr.mxu1 %v57103_v40 }
0x1c7e   :  { %51223 = vmatprep.subr.mxu0 %v57158_v30  ;;  %51217 = vmatpush3.msra.mxu1 %v29683_v56 }
0x1c7f   :  { %51218 = vmatprep.mubr.msk.f32.mxu1 %vm52763_vm1, %v57103_v40  ;;  %51224 = vmatpush3.msra.mxu0 %v57158_v30 }
0x1c80   :  { %51225 = vmatprep.mubr.f32.mxu0 %v55601_v29  ;;  %51219 = vmatmul.mubr.f32.vlgmr.msra.gmra.mxu1 %v52920_v43 }
0x1c81   :  { %51226 = vmatmul.mubr.f32.vlgmr.msra.gmra.mxu0 %v55605_v57  ;;  %51228 = vmatprep.subr.mxu1 %v57159_v5 }
0x1c82   :  { %51235 = vmatprep.subr.mxu0 %v57160_v9  ;;  %51229 = vmatpush3.msra.mxu1 %v57159_v5 }
0x1c83   :  { %51236 = vmatpush3.msra.mxu0 %v57160_v9  ;;  %51230 = vmatprep.subr.mxu1 %v57161_v27 }
0x1c84   :  { %51237 = vmatprep.subr.mxu0 %v57162_v20  ;;  %51231 = vmatpush3.msra.mxu1 %v57161_v27 }
0x1c85   :  { %51232 = vmatprep.mubr.f32.mxu1 %v55560_v6  ;;  %51238 = vmatpush3.msra.mxu0 %v57162_v20 }
0x1c86   :  { %51239 = vmatprep.mubr.f32.mxu0 %v55570_v10  ;;  %51233 = vmatmul.mubr.f32.vlgmr.msra.gmra.mxu1 %v55563_v14 }
0x1c87   :  { %51240 = vmatmul.mubr.f32.vlgmr.msra.gmra.mxu0 %v55574_v1  ;;  %51242 = vmatprep.subr.mxu1 %v57157_v38 }
0x1c88   :  { %51249 = vmatprep.subr.mxu0 %v57163_v32  ;;  %51243 = vmatpush3.msra.mxu1 %v57157_v38 }
0x1c89   :  { %51250 = vmatpush3.msra.mxu0 %v57163_v32  ;;  %51244 = vmatprep.subr.mxu1 %v57158_v30 }
0x1c8a   :  { %51251 = vmatprep.subr.mxu0 %v57164_v0  ;;  %51245 = vmatpush3.msra.mxu1 %v57158_v30 }
0x1c8b   :  { %51246 = vmatprep.mubr.f32.mxu1 %v55579_v18  ;;  %51252 = vmatpush3.msra.mxu0 %v57164_v0 }
0x1c8c   :  { %51253 = vmatprep.mubr.f32.mxu0 %v55560_v6  ;;  %51247 = vmatmul.mubr.f32.vlgmr.msra.gmra.mxu1 %v55584_v41 }
0x1c8d   :  { %51254 = vmatmul.mubr.f32.vlgmr.msra.gmra.mxu0 %v55563_v14  ;;  %51256 = vmatprep.subr.mxu1 %v57157_v38 }
0x1c8e   :  { %51257 = vmatpush3.msra.mxu1 %v57157_v38  ;;  %51260 = vmatprep.mubr.f32.mxu1 %v55560_v6 }
0x1c8f   :  { %51258 = vmatprep.subr.mxu1 %v57158_v30  ;;  %51263 = vmatprep.subr.mxu0 %v57103_v40 }
0x1c90   :  { %51259 = vmatpush3.msra.mxu1 %v57158_v30  ;;  %51267 = vmatprep.mubr.msk.f32.mxu0 %vm52763_vm1, %v57103_v40 }
0x1c91   :  { %51261 = vmatmul.mubr.f32.vlgmr.msra.gmra.mxu1 %v55563_v14  ;;  %51270 = vmatprep.subr.mxu1 %v57103_v40 }
0x1c92   :  { %51274 = vmatprep.mubr.msk.f32.mxu1 %vm52763_vm1, %v57103_v40 }
0x1d2f   :  { %v29724_v21 = vpop.f32.mrf.mxu0 }
0x1d31   :  { %v51185_v60 = vpop.f32.mrf.mxu0 }
0x1d33   :  { %v29881_v58 = vpop.f32.mrf.mxu0 }
0x1d35   :  { %v51199_v36 = vpop.f32.mrf.mxu0 }
0x1d37   :  { %v29805_v2 = vpop.f32.mrf.mxu1 }
0x1d38   :  { %v29806_v28 = vadd.f32 %v29805_v2, %v29724_v21 }
0x1d39   :  { %v51192_v52 = vpop.f32.mrf.mxu1 }
0x1d3a   :  { %v29882_v16 = vadd.f32 %v29881_v58, %v29806_v28  ;;  %v30033_v46 = vpop.f32.mrf.mxu0 }
0x1d3b   :  { %v29956_v56 = vpop.f32.mrf.mxu1 }
0x1d3c   :  { %v29957_v3 = vadd.f32 %v29956_v56, %v29882_v16  ;;  %v51213_v15 = vpop.f32.mrf.mxu0 }
0x1d3d   :  { %v51206_v7 = vpop.f32.mrf.mxu1 }
0x1d3e   :  { %v30034_v48 = vadd.f32 %v30033_v46, %v29957_v3  ;;  %v29141_v3 = vmul.f32 %v55447_v19, %v55447_v19 }
0x1d40   :  { %v30106_v62 = vpop.f32.mrf.mxu1 }
0x1d41   :  { %v55650_v8 = vadd.f32 %v30106_v62, %v30034_v48  ;;  %v51227_v34 = vpop.f32.mrf.mxu0  ;;  %v29142_v48 = vmul.f32 %v55451_v37, %v55451_v37 }
0x1d42   :  { %v51220_v17 = vpop.f32.mrf.mxu1 }
0x1d43   :  { %v30189_v26 = vpop.f32.mrf.mxu0  ;;  %v31078_v17 = vsel %vm76_vm0, %v29141_v3, 0 }
0x1d46   :  { %v51234_v31 = vpop.f32.mrf.mxu1 }
0x1d47   :  { %v30287_v60 = vadd.f32 %v51234_v31, %v51227_v34  ;;  %v51241_v41 = vpop.f32.mrf.mxu0 }
0x1d48   :  { %v30280_v36 = vpop.f32.mrf.mxu1 }
0x1d49   :  { %v30370_v18 = vadd.f32 %v51241_v41, %v30287_v60  ;;  %v30281_v21 = vadd.f32 %v30280_v36, %v30189_v26  ;;  %v30362_v2 = vpop.f32.mrf.mxu0 }
0x1d4b   :  { %v30363_v58 = vadd.f32 %v30362_v2, %v30281_v21  ;;  %v55658_v2 = vand.u32 4294901760, %v31078_v17 }
0x1d4c   :  { %v51248_v28 = vpop.f32.mrf.mxu1 }
0x1d4d   :  { %v30453_v52 = vadd.f32 %v51248_v28, %v30370_v18  ;;  %v51255_v16 = vpop.f32.mrf.mxu0  ;;  %v31081_v18 = vsel %vm76_vm0, %v29142_v48, 0 }
0x1d4e   :  { %v30444_v56 = vpop.f32.mrf.mxu1  ;;  %v55661_v19 = vand.u32 4294901760, %v31081_v18 }
0x1d4f   :  { %v30536_v15 = vadd.f32 %v51255_v16, %v30453_v52  ;;  %v30445_v46 = vadd.f32 %v30444_v56, %v30363_v58  ;;  %v30529_v7 = vpop.f32.mrf.mxu0  ;;  %v55668_v16 = vsub.f32 %v31078_v17, %v55658_v2 }
0x1d50   :  { %v55672_v56 = vsub.f32 %v31081_v18, %v55661_v19 }
0x1d51   :  { %v30530_v31 = vadd.f32 %v30529_v7, %v30445_v46  ;;  %v51262_v62 = vpop.f32.mrf.mxu1  ;;  %v55677_v7 = vand.u32 4294901760, %v55668_v16 }
0x1d52   :  { %v30615_v34 = vadd.f32 %v51262_v62, %v30536_v15  ;;  %v55682_v48 = vand.u32 4294901760, %v55672_v56 }
0x1d53   :  { %v30608_v41 = vpop.f32.mrf.mxu1 }
0x1d54   :  { %v30647_v26 = vand.u32 4294901760, %v30615_v34  ;;  %v30609_v60 = vadd.f32 %v30608_v41, %v30530_v31  ;;  %57169 = vst [vmem:[#allocation22_spill] sm:$0xff] %v55682_v48  ;;  %v31153_v31 = vsub.f32 %v55668_v16, %v55677_v7  ;;  %v31163_v62 = vsub.f32 %v55672_v56, %v55682_v48 }
0x1d56   :  { %v30725_v36 = vsub.f32 %v30615_v34, %v30647_v26  ;;  %v30650_v21 = vand.u32 4294901760, %v30609_v60  ;;  %51264 = vmatpush3.msra.mxu0 %v30647_v26  ;;  %v55699_v34 = vand.u32 4294901760, %v31153_v31  ;;  %v55703_v41 = vand.u32 4294901760, %v31163_v62 }
0x1d57   :  { %51265 = vmatprep.subr.mxu0 %v57103_v40 }
0x1d58   :  { %v30726_v37 = vand.u32 4294901760, %v30725_v36  ;;  %v30732_v58 = vsub.f32 %v30609_v60, %v30650_v21  ;;  %51266 = vmatpush3.msra.mxu0 %v30650_v21 }
0x1d59   :  { %51277 = vmatprep.subr.mxu0 %v57103_v40  ;;  %51268 = vmatmul.mubr.f32.vlgmr.msra.gmra.mxu0 %v52936_v12 }
0x1d5a   :  { %v30727_v28 = vsub.f32 %v30725_v36, %v30726_v37  ;;  %v30733_v52 = vand.u32 4294901760, %v30732_v58  ;;  %51278 = vmatpush3.msra.mxu0 %v30725_v36  ;;  %51281 = vmatprep.mubr.msk.f32.mxu0 %vm52763_vm1, %v57103_v40 }
0x1d5b   :  { %51279 = vmatprep.subr.mxu0 %v57103_v40 }
0x1d5c   :  { %51280 = vmatpush3.msra.mxu0 %v30732_v58  ;;  %v30728_v15 = vand.u32 4294901760, %v30727_v28  ;;  %v30734_v46 = vsub.f32 %v30732_v58, %v30733_v52 }
0x1d5d   :  { %51291 = vmatprep.subr.mxu0 %v57103_v40  ;;  %51282 = vmatmul.mubr.f32.vlgmr.msra.gmra.mxu0 %v52923_v47 }
0x1d5e   :  { %51271 = vmatpush3.msra.mxu1 %v30728_v15  ;;  %51292 = vmatpush3.msra.mxu0 %v30726_v37  ;;  %v30735_v3 = vand.u32 4294901760, %v30734_v46 }
0x1d5f   :  { %51272 = vmatprep.subr.mxu1 %v57103_v40  ;;  %51293 = vmatprep.subr.mxu0 %v57103_v40 }
0x1d60   :  { %51273 = vmatpush3.msra.mxu1 %v30735_v3  ;;  %51294 = vmatpush3.msra.mxu0 %v30733_v52 }
0x1d61   :  { %51275 = vmatmul.mubr.f32.vlgmr.msra.gmra.mxu1 %v52920_v43  ;;  %51284 = vmatprep.subr.mxu1 %v57103_v40 }
0x1d62   :  { %51285 = vmatpush3.msra.mxu1 %v30647_v26  ;;  %51288 = vmatprep.mubr.msk.f32.mxu1 %vm52763_vm1, %v57103_v40 }
0x1d63   :  { %51286 = vmatprep.subr.mxu1 %v57103_v40  ;;  %51295 = vmatprep.mubr.msk.f32.mxu0 %vm52763_vm1, %v57103_v40 }
0x1d64   :  { %51287 = vmatpush3.msra.mxu1 %v30650_v21  ;;  %51296 = vmatmul.mubr.f32.vlgmr.msra.gmra.mxu0 %v52920_v43 }
0x1d65   :  { %51289 = vmatmul.mubr.f32.vlgmr.msra.gmra.mxu1 %v52926_v54  ;;  %51298 = vmatprep.subr.mxu1 %v57103_v40 }
0x1d66   :  { %51305 = vmatprep.subr.mxu0 %v57157_v38  ;;  %51299 = vmatpush3.msra.mxu1 %v30647_v26 }
0x1d67   :  { %51306 = vmatpush3.msra.mxu0 %v57157_v38  ;;  %51300 = vmatprep.subr.mxu1 %v57103_v40 }
0x1d68   :  { %51307 = vmatprep.subr.mxu0 %v57158_v30  ;;  %51301 = vmatpush3.msra.mxu1 %v30650_v21 }
0x1d69   :  { %51302 = vmatprep.mubr.msk.f32.mxu1 %vm52763_vm1, %v57103_v40  ;;  %51308 = vmatpush3.msra.mxu0 %v57158_v30 }
0x1d6a   :  { %51309 = vmatprep.mubr.f32.mxu0 %v55699_v34  ;;  %51303 = vmatmul.mubr.f32.vlgmr.msra.gmra.mxu1 %v52920_v43 }
0x1d6b   :  { %51310 = vmatmul.mubr.f32.vlgmr.msra.gmra.mxu0 %v55703_v41  ;;  %51312 = vmatprep.subr.mxu1 %v57159_v5 }
0x1d6c   :  { %51319 = vmatprep.subr.mxu0 %v57160_v9  ;;  %51313 = vmatpush3.msra.mxu1 %v57159_v5 }
0x1d6d   :  { %51320 = vmatpush3.msra.mxu0 %v57160_v9  ;;  %51314 = vmatprep.subr.mxu1 %v57161_v27 }
0x1d6e   :  { %51321 = vmatprep.subr.mxu0 %v57162_v20  ;;  %51315 = vmatpush3.msra.mxu1 %v57161_v27 }
0x1d6f   :  { %51316 = vmatprep.mubr.f32.mxu1 %v55658_v2  ;;  %51322 = vmatpush3.msra.mxu0 %v57162_v20 }
0x1d70   :  { %51323 = vmatprep.mubr.f32.mxu0 %v55668_v16  ;;  %51317 = vmatmul.mubr.f32.vlgmr.msra.gmra.mxu1 %v55661_v19 }
0x1d71   :  { %51324 = vmatmul.mubr.f32.vlgmr.msra.gmra.mxu0 %v55672_v56  ;;  %51326 = vmatprep.subr.mxu1 %v57157_v38 }
0x1d72   :  { %51333 = vmatprep.subr.mxu0 %v57163_v32  ;;  %51327 = vmatpush3.msra.mxu1 %v57157_v38 }
0x1d73   :  { %51334 = vmatpush3.msra.mxu0 %v57163_v32  ;;  %51328 = vmatprep.subr.mxu1 %v57158_v30 }
0x1d74   :  { %51335 = vmatprep.subr.mxu0 %v57164_v0  ;;  %51329 = vmatpush3.msra.mxu1 %v57158_v30 }
0x1d75   :  { %51330 = vmatprep.mubr.f32.mxu1 %v55677_v7  ;;  %51336 = vmatpush3.msra.mxu0 %v57164_v0 }
0x1d76   :  { %51337 = vmatprep.mubr.f32.mxu0 %v55658_v2  ;;  %51331 = vmatmul.mubr.f32.vlgmr.msra.gmra.mxu1 %v55682_v48 }
0x1d77   :  { %51338 = vmatmul.mubr.f32.vlgmr.msra.gmra.mxu0 %v55661_v19  ;;  %51340 = vmatprep.subr.mxu1 %v57157_v38 }
0x1d78   :  { %51341 = vmatpush3.msra.mxu1 %v57157_v38  ;;  %51344 = vmatprep.mubr.f32.mxu1 %v55658_v2 }
0x1d79   :  { %51342 = vmatprep.subr.mxu1 %v57158_v30  ;;  %51347 = vmatprep.subr.mxu0 %v57103_v40 }
0x1d7a   :  { %51343 = vmatpush3.msra.mxu1 %v57158_v30  ;;  %51351 = vmatprep.mubr.msk.f32.mxu0 %vm52763_vm1, %v57103_v40 }
0x1d7b   :  { %51345 = vmatmul.mubr.f32.vlgmr.msra.gmra.mxu1 %v55661_v19  ;;  %51354 = vmatprep.subr.mxu1 %v57103_v40 }
0x1d7c   :  { %51358 = vmatprep.mubr.msk.f32.mxu1 %vm52763_vm1, %v57103_v40 }
0x1e19   :  { %v30691_v17 = vpop.f32.mrf.mxu0 }
0x1e1b   :  { %v51269_v26 = vpop.f32.mrf.mxu0 }
0x1e1d   :  { %v30848_v60 = vpop.f32.mrf.mxu0 }
0x1e1f   :  { %v51283_v18 = vpop.f32.mrf.mxu0 }
0x1e21   :  { %v30772_v36 = vpop.f32.mrf.mxu1 }
0x1e22   :  { %v30773_v21 = vadd.f32 %v30772_v36, %v30691_v17 }
0x1e23   :  { %v51276_v37 = vpop.f32.mrf.mxu1 }
0x1e24   :  { %v30849_v58 = vadd.f32 %v30848_v60, %v30773_v21  ;;  %v31000_v28 = vpop.f32.mrf.mxu0 }
0x1e25   :  { %v30923_v52 = vpop.f32.mrf.mxu1 }
0x1e26   :  { %v30924_v15 = vadd.f32 %v30923_v52, %v30849_v58  ;;  %v51297_v46 = vpop.f32.mrf.mxu0 }
0x1e27   :  { %v51290_v3 = vpop.f32.mrf.mxu1 }
0x1e28   :  { %v31001_v31 = vadd.f32 %v31000_v28, %v30924_v15 }
0x1e2a   :  { %v31073_v62 = vpop.f32.mrf.mxu1 }
0x1e2b   :  { %v55748_v0 = vadd.f32 %v31073_v62, %v31001_v31  ;;  %v51311_v32 = vpop.f32.mrf.mxu0 }
0x1e2c   :  { %v51304_v20 = vpop.f32.mrf.mxu1 }
0x1e2d   :  { %v31156_v27 = vpop.f32.mrf.mxu0 }
0x1e30   :  { %v51318_v9 = vpop.f32.mrf.mxu1 }
0x1e31   :  { %v31254_v26 = vadd.f32 %v51318_v9, %v51311_v32  ;;  %v51325_v5 = vpop.f32.mrf.mxu0 }
0x1e32   :  { %v31247_v18 = vpop.f32.mrf.mxu1 }
0x1e33   :  { %v31337_v30 = vadd.f32 %v51325_v5, %v31254_v26  ;;  %v31248_v17 = vadd.f32 %v31247_v18, %v31156_v27  ;;  %v31329_v36 = vpop.f32.mrf.mxu0 }
0x1e35   :  { %v31330_v60 = vadd.f32 %v31329_v36, %v31248_v17 }
0x1e36   :  { %v51332_v21 = vpop.f32.mrf.mxu1 }
0x1e37   :  { %v31420_v37 = vadd.f32 %v51332_v21, %v31337_v30  ;;  %v51339_v58 = vpop.f32.mrf.mxu0 }
0x1e38   :  { %v31411_v52 = vpop.f32.mrf.mxu1 }
0x1e39   :  { %v31503_v46 = vadd.f32 %v51339_v58, %v31420_v37  ;;  %v31412_v28 = vadd.f32 %v31411_v52, %v31330_v60  ;;  %v31496_v15 = vpop.f32.mrf.mxu0 }
0x1e3b   :  { %v31497_v3 = vadd.f32 %v31496_v15, %v31412_v28  ;;  %v51346_v31 = vpop.f32.mrf.mxu1 }
0x1e3c   :  { %v31582_v62 = vadd.f32 %v51346_v31, %v31503_v46 }
0x1e3d   :  { %v31575_v20 = vpop.f32.mrf.mxu1 }
0x1e3e   :  { %v31614_v38 = vand.u32 4294901760, %v31582_v62  ;;  %v31576_v48 = vadd.f32 %v31575_v20, %v31497_v3 }
0x1e40   :  { %v31692_v9 = vsub.f32 %v31582_v62, %v31614_v38  ;;  %v31617_v32 = vand.u32 4294901760, %v31576_v48  ;;  %51348 = vmatpush3.msra.mxu0 %v31614_v38 }
0x1e41   :  { %51349 = vmatprep.subr.mxu0 %v57103_v40 }
0x1e42   :  { %v31693_v5 = vand.u32 4294901760, %v31692_v9  ;;  %v31699_v27 = vsub.f32 %v31576_v48, %v31617_v32  ;;  %51350 = vmatpush3.msra.mxu0 %v31617_v32 }
0x1e43   :  { %51361 = vmatprep.subr.mxu0 %v57103_v40  ;;  %51352 = vmatmul.mubr.f32.vlgmr.msra.gmra.mxu0 %v52936_v12 }
0x1e44   :  { %v31694_v30 = vsub.f32 %v31692_v9, %v31693_v5  ;;  %v31700_v26 = vand.u32 4294901760, %v31699_v27  ;;  %51362 = vmatpush3.msra.mxu0 %v31692_v9  ;;  %51365 = vmatprep.mubr.msk.f32.mxu0 %vm52763_vm1, %v57103_v40 }
0x1e45   :  { %51363 = vmatprep.subr.mxu0 %v57103_v40 }
0x1e46   :  { %51364 = vmatpush3.msra.mxu0 %v31699_v27  ;;  %v31695_v18 = vand.u32 4294901760, %v31694_v30  ;;  %v31701_v17 = vsub.f32 %v31699_v27, %v31700_v26 }
0x1e47   :  { %51375 = vmatprep.subr.mxu0 %v57103_v40  ;;  %51366 = vmatmul.mubr.f32.vlgmr.msra.gmra.mxu0 %v52923_v47 }
0x1e48   :  { %51355 = vmatpush3.msra.mxu1 %v31695_v18  ;;  %51376 = vmatpush3.msra.mxu0 %v31693_v5  ;;  %v31702_v48 = vand.u32 4294901760, %v31701_v17 }
0x1e49   :  { %51356 = vmatprep.subr.mxu1 %v57103_v40  ;;  %51377 = vmatprep.subr.mxu0 %v57103_v40 }
0x1e4a   :  { %51357 = vmatpush3.msra.mxu1 %v31702_v48  ;;  %51378 = vmatpush3.msra.mxu0 %v31700_v26 }
0x1e4b   :  { %51359 = vmatmul.mubr.f32.vlgmr.msra.gmra.mxu1 %v52920_v43  ;;  %51368 = vmatprep.subr.mxu1 %v57103_v40 }
0x1e4c   :  { %51369 = vmatpush3.msra.mxu1 %v31614_v38  ;;  %51372 = vmatprep.mubr.msk.f32.mxu1 %vm52763_vm1, %v57103_v40 }
0x1e4d   :  { %51370 = vmatprep.subr.mxu1 %v57103_v40  ;;  %51379 = vmatprep.mubr.msk.f32.mxu0 %vm52763_vm1, %v57103_v40 }
0x1e4e   :  { %51371 = vmatpush3.msra.mxu1 %v31617_v32  ;;  %51380 = vmatmul.mubr.f32.vlgmr.msra.gmra.mxu0 %v52920_v43 }
0x1e4f   :  { %51373 = vmatmul.mubr.f32.vlgmr.msra.gmra.mxu1 %v52926_v54  ;;  %51382 = vmatprep.subr.mxu1 %v57103_v40 }
0x1e50   :  { %51389 = vmatprep.subr.mxu0 %v53134_v4  ;;  %51383 = vmatpush3.msra.mxu1 %v31614_v38 }
0x1e51   :  { %51390 = vmatpush3.msra.mxu0 %v53134_v4  ;;  %51384 = vmatprep.subr.mxu1 %v57103_v40 }
0x1e52   :  { %51391 = vmatprep.subr.mxu0 %v53137_v11  ;;  %51385 = vmatpush3.msra.mxu1 %v31617_v32 }
0x1e53   :  { %51386 = vmatprep.mubr.msk.f32.mxu1 %vm52763_vm1, %v57103_v40  ;;  %51392 = vmatpush3.msra.mxu0 %v53137_v11 }
0x1e54   :  { %51393 = vmatprep.mubr.f32.mxu0 %v55500_v59  ;;  %51387 = vmatmul.mubr.f32.vlgmr.msra.gmra.mxu1 %v52920_v43 }
0x1e55   :  { %51394 = vmatmul.mubr.f32.vlgmr.msra.gmra.mxu0 %v55504_v63  ;;  %51396 = vmatprep.subr.mxu1 %v53177_v53 }
0x1e56   :  { %51403 = vmatprep.subr.mxu0 %v53145_v23  ;;  %51397 = vmatpush3.msra.mxu1 %v53177_v53 }
0x1e57   :  { %51404 = vmatpush3.msra.mxu0 %v53145_v23  ;;  %51398 = vmatprep.subr.mxu1 %v53183_v55 }
0x1e58   :  { %51405 = vmatprep.subr.mxu0 %v53150_v44  ;;  %51399 = vmatpush3.msra.mxu1 %v53183_v55 }
0x1e59   :  { %51400 = vmatprep.mubr.f32.mxu1 %v55459_v13  ;;  %51406 = vmatpush3.msra.mxu0 %v53150_v44 }
0x1e5a   :  { %51407 = vmatprep.mubr.f32.mxu0 %v55469_v25  ;;  %51401 = vmatmul.mubr.f32.vlgmr.msra.gmra.mxu1 %v55462_v24 }
0x1e5b   :  { %51408 = vmatmul.mubr.f32.vlgmr.msra.gmra.mxu0 %v55473_v39  ;;  %51410 = vmatprep.subr.mxu1 %v53134_v4 }
0x1e5c   :  { %51417 = vmatprep.subr.mxu0 %v53155_v49  ;;  %51411 = vmatpush3.msra.mxu1 %v53134_v4 }
0x1e5d   :  { %51418 = vmatpush3.msra.mxu0 %v53155_v49  ;;  %51412 = vmatprep.subr.mxu1 %v53137_v11 }
0x1e5e   :  { %51419 = vmatprep.subr.mxu0 %v53160_v50  ;;  %51413 = vmatpush3.msra.mxu1 %v53137_v11 }
0x1e5f   :  { %51414 = vmatprep.mubr.f32.mxu1 %v55478_v42  ;;  %51420 = vmatpush3.msra.mxu0 %v53160_v50 }
0x1e60   :  { %51421 = vmatprep.mubr.f32.mxu0 %v55459_v13  ;;  %51415 = vmatmul.mubr.f32.vlgmr.msra.gmra.mxu1 %v55483_v22 }
0x1e61   :  { %51422 = vmatmul.mubr.f32.vlgmr.msra.gmra.mxu0 %v55462_v24  ;;  %51424 = vmatprep.subr.mxu1 %v53134_v4 }
0x1e62   :  { %51425 = vmatpush3.msra.mxu1 %v53134_v4  ;;  %51428 = vmatprep.mubr.f32.mxu1 %v55459_v13 }
0x1e63   :  { %51426 = vmatprep.subr.mxu1 %v53137_v11  ;;  %51431 = vmatprep.subr.mxu0 %v57103_v40 }
0x1e64   :  { %51427 = vmatpush3.msra.mxu1 %v53137_v11  ;;  %51435 = vmatprep.mubr.msk.f32.mxu0 %vm52763_vm1, %v57103_v40 }
0x1e65   :  { %51429 = vmatmul.mubr.f32.vlgmr.msra.gmra.mxu1 %v55462_v24  ;;  %51438 = vmatprep.subr.mxu1 %v57103_v40 }
0x1e66   :  { %51442 = vmatprep.mubr.msk.f32.mxu1 %vm52763_vm1, %v57103_v40 }
0x1f03   :  { %v31658_v25 = vpop.f32.mrf.mxu0 }
0x1f05   :  { %v51353_v39 = vpop.f32.mrf.mxu0 }
0x1f07   :  { %v31815_v42 = vpop.f32.mrf.mxu0 }
0x1f09   :  { %v51367_v13 = vpop.f32.mrf.mxu0 }
0x1f0b   :  { %v31739_v22 = vpop.f32.mrf.mxu1 }
0x1f0c   :  { %v31740_v38 = vadd.f32 %v31739_v22, %v31658_v25 }
0x1f0d   :  { %v51360_v59 = vpop.f32.mrf.mxu1 }
0x1f0e   :  { %v31816_v63 = vadd.f32 %v31815_v42, %v31740_v38  ;;  %v31967_v36 = vpop.f32.mrf.mxu0 }
0x1f0f   :  { %v31890_v60 = vpop.f32.mrf.mxu1 }
0x1f10   :  { %v31891_v21 = vadd.f32 %v31890_v60, %v31816_v63  ;;  %v51381_v37 = vpop.f32.mrf.mxu0 }
0x1f11   :  { %v51374_v58 = vpop.f32.mrf.mxu1 }
0x1f12   :  { %v31968_v52 = vadd.f32 %v31967_v36, %v31891_v21 }
0x1f14   :  { %v32040_v24 = vpop.f32.mrf.mxu1 }
0x1f15   :  { %v32041_v46 = vadd.f32 %v32040_v24, %v31968_v52  ;;  %v51395_v28 = vpop.f32.mrf.mxu0 }
0x1f16   :  { %v51388_v15 = vpop.f32.mrf.mxu1 }
0x1f17   :  { %v32044_v3 = vmul.f32 %v32041_v46, %v55748_v0  ;;  %v32121_v31 = vpop.f32.mrf.mxu0 }
0x1f19   :  { %52680 = vrsqrt.f32 %v32044_v3 }
0x1f1a   :  { %v51402_v62 = vpop.f32.mrf.mxu1 }
0x1f1b   :  { %v32219_v20 = vadd.f32 %v51402_v62, %v51395_v28  ;;  %v51409_v9 = vpop.f32.mrf.mxu0 }
0x1f1c   :  { %v32212_v32 = vpop.f32.mrf.mxu1 }
0x1f1d   :  { %v32302_v5 = vadd.f32 %v51409_v9, %v32219_v20  ;;  %v32213_v27 = vadd.f32 %v32212_v32, %v32121_v31  ;;  %v32294_v30 = vpop.f32.mrf.mxu0 }
0x1f1f   :  { %v32295_v26 = vadd.f32 %v32294_v30, %v32213_v27 }
0x1f20   :  { %v51416_v18 = vpop.f32.mrf.mxu1 }
0x1f21   :  { %v32385_v17 = vadd.f32 %v51416_v18, %v32302_v5  ;;  %v51423_v48 = vpop.f32.mrf.mxu0 }
0x1f22   :  { %v32376_v25 = vpop.f32.mrf.mxu1 }
0x1f23   :  { %v32468_v39 = vadd.f32 %v51423_v48, %v32385_v17  ;;  %v32377_v42 = vadd.f32 %v32376_v25, %v32295_v26  ;;  %v32461_v13 = vpop.f32.mrf.mxu0 }
0x1f25   :  { %v32462_v22 = vadd.f32 %v32461_v13, %v32377_v42  ;;  %v51430_v38 = vpop.f32.mrf.mxu1 }
0x1f26   :  { %v52681_v0 = vpop.eup %52680  ;;  %v32547_v59 = vadd.f32 %v51430_v38, %v32468_v39 }
0x1f27   :  { %v32540_v63 = vpop.f32.mrf.mxu1  ;;  %v32046_v36 = vmul.f32 %v52681_v0, %v55650_v8 }
0x1f28   :  { %v32579_v60 = vand.u32 4294901760, %v32547_v59  ;;  %v32541_v21 = vadd.f32 %v32540_v63, %v32462_v22 }
0x1f29   :  { %v55819_v37 = vadd.f32 %v32046_v36, %v55307_v33 }
0x1f2a   :  { %v32657_v58 = vsub.f32 %v32547_v59, %v32579_v60  ;;  %v32582_v52 = vand.u32 4294901760, %v32541_v21  ;;  %51432 = vmatpush3.msra.mxu0 %v32579_v60 }
0x1f2b   :  { %51433 = vmatprep.subr.mxu0 %v57103_v40 }
0x1f2c   :  { %v32658_v24 = vand.u32 4294901760, %v32657_v58  ;;  %v32664_v46 = vsub.f32 %v32541_v21, %v32582_v52  ;;  %51434 = vmatpush3.msra.mxu0 %v32582_v52 }
0x1f2d   :  { %51445 = vmatprep.subr.mxu0 %v57103_v40  ;;  %51436 = vmatmul.mubr.f32.vlgmr.msra.gmra.mxu0 %v53241_v51 }
0x1f2e   :  { %v32659_v28 = vsub.f32 %v32657_v58, %v32658_v24  ;;  %v32665_v15 = vand.u32 4294901760, %v32664_v46  ;;  %51446 = vmatpush3.msra.mxu0 %v32657_v58  ;;  %51449 = vmatprep.mubr.msk.f32.mxu0 %vm52763_vm1, %v57103_v40 }
0x1f2f   :  { %51447 = vmatprep.subr.mxu0 %v57103_v40 }
0x1f30   :  { %51448 = vmatpush3.msra.mxu0 %v32664_v46  ;;  %v32660_v33 = vand.u32 4294901760, %v32659_v28  ;;  %v32666_v8 = vsub.f32 %v32664_v46, %v32665_v15 }
0x1f31   :  { %51459 = vmatprep.subr.mxu0 %v57103_v40  ;;  %51450 = vmatmul.mubr.f32.vlgmr.msra.gmra.mxu0 %v53234_v35 }
0x1f32   :  { %51439 = vmatpush3.msra.mxu1 %v32660_v33  ;;  %51460 = vmatpush3.msra.mxu0 %v32658_v24  ;;  %v32667_v3 = vand.u32 4294901760, %v32666_v8 }
0x1f33   :  { %51440 = vmatprep.subr.mxu1 %v57103_v40  ;;  %51461 = vmatprep.subr.mxu0 %v57103_v40 }
0x1f34   :  { %51441 = vmatpush3.msra.mxu1 %v32667_v3  ;;  %51462 = vmatpush3.msra.mxu0 %v32665_v15 }
0x1f35   :  { %51443 = vmatmul.mubr.f32.vlgmr.msra.gmra.mxu1 %v53231_v45  ;;  %51452 = vmatprep.subr.mxu1 %v57103_v40 }
0x1f36   :  { %51453 = vmatpush3.msra.mxu1 %v32579_v60  ;;  %51456 = vmatprep.mubr.msk.f32.mxu1 %vm52763_vm1, %v57103_v40 }
0x1f37   :  { %51454 = vmatprep.subr.mxu1 %v57103_v40  ;;  %51463 = vmatprep.mubr.msk.f32.mxu0 %vm52763_vm1, %v57103_v40 }
0x1f38   :  { %51455 = vmatpush3.msra.mxu1 %v32582_v52  ;;  %51464 = vmatmul.mubr.f32.vlgmr.msra.gmra.mxu0 %v53231_v45 }
0x1f39   :  { %51457 = vmatmul.mubr.f32.vlgmr.msra.gmra.mxu1 %v53237_v61  ;;  %51466 = vmatprep.subr.mxu1 %v57103_v40 }
0x1f3a   :  { %51473 = vmatprep.subr.mxu0 %v53134_v4  ;;  %51467 = vmatpush3.msra.mxu1 %v32579_v60 }
0x1f3b   :  { %51474 = vmatpush3.msra.mxu0 %v53134_v4  ;;  %51468 = vmatprep.subr.mxu1 %v57103_v40 }
0x1f3c   :  { %51475 = vmatprep.subr.mxu0 %v53137_v11  ;;  %51469 = vmatpush3.msra.mxu1 %v32582_v52 }
0x1f3d   :  { %51470 = vmatprep.mubr.msk.f32.mxu1 %vm52763_vm1, %v57103_v40  ;;  %51476 = vmatpush3.msra.mxu0 %v53137_v11 }
0x1f3e   :  { %51477 = vmatprep.mubr.f32.mxu0 %v55601_v29  ;;  %51471 = vmatmul.mubr.f32.vlgmr.msra.gmra.mxu1 %v53231_v45  ;;  %v57170_v29 = vld [vmem:[#allocation19_spill] sm:$0xff] }
0x1f3f   :  { %51478 = vmatmul.mubr.f32.vlgmr.msra.gmra.mxu0 %v55605_v57  ;;  %51480 = vmatprep.subr.mxu1 %v53177_v53 }
0x1f40   :  { %51487 = vmatprep.subr.mxu0 %v53145_v23  ;;  %51481 = vmatpush3.msra.mxu1 %v53177_v53 }
0x1f41   :  { %51488 = vmatpush3.msra.mxu0 %v53145_v23  ;;  %51482 = vmatprep.subr.mxu1 %v53183_v55 }
0x1f42   :  { %51489 = vmatprep.subr.mxu0 %v53150_v44  ;;  %51483 = vmatpush3.msra.mxu1 %v53183_v55 }
0x1f43   :  { %51484 = vmatprep.mubr.f32.mxu1 %v55560_v6  ;;  %51490 = vmatpush3.msra.mxu0 %v53150_v44 }
0x1f44   :  { %51491 = vmatprep.mubr.f32.mxu0 %v55570_v10  ;;  %51485 = vmatmul.mubr.f32.vlgmr.msra.gmra.mxu1 %v55563_v14  ;;  %v57171_v10 = vld [vmem:[#allocation20_spill] sm:$0xff] }
0x1f45   :  { %51492 = vmatmul.mubr.f32.vlgmr.msra.gmra.mxu0 %v55574_v1  ;;  %51494 = vmatprep.subr.mxu1 %v53134_v4 }
0x1f46   :  { %51501 = vmatprep.subr.mxu0 %v53155_v49  ;;  %51495 = vmatpush3.msra.mxu1 %v53134_v4 }
0x1f47   :  { %51502 = vmatpush3.msra.mxu0 %v53155_v49  ;;  %51496 = vmatprep.subr.mxu1 %v53137_v11 }
0x1f48   :  { %51503 = vmatprep.subr.mxu0 %v53160_v50  ;;  %51497 = vmatpush3.msra.mxu1 %v53137_v11 }
0x1f49   :  { %51498 = vmatprep.mubr.f32.mxu1 %v57170_v29  ;;  %51504 = vmatpush3.msra.mxu0 %v53160_v50 }
0x1f4a   :  { %51505 = vmatprep.mubr.f32.mxu0 %v55560_v6  ;;  %51499 = vmatmul.mubr.f32.vlgmr.msra.gmra.mxu1 %v57171_v10 }
0x1f4b   :  { %51506 = vmatmul.mubr.f32.vlgmr.msra.gmra.mxu0 %v55563_v14  ;;  %51508 = vmatprep.subr.mxu1 %v53134_v4 }
0x1f4c   :  { %51509 = vmatpush3.msra.mxu1 %v53134_v4  ;;  %51512 = vmatprep.mubr.f32.mxu1 %v55560_v6 }
0x1f4d   :  { %51510 = vmatprep.subr.mxu1 %v53137_v11  ;;  %51515 = vmatprep.subr.mxu0 %v57103_v40 }
0x1f4e   :  { %51511 = vmatpush3.msra.mxu1 %v53137_v11  ;;  %51519 = vmatprep.mubr.msk.f32.mxu0 %vm52763_vm1, %v57103_v40 }
0x1f4f   :  { %51513 = vmatmul.mubr.f32.vlgmr.msra.gmra.mxu1 %v55563_v14  ;;  %51522 = vmatprep.subr.mxu1 %v57103_v40 }
0x1f50   :  { %51526 = vmatprep.mubr.msk.f32.mxu1 %vm52763_vm1, %v57103_v40 }
0x1fed   :  { %v32623_v1 = vpop.f32.mrf.mxu0 }
0x1fef   :  { %v51437_v57 = vpop.f32.mrf.mxu0 }
0x1ff1   :  { %v32780_v31 = vpop.f32.mrf.mxu0 }
0x1ff3   :  { %v51451_v6 = vpop.f32.mrf.mxu0 }
0x1ff5   :  { %v32704_v62 = vpop.f32.mrf.mxu1 }
0x1ff6   :  { %v32705_v20 = vadd.f32 %v32704_v62, %v32623_v1 }
0x1ff7   :  { %v51444_v9 = vpop.f32.mrf.mxu1 }
0x1ff8   :  { %v32781_v32 = vadd.f32 %v32780_v31, %v32705_v20  ;;  %v32932_v5 = vpop.f32.mrf.mxu0 }
0x1ff9   :  { %v32855_v27 = vpop.f32.mrf.mxu1 }
0x1ffa   :  { %v32856_v30 = vadd.f32 %v32855_v27, %v32781_v32  ;;  %v51465_v26 = vpop.f32.mrf.mxu0 }
0x1ffb   :  { %v51458_v18 = vpop.f32.mrf.mxu1 }
0x1ffc   :  { %v32933_v17 = vadd.f32 %v32932_v5, %v32856_v30 }
0x1ffe   :  { %v33005_v14 = vpop.f32.mrf.mxu1 }
0x1fff   :  { %v55887_v48 = vadd.f32 %v33005_v14, %v32933_v17  ;;  %v51479_v25 = vpop.f32.mrf.mxu0 }
0x2000   :  { %v51472_v39 = vpop.f32.mrf.mxu1 }
0x2001   :  { %v33082_v42 = vpop.f32.mrf.mxu0 }
0x2004   :  { %v51486_v13 = vpop.f32.mrf.mxu1 }
0x2005   :  { %v33180_v22 = vadd.f32 %v51486_v13, %v51479_v25  ;;  %v51493_v38 = vpop.f32.mrf.mxu0 }
0x2006   :  { %v33173_v0 = vpop.f32.mrf.mxu1 }
0x2007   :  { %v33263_v59 = vadd.f32 %v51493_v38, %v33180_v22  ;;  %v33174_v63 = vadd.f32 %v33173_v0, %v33082_v42  ;;  %v33255_v36 = vpop.f32.mrf.mxu0 }
0x2009   :  { %v33256_v60 = vadd.f32 %v33255_v36, %v33174_v63  ;;  %v34936_v63 = vld [vmem:[#allocation2 + $0x60] sm:$0xff] }
0x200a   :  { %v51500_v21 = vpop.f32.mrf.mxu1  ;;  %v34943_v36 = vld [vmem:[#allocation5 + $0x60] sm:$0xff] }
0x200b   :  { %v33346_v58 = vadd.f32 %v51500_v21, %v33263_v59  ;;  %v51507_v52 = vpop.f32.mrf.mxu0  ;;  %v34944_v21 = vld [vmem:[#allocation5 + $0x68] sm:$0xff] }
0x200c   :  { %v33337_v24 = vpop.f32.mrf.mxu1 }
0x200d   :  { %v33429_v46 = vadd.f32 %v51507_v52, %v33346_v58  ;;  %v33338_v28 = vadd.f32 %v33337_v24, %v33256_v60  ;;  %v33422_v15 = vpop.f32.mrf.mxu0  ;;  %v34937_v60 = vld [vmem:[#allocation2 + $0x68] sm:$0xff] }
0x200f   :  { %v33423_v33 = vadd.f32 %v33422_v15, %v33338_v28  ;;  %v51514_v8 = vpop.f32.mrf.mxu1  ;;  %v34945_v28 = vmax.f32 %v34943_v36, 1e-06 }
0x2010   :  { %v33508_v3 = vadd.f32 %v51514_v8, %v33429_v46  ;;  %v34938_v46 = vmax.f32 %v34936_v63, 1e-06  ;;  %v34946_v8 = vmax.f32 %v34944_v21, 1e-06 }
0x2011   :  { %v33501_v29 = vpop.f32.mrf.mxu1 }
0x2012   :  { %v33540_v10 = vand.u32 4294901760, %v33508_v3  ;;  %v33502_v1 = vadd.f32 %v33501_v29, %v33423_v33  ;;  %v34939_v33 = vmax.f32 %v34937_v60, 1e-06 }
0x2014   :  { %v33618_v57 = vsub.f32 %v33508_v3, %v33540_v10  ;;  %v33543_v31 = vand.u32 4294901760, %v33502_v1  ;;  %51516 = vmatpush3.msra.mxu0 %v33540_v10 }
0x2015   :  { %51517 = vmatprep.subr.mxu0 %v57103_v40 }
0x2016   :  { %v33619_v6 = vand.u32 4294901760, %v33618_v57  ;;  %v33625_v62 = vsub.f32 %v33502_v1, %v33543_v31  ;;  %51518 = vmatpush3.msra.mxu0 %v33543_v31 }
0x2017   :  { %51529 = vmatprep.subr.mxu0 %v57103_v40  ;;  %51520 = vmatmul.mubr.f32.vlgmr.msra.gmra.mxu0 %v53241_v51 }
0x2018   :  { %v33620_v20 = vsub.f32 %v33618_v57, %v33619_v6  ;;  %v33626_v9 = vand.u32 4294901760, %v33625_v62  ;;  %51530 = vmatpush3.msra.mxu0 %v33618_v57  ;;  %51533 = vmatprep.mubr.msk.f32.mxu0 %vm52763_vm1, %v57103_v40  ;;  %v55957_v57 = vmin.f32 %v34938_v46, 0.999999 }
0x2019   :  { %51531 = vmatprep.subr.mxu0 %v57103_v40 }
0x201a   :  { %51532 = vmatpush3.msra.mxu0 %v33625_v62  ;;  %v33621_v32 = vand.u32 4294901760, %v33620_v20  ;;  %v33627_v5 = vsub.f32 %v33625_v62, %v33626_v9  ;;  %v55961_v62 = vmin.f32 %v34939_v33, 0.999999  ;;  %v55963_v20 = vmin.f32 %v34946_v8, 0.999999  ;;  %v57173_v33 = vld [vmem:[#allocation11_spill] sm:$0xff] }
0x201b   :  { %51543 = vmatprep.subr.mxu0 %v57103_v40  ;;  %51534 = vmatmul.mubr.f32.vlgmr.msra.gmra.mxu0 %v53234_v35 }
0x201c   :  { %51523 = vmatpush3.msra.mxu1 %v33621_v32  ;;  %51544 = vmatpush3.msra.mxu0 %v33619_v6  ;;  %v33628_v27 = vand.u32 4294901760, %v33627_v5 }
0x201d   :  { %51524 = vmatprep.subr.mxu1 %v57103_v40  ;;  %51545 = vmatprep.subr.mxu0 %v57103_v40 }
0x201e   :  { %51525 = vmatpush3.msra.mxu1 %v33628_v27  ;;  %51546 = vmatpush3.msra.mxu0 %v33626_v9 }
0x201f   :  { %51527 = vmatmul.mubr.f32.vlgmr.msra.gmra.mxu1 %v53231_v45  ;;  %51536 = vmatprep.subr.mxu1 %v57103_v40 }
0x2020   :  { %51537 = vmatpush3.msra.mxu1 %v33540_v10  ;;  %51540 = vmatprep.mubr.msk.f32.mxu1 %vm52763_vm1, %v57103_v40 }
0x2021   :  { %51538 = vmatprep.subr.mxu1 %v57103_v40  ;;  %51547 = vmatprep.mubr.msk.f32.mxu0 %vm52763_vm1, %v57103_v40 }
0x2022   :  { %51539 = vmatpush3.msra.mxu1 %v33543_v31  ;;  %51548 = vmatmul.mubr.f32.vlgmr.msra.gmra.mxu0 %v53231_v45 }
0x2023   :  { %51541 = vmatmul.mubr.f32.vlgmr.msra.gmra.mxu1 %v53237_v61  ;;  %51550 = vmatprep.subr.mxu1 %v57103_v40 }
0x2024   :  { %51557 = vmatprep.subr.mxu0 %v53134_v4  ;;  %51551 = vmatpush3.msra.mxu1 %v33540_v10 }
0x2025   :  { %51558 = vmatpush3.msra.mxu0 %v53134_v4  ;;  %51552 = vmatprep.subr.mxu1 %v57103_v40 }
0x2026   :  { %51559 = vmatprep.subr.mxu0 %v53137_v11  ;;  %51553 = vmatpush3.msra.mxu1 %v33543_v31  ;;  %v55959_v31 = vmin.f32 %v34945_v28, 0.999999 }
0x2027   :  { %51554 = vmatprep.mubr.msk.f32.mxu1 %vm52763_vm1, %v57103_v40  ;;  %51560 = vmatpush3.msra.mxu0 %v53137_v11 }
0x2028   :  { %51561 = vmatprep.mubr.f32.mxu0 %v55699_v34  ;;  %51555 = vmatmul.mubr.f32.vlgmr.msra.gmra.mxu1 %v53231_v45 }
0x2029   :  { %51562 = vmatmul.mubr.f32.vlgmr.msra.gmra.mxu0 %v55703_v41  ;;  %51564 = vmatprep.subr.mxu1 %v53177_v53 }
0x202a   :  { %51571 = vmatprep.subr.mxu0 %v53145_v23  ;;  %51565 = vmatpush3.msra.mxu1 %v53177_v53 }
0x202b   :  { %51572 = vmatpush3.msra.mxu0 %v53145_v23  ;;  %51566 = vmatprep.subr.mxu1 %v53183_v55 }
0x202c   :  { %51573 = vmatprep.subr.mxu0 %v53150_v44  ;;  %51567 = vmatpush3.msra.mxu1 %v53183_v55 }
0x202d   :  { %51568 = vmatprep.mubr.f32.mxu1 %v55658_v2  ;;  %51574 = vmatpush3.msra.mxu0 %v53150_v44 }
0x202e   :  { %51575 = vmatprep.mubr.f32.mxu0 %v55668_v16  ;;  %51569 = vmatmul.mubr.f32.vlgmr.msra.gmra.mxu1 %v55661_v19  ;;  %v57172_v16 = vld [vmem:[#allocation22_spill] sm:$0xff] }
0x202f   :  { %51576 = vmatmul.mubr.f32.vlgmr.msra.gmra.mxu0 %v55672_v56  ;;  %51578 = vmatprep.subr.mxu1 %v53134_v4 }
0x2030   :  { %51585 = vmatprep.subr.mxu0 %v53155_v49  ;;  %51579 = vmatpush3.msra.mxu1 %v53134_v4 }
0x2031   :  { %51586 = vmatpush3.msra.mxu0 %v53155_v49  ;;  %51580 = vmatprep.subr.mxu1 %v53137_v11 }
0x2032   :  { %51587 = vmatprep.subr.mxu0 %v53160_v50  ;;  %51581 = vmatpush3.msra.mxu1 %v53137_v11 }
0x2033   :  { %51582 = vmatprep.mubr.f32.mxu1 %v55677_v7  ;;  %51588 = vmatpush3.msra.mxu0 %v53160_v50 }
0x2034   :  { %51589 = vmatprep.mubr.f32.mxu0 %v55658_v2  ;;  %51583 = vmatmul.mubr.f32.vlgmr.msra.gmra.mxu1 %v57172_v16 }
0x2035   :  { %51590 = vmatmul.mubr.f32.vlgmr.msra.gmra.mxu0 %v55661_v19  ;;  %51592 = vmatprep.subr.mxu1 %v53134_v4 }
0x2036   :  { %51593 = vmatpush3.msra.mxu1 %v53134_v4  ;;  %51596 = vmatprep.mubr.f32.mxu1 %v55658_v2 }
0x2037   :  { %51594 = vmatprep.subr.mxu1 %v53137_v11  ;;  %51599 = vmatprep.subr.mxu0 %v57103_v40 }
0x2038   :  { %51595 = vmatpush3.msra.mxu1 %v53137_v11  ;;  %51603 = vmatprep.mubr.msk.f32.mxu0 %vm52763_vm1, %v57103_v40 }
0x2039   :  { %51597 = vmatmul.mubr.f32.vlgmr.msra.gmra.mxu1 %v55661_v19  ;;  %51606 = vmatprep.subr.mxu1 %v57103_v40 }
0x203a   :  { %51610 = vmatprep.mubr.msk.f32.mxu1 %vm52763_vm1, %v57103_v40 }
0x20d7   :  { %v33584_v56 = vpop.f32.mrf.mxu0 }
0x20d9   :  { %v51521_v7 = vpop.f32.mrf.mxu0 }
0x20db   :  { %v33741_v34 = vpop.f32.mrf.mxu0 }
0x20dd   :  { %v51535_v2 = vpop.f32.mrf.mxu0 }
0x20df   :  { %v33665_v41 = vpop.f32.mrf.mxu1 }
0x20e0   :  { %v33666_v30 = vadd.f32 %v33665_v41, %v33584_v56  ;;  %v34949_v56 = vmul.f32 %v55959_v31, %v55957_v57 }
0x20e1   :  { %v51528_v26 = vpop.f32.mrf.mxu1 }
0x20e2   :  { %v33742_v18 = vadd.f32 %v33741_v34, %v33666_v30  ;;  %v33893_v17 = vpop.f32.mrf.mxu0  ;;  %v34950_v34 = vmul.f32 %v55963_v20, %v55961_v62 }
0x20e3   :  { %v33816_v14 = vpop.f32.mrf.mxu1 }
0x20e4   :  { %v33817_v25 = vadd.f32 %v33816_v14, %v33742_v18  ;;  %v51549_v39 = vpop.f32.mrf.mxu0  ;;  %v34956_v18 = vsel %vm76_vm0, %v34949_v56, 0 }
0x20e5   :  { %v51542_v42 = vpop.f32.mrf.mxu1 }
0x20e6   :  { %v33894_v13 = vadd.f32 %v33893_v17, %v33817_v25  ;;  %v34959_v25 = vsel %vm76_vm0, %v34950_v34, 0 }
0x20e8   :  { %v33966_v19 = vpop.f32.mrf.mxu1 }
0x20e9   :  { %v55955_v22 = vadd.f32 %v33966_v19, %v33894_v13  ;;  %v51563_v38 = vpop.f32.mrf.mxu0  ;;  %v55971_v13 = vand.u32 4294901760, %v34956_v18  ;;  %v55974_v19 = vand.u32 4294901760, %v34959_v25 }
0x20ea   :  { %v51556_v0 = vpop.f32.mrf.mxu1 }
0x20eb   :  { %v34043_v59 = vpop.f32.mrf.mxu0  ;;  %v55981_v36 = vsub.f32 %v34956_v18, %v55971_v13  ;;  %v55985_v60 = vsub.f32 %v34959_v25, %v55974_v19 }
0x20ed   :  { %v55995_v46 = vand.u32 4294901760, %v55985_v60 }
0x20ee   :  { %v51570_v58 = vpop.f32.mrf.mxu1 }
0x20ef   :  { %v34141_v52 = vadd.f32 %v51570_v58, %v51563_v38  ;;  %v51577_v24 = vpop.f32.mrf.mxu0 }
0x20f0   :  { %v34134_v15 = vpop.f32.mrf.mxu1 }
0x20f1   :  { %v34224_v3 = vadd.f32 %v51577_v24, %v34141_v52  ;;  %v34135_v29 = vadd.f32 %v34134_v15, %v34043_v59  ;;  %v34216_v10 = vpop.f32.mrf.mxu0  ;;  %v55990_v24 = vand.u32 4294901760, %v55981_v36  ;;  %v35041_v15 = vsub.f32 %v55985_v60, %v55995_v46 }
0x20f3   :  { %v34217_v1 = vadd.f32 %v34216_v10, %v34135_v29  ;;  %v35031_v28 = vsub.f32 %v55981_v36, %v55990_v24  ;;  %v57174_v29 = vld [vmem:[#allocation12_spill] sm:$0xff]  ;;  %v57175_v10 = vld [vmem:[#allocation17_spill] sm:$0xff] }
0x20f4   :  { %v51584_v6 = vpop.f32.mrf.mxu1 }
0x20f5   :  { %v34307_v9 = vadd.f32 %v51584_v6, %v34224_v3  ;;  %v51591_v32 = vpop.f32.mrf.mxu0  ;;  %v56012_v8 = vand.u32 4294901760, %v35031_v28  ;;  %v56016_v3 = vand.u32 4294901760, %v35041_v15  ;;  %v57177_v6 = vld [vmem:[#allocation18_spill] sm:$0xff] }
0x20f6   :  { %v34298_v5 = vpop.f32.mrf.mxu1 }
0x20f7   :  { %v34390_v27 = vadd.f32 %v51591_v32, %v34307_v9  ;;  %v34299_v16 = vadd.f32 %v34298_v5, %v34217_v1  ;;  %v34383_v7 = vpop.f32.mrf.mxu0  ;;  %v57176_v1 = vld [vmem:[#allocation13_spill] sm:$0xff]  ;;  %v57178_v9 = vld [vmem:[#allocation14_spill] sm:$0xff]  ;;  %v57179_v32 = vld [vmem:[#allocation15_spill] sm:$0xff] }
0x20f8   :  { %v57180_v5 = vld [vmem:[#allocation16_spill] sm:$0xff] }
0x20f9   :  { %v34384_v2 = vadd.f32 %v34383_v7, %v34299_v16  ;;  %v51598_v41 = vpop.f32.mrf.mxu1 }
0x20fa   :  { %v34469_v30 = vadd.f32 %v51598_v41, %v34390_v27 }
0x20fb   :  { %v34462_v26 = vpop.f32.mrf.mxu1 }
0x20fc   :  { %v34501_v17 = vand.u32 4294901760, %v34469_v30  ;;  %v34463_v14 = vadd.f32 %v34462_v26, %v34384_v2 }
0x20fe   :  { %v34579_v39 = vsub.f32 %v34469_v30, %v34501_v17  ;;  %v34504_v42 = vand.u32 4294901760, %v34463_v14  ;;  %51600 = vmatpush3.msra.mxu0 %v34501_v17 }
0x20ff   :  { %51601 = vmatprep.subr.mxu0 %v57103_v40 }
0x2100   :  { %v34580_v38 = vand.u32 4294901760, %v34579_v39  ;;  %v34586_v0 = vsub.f32 %v34463_v14, %v34504_v42  ;;  %51602 = vmatpush3.msra.mxu0 %v34504_v42 }
0x2101   :  { %51613 = vmatprep.subr.mxu0 %v57103_v40  ;;  %51604 = vmatmul.mubr.f32.vlgmr.msra.gmra.mxu0 %v53241_v51 }
0x2102   :  { %v34581_v59 = vsub.f32 %v34579_v39, %v34580_v38  ;;  %v34587_v63 = vand.u32 4294901760, %v34586_v0  ;;  %51614 = vmatpush3.msra.mxu0 %v34579_v39  ;;  %51617 = vmatprep.mubr.msk.f32.mxu0 %vm52763_vm1, %v57103_v40 }
0x2103   :  { %51615 = vmatprep.subr.mxu0 %v57103_v40 }
0x2104   :  { %51616 = vmatpush3.msra.mxu0 %v34586_v0  ;;  %v34582_v21 = vand.u32 4294901760, %v34581_v59  ;;  %v34588_v58 = vsub.f32 %v34586_v0, %v34587_v63 }
0x2105   :  { %51627 = vmatprep.subr.mxu0 %v57103_v40  ;;  %51618 = vmatmul.mubr.f32.vlgmr.msra.gmra.mxu0 %v53234_v35 }
0x2106   :  { %51607 = vmatpush3.msra.mxu1 %v34582_v21  ;;  %51628 = vmatpush3.msra.mxu0 %v34580_v38  ;;  %v34589_v52 = vand.u32 4294901760, %v34588_v58 }
0x2107   :  { %51608 = vmatprep.subr.mxu1 %v57103_v40  ;;  %51629 = vmatprep.subr.mxu0 %v57103_v40 }
0x2108   :  { %51609 = vmatpush3.msra.mxu1 %v34589_v52  ;;  %51630 = vmatpush3.msra.mxu0 %v34587_v63 }
0x2109   :  { %51611 = vmatmul.mubr.f32.vlgmr.msra.gmra.mxu1 %v53231_v45  ;;  %51620 = vmatprep.subr.mxu1 %v57103_v40 }
0x210a   :  { %51621 = vmatpush3.msra.mxu1 %v34501_v17  ;;  %51624 = vmatprep.mubr.msk.f32.mxu1 %vm52763_vm1, %v57103_v40 }
0x210b   :  { %51622 = vmatprep.subr.mxu1 %v57103_v40  ;;  %51631 = vmatprep.mubr.msk.f32.mxu0 %vm52763_vm1, %v57103_v40 }
0x210c   :  { %51623 = vmatpush3.msra.mxu1 %v34504_v42  ;;  %51632 = vmatmul.mubr.f32.vlgmr.msra.gmra.mxu0 %v53231_v45 }
0x210d   :  { %51625 = vmatmul.mubr.f32.vlgmr.msra.gmra.mxu1 %v53237_v61  ;;  %51634 = vmatprep.subr.mxu1 %v57103_v40 }
0x210e   :  { %51641 = vmatprep.subr.mxu0 %v57173_v33  ;;  %51635 = vmatpush3.msra.mxu1 %v34501_v17 }
0x210f   :  { %51642 = vmatpush3.msra.mxu0 %v57173_v33  ;;  %51636 = vmatprep.subr.mxu1 %v57103_v40 }
0x2110   :  { %51643 = vmatprep.subr.mxu0 %v57174_v29  ;;  %51637 = vmatpush3.msra.mxu1 %v34504_v42 }
0x2111   :  { %51638 = vmatprep.mubr.msk.f32.mxu1 %vm52763_vm1, %v57103_v40  ;;  %51644 = vmatpush3.msra.mxu0 %v57174_v29 }
0x2112   :  { %51645 = vmatprep.mubr.f32.mxu0 %v56012_v8  ;;  %51639 = vmatmul.mubr.f32.vlgmr.msra.gmra.mxu1 %v53231_v45 }
0x2113   :  { %51646 = vmatmul.mubr.f32.vlgmr.msra.gmra.mxu0 %v56016_v3  ;;  %51648 = vmatprep.subr.mxu1 %v57175_v10 }
0x2114   :  { %51655 = vmatprep.subr.mxu0 %v57176_v1  ;;  %51649 = vmatpush3.msra.mxu1 %v57175_v10 }
0x2115   :  { %51656 = vmatpush3.msra.mxu0 %v57176_v1  ;;  %51650 = vmatprep.subr.mxu1 %v57177_v6 }
0x2116   :  { %51657 = vmatprep.subr.mxu0 %v57178_v9  ;;  %51651 = vmatpush3.msra.mxu1 %v57177_v6 }
0x2117   :  { %51652 = vmatprep.mubr.f32.mxu1 %v55971_v13  ;;  %51658 = vmatpush3.msra.mxu0 %v57178_v9 }
0x2118   :  { %51659 = vmatprep.mubr.f32.mxu0 %v55981_v36  ;;  %51653 = vmatmul.mubr.f32.vlgmr.msra.gmra.mxu1 %v55974_v19 }
0x2119   :  { %51660 = vmatmul.mubr.f32.vlgmr.msra.gmra.mxu0 %v55985_v60  ;;  %51662 = vmatprep.subr.mxu1 %v57173_v33 }
0x211a   :  { %51669 = vmatprep.subr.mxu0 %v57179_v32  ;;  %51663 = vmatpush3.msra.mxu1 %v57173_v33 }
0x211b   :  { %51670 = vmatpush3.msra.mxu0 %v57179_v32  ;;  %51664 = vmatprep.subr.mxu1 %v57174_v29 }
0x211c   :  { %51671 = vmatprep.subr.mxu0 %v57180_v5  ;;  %51665 = vmatpush3.msra.mxu1 %v57174_v29 }
0x211d   :  { %51666 = vmatprep.mubr.f32.mxu1 %v55990_v24  ;;  %51672 = vmatpush3.msra.mxu0 %v57180_v5 }
0x211e   :  { %51673 = vmatprep.mubr.f32.mxu0 %v55971_v13  ;;  %51667 = vmatmul.mubr.f32.vlgmr.msra.gmra.mxu1 %v55995_v46 }
0x211f   :  { %51674 = vmatmul.mubr.f32.vlgmr.msra.gmra.mxu0 %v55974_v19  ;;  %51676 = vmatprep.subr.mxu1 %v57173_v33 }
0x2120   :  { %51677 = vmatpush3.msra.mxu1 %v57173_v33  ;;  %51680 = vmatprep.mubr.f32.mxu1 %v55971_v13 }
0x2121   :  { %51678 = vmatprep.subr.mxu1 %v57174_v29  ;;  %51683 = vmatprep.subr.mxu0 %v57103_v40 }
0x2122   :  { %51679 = vmatpush3.msra.mxu1 %v57174_v29  ;;  %51687 = vmatprep.mubr.msk.f32.mxu0 %vm52763_vm1, %v57103_v40 }
0x2123   :  { %51681 = vmatmul.mubr.f32.vlgmr.msra.gmra.mxu1 %v55974_v19  ;;  %51690 = vmatprep.subr.mxu1 %v57103_v40 }
0x2124   :  { %51694 = vmatprep.mubr.msk.f32.mxu1 %vm52763_vm1, %v57103_v40 }
0x21c1   :  { %v34545_v27 = vpop.f32.mrf.mxu0 }
0x21c3   :  { %v51605_v16 = vpop.f32.mrf.mxu0 }
0x21c5   :  { %v34702_v56 = vpop.f32.mrf.mxu0 }
0x21c7   :  { %v51619_v7 = vpop.f32.mrf.mxu0 }
0x21c9   :  { %v34626_v34 = vpop.f32.mrf.mxu1 }
0x21ca   :  { %v34627_v2 = vadd.f32 %v34626_v34, %v34545_v27 }
0x21cb   :  { %v51612_v41 = vpop.f32.mrf.mxu1 }
0x21cc   :  { %v34703_v30 = vadd.f32 %v34702_v56, %v34627_v2  ;;  %v34854_v26 = vpop.f32.mrf.mxu0 }
0x21cd   :  { %v34777_v18 = vpop.f32.mrf.mxu1 }
0x21ce   :  { %v34778_v17 = vadd.f32 %v34777_v18, %v34703_v30  ;;  %v51633_v14 = vpop.f32.mrf.mxu0 }
0x21cf   :  { %v51626_v25 = vpop.f32.mrf.mxu1  ;;  %v34952_v14 = vmul.f32 %v55961_v62, %v55961_v62 }
0x21d0   :  { %v34855_v39 = vadd.f32 %v34854_v26, %v34778_v17  ;;  %v34951_v17 = vmul.f32 %v55957_v57, %v55957_v57 }
0x21d2   :  { %v34927_v42 = vpop.f32.mrf.mxu1 }
0x21d3   :  { %v34928_v38 = vadd.f32 %v34927_v42, %v34855_v39  ;;  %v51647_v0 = vpop.f32.mrf.mxu0 }
0x21d4   :  { %v51640_v59 = vpop.f32.mrf.mxu1 }
0x21d5   :  { %v34931_v63 = vmul.f32 %v34928_v38, %v55955_v22  ;;  %v35034_v21 = vpop.f32.mrf.mxu0  ;;  %v35923_v59 = vsel %vm76_vm0, %v34951_v17, 0 }
0x21d6   :  { %v56072_v62 = vand.u32 4294901760, %v35923_v59 }
0x21d7   :  { %52682 = vrsqrt.f32 %v34931_v63 }
0x21d8   :  { %v51654_v58 = vpop.f32.mrf.mxu1 }
0x21d9   :  { %v35132_v52 = vadd.f32 %v51654_v58, %v51647_v0  ;;  %v51661_v28 = vpop.f32.mrf.mxu0 }
0x21da   :  { %v35125_v15 = vpop.f32.mrf.mxu1 }
0x21db   :  { %v35215_v27 = vadd.f32 %v51661_v28, %v35132_v52  ;;  %v35126_v16 = vadd.f32 %v35125_v15, %v35034_v21  ;;  %v35207_v56 = vpop.f32.mrf.mxu0  ;;  %v35926_v52 = vsel %vm76_vm0, %v34952_v14, 0  ;;  %v57181_v28 = vld [vmem:[#allocation21_spill] sm:$0xff] }
0x21dd   :  { %v35208_v7 = vadd.f32 %v35207_v56, %v35126_v16  ;;  %v56075_v16 = vand.u32 4294901760, %v35926_v52 }
0x21de   :  { %v51668_v34 = vpop.f32.mrf.mxu1 }
0x21df   :  { %v35298_v2 = vadd.f32 %v51668_v34, %v35215_v27  ;;  %v51675_v41 = vpop.f32.mrf.mxu0 }
0x21e0   :  { %v35289_v30 = vpop.f32.mrf.mxu1 }
0x21e1   :  { %v35381_v26 = vadd.f32 %v51675_v41, %v35298_v2  ;;  %v35290_v18 = vadd.f32 %v35289_v30, %v35208_v7  ;;  %v35374_v22 = vpop.f32.mrf.mxu0  ;;  %v56082_v2 = vsub.f32 %v35923_v59, %v56072_v62  ;;  %v56086_v41 = vsub.f32 %v35926_v52, %v56075_v16 }
0x21e3   :  { %v35375_v25 = vadd.f32 %v35374_v22, %v35290_v18  ;;  %v51682_v39 = vpop.f32.mrf.mxu1  ;;  %v56091_v17 = vand.u32 4294901760, %v56082_v2  ;;  %v56096_v22 = vand.u32 4294901760, %v56086_v41 }
0x21e4   :  { %v52683_v42 = vpop.eup %52682  ;;  %v35460_v38 = vadd.f32 %v51682_v39, %v35381_v26 }
0x21e5   :  { %v35453_v0 = vpop.f32.mrf.mxu1  ;;  %v34933_v63 = vmul.f32 %v52683_v42, %v55887_v48  ;;  %57183 = vst [vmem:[#allocation20_spill] sm:$0xff] %v56091_v17  ;;  %57184 = vst [vmem:[#allocation22_spill] sm:$0xff] %v56096_v22  ;;  %v35998_v14 = vsub.f32 %v56082_v2, %v56091_v17 }
0x21e6   :  { %v35492_v21 = vand.u32 4294901760, %v35460_v38  ;;  %v35454_v58 = vadd.f32 %v35453_v0, %v35375_v25  ;;  %v36008_v25 = vsub.f32 %v56086_v41, %v56096_v22 }
0x21e7   :  { %v56070_v15 = vadd.f32 %v34933_v63, %v57181_v28  ;;  %v56113_v39 = vand.u32 4294901760, %v35998_v14 }
0x21e8   :  { %v35570_v57 = vsub.f32 %v35460_v38, %v35492_v21  ;;  %v35495_v27 = vand.u32 4294901760, %v35454_v58  ;;  %51684 = vmatpush3.msra.mxu0 %v35492_v21  ;;  %v56117_v42 = vand.u32 4294901760, %v36008_v25 }
0x21e9   :  { %57182 = vst [vmem:[#allocation19_spill] sm:$0xff] %v56070_v15  ;;  %51685 = vmatprep.subr.mxu0 %v57103_v40 }
0x21ea   :  { %v35571_v56 = vand.u32 4294901760, %v35570_v57  ;;  %v35577_v7 = vsub.f32 %v35454_v58, %v35495_v27  ;;  %51686 = vmatpush3.msra.mxu0 %v35495_v27 }
0x21eb   :  { %51697 = vmatprep.subr.mxu0 %v57103_v40  ;;  %51688 = vmatmul.mubr.f32.vlgmr.msra.gmra.mxu0 %v52936_v12 }
0x21ec   :  { %v35572_v48 = vsub.f32 %v35570_v57, %v35571_v56  ;;  %v35578_v34 = vand.u32 4294901760, %v35577_v7  ;;  %51698 = vmatpush3.msra.mxu0 %v35570_v57  ;;  %51701 = vmatprep.mubr.msk.f32.mxu0 %vm52763_vm1, %v57103_v40 }
0x21ed   :  { %51699 = vmatprep.subr.mxu0 %v57103_v40 }
0x21ee   :  { %51700 = vmatpush3.msra.mxu0 %v35577_v7  ;;  %v35573_v30 = vand.u32 4294901760, %v35572_v48  ;;  %v35579_v26 = vsub.f32 %v35577_v7, %v35578_v34 }
0x21ef   :  { %51711 = vmatprep.subr.mxu0 %v57103_v40  ;;  %51702 = vmatmul.mubr.f32.vlgmr.msra.gmra.mxu0 %v52923_v47 }
0x21f0   :  { %51691 = vmatpush3.msra.mxu1 %v35573_v30  ;;  %51712 = vmatpush3.msra.mxu0 %v35571_v56  ;;  %v35580_v18 = vand.u32 4294901760, %v35579_v26 }
0x21f1   :  { %51692 = vmatprep.subr.mxu1 %v57103_v40  ;;  %51713 = vmatprep.subr.mxu0 %v57103_v40 }
0x21f2   :  { %51693 = vmatpush3.msra.mxu1 %v35580_v18  ;;  %51714 = vmatpush3.msra.mxu0 %v35578_v34 }
0x21f3   :  { %51695 = vmatmul.mubr.f32.vlgmr.msra.gmra.mxu1 %v52920_v43  ;;  %51704 = vmatprep.subr.mxu1 %v57103_v40 }
0x21f4   :  { %51705 = vmatpush3.msra.mxu1 %v35492_v21  ;;  %51708 = vmatprep.mubr.msk.f32.mxu1 %vm52763_vm1, %v57103_v40 }
0x21f5   :  { %51706 = vmatprep.subr.mxu1 %v57103_v40  ;;  %51715 = vmatprep.mubr.msk.f32.mxu0 %vm52763_vm1, %v57103_v40 }
0x21f6   :  { %51707 = vmatpush3.msra.mxu1 %v35495_v27  ;;  %51716 = vmatmul.mubr.f32.vlgmr.msra.gmra.mxu0 %v52920_v43 }
0x21f7   :  { %51709 = vmatmul.mubr.f32.vlgmr.msra.gmra.mxu1 %v52926_v54  ;;  %51718 = vmatprep.subr.mxu1 %v57103_v40 }
0x21f8   :  { %51725 = vmatprep.subr.mxu0 %v57173_v33  ;;  %51719 = vmatpush3.msra.mxu1 %v35492_v21 }
0x21f9   :  { %51726 = vmatpush3.msra.mxu0 %v57173_v33  ;;  %51720 = vmatprep.subr.mxu1 %v57103_v40 }
0x21fa   :  { %51727 = vmatprep.subr.mxu0 %v57174_v29  ;;  %51721 = vmatpush3.msra.mxu1 %v35495_v27 }
0x21fb   :  { %51722 = vmatprep.mubr.msk.f32.mxu1 %vm52763_vm1, %v57103_v40  ;;  %51728 = vmatpush3.msra.mxu0 %v57174_v29 }
0x21fc   :  { %51729 = vmatprep.mubr.f32.mxu0 %v56113_v39  ;;  %51723 = vmatmul.mubr.f32.vlgmr.msra.gmra.mxu1 %v52920_v43 }
0x21fd   :  { %51730 = vmatmul.mubr.f32.vlgmr.msra.gmra.mxu0 %v56117_v42  ;;  %51732 = vmatprep.subr.mxu1 %v57175_v10 }
0x21fe   :  { %51739 = vmatprep.subr.mxu0 %v57176_v1  ;;  %51733 = vmatpush3.msra.mxu1 %v57175_v10 }
0x21ff   :  { %51740 = vmatpush3.msra.mxu0 %v57176_v1  ;;  %51734 = vmatprep.subr.mxu1 %v57177_v6 }
0x2200   :  { %51741 = vmatprep.subr.mxu0 %v57178_v9  ;;  %51735 = vmatpush3.msra.mxu1 %v57177_v6 }
0x2201   :  { %51736 = vmatprep.mubr.f32.mxu1 %v56072_v62  ;;  %51742 = vmatpush3.msra.mxu0 %v57178_v9 }
0x2202   :  { %51743 = vmatprep.mubr.f32.mxu0 %v56082_v2  ;;  %51737 = vmatmul.mubr.f32.vlgmr.msra.gmra.mxu1 %v56075_v16 }
0x2203   :  { %51744 = vmatmul.mubr.f32.vlgmr.msra.gmra.mxu0 %v56086_v41  ;;  %51746 = vmatprep.subr.mxu1 %v57173_v33 }
0x2204   :  { %51753 = vmatprep.subr.mxu0 %v57179_v32  ;;  %51747 = vmatpush3.msra.mxu1 %v57173_v33 }
0x2205   :  { %51754 = vmatpush3.msra.mxu0 %v57179_v32  ;;  %51748 = vmatprep.subr.mxu1 %v57174_v29 }
0x2206   :  { %51755 = vmatprep.subr.mxu0 %v57180_v5  ;;  %51749 = vmatpush3.msra.mxu1 %v57174_v29 }
0x2207   :  { %51750 = vmatprep.mubr.f32.mxu1 %v56091_v17  ;;  %51756 = vmatpush3.msra.mxu0 %v57180_v5 }
0x2208   :  { %51757 = vmatprep.mubr.f32.mxu0 %v56072_v62  ;;  %51751 = vmatmul.mubr.f32.vlgmr.msra.gmra.mxu1 %v56096_v22 }
0x2209   :  { %51758 = vmatmul.mubr.f32.vlgmr.msra.gmra.mxu0 %v56075_v16  ;;  %51760 = vmatprep.subr.mxu1 %v57173_v33 }
0x220a   :  { %51761 = vmatpush3.msra.mxu1 %v57173_v33  ;;  %51764 = vmatprep.mubr.f32.mxu1 %v56072_v62 }
0x220b   :  { %51762 = vmatprep.subr.mxu1 %v57174_v29  ;;  %51767 = vmatprep.subr.mxu0 %v57103_v40 }
0x220c   :  { %51763 = vmatpush3.msra.mxu1 %v57174_v29  ;;  %51771 = vmatprep.mubr.msk.f32.mxu0 %vm52763_vm1, %v57103_v40 }
0x220d   :  { %51765 = vmatmul.mubr.f32.vlgmr.msra.gmra.mxu1 %v56075_v16  ;;  %51774 = vmatprep.subr.mxu1 %v57103_v40 }
0x220e   :  { %51778 = vmatprep.mubr.msk.f32.mxu1 %vm52763_vm1, %v57103_v40 }
0x22ab   :  { %v35536_v38 = vpop.f32.mrf.mxu0 }
0x22ad   :  { %v51689_v0 = vpop.f32.mrf.mxu0 }
0x22af   :  { %v35693_v59 = vpop.f32.mrf.mxu0 }
0x22b1   :  { %v51703_v63 = vpop.f32.mrf.mxu0 }
0x22b3   :  { %v35617_v21 = vpop.f32.mrf.mxu1 }
0x22b4   :  { %v35618_v58 = vadd.f32 %v35617_v21, %v35536_v38 }
0x22b5   :  { %v51696_v52 = vpop.f32.mrf.mxu1 }
0x22b6   :  { %v35694_v28 = vadd.f32 %v35693_v59, %v35618_v58  ;;  %v35845_v57 = vpop.f32.mrf.mxu0 }
0x22b7   :  { %v35768_v27 = vpop.f32.mrf.mxu1 }
0x22b8   :  { %v35769_v56 = vadd.f32 %v35768_v27, %v35694_v28  ;;  %v51717_v7 = vpop.f32.mrf.mxu0 }
0x22b9   :  { %v51710_v48 = vpop.f32.mrf.mxu1 }
0x22ba   :  { %v35846_v34 = vadd.f32 %v35845_v57, %v35769_v56  ;;  %v34953_v56 = vmul.f32 %v55959_v31, %v55959_v31 }
0x22bc   :  { %v35918_v30 = vpop.f32.mrf.mxu1 }
0x22bd   :  { %v56162_v26 = vadd.f32 %v35918_v30, %v35846_v34  ;;  %v51731_v18 = vpop.f32.mrf.mxu0  ;;  %v34954_v34 = vmul.f32 %v55963_v20, %v55963_v20 }
0x22be   :  { %v51724_v14 = vpop.f32.mrf.mxu1 }
0x22bf   :  { %v36001_v25 = vpop.f32.mrf.mxu0  ;;  %v36890_v14 = vsel %vm76_vm0, %v34953_v56, 0 }
0x22c2   :  { %v51738_v15 = vpop.f32.mrf.mxu1 }
0x22c3   :  { %v36099_v0 = vadd.f32 %v51738_v15, %v51731_v18  ;;  %v51745_v22 = vpop.f32.mrf.mxu0 }
0x22c4   :  { %v36092_v63 = vpop.f32.mrf.mxu1 }
0x22c5   :  { %v36182_v17 = vadd.f32 %v51745_v22, %v36099_v0  ;;  %v36093_v38 = vadd.f32 %v36092_v63, %v36001_v25  ;;  %v36174_v21 = vpop.f32.mrf.mxu0 }
0x22c7   :  { %v36175_v59 = vadd.f32 %v36174_v21, %v36093_v38  ;;  %v56170_v21 = vand.u32 4294901760, %v36890_v14 }
0x22c8   :  { %v51752_v58 = vpop.f32.mrf.mxu1 }
0x22c9   :  { %v36265_v52 = vadd.f32 %v51752_v58, %v36182_v17  ;;  %v51759_v28 = vpop.f32.mrf.mxu0  ;;  %v36893_v17 = vsel %vm76_vm0, %v34954_v34, 0 }
0x22ca   :  { %v36256_v27 = vpop.f32.mrf.mxu1  ;;  %v56173_v31 = vand.u32 4294901760, %v36893_v17 }
0x22cb   :  { %v36348_v7 = vadd.f32 %v51759_v28, %v36265_v52  ;;  %v36257_v57 = vadd.f32 %v36256_v27, %v36175_v59  ;;  %v36341_v48 = vpop.f32.mrf.mxu0  ;;  %v56180_v28 = vsub.f32 %v36890_v14, %v56170_v21 }
0x22cc   :  { %v56184_v27 = vsub.f32 %v36893_v17, %v56173_v31 }
0x22cd   :  { %v36342_v15 = vadd.f32 %v36341_v48, %v36257_v57  ;;  %v51766_v30 = vpop.f32.mrf.mxu1  ;;  %v56189_v48 = vand.u32 4294901760, %v56180_v28 }
0x22ce   :  { %v36427_v18 = vadd.f32 %v51766_v30, %v36348_v7  ;;  %v56194_v34 = vand.u32 4294901760, %v56184_v27 }
0x22cf   :  { %v36420_v22 = vpop.f32.mrf.mxu1 }
0x22d0   :  { %v36459_v25 = vand.u32 4294901760, %v36427_v18  ;;  %v36421_v0 = vadd.f32 %v36420_v22, %v36342_v15  ;;  %57185 = vst [vmem:[#allocation21_spill] sm:$0xff] %v56194_v34  ;;  %v36965_v15 = vsub.f32 %v56180_v28, %v56189_v48  ;;  %v36975_v30 = vsub.f32 %v56184_v27, %v56194_v34 }
0x22d2   :  { %v36537_v63 = vsub.f32 %v36427_v18, %v36459_v25  ;;  %v36462_v38 = vand.u32 4294901760, %v36421_v0  ;;  %51768 = vmatpush3.msra.mxu0 %v36459_v25  ;;  %v56211_v18 = vand.u32 4294901760, %v36965_v15  ;;  %v56215_v22 = vand.u32 4294901760, %v36975_v30 }
0x22d3   :  { %51769 = vmatprep.subr.mxu0 %v57103_v40 }
0x22d4   :  { %v36538_v20 = vand.u32 4294901760, %v36537_v63  ;;  %v36544_v59 = vsub.f32 %v36421_v0, %v36462_v38  ;;  %51770 = vmatpush3.msra.mxu0 %v36462_v38 }
0x22d5   :  { %51781 = vmatprep.subr.mxu0 %v57103_v40  ;;  %51772 = vmatmul.mubr.f32.vlgmr.msra.gmra.mxu0 %v52936_v12 }
0x22d6   :  { %v36539_v58 = vsub.f32 %v36537_v63, %v36538_v20  ;;  %v36545_v52 = vand.u32 4294901760, %v36544_v59  ;;  %51782 = vmatpush3.msra.mxu0 %v36537_v63  ;;  %51785 = vmatprep.mubr.msk.f32.mxu0 %vm52763_vm1, %v57103_v40 }
0x22d7   :  { %51783 = vmatprep.subr.mxu0 %v57103_v40 }
0x22d8   :  { %51784 = vmatpush3.msra.mxu0 %v36544_v59  ;;  %v36540_v7 = vand.u32 4294901760, %v36539_v58  ;;  %v36546_v57 = vsub.f32 %v36544_v59, %v36545_v52 }
0x22d9   :  { %51795 = vmatprep.subr.mxu0 %v57103_v40  ;;  %51786 = vmatmul.mubr.f32.vlgmr.msra.gmra.mxu0 %v52923_v47 }
0x22da   :  { %51775 = vmatpush3.msra.mxu1 %v36540_v7  ;;  %51796 = vmatpush3.msra.mxu0 %v36538_v20  ;;  %v36547_v56 = vand.u32 4294901760, %v36546_v57 }
0x22db   :  { %51776 = vmatprep.subr.mxu1 %v57103_v40  ;;  %51797 = vmatprep.subr.mxu0 %v57103_v40 }
0x22dc   :  { %51777 = vmatpush3.msra.mxu1 %v36547_v56  ;;  %51798 = vmatpush3.msra.mxu0 %v36545_v52 }
0x22dd   :  { %51779 = vmatmul.mubr.f32.vlgmr.msra.gmra.mxu1 %v52920_v43  ;;  %51788 = vmatprep.subr.mxu1 %v57103_v40 }
0x22de   :  { %51789 = vmatpush3.msra.mxu1 %v36459_v25  ;;  %51792 = vmatprep.mubr.msk.f32.mxu1 %vm52763_vm1, %v57103_v40 }
0x22df   :  { %51790 = vmatprep.subr.mxu1 %v57103_v40  ;;  %51799 = vmatprep.mubr.msk.f32.mxu0 %vm52763_vm1, %v57103_v40 }
0x22e0   :  { %51791 = vmatpush3.msra.mxu1 %v36462_v38  ;;  %51800 = vmatmul.mubr.f32.vlgmr.msra.gmra.mxu0 %v52920_v43 }
0x22e1   :  { %51793 = vmatmul.mubr.f32.vlgmr.msra.gmra.mxu1 %v52926_v54  ;;  %51802 = vmatprep.subr.mxu1 %v57103_v40 }
0x22e2   :  { %51809 = vmatprep.subr.mxu0 %v57173_v33  ;;  %51803 = vmatpush3.msra.mxu1 %v36459_v25 }
0x22e3   :  { %51810 = vmatpush3.msra.mxu0 %v57173_v33  ;;  %51804 = vmatprep.subr.mxu1 %v57103_v40 }
0x22e4   :  { %51811 = vmatprep.subr.mxu0 %v57174_v29  ;;  %51805 = vmatpush3.msra.mxu1 %v36462_v38 }
0x22e5   :  { %51806 = vmatprep.mubr.msk.f32.mxu1 %vm52763_vm1, %v57103_v40  ;;  %51812 = vmatpush3.msra.mxu0 %v57174_v29 }
0x22e6   :  { %51813 = vmatprep.mubr.f32.mxu0 %v56211_v18  ;;  %51807 = vmatmul.mubr.f32.vlgmr.msra.gmra.mxu1 %v52920_v43 }
0x22e7   :  { %51814 = vmatmul.mubr.f32.vlgmr.msra.gmra.mxu0 %v56215_v22  ;;  %51816 = vmatprep.subr.mxu1 %v57175_v10 }
0x22e8   :  { %51823 = vmatprep.subr.mxu0 %v57176_v1  ;;  %51817 = vmatpush3.msra.mxu1 %v57175_v10 }
0x22e9   :  { %51824 = vmatpush3.msra.mxu0 %v57176_v1  ;;  %51818 = vmatprep.subr.mxu1 %v57177_v6 }
0x22ea   :  { %51825 = vmatprep.subr.mxu0 %v57178_v9  ;;  %51819 = vmatpush3.msra.mxu1 %v57177_v6 }
0x22eb   :  { %51820 = vmatprep.mubr.f32.mxu1 %v56170_v21  ;;  %51826 = vmatpush3.msra.mxu0 %v57178_v9 }
0x22ec   :  { %51827 = vmatprep.mubr.f32.mxu0 %v56180_v28  ;;  %51821 = vmatmul.mubr.f32.vlgmr.msra.gmra.mxu1 %v56173_v31 }
0x22ed   :  { %51828 = vmatmul.mubr.f32.vlgmr.msra.gmra.mxu0 %v56184_v27  ;;  %51830 = vmatprep.subr.mxu1 %v57173_v33 }
0x22ee   :  { %51837 = vmatprep.subr.mxu0 %v57179_v32  ;;  %51831 = vmatpush3.msra.mxu1 %v57173_v33 }
0x22ef   :  { %51838 = vmatpush3.msra.mxu0 %v57179_v32  ;;  %51832 = vmatprep.subr.mxu1 %v57174_v29 }
0x22f0   :  { %51839 = vmatprep.subr.mxu0 %v57180_v5  ;;  %51833 = vmatpush3.msra.mxu1 %v57174_v29 }
0x22f1   :  { %51834 = vmatprep.mubr.f32.mxu1 %v56189_v48  ;;  %51840 = vmatpush3.msra.mxu0 %v57180_v5 }
0x22f2   :  { %51841 = vmatprep.mubr.f32.mxu0 %v56170_v21  ;;  %51835 = vmatmul.mubr.f32.vlgmr.msra.gmra.mxu1 %v56194_v34 }
0x22f3   :  { %51842 = vmatmul.mubr.f32.vlgmr.msra.gmra.mxu0 %v56173_v31  ;;  %51844 = vmatprep.subr.mxu1 %v57173_v33 }
0x22f4   :  { %51845 = vmatpush3.msra.mxu1 %v57173_v33  ;;  %51848 = vmatprep.mubr.f32.mxu1 %v56170_v21 }
0x22f5   :  { %51846 = vmatprep.subr.mxu1 %v57174_v29  ;;  %51851 = vmatprep.subr.mxu0 %v57103_v40 }
0x22f6   :  { %51847 = vmatpush3.msra.mxu1 %v57174_v29  ;;  %51855 = vmatprep.mubr.msk.f32.mxu0 %vm52763_vm1, %v57103_v40 }
0x22f7   :  { %51849 = vmatmul.mubr.f32.vlgmr.msra.gmra.mxu1 %v56173_v31  ;;  %51858 = vmatprep.subr.mxu1 %v57103_v40 }
0x22f8   :  { %51862 = vmatprep.mubr.msk.f32.mxu1 %vm52763_vm1, %v57103_v40 }
0x2395   :  { %v36503_v14 = vpop.f32.mrf.mxu0 }
0x2397   :  { %v51773_v25 = vpop.f32.mrf.mxu0 }
0x2399   :  { %v36660_v0 = vpop.f32.mrf.mxu0 }
0x239b   :  { %v51787_v17 = vpop.f32.mrf.mxu0 }
0x239d   :  { %v36584_v63 = vpop.f32.mrf.mxu1 }
0x239e   :  { %v36585_v38 = vadd.f32 %v36584_v63, %v36503_v14 }
0x239f   :  { %v51780_v20 = vpop.f32.mrf.mxu1 }
0x23a0   :  { %v36661_v59 = vadd.f32 %v36660_v0, %v36585_v38  ;;  %v36812_v58 = vpop.f32.mrf.mxu0 }
0x23a1   :  { %v36735_v52 = vpop.f32.mrf.mxu1 }
0x23a2   :  { %v36736_v7 = vadd.f32 %v36735_v52, %v36661_v59  ;;  %v51801_v57 = vpop.f32.mrf.mxu0 }
0x23a3   :  { %v51794_v56 = vpop.f32.mrf.mxu1 }
0x23a4   :  { %v36813_v15 = vadd.f32 %v36812_v58, %v36736_v7 }
0x23a6   :  { %v36885_v30 = vpop.f32.mrf.mxu1 }
0x23a7   :  { %v56260_v5 = vadd.f32 %v36885_v30, %v36813_v15  ;;  %v51815_v32 = vpop.f32.mrf.mxu0 }
0x23a8   :  { %v51808_v9 = vpop.f32.mrf.mxu1 }
0x23a9   :  { %v36968_v6 = vpop.f32.mrf.mxu0 }
0x23ac   :  { %v51822_v1 = vpop.f32.mrf.mxu1 }
0x23ad   :  { %v37066_v25 = vadd.f32 %v51822_v1, %v51815_v32  ;;  %v51829_v10 = vpop.f32.mrf.mxu0 }
0x23ae   :  { %v37059_v17 = vpop.f32.mrf.mxu1 }
0x23af   :  { %v37149_v29 = vadd.f32 %v51829_v10, %v37066_v25  ;;  %v37060_v14 = vadd.f32 %v37059_v17, %v36968_v6  ;;  %v37141_v63 = vpop.f32.mrf.mxu0 }
0x23b1   :  { %v37142_v0 = vadd.f32 %v37141_v63, %v37060_v14 }
0x23b2   :  { %v51836_v38 = vpop.f32.mrf.mxu1 }
0x23b3   :  { %v37232_v20 = vadd.f32 %v51836_v38, %v37149_v29  ;;  %v51843_v59 = vpop.f32.mrf.mxu0 }
0x23b4   :  { %v37223_v52 = vpop.f32.mrf.mxu1 }
0x23b5   :  { %v37315_v57 = vadd.f32 %v51843_v59, %v37232_v20  ;;  %v37224_v58 = vadd.f32 %v37223_v52, %v37142_v0  ;;  %v37308_v7 = vpop.f32.mrf.mxu0 }
0x23b7   :  { %v37309_v56 = vadd.f32 %v37308_v7, %v37224_v58  ;;  %v51850_v15 = vpop.f32.mrf.mxu1 }
0x23b8   :  { %v37394_v30 = vadd.f32 %v51850_v15, %v37315_v57 }
0x23b9   :  { %v37387_v9 = vpop.f32.mrf.mxu1 }
0x23ba   :  { %v37426_v33 = vand.u32 4294901760, %v37394_v30  ;;  %v37388_v34 = vadd.f32 %v37387_v9, %v37309_v56 }
0x23bc   :  { %v37504_v1 = vsub.f32 %v37394_v30, %v37426_v33  ;;  %v37429_v32 = vand.u32 4294901760, %v37388_v34  ;;  %51852 = vmatpush3.msra.mxu0 %v37426_v33 }
0x23bd   :  { %51853 = vmatprep.subr.mxu0 %v57103_v40 }
0x23be   :  { %v37505_v10 = vand.u32 4294901760, %v37504_v1  ;;  %v37511_v6 = vsub.f32 %v37388_v34, %v37429_v32  ;;  %51854 = vmatpush3.msra.mxu0 %v37429_v32 }
0x23bf   :  { %51865 = vmatprep.subr.mxu0 %v57103_v40  ;;  %51856 = vmatmul.mubr.f32.vlgmr.msra.gmra.mxu0 %v52936_v12 }
0x23c0   :  { %v37506_v29 = vsub.f32 %v37504_v1, %v37505_v10  ;;  %v37512_v25 = vand.u32 4294901760, %v37511_v6  ;;  %51866 = vmatpush3.msra.mxu0 %v37504_v1  ;;  %51869 = vmatprep.mubr.msk.f32.mxu0 %vm52763_vm1, %v57103_v40 }
0x23c1   :  { %51867 = vmatprep.subr.mxu0 %v57103_v40 }
0x23c2   :  { %51868 = vmatpush3.msra.mxu0 %v37511_v6  ;;  %v37507_v17 = vand.u32 4294901760, %v37506_v29  ;;  %v37513_v14 = vsub.f32 %v37511_v6, %v37512_v25 }
0x23c3   :  { %51879 = vmatprep.subr.mxu0 %v57103_v40  ;;  %51870 = vmatmul.mubr.f32.vlgmr.msra.gmra.mxu0 %v52923_v47 }
0x23c4   :  { %51859 = vmatpush3.msra.mxu1 %v37507_v17  ;;  %51880 = vmatpush3.msra.mxu0 %v37505_v10  ;;  %v37514_v34 = vand.u32 4294901760, %v37513_v14 }
0x23c5   :  { %51860 = vmatprep.subr.mxu1 %v57103_v40  ;;  %51881 = vmatprep.subr.mxu0 %v57103_v40 }
0x23c6   :  { %51861 = vmatpush3.msra.mxu1 %v37514_v34  ;;  %51882 = vmatpush3.msra.mxu0 %v37512_v25 }
0x23c7   :  { %51863 = vmatmul.mubr.f32.vlgmr.msra.gmra.mxu1 %v52920_v43  ;;  %51872 = vmatprep.subr.mxu1 %v57103_v40 }
0x23c8   :  { %51873 = vmatpush3.msra.mxu1 %v37426_v33  ;;  %51876 = vmatprep.mubr.msk.f32.mxu1 %vm52763_vm1, %v57103_v40 }
0x23c9   :  { %51874 = vmatprep.subr.mxu1 %v57103_v40  ;;  %51883 = vmatprep.mubr.msk.f32.mxu0 %vm52763_vm1, %v57103_v40 }
0x23ca   :  { %51875 = vmatpush3.msra.mxu1 %v37429_v32  ;;  %51884 = vmatmul.mubr.f32.vlgmr.msra.gmra.mxu0 %v52920_v43 }
0x23cb   :  { %51877 = vmatmul.mubr.f32.vlgmr.msra.gmra.mxu1 %v52926_v54  ;;  %51886 = vmatprep.subr.mxu1 %v57103_v40 }
0x23cc   :  { %51893 = vmatprep.subr.mxu0 %v53134_v4  ;;  %51887 = vmatpush3.msra.mxu1 %v37426_v33 }
0x23cd   :  { %51894 = vmatpush3.msra.mxu0 %v53134_v4  ;;  %51888 = vmatprep.subr.mxu1 %v57103_v40 }
0x23ce   :  { %51895 = vmatprep.subr.mxu0 %v53137_v11  ;;  %51889 = vmatpush3.msra.mxu1 %v37429_v32 }
0x23cf   :  { %51890 = vmatprep.mubr.msk.f32.mxu1 %vm52763_vm1, %v57103_v40  ;;  %51896 = vmatpush3.msra.mxu0 %v53137_v11 }
0x23d0   :  { %51897 = vmatprep.mubr.f32.mxu0 %v56012_v8  ;;  %51891 = vmatmul.mubr.f32.vlgmr.msra.gmra.mxu1 %v52920_v43 }
0x23d1   :  { %51898 = vmatmul.mubr.f32.vlgmr.msra.gmra.mxu0 %v56016_v3  ;;  %51900 = vmatprep.subr.mxu1 %v53177_v53 }
0x23d2   :  { %51907 = vmatprep.subr.mxu0 %v53145_v23  ;;  %51901 = vmatpush3.msra.mxu1 %v53177_v53 }
0x23d3   :  { %51908 = vmatpush3.msra.mxu0 %v53145_v23  ;;  %51902 = vmatprep.subr.mxu1 %v53183_v55 }
0x23d4   :  { %51909 = vmatprep.subr.mxu0 %v53150_v44  ;;  %51903 = vmatpush3.msra.mxu1 %v53183_v55 }
0x23d5   :  { %51904 = vmatprep.mubr.f32.mxu1 %v55971_v13  ;;  %51910 = vmatpush3.msra.mxu0 %v53150_v44 }
0x23d6   :  { %51911 = vmatprep.mubr.f32.mxu0 %v55981_v36  ;;  %51905 = vmatmul.mubr.f32.vlgmr.msra.gmra.mxu1 %v55974_v19 }
0x23d7   :  { %51912 = vmatmul.mubr.f32.vlgmr.msra.gmra.mxu0 %v55985_v60  ;;  %51914 = vmatprep.subr.mxu1 %v53134_v4 }
0x23d8   :  { %51921 = vmatprep.subr.mxu0 %v53155_v49  ;;  %51915 = vmatpush3.msra.mxu1 %v53134_v4 }
0x23d9   :  { %51922 = vmatpush3.msra.mxu0 %v53155_v49  ;;  %51916 = vmatprep.subr.mxu1 %v53137_v11 }
0x23da   :  { %51923 = vmatprep.subr.mxu0 %v53160_v50  ;;  %51917 = vmatpush3.msra.mxu1 %v53137_v11 }
0x23db   :  { %51918 = vmatprep.mubr.f32.mxu1 %v55990_v24  ;;  %51924 = vmatpush3.msra.mxu0 %v53160_v50 }
0x23dc   :  { %51925 = vmatprep.mubr.f32.mxu0 %v55971_v13  ;;  %51919 = vmatmul.mubr.f32.vlgmr.msra.gmra.mxu1 %v55995_v46 }
0x23dd   :  { %51926 = vmatmul.mubr.f32.vlgmr.msra.gmra.mxu0 %v55974_v19  ;;  %51928 = vmatprep.subr.mxu1 %v53134_v4 }
0x23de   :  { %51929 = vmatpush3.msra.mxu1 %v53134_v4  ;;  %51932 = vmatprep.mubr.f32.mxu1 %v55971_v13 }
0x23df   :  { %51930 = vmatprep.subr.mxu1 %v53137_v11  ;;  %51935 = vmatprep.subr.mxu0 %v57103_v40 }
0x23e0   :  { %51931 = vmatpush3.msra.mxu1 %v53137_v11  ;;  %51939 = vmatprep.mubr.msk.f32.mxu0 %vm52763_vm1, %v57103_v40 }
0x23e1   :  { %51933 = vmatmul.mubr.f32.vlgmr.msra.gmra.mxu1 %v55974_v19  ;;  %51942 = vmatprep.subr.mxu1 %v57103_v40 }
0x23e2   :  { %51946 = vmatprep.mubr.msk.f32.mxu1 %vm52763_vm1, %v57103_v40 }
0x247f   :  { %v37470_v36 = vpop.f32.mrf.mxu0 }
0x2481   :  { %v51857_v60 = vpop.f32.mrf.mxu0 }
0x2483   :  { %v37627_v24 = vpop.f32.mrf.mxu0 }
0x2485   :  { %v51871_v13 = vpop.f32.mrf.mxu0 }
0x2487   :  { %v37551_v46 = vpop.f32.mrf.mxu1 }
0x2488   :  { %v37552_v33 = vadd.f32 %v37551_v46, %v37470_v36 }
0x2489   :  { %v51864_v8 = vpop.f32.mrf.mxu1 }
0x248a   :  { %v37628_v3 = vadd.f32 %v37627_v24, %v37552_v33  ;;  %v37779_v63 = vpop.f32.mrf.mxu0 }
0x248b   :  { %v37702_v0 = vpop.f32.mrf.mxu1 }
0x248c   :  { %v37703_v38 = vadd.f32 %v37702_v0, %v37628_v3  ;;  %v51885_v20 = vpop.f32.mrf.mxu0 }
0x248d   :  { %v51878_v59 = vpop.f32.mrf.mxu1 }
0x248e   :  { %v37780_v52 = vadd.f32 %v37779_v63, %v37703_v38 }
0x2490   :  { %v37852_v19 = vpop.f32.mrf.mxu1 }
0x2491   :  { %v37853_v57 = vadd.f32 %v37852_v19, %v37780_v52  ;;  %v51899_v58 = vpop.f32.mrf.mxu0 }
0x2492   :  { %v51892_v7 = vpop.f32.mrf.mxu1 }
0x2493   :  { %v37856_v56 = vmul.f32 %v37853_v57, %v56260_v5  ;;  %v37933_v15 = vpop.f32.mrf.mxu0 }
0x2495   :  { %52684 = vrsqrt.f32 %v37856_v56 }
0x2496   :  { %v51906_v30 = vpop.f32.mrf.mxu1 }
0x2497   :  { %v38031_v9 = vadd.f32 %v51906_v30, %v51899_v58  ;;  %v51913_v1 = vpop.f32.mrf.mxu0 }
0x2498   :  { %v38024_v32 = vpop.f32.mrf.mxu1 }
0x2499   :  { %v38114_v10 = vadd.f32 %v51913_v1, %v38031_v9  ;;  %v38025_v6 = vadd.f32 %v38024_v32, %v37933_v15  ;;  %v38106_v29 = vpop.f32.mrf.mxu0 }
0x249b   :  { %v38107_v25 = vadd.f32 %v38106_v29, %v38025_v6 }
0x249c   :  { %v51920_v17 = vpop.f32.mrf.mxu1 }
0x249d   :  { %v38197_v14 = vadd.f32 %v51920_v17, %v38114_v10  ;;  %v51927_v34 = vpop.f32.mrf.mxu0 }
0x249e   :  { %v38188_v36 = vpop.f32.mrf.mxu1 }
0x249f   :  { %v38280_v60 = vadd.f32 %v51927_v34, %v38197_v14  ;;  %v38189_v24 = vadd.f32 %v38188_v36, %v38107_v25  ;;  %v38273_v13 = vpop.f32.mrf.mxu0 }
0x24a1   :  { %v38274_v46 = vadd.f32 %v38273_v13, %v38189_v24  ;;  %v51934_v33 = vpop.f32.mrf.mxu1 }
0x24a2   :  { %v52685_v5 = vpop.eup %52684  ;;  %v38359_v8 = vadd.f32 %v51934_v33, %v38280_v60 }
0x24a3   :  { %v38352_v3 = vpop.f32.mrf.mxu1  ;;  %v37858_v63 = vmul.f32 %v52685_v5, %v56162_v26 }
0x24a4   :  { %v38391_v0 = vand.u32 4294901760, %v38359_v8  ;;  %v38353_v38 = vadd.f32 %v38352_v3, %v38274_v46 }
0x24a5   :  { %v56331_v20 = vadd.f32 %v37858_v63, %v55819_v37 }
0x24a6   :  { %v38469_v59 = vsub.f32 %v38359_v8, %v38391_v0  ;;  %v38394_v52 = vand.u32 4294901760, %v38353_v38  ;;  %51936 = vmatpush3.msra.mxu0 %v38391_v0 }
0x24a7   :  { %51937 = vmatprep.subr.mxu0 %v57103_v40 }
0x24a8   :  { %v38470_v19 = vand.u32 4294901760, %v38469_v59  ;;  %v38476_v57 = vsub.f32 %v38353_v38, %v38394_v52  ;;  %51938 = vmatpush3.msra.mxu0 %v38394_v52 }
0x24a9   :  { %51949 = vmatprep.subr.mxu0 %v57103_v40  ;;  %51940 = vmatmul.mubr.f32.vlgmr.msra.gmra.mxu0 %v53241_v51 }
0x24aa   :  { %v38471_v58 = vsub.f32 %v38469_v59, %v38470_v19  ;;  %v38477_v7 = vand.u32 4294901760, %v38476_v57  ;;  %51950 = vmatpush3.msra.mxu0 %v38469_v59  ;;  %51953 = vmatprep.mubr.msk.f32.mxu0 %vm52763_vm1, %v57103_v40 }
0x24ab   :  { %51951 = vmatprep.subr.mxu0 %v57103_v40 }
0x24ac   :  { %v38478_v37 = vsub.f32 %v38476_v57, %v38477_v7  ;;  %51952 = vmatpush3.msra.mxu0 %v38476_v57  ;;  %v38472_v26 = vand.u32 4294901760, %v38471_v58 }
0x24ad   :  { %51963 = vmatprep.subr.mxu0 %v57103_v40  ;;  %51954 = vmatmul.mubr.f32.vlgmr.msra.gmra.mxu0 %v53234_v35 }
0x24ae   :  { %51943 = vmatpush3.msra.mxu1 %v38472_v26  ;;  %51964 = vmatpush3.msra.mxu0 %v38470_v19  ;;  %v38479_v56 = vand.u32 4294901760, %v38478_v37 }
0x24af   :  { %51944 = vmatprep.subr.mxu1 %v57103_v40  ;;  %51965 = vmatprep.subr.mxu0 %v57103_v40 }
0x24b0   :  { %51945 = vmatpush3.msra.mxu1 %v38479_v56  ;;  %51966 = vmatpush3.msra.mxu0 %v38477_v7 }
0x24b1   :  { %51947 = vmatmul.mubr.f32.vlgmr.msra.gmra.mxu1 %v53231_v45  ;;  %51956 = vmatprep.subr.mxu1 %v57103_v40 }
0x24b2   :  { %51957 = vmatpush3.msra.mxu1 %v38391_v0  ;;  %51960 = vmatprep.mubr.msk.f32.mxu1 %vm52763_vm1, %v57103_v40 }
0x24b3   :  { %51958 = vmatprep.subr.mxu1 %v57103_v40  ;;  %51967 = vmatprep.mubr.msk.f32.mxu0 %vm52763_vm1, %v57103_v40 }
0x24b4   :  { %51959 = vmatpush3.msra.mxu1 %v38394_v52  ;;  %51968 = vmatmul.mubr.f32.vlgmr.msra.gmra.mxu0 %v53231_v45 }
0x24b5   :  { %51961 = vmatmul.mubr.f32.vlgmr.msra.gmra.mxu1 %v53237_v61  ;;  %51970 = vmatprep.subr.mxu1 %v57103_v40 }
0x24b6   :  { %51977 = vmatprep.subr.mxu0 %v53134_v4  ;;  %51971 = vmatpush3.msra.mxu1 %v38391_v0 }
0x24b7   :  { %51978 = vmatpush3.msra.mxu0 %v53134_v4  ;;  %51972 = vmatprep.subr.mxu1 %v57103_v40 }
0x24b8   :  { %51979 = vmatprep.subr.mxu0 %v53137_v11  ;;  %51973 = vmatpush3.msra.mxu1 %v38394_v52 }
0x24b9   :  { %51974 = vmatprep.mubr.msk.f32.mxu1 %vm52763_vm1, %v57103_v40  ;;  %51980 = vmatpush3.msra.mxu0 %v53137_v11 }
0x24ba   :  { %51981 = vmatprep.mubr.f32.mxu0 %v56113_v39  ;;  %51975 = vmatmul.mubr.f32.vlgmr.msra.gmra.mxu1 %v53231_v45  ;;  %v57186_v39 = vld [vmem:[#allocation20_spill] sm:$0xff] }
0x24bb   :  { %51982 = vmatmul.mubr.f32.vlgmr.msra.gmra.mxu0 %v56117_v42  ;;  %51984 = vmatprep.subr.mxu1 %v53177_v53 }
0x24bc   :  { %51991 = vmatprep.subr.mxu0 %v53145_v23  ;;  %51985 = vmatpush3.msra.mxu1 %v53177_v53 }
0x24bd   :  { %51992 = vmatpush3.msra.mxu0 %v53145_v23  ;;  %51986 = vmatprep.subr.mxu1 %v53183_v55 }
0x24be   :  { %51993 = vmatprep.subr.mxu0 %v53150_v44  ;;  %51987 = vmatpush3.msra.mxu1 %v53183_v55 }
0x24bf   :  { %51988 = vmatprep.mubr.f32.mxu1 %v56072_v62  ;;  %51994 = vmatpush3.msra.mxu0 %v53150_v44 }
0x24c0   :  { %51995 = vmatprep.mubr.f32.mxu0 %v56082_v2  ;;  %51989 = vmatmul.mubr.f32.vlgmr.msra.gmra.mxu1 %v56075_v16  ;;  %v57187_v2 = vld [vmem:[#allocation22_spill] sm:$0xff] }
0x24c1   :  { %51996 = vmatmul.mubr.f32.vlgmr.msra.gmra.mxu0 %v56086_v41  ;;  %51998 = vmatprep.subr.mxu1 %v53134_v4 }
0x24c2   :  { %52005 = vmatprep.subr.mxu0 %v53155_v49  ;;  %51999 = vmatpush3.msra.mxu1 %v53134_v4 }
0x24c3   :  { %52006 = vmatpush3.msra.mxu0 %v53155_v49  ;;  %52000 = vmatprep.subr.mxu1 %v53137_v11 }
0x24c4   :  { %52007 = vmatprep.subr.mxu0 %v53160_v50  ;;  %52001 = vmatpush3.msra.mxu1 %v53137_v11 }
0x24c5   :  { %52002 = vmatprep.mubr.f32.mxu1 %v57186_v39  ;;  %52008 = vmatpush3.msra.mxu0 %v53160_v50 }
0x24c6   :  { %52009 = vmatprep.mubr.f32.mxu0 %v56072_v62  ;;  %52003 = vmatmul.mubr.f32.vlgmr.msra.gmra.mxu1 %v57187_v2 }
0x24c7   :  { %52010 = vmatmul.mubr.f32.vlgmr.msra.gmra.mxu0 %v56075_v16  ;;  %52012 = vmatprep.subr.mxu1 %v53134_v4 }
0x24c8   :  { %52013 = vmatpush3.msra.mxu1 %v53134_v4  ;;  %52016 = vmatprep.mubr.f32.mxu1 %v56072_v62 }
0x24c9   :  { %52014 = vmatprep.subr.mxu1 %v53137_v11  ;;  %52019 = vmatprep.subr.mxu0 %v57103_v40 }
0x24ca   :  { %52015 = vmatpush3.msra.mxu1 %v53137_v11  ;;  %52023 = vmatprep.mubr.msk.f32.mxu0 %vm52763_vm1, %v57103_v40 }
0x24cb   :  { %52017 = vmatmul.mubr.f32.vlgmr.msra.gmra.mxu1 %v56075_v16  ;;  %52026 = vmatprep.subr.mxu1 %v57103_v40 }
0x24cc   :  { %52030 = vmatprep.mubr.msk.f32.mxu1 %vm52763_vm1, %v57103_v40 }
0x2569   :  { %v38435_v41 = vpop.f32.mrf.mxu0 }
0x256b   :  { %v51941_v42 = vpop.f32.mrf.mxu0 }
0x256d   :  { %v38592_v15 = vpop.f32.mrf.mxu0 }
0x256f   :  { %v51955_v62 = vpop.f32.mrf.mxu0 }
0x2571   :  { %v38516_v30 = vpop.f32.mrf.mxu1 }
0x2572   :  { %v38517_v9 = vadd.f32 %v38516_v30, %v38435_v41 }
0x2573   :  { %v51948_v1 = vpop.f32.mrf.mxu1 }
0x2574   :  { %v38593_v32 = vadd.f32 %v38592_v15, %v38517_v9  ;;  %v38744_v10 = vpop.f32.mrf.mxu0 }
0x2575   :  { %v38667_v6 = vpop.f32.mrf.mxu1 }
0x2576   :  { %v38668_v29 = vadd.f32 %v38667_v6, %v38593_v32  ;;  %v51969_v25 = vpop.f32.mrf.mxu0 }
0x2577   :  { %v51962_v17 = vpop.f32.mrf.mxu1 }
0x2578   :  { %v38745_v14 = vadd.f32 %v38744_v10, %v38668_v29 }
0x257a   :  { %v38817_v16 = vpop.f32.mrf.mxu1 }
0x257b   :  { %v56399_v34 = vadd.f32 %v38817_v16, %v38745_v14  ;;  %v51983_v36 = vpop.f32.mrf.mxu0 }
0x257c   :  { %v51976_v60 = vpop.f32.mrf.mxu1 }
0x257d   :  { %v38894_v24 = vpop.f32.mrf.mxu0 }
0x2580   :  { %v51990_v13 = vpop.f32.mrf.mxu1 }
0x2581   :  { %v38992_v46 = vadd.f32 %v51990_v13, %v51983_v36  ;;  %v51997_v33 = vpop.f32.mrf.mxu0 }
0x2582   :  { %v38985_v5 = vpop.f32.mrf.mxu1 }
0x2583   :  { %v39075_v8 = vadd.f32 %v51997_v33, %v38992_v46  ;;  %v38986_v3 = vadd.f32 %v38985_v5, %v38894_v24  ;;  %v39067_v63 = vpop.f32.mrf.mxu0 }
0x2585   :  { %v39068_v0 = vadd.f32 %v39067_v63, %v38986_v3  ;;  %v40748_v3 = vld [vmem:[#allocation2 + $0x70] sm:$0xff] }
0x2586   :  { %v52004_v38 = vpop.f32.mrf.mxu1  ;;  %v40755_v63 = vld [vmem:[#allocation5 + $0x70] sm:$0xff] }
0x2587   :  { %v39158_v59 = vadd.f32 %v52004_v38, %v39075_v8  ;;  %v52011_v52 = vpop.f32.mrf.mxu0  ;;  %v40756_v38 = vld [vmem:[#allocation5 + $0x78] sm:$0xff] }
0x2588   :  { %v39149_v19 = vpop.f32.mrf.mxu1 }
0x2589   :  { %v39241_v57 = vadd.f32 %v52011_v52, %v39158_v59  ;;  %v39150_v58 = vadd.f32 %v39149_v19, %v39068_v0  ;;  %v39234_v7 = vpop.f32.mrf.mxu0  ;;  %v40749_v0 = vld [vmem:[#allocation2 + $0x78] sm:$0xff] }
0x258b   :  { %v39235_v37 = vadd.f32 %v39234_v7, %v39150_v58  ;;  %v52018_v26 = vpop.f32.mrf.mxu1  ;;  %v40757_v58 = vmax.f32 %v40755_v63, 1e-06 }
0x258c   :  { %v39320_v56 = vadd.f32 %v52018_v26, %v39241_v57  ;;  %v40750_v57 = vmax.f32 %v40748_v3, 1e-06  ;;  %v40758_v26 = vmax.f32 %v40756_v38, 1e-06 }
0x258d   :  { %v39313_v39 = vpop.f32.mrf.mxu1 }
0x258e   :  { %v39352_v2 = vand.u32 4294901760, %v39320_v56  ;;  %v39314_v41 = vadd.f32 %v39313_v39, %v39235_v37  ;;  %v40751_v37 = vmax.f32 %v40749_v0, 1e-06 }
0x2590   :  { %v39430_v42 = vsub.f32 %v39320_v56, %v39352_v2  ;;  %v39355_v15 = vand.u32 4294901760, %v39314_v41  ;;  %52020 = vmatpush3.msra.mxu0 %v39352_v2 }
0x2591   :  { %52021 = vmatprep.subr.mxu0 %v57103_v40 }
0x2592   :  { %v39431_v62 = vand.u32 4294901760, %v39430_v42  ;;  %v39437_v30 = vsub.f32 %v39314_v41, %v39355_v15  ;;  %52022 = vmatpush3.msra.mxu0 %v39355_v15 }
0x2593   :  { %52033 = vmatprep.subr.mxu0 %v57103_v40  ;;  %52024 = vmatmul.mubr.f32.vlgmr.msra.gmra.mxu0 %v53241_v51 }
0x2594   :  { %v39432_v9 = vsub.f32 %v39430_v42, %v39431_v62  ;;  %v39438_v1 = vand.u32 4294901760, %v39437_v30  ;;  %52034 = vmatpush3.msra.mxu0 %v39430_v42  ;;  %52037 = vmatprep.mubr.msk.f32.mxu0 %vm52763_vm1, %v57103_v40  ;;  %v56469_v42 = vmin.f32 %v40750_v57, 0.999999 }
0x2595   :  { %52035 = vmatprep.subr.mxu0 %v57103_v40 }
0x2596   :  { %v39439_v32 = vsub.f32 %v39437_v30, %v39438_v1  ;;  %52036 = vmatpush3.msra.mxu0 %v39437_v30  ;;  %v39433_v10 = vand.u32 4294901760, %v39432_v9  ;;  %v56473_v30 = vmin.f32 %v40751_v37, 0.999999  ;;  %v56475_v9 = vmin.f32 %v40758_v26, 0.999999  ;;  %v57189_v37 = vld [vmem:[#allocation11_spill] sm:$0xff] }
0x2597   :  { %52047 = vmatprep.subr.mxu0 %v57103_v40  ;;  %52038 = vmatmul.mubr.f32.vlgmr.msra.gmra.mxu0 %v53234_v35 }
0x2598   :  { %52027 = vmatpush3.msra.mxu1 %v39433_v10  ;;  %52048 = vmatpush3.msra.mxu0 %v39431_v62  ;;  %v39440_v6 = vand.u32 4294901760, %v39439_v32 }
0x2599   :  { %52028 = vmatprep.subr.mxu1 %v57103_v40  ;;  %52049 = vmatprep.subr.mxu0 %v57103_v40 }
0x259a   :  { %52029 = vmatpush3.msra.mxu1 %v39440_v6  ;;  %52050 = vmatpush3.msra.mxu0 %v39438_v1 }
0x259b   :  { %52031 = vmatmul.mubr.f32.vlgmr.msra.gmra.mxu1 %v53231_v45  ;;  %52040 = vmatprep.subr.mxu1 %v57103_v40 }
0x259c   :  { %52041 = vmatpush3.msra.mxu1 %v39352_v2  ;;  %52044 = vmatprep.mubr.msk.f32.mxu1 %vm52763_vm1, %v57103_v40 }
0x259d   :  { %52042 = vmatprep.subr.mxu1 %v57103_v40  ;;  %52051 = vmatprep.mubr.msk.f32.mxu0 %vm52763_vm1, %v57103_v40 }
0x259e   :  { %52043 = vmatpush3.msra.mxu1 %v39355_v15  ;;  %52052 = vmatmul.mubr.f32.vlgmr.msra.gmra.mxu0 %v53231_v45 }
0x259f   :  { %52045 = vmatmul.mubr.f32.vlgmr.msra.gmra.mxu1 %v53237_v61  ;;  %52054 = vmatprep.subr.mxu1 %v57103_v40 }
0x25a0   :  { %52061 = vmatprep.subr.mxu0 %v53134_v4  ;;  %52055 = vmatpush3.msra.mxu1 %v39352_v2 }
0x25a1   :  { %52062 = vmatpush3.msra.mxu0 %v53134_v4  ;;  %52056 = vmatprep.subr.mxu1 %v57103_v40 }
0x25a2   :  { %52063 = vmatprep.subr.mxu0 %v53137_v11  ;;  %52057 = vmatpush3.msra.mxu1 %v39355_v15  ;;  %v56471_v15 = vmin.f32 %v40757_v58, 0.999999 }
0x25a3   :  { %52058 = vmatprep.mubr.msk.f32.mxu1 %vm52763_vm1, %v57103_v40  ;;  %52064 = vmatpush3.msra.mxu0 %v53137_v11 }
0x25a4   :  { %52065 = vmatprep.mubr.f32.mxu0 %v56211_v18  ;;  %52059 = vmatmul.mubr.f32.vlgmr.msra.gmra.mxu1 %v53231_v45 }
0x25a5   :  { %52066 = vmatmul.mubr.f32.vlgmr.msra.gmra.mxu0 %v56215_v22  ;;  %52068 = vmatprep.subr.mxu1 %v53177_v53 }
0x25a6   :  { %52075 = vmatprep.subr.mxu0 %v53145_v23  ;;  %52069 = vmatpush3.msra.mxu1 %v53177_v53 }
0x25a7   :  { %52076 = vmatpush3.msra.mxu0 %v53145_v23  ;;  %52070 = vmatprep.subr.mxu1 %v53183_v55 }
0x25a8   :  { %52077 = vmatprep.subr.mxu0 %v53150_v44  ;;  %52071 = vmatpush3.msra.mxu1 %v53183_v55 }
0x25a9   :  { %52072 = vmatprep.mubr.f32.mxu1 %v56170_v21  ;;  %52078 = vmatpush3.msra.mxu0 %v53150_v44 }
0x25aa   :  { %52079 = vmatprep.mubr.f32.mxu0 %v56180_v28  ;;  %52073 = vmatmul.mubr.f32.vlgmr.msra.gmra.mxu1 %v56173_v31  ;;  %v57188_v28 = vld [vmem:[#allocation21_spill] sm:$0xff] }
0x25ab   :  { %52080 = vmatmul.mubr.f32.vlgmr.msra.gmra.mxu0 %v56184_v27  ;;  %52082 = vmatprep.subr.mxu1 %v53134_v4 }
0x25ac   :  { %52089 = vmatprep.subr.mxu0 %v53155_v49  ;;  %52083 = vmatpush3.msra.mxu1 %v53134_v4 }
0x25ad   :  { %52090 = vmatpush3.msra.mxu0 %v53155_v49  ;;  %52084 = vmatprep.subr.mxu1 %v53137_v11 }
0x25ae   :  { %52091 = vmatprep.subr.mxu0 %v53160_v50  ;;  %52085 = vmatpush3.msra.mxu1 %v53137_v11 }
0x25af   :  { %52086 = vmatprep.mubr.f32.mxu1 %v56189_v48  ;;  %52092 = vmatpush3.msra.mxu0 %v53160_v50 }
0x25b0   :  { %52093 = vmatprep.mubr.f32.mxu0 %v56170_v21  ;;  %52087 = vmatmul.mubr.f32.vlgmr.msra.gmra.mxu1 %v57188_v28 }
0x25b1   :  { %52094 = vmatmul.mubr.f32.vlgmr.msra.gmra.mxu0 %v56173_v31  ;;  %52096 = vmatprep.subr.mxu1 %v53134_v4 }
0x25b2   :  { %52097 = vmatpush3.msra.mxu1 %v53134_v4  ;;  %52100 = vmatprep.mubr.f32.mxu1 %v56170_v21 }
0x25b3   :  { %52098 = vmatprep.subr.mxu1 %v53137_v11  ;;  %52103 = vmatprep.subr.mxu0 %v57103_v40 }
0x25b4   :  { %52099 = vmatpush3.msra.mxu1 %v53137_v11  ;;  %52107 = vmatprep.mubr.msk.f32.mxu0 %vm52763_vm1, %v57103_v40 }
0x25b5   :  { %52101 = vmatmul.mubr.f32.vlgmr.msra.gmra.mxu1 %v56173_v31  ;;  %52110 = vmatprep.subr.mxu1 %v57103_v40 }
0x25b6   :  { %52114 = vmatprep.mubr.msk.f32.mxu1 %vm52763_vm1, %v57103_v40 }
0x2653   :  { %v39396_v27 = vpop.f32.mrf.mxu0 }
0x2655   :  { %v52025_v48 = vpop.f32.mrf.mxu0 }
0x2657   :  { %v39553_v18 = vpop.f32.mrf.mxu0 }
0x2659   :  { %v52039_v21 = vpop.f32.mrf.mxu0 }
0x265b   :  { %v39477_v22 = vpop.f32.mrf.mxu1 }
0x265c   :  { %v39478_v29 = vadd.f32 %v39477_v22, %v39396_v27  ;;  %v40761_v27 = vmul.f32 %v56471_v15, %v56469_v42 }
0x265d   :  { %v52032_v25 = vpop.f32.mrf.mxu1 }
0x265e   :  { %v39554_v17 = vadd.f32 %v39553_v18, %v39478_v29  ;;  %v39705_v14 = vpop.f32.mrf.mxu0  ;;  %v40762_v18 = vmul.f32 %v56475_v9, %v56473_v30 }
0x265f   :  { %v39628_v16 = vpop.f32.mrf.mxu1 }
0x2660   :  { %v39629_v36 = vadd.f32 %v39628_v16, %v39554_v17  ;;  %v52053_v60 = vpop.f32.mrf.mxu0  ;;  %v40768_v17 = vsel %vm76_vm0, %v40761_v27, 0 }
0x2661   :  { %v52046_v24 = vpop.f32.mrf.mxu1 }
0x2662   :  { %v39706_v13 = vadd.f32 %v39705_v14, %v39629_v36  ;;  %v40771_v36 = vsel %vm76_vm0, %v40762_v18, 0 }
0x2664   :  { %v39778_v31 = vpop.f32.mrf.mxu1 }
0x2665   :  { %v56467_v46 = vadd.f32 %v39778_v31, %v39706_v13  ;;  %v52067_v33 = vpop.f32.mrf.mxu0  ;;  %v56483_v13 = vand.u32 4294901760, %v40768_v17  ;;  %v56486_v31 = vand.u32 4294901760, %v40771_v36 }
0x2666   :  { %v52060_v5 = vpop.f32.mrf.mxu1 }
0x2667   :  { %v39855_v8 = vpop.f32.mrf.mxu0  ;;  %v56493_v63 = vsub.f32 %v40768_v17, %v56483_v13  ;;  %v56497_v0 = vsub.f32 %v40771_v36, %v56486_v31 }
0x2669   :  { %v56507_v57 = vand.u32 4294901760, %v56497_v0 }
0x266a   :  { %v52074_v59 = vpop.f32.mrf.mxu1 }
0x266b   :  { %v39953_v52 = vadd.f32 %v52074_v59, %v52067_v33  ;;  %v52081_v19 = vpop.f32.mrf.mxu0 }
0x266c   :  { %v39946_v7 = vpop.f32.mrf.mxu1 }
0x266d   :  { %v40036_v56 = vadd.f32 %v52081_v19, %v39953_v52  ;;  %v39947_v39 = vadd.f32 %v39946_v7, %v39855_v8  ;;  %v40028_v2 = vpop.f32.mrf.mxu0  ;;  %v56502_v19 = vand.u32 4294901760, %v56493_v63  ;;  %v40853_v7 = vsub.f32 %v56497_v0, %v56507_v57 }
0x266f   :  { %v40029_v41 = vadd.f32 %v40028_v2, %v39947_v39  ;;  %v40843_v58 = vsub.f32 %v56493_v63, %v56502_v19  ;;  %v57190_v39 = vld [vmem:[#allocation12_spill] sm:$0xff]  ;;  %v57191_v2 = vld [vmem:[#allocation17_spill] sm:$0xff] }
0x2670   :  { %v52088_v62 = vpop.f32.mrf.mxu1 }
0x2671   :  { %v40119_v1 = vadd.f32 %v52088_v62, %v40036_v56  ;;  %v52095_v32 = vpop.f32.mrf.mxu0  ;;  %v56524_v26 = vand.u32 4294901760, %v40843_v58  ;;  %v56528_v56 = vand.u32 4294901760, %v40853_v7  ;;  %v57193_v62 = vld [vmem:[#allocation18_spill] sm:$0xff] }
0x2672   :  { %v40110_v10 = vpop.f32.mrf.mxu1 }
0x2673   :  { %v40202_v6 = vadd.f32 %v52095_v32, %v40119_v1  ;;  %v40111_v28 = vadd.f32 %v40110_v10, %v40029_v41  ;;  %v40195_v48 = vpop.f32.mrf.mxu0  ;;  %v57192_v41 = vld [vmem:[#allocation13_spill] sm:$0xff]  ;;  %v57194_v1 = vld [vmem:[#allocation14_spill] sm:$0xff]  ;;  %v57195_v32 = vld [vmem:[#allocation15_spill] sm:$0xff] }
0x2674   :  { %v57196_v10 = vld [vmem:[#allocation16_spill] sm:$0xff] }
0x2675   :  { %v40196_v21 = vadd.f32 %v40195_v48, %v40111_v28  ;;  %v52102_v22 = vpop.f32.mrf.mxu1 }
0x2676   :  { %v40281_v29 = vadd.f32 %v52102_v22, %v40202_v6 }
0x2677   :  { %v40274_v25 = vpop.f32.mrf.mxu1 }
0x2678   :  { %v40313_v14 = vand.u32 4294901760, %v40281_v29  ;;  %v40275_v16 = vadd.f32 %v40274_v25, %v40196_v21 }
0x267a   :  { %v40391_v60 = vsub.f32 %v40281_v29, %v40313_v14  ;;  %v40316_v24 = vand.u32 4294901760, %v40275_v16  ;;  %52104 = vmatpush3.msra.mxu0 %v40313_v14 }
0x267b   :  { %52105 = vmatprep.subr.mxu0 %v57103_v40 }
0x267c   :  { %v40392_v33 = vand.u32 4294901760, %v40391_v60  ;;  %v40398_v5 = vsub.f32 %v40275_v16, %v40316_v24  ;;  %52106 = vmatpush3.msra.mxu0 %v40316_v24 }
0x267d   :  { %52117 = vmatprep.subr.mxu0 %v57103_v40  ;;  %52108 = vmatmul.mubr.f32.vlgmr.msra.gmra.mxu0 %v53241_v51 }
0x267e   :  { %v40393_v8 = vsub.f32 %v40391_v60, %v40392_v33  ;;  %v40399_v3 = vand.u32 4294901760, %v40398_v5  ;;  %52118 = vmatpush3.msra.mxu0 %v40391_v60  ;;  %52121 = vmatprep.mubr.msk.f32.mxu0 %vm52763_vm1, %v57103_v40 }
0x267f   :  { %52119 = vmatprep.subr.mxu0 %v57103_v40 }
0x2680   :  { %v40400_v38 = vsub.f32 %v40398_v5, %v40399_v3  ;;  %52120 = vmatpush3.msra.mxu0 %v40398_v5  ;;  %v40394_v59 = vand.u32 4294901760, %v40393_v8 }
0x2681   :  { %52131 = vmatprep.subr.mxu0 %v57103_v40  ;;  %52122 = vmatmul.mubr.f32.vlgmr.msra.gmra.mxu0 %v53234_v35 }
0x2682   :  { %52111 = vmatpush3.msra.mxu1 %v40394_v59  ;;  %52132 = vmatpush3.msra.mxu0 %v40392_v33  ;;  %v40401_v52 = vand.u32 4294901760, %v40400_v38 }
0x2683   :  { %52112 = vmatprep.subr.mxu1 %v57103_v40  ;;  %52133 = vmatprep.subr.mxu0 %v57103_v40 }
0x2684   :  { %52113 = vmatpush3.msra.mxu1 %v40401_v52  ;;  %52134 = vmatpush3.msra.mxu0 %v40399_v3 }
0x2685   :  { %52115 = vmatmul.mubr.f32.vlgmr.msra.gmra.mxu1 %v53231_v45  ;;  %52124 = vmatprep.subr.mxu1 %v57103_v40 }
0x2686   :  { %52125 = vmatpush3.msra.mxu1 %v40313_v14  ;;  %52128 = vmatprep.mubr.msk.f32.mxu1 %vm52763_vm1, %v57103_v40 }
0x2687   :  { %52126 = vmatprep.subr.mxu1 %v57103_v40  ;;  %52135 = vmatprep.mubr.msk.f32.mxu0 %vm52763_vm1, %v57103_v40 }
0x2688   :  { %52127 = vmatpush3.msra.mxu1 %v40316_v24  ;;  %52136 = vmatmul.mubr.f32.vlgmr.msra.gmra.mxu0 %v53231_v45 }
0x2689   :  { %52129 = vmatmul.mubr.f32.vlgmr.msra.gmra.mxu1 %v53237_v61  ;;  %52138 = vmatprep.subr.mxu1 %v57103_v40 }
0x268a   :  { %52145 = vmatprep.subr.mxu0 %v57189_v37  ;;  %52139 = vmatpush3.msra.mxu1 %v40313_v14 }
0x268b   :  { %52146 = vmatpush3.msra.mxu0 %v57189_v37  ;;  %52140 = vmatprep.subr.mxu1 %v57103_v40 }
0x268c   :  { %52147 = vmatprep.subr.mxu0 %v57190_v39  ;;  %52141 = vmatpush3.msra.mxu1 %v40316_v24 }
0x268d   :  { %52142 = vmatprep.mubr.msk.f32.mxu1 %vm52763_vm1, %v57103_v40  ;;  %52148 = vmatpush3.msra.mxu0 %v57190_v39 }
0x268e   :  { %52149 = vmatprep.mubr.f32.mxu0 %v56524_v26  ;;  %52143 = vmatmul.mubr.f32.vlgmr.msra.gmra.mxu1 %v53231_v45 }
0x268f   :  { %52150 = vmatmul.mubr.f32.vlgmr.msra.gmra.mxu0 %v56528_v56  ;;  %52152 = vmatprep.subr.mxu1 %v57191_v2 }
0x2690   :  { %52159 = vmatprep.subr.mxu0 %v57192_v41  ;;  %52153 = vmatpush3.msra.mxu1 %v57191_v2 }
0x2691   :  { %52160 = vmatpush3.msra.mxu0 %v57192_v41  ;;  %52154 = vmatprep.subr.mxu1 %v57193_v62 }
0x2692   :  { %52161 = vmatprep.subr.mxu0 %v57194_v1  ;;  %52155 = vmatpush3.msra.mxu1 %v57193_v62 }
0x2693   :  { %52156 = vmatprep.mubr.f32.mxu1 %v56483_v13  ;;  %52162 = vmatpush3.msra.mxu0 %v57194_v1 }
0x2694   :  { %52163 = vmatprep.mubr.f32.mxu0 %v56493_v63  ;;  %52157 = vmatmul.mubr.f32.vlgmr.msra.gmra.mxu1 %v56486_v31 }
0x2695   :  { %52164 = vmatmul.mubr.f32.vlgmr.msra.gmra.mxu0 %v56497_v0  ;;  %52166 = vmatprep.subr.mxu1 %v57189_v37 }
0x2696   :  { %52173 = vmatprep.subr.mxu0 %v57195_v32  ;;  %52167 = vmatpush3.msra.mxu1 %v57189_v37 }
0x2697   :  { %52174 = vmatpush3.msra.mxu0 %v57195_v32  ;;  %52168 = vmatprep.subr.mxu1 %v57190_v39 }
0x2698   :  { %52175 = vmatprep.subr.mxu0 %v57196_v10  ;;  %52169 = vmatpush3.msra.mxu1 %v57190_v39 }
0x2699   :  { %52170 = vmatprep.mubr.f32.mxu1 %v56502_v19  ;;  %52176 = vmatpush3.msra.mxu0 %v57196_v10 }
0x269a   :  { %52177 = vmatprep.mubr.f32.mxu0 %v56483_v13  ;;  %52171 = vmatmul.mubr.f32.vlgmr.msra.gmra.mxu1 %v56507_v57 }
0x269b   :  { %52178 = vmatmul.mubr.f32.vlgmr.msra.gmra.mxu0 %v56486_v31  ;;  %52180 = vmatprep.subr.mxu1 %v57189_v37 }
0x269c   :  { %52181 = vmatpush3.msra.mxu1 %v57189_v37  ;;  %52184 = vmatprep.mubr.f32.mxu1 %v56483_v13 }
0x269d   :  { %52182 = vmatprep.subr.mxu1 %v57190_v39  ;;  %52187 = vmatprep.subr.mxu0 %v57103_v40 }
0x269e   :  { %52183 = vmatpush3.msra.mxu1 %v57190_v39  ;;  %52191 = vmatprep.mubr.msk.f32.mxu0 %vm52763_vm1, %v57103_v40 }
0x269f   :  { %52185 = vmatmul.mubr.f32.vlgmr.msra.gmra.mxu1 %v56486_v31  ;;  %52194 = vmatprep.subr.mxu1 %v57103_v40 }
0x26a0   :  { %52198 = vmatprep.mubr.msk.f32.mxu1 %vm52763_vm1, %v57103_v40 }
0x273d   :  { %v40357_v6 = vpop.f32.mrf.mxu0 }
0x273f   :  { %v52109_v28 = vpop.f32.mrf.mxu0 }
0x2741   :  { %v40514_v27 = vpop.f32.mrf.mxu0 }
0x2743   :  { %v52123_v48 = vpop.f32.mrf.mxu0 }
0x2745   :  { %v40438_v18 = vpop.f32.mrf.mxu1 }
0x2746   :  { %v40439_v21 = vadd.f32 %v40438_v18, %v40357_v6 }
0x2747   :  { %v52116_v22 = vpop.f32.mrf.mxu1 }
0x2748   :  { %v40515_v29 = vadd.f32 %v40514_v27, %v40439_v21  ;;  %v40666_v25 = vpop.f32.mrf.mxu0 }
0x2749   :  { %v40589_v17 = vpop.f32.mrf.mxu1 }
0x274a   :  { %v40590_v14 = vadd.f32 %v40589_v17, %v40515_v29  ;;  %v52137_v16 = vpop.f32.mrf.mxu0 }
0x274b   :  { %v52130_v36 = vpop.f32.mrf.mxu1  ;;  %v40764_v16 = vmul.f32 %v56473_v30, %v56473_v30 }
0x274c   :  { %v40667_v60 = vadd.f32 %v40666_v25, %v40590_v14  ;;  %v40763_v14 = vmul.f32 %v56469_v42, %v56469_v42 }
0x274e   :  { %v40739_v24 = vpop.f32.mrf.mxu1 }
0x274f   :  { %v40740_v33 = vadd.f32 %v40739_v24, %v40667_v60  ;;  %v52151_v5 = vpop.f32.mrf.mxu0 }
0x2750   :  { %v52144_v8 = vpop.f32.mrf.mxu1 }
0x2751   :  { %v40743_v3 = vmul.f32 %v40740_v33, %v56467_v46  ;;  %v40846_v38 = vpop.f32.mrf.mxu0  ;;  %v41735_v8 = vsel %vm76_vm0, %v40763_v14, 0 }
0x2752   :  { %v56584_v30 = vand.u32 4294901760, %v41735_v8 }
0x2753   :  { %52686 = vrsqrt.f32 %v40743_v3 }
0x2754   :  { %v52158_v59 = vpop.f32.mrf.mxu1 }
0x2755   :  { %v40944_v52 = vadd.f32 %v52158_v59, %v52151_v5  ;;  %v52165_v58 = vpop.f32.mrf.mxu0 }
0x2756   :  { %v40937_v7 = vpop.f32.mrf.mxu1 }
0x2757   :  { %v41027_v6 = vadd.f32 %v52165_v58, %v40944_v52  ;;  %v40938_v28 = vadd.f32 %v40937_v7, %v40846_v38  ;;  %v41019_v27 = vpop.f32.mrf.mxu0  ;;  %v41738_v52 = vsel %vm76_vm0, %v40764_v16, 0  ;;  %v57197_v58 = vld [vmem:[#allocation19_spill] sm:$0xff] }
0x2759   :  { %v41020_v48 = vadd.f32 %v41019_v27, %v40938_v28  ;;  %v56587_v28 = vand.u32 4294901760, %v41738_v52 }
0x275a   :  { %v52172_v18 = vpop.f32.mrf.mxu1 }
0x275b   :  { %v41110_v21 = vadd.f32 %v52172_v18, %v41027_v6  ;;  %v52179_v22 = vpop.f32.mrf.mxu0 }
0x275c   :  { %v41101_v29 = vpop.f32.mrf.mxu1 }
0x275d   :  { %v41193_v25 = vadd.f32 %v52179_v22, %v41110_v21  ;;  %v41102_v17 = vadd.f32 %v41101_v29, %v41020_v48  ;;  %v41186_v46 = vpop.f32.mrf.mxu0  ;;  %v56594_v21 = vsub.f32 %v41735_v8, %v56584_v30  ;;  %v56598_v22 = vsub.f32 %v41738_v52, %v56587_v28 }
0x275f   :  { %v41187_v36 = vadd.f32 %v41186_v46, %v41102_v17  ;;  %v52186_v60 = vpop.f32.mrf.mxu1  ;;  %v56603_v14 = vand.u32 4294901760, %v56594_v21  ;;  %v56608_v46 = vand.u32 4294901760, %v56598_v22 }
0x2760   :  { %v52687_v24 = vpop.eup %52686  ;;  %v41272_v33 = vadd.f32 %v52186_v60, %v41193_v25 }
0x2761   :  { %v41265_v5 = vpop.f32.mrf.mxu1  ;;  %v40745_v3 = vmul.f32 %v52687_v24, %v56399_v34  ;;  %57199 = vst [vmem:[#allocation22_spill] sm:$0xff] %v56603_v14  ;;  %57200 = vst [vmem:[#allocation21_spill] sm:$0xff] %v56608_v46  ;;  %v41810_v16 = vsub.f32 %v56594_v21, %v56603_v14 }
0x2762   :  { %v41304_v38 = vand.u32 4294901760, %v41272_v33  ;;  %v41266_v59 = vadd.f32 %v41265_v5, %v41187_v36  ;;  %v41820_v36 = vsub.f32 %v56598_v22, %v56608_v46 }
0x2763   :  { %v56582_v7 = vadd.f32 %v40745_v3, %v57197_v58  ;;  %v56625_v60 = vand.u32 4294901760, %v41810_v16 }
0x2764   :  { %v41382_v42 = vsub.f32 %v41272_v33, %v41304_v38  ;;  %v41307_v6 = vand.u32 4294901760, %v41266_v59  ;;  %52188 = vmatpush3.msra.mxu0 %v41304_v38  ;;  %v56629_v24 = vand.u32 4294901760, %v41820_v36 }
0x2765   :  { %57198 = vst [vmem:[#allocation20_spill] sm:$0xff] %v56582_v7  ;;  %52189 = vmatprep.subr.mxu0 %v57103_v40 }
0x2766   :  { %v41383_v27 = vand.u32 4294901760, %v41382_v42  ;;  %v41389_v48 = vsub.f32 %v41266_v59, %v41307_v6  ;;  %52190 = vmatpush3.msra.mxu0 %v41307_v6 }
0x2767   :  { %52201 = vmatprep.subr.mxu0 %v57103_v40  ;;  %52192 = vmatmul.mubr.f32.vlgmr.msra.gmra.mxu0 %v52936_v12 }
0x2768   :  { %v41384_v34 = vsub.f32 %v41382_v42, %v41383_v27  ;;  %v41390_v18 = vand.u32 4294901760, %v41389_v48  ;;  %52202 = vmatpush3.msra.mxu0 %v41382_v42  ;;  %52205 = vmatprep.mubr.msk.f32.mxu0 %vm52763_vm1, %v57103_v40 }
0x2769   :  { %52203 = vmatprep.subr.mxu0 %v57103_v40 }
0x276a   :  { %v41391_v29 = vsub.f32 %v41389_v48, %v41390_v18  ;;  %52204 = vmatpush3.msra.mxu0 %v41389_v48  ;;  %v41385_v25 = vand.u32 4294901760, %v41384_v34 }
0x276b   :  { %52215 = vmatprep.subr.mxu0 %v57103_v40  ;;  %52206 = vmatmul.mubr.f32.vlgmr.msra.gmra.mxu0 %v52923_v47 }
0x276c   :  { %52195 = vmatpush3.msra.mxu1 %v41385_v25  ;;  %52216 = vmatpush3.msra.mxu0 %v41383_v27  ;;  %v41392_v17 = vand.u32 4294901760, %v41391_v29 }
0x276d   :  { %52196 = vmatprep.subr.mxu1 %v57103_v40  ;;  %52217 = vmatprep.subr.mxu0 %v57103_v40 }
0x276e   :  { %52197 = vmatpush3.msra.mxu1 %v41392_v17  ;;  %52218 = vmatpush3.msra.mxu0 %v41390_v18 }
0x276f   :  { %52199 = vmatmul.mubr.f32.vlgmr.msra.gmra.mxu1 %v52920_v43  ;;  %52208 = vmatprep.subr.mxu1 %v57103_v40 }
0x2770   :  { %52209 = vmatpush3.msra.mxu1 %v41304_v38  ;;  %52212 = vmatprep.mubr.msk.f32.mxu1 %vm52763_vm1, %v57103_v40 }
0x2771   :  { %52210 = vmatprep.subr.mxu1 %v57103_v40  ;;  %52219 = vmatprep.mubr.msk.f32.mxu0 %vm52763_vm1, %v57103_v40 }
0x2772   :  { %52211 = vmatpush3.msra.mxu1 %v41307_v6  ;;  %52220 = vmatmul.mubr.f32.vlgmr.msra.gmra.mxu0 %v52920_v43 }
0x2773   :  { %52213 = vmatmul.mubr.f32.vlgmr.msra.gmra.mxu1 %v52926_v54  ;;  %52222 = vmatprep.subr.mxu1 %v57103_v40 }
0x2774   :  { %52229 = vmatprep.subr.mxu0 %v57189_v37  ;;  %52223 = vmatpush3.msra.mxu1 %v41304_v38 }
0x2775   :  { %52230 = vmatpush3.msra.mxu0 %v57189_v37  ;;  %52224 = vmatprep.subr.mxu1 %v57103_v40 }
0x2776   :  { %52231 = vmatprep.subr.mxu0 %v57190_v39  ;;  %52225 = vmatpush3.msra.mxu1 %v41307_v6 }
0x2777   :  { %52226 = vmatprep.mubr.msk.f32.mxu1 %vm52763_vm1, %v57103_v40  ;;  %52232 = vmatpush3.msra.mxu0 %v57190_v39 }
0x2778   :  { %52233 = vmatprep.mubr.f32.mxu0 %v56625_v60  ;;  %52227 = vmatmul.mubr.f32.vlgmr.msra.gmra.mxu1 %v52920_v43 }
0x2779   :  { %52234 = vmatmul.mubr.f32.vlgmr.msra.gmra.mxu0 %v56629_v24  ;;  %52236 = vmatprep.subr.mxu1 %v57191_v2 }
0x277a   :  { %52243 = vmatprep.subr.mxu0 %v57192_v41  ;;  %52237 = vmatpush3.msra.mxu1 %v57191_v2 }
0x277b   :  { %52244 = vmatpush3.msra.mxu0 %v57192_v41  ;;  %52238 = vmatprep.subr.mxu1 %v57193_v62 }
0x277c   :  { %52245 = vmatprep.subr.mxu0 %v57194_v1  ;;  %52239 = vmatpush3.msra.mxu1 %v57193_v62 }
0x277d   :  { %52240 = vmatprep.mubr.f32.mxu1 %v56584_v30  ;;  %52246 = vmatpush3.msra.mxu0 %v57194_v1 }
0x277e   :  { %52247 = vmatprep.mubr.f32.mxu0 %v56594_v21  ;;  %52241 = vmatmul.mubr.f32.vlgmr.msra.gmra.mxu1 %v56587_v28 }
0x277f   :  { %52248 = vmatmul.mubr.f32.vlgmr.msra.gmra.mxu0 %v56598_v22  ;;  %52250 = vmatprep.subr.mxu1 %v57189_v37 }
0x2780   :  { %52257 = vmatprep.subr.mxu0 %v57195_v32  ;;  %52251 = vmatpush3.msra.mxu1 %v57189_v37 }
0x2781   :  { %52258 = vmatpush3.msra.mxu0 %v57195_v32  ;;  %52252 = vmatprep.subr.mxu1 %v57190_v39 }
0x2782   :  { %52259 = vmatprep.subr.mxu0 %v57196_v10  ;;  %52253 = vmatpush3.msra.mxu1 %v57190_v39 }
0x2783   :  { %52254 = vmatprep.mubr.f32.mxu1 %v56603_v14  ;;  %52260 = vmatpush3.msra.mxu0 %v57196_v10 }
0x2784   :  { %52261 = vmatprep.mubr.f32.mxu0 %v56584_v30  ;;  %52255 = vmatmul.mubr.f32.vlgmr.msra.gmra.mxu1 %v56608_v46 }
0x2785   :  { %52262 = vmatmul.mubr.f32.vlgmr.msra.gmra.mxu0 %v56587_v28  ;;  %52264 = vmatprep.subr.mxu1 %v57189_v37 }
0x2786   :  { %52265 = vmatpush3.msra.mxu1 %v57189_v37  ;;  %52268 = vmatprep.mubr.f32.mxu1 %v56584_v30 }
0x2787   :  { %52266 = vmatprep.subr.mxu1 %v57190_v39  ;;  %52271 = vmatprep.subr.mxu0 %v57103_v40 }
0x2788   :  { %52267 = vmatpush3.msra.mxu1 %v57190_v39  ;;  %52275 = vmatprep.mubr.msk.f32.mxu0 %vm52763_vm1, %v57103_v40 }
0x2789   :  { %52269 = vmatmul.mubr.f32.vlgmr.msra.gmra.mxu1 %v56587_v28  ;;  %52278 = vmatprep.subr.mxu1 %v57103_v40 }
0x278a   :  { %52282 = vmatprep.mubr.msk.f32.mxu1 %vm52763_vm1, %v57103_v40 }
0x2827   :  { %v41348_v33 = vpop.f32.mrf.mxu0 }
0x2829   :  { %v52193_v5 = vpop.f32.mrf.mxu0 }
0x282b   :  { %v41505_v8 = vpop.f32.mrf.mxu0 }
0x282d   :  { %v52207_v3 = vpop.f32.mrf.mxu0 }
0x282f   :  { %v41429_v38 = vpop.f32.mrf.mxu1 }
0x2830   :  { %v41430_v59 = vadd.f32 %v41429_v38, %v41348_v33 }
0x2831   :  { %v52200_v52 = vpop.f32.mrf.mxu1 }
0x2832   :  { %v41506_v58 = vadd.f32 %v41505_v8, %v41430_v59  ;;  %v41657_v42 = vpop.f32.mrf.mxu0 }
0x2833   :  { %v41580_v6 = vpop.f32.mrf.mxu1 }
0x2834   :  { %v41581_v27 = vadd.f32 %v41580_v6, %v41506_v58  ;;  %v52221_v48 = vpop.f32.mrf.mxu0 }
0x2835   :  { %v52214_v34 = vpop.f32.mrf.mxu1 }
0x2836   :  { %v41658_v18 = vadd.f32 %v41657_v42, %v41581_v27  ;;  %v40765_v27 = vmul.f32 %v56471_v15, %v56471_v15 }
0x2838   :  { %v41730_v29 = vpop.f32.mrf.mxu1 }
0x2839   :  { %v56674_v25 = vadd.f32 %v41730_v29, %v41658_v18  ;;  %v52235_v17 = vpop.f32.mrf.mxu0  ;;  %v40766_v18 = vmul.f32 %v56475_v9, %v56475_v9 }
0x283a   :  { %v52228_v16 = vpop.f32.mrf.mxu1 }
0x283b   :  { %v41813_v36 = vpop.f32.mrf.mxu0  ;;  %v42702_v16 = vsel %vm76_vm0, %v40765_v27, 0 }
0x283e   :  { %v52242_v7 = vpop.f32.mrf.mxu1 }
0x283f   :  { %v41911_v5 = vadd.f32 %v52242_v7, %v52235_v17  ;;  %v52249_v46 = vpop.f32.mrf.mxu0 }
0x2840   :  { %v41904_v3 = vpop.f32.mrf.mxu1 }
0x2841   :  { %v41994_v14 = vadd.f32 %v52249_v46, %v41911_v5  ;;  %v41905_v33 = vadd.f32 %v41904_v3, %v41813_v36  ;;  %v41986_v38 = vpop.f32.mrf.mxu0 }
0x2843   :  { %v41987_v8 = vadd.f32 %v41986_v38, %v41905_v33  ;;  %v56682_v38 = vand.u32 4294901760, %v42702_v16 }
0x2844   :  { %v52256_v59 = vpop.f32.mrf.mxu1 }
0x2845   :  { %v42077_v52 = vadd.f32 %v52256_v59, %v41994_v14  ;;  %v52263_v58 = vpop.f32.mrf.mxu0  ;;  %v42705_v14 = vsel %vm76_vm0, %v40766_v18, 0 }
0x2846   :  { %v42068_v6 = vpop.f32.mrf.mxu1  ;;  %v56685_v15 = vand.u32 4294901760, %v42705_v14 }
0x2847   :  { %v42160_v48 = vadd.f32 %v52263_v58, %v42077_v52  ;;  %v42069_v42 = vadd.f32 %v42068_v6, %v41987_v8  ;;  %v42153_v34 = vpop.f32.mrf.mxu0  ;;  %v56692_v58 = vsub.f32 %v42702_v16, %v56682_v38 }
0x2848   :  { %v56696_v6 = vsub.f32 %v42705_v14, %v56685_v15 }
0x2849   :  { %v42154_v7 = vadd.f32 %v42153_v34, %v42069_v42  ;;  %v52270_v29 = vpop.f32.mrf.mxu1  ;;  %v56701_v34 = vand.u32 4294901760, %v56692_v58 }
0x284a   :  { %v42239_v17 = vadd.f32 %v52270_v29, %v42160_v48  ;;  %v56706_v18 = vand.u32 4294901760, %v56696_v6 }
0x284b   :  { %v42232_v46 = vpop.f32.mrf.mxu1 }
0x284c   :  { %v42271_v36 = vand.u32 4294901760, %v42239_v17  ;;  %v42233_v5 = vadd.f32 %v42232_v46, %v42154_v7  ;;  %57201 = vst [vmem:[#allocation11_spill] sm:$0xff] %v56706_v18  ;;  %v42777_v7 = vsub.f32 %v56692_v58, %v56701_v34  ;;  %v42787_v29 = vsub.f32 %v56696_v6, %v56706_v18 }
0x284e   :  { %v42349_v3 = vsub.f32 %v42239_v17, %v42271_v36  ;;  %v42274_v33 = vand.u32 4294901760, %v42233_v5  ;;  %52272 = vmatpush3.msra.mxu0 %v42271_v36  ;;  %v56723_v17 = vand.u32 4294901760, %v42777_v7  ;;  %v56727_v46 = vand.u32 4294901760, %v42787_v29 }
0x284f   :  { %52273 = vmatprep.subr.mxu0 %v57103_v40 }
0x2850   :  { %v42350_v9 = vand.u32 4294901760, %v42349_v3  ;;  %v42356_v8 = vsub.f32 %v42233_v5, %v42274_v33  ;;  %52274 = vmatpush3.msra.mxu0 %v42274_v33 }
0x2851   :  { %52285 = vmatprep.subr.mxu0 %v57103_v40  ;;  %52276 = vmatmul.mubr.f32.vlgmr.msra.gmra.mxu0 %v52936_v12 }
0x2852   :  { %v42351_v59 = vsub.f32 %v42349_v3, %v42350_v9  ;;  %v42357_v52 = vand.u32 4294901760, %v42356_v8  ;;  %52286 = vmatpush3.msra.mxu0 %v42349_v3  ;;  %52289 = vmatprep.mubr.msk.f32.mxu0 %vm52763_vm1, %v57103_v40 }
0x2853   :  { %52287 = vmatprep.subr.mxu0 %v57103_v40 }
0x2854   :  { %v42358_v48 = vsub.f32 %v42356_v8, %v42357_v52  ;;  %52288 = vmatpush3.msra.mxu0 %v42356_v8  ;;  %v42352_v42 = vand.u32 4294901760, %v42351_v59 }
0x2855   :  { %52299 = vmatprep.subr.mxu0 %v57103_v40  ;;  %52290 = vmatmul.mubr.f32.vlgmr.msra.gmra.mxu0 %v52923_v47 }
0x2856   :  { %52279 = vmatpush3.msra.mxu1 %v42352_v42  ;;  %52300 = vmatpush3.msra.mxu0 %v42350_v9  ;;  %v42359_v27 = vand.u32 4294901760, %v42358_v48 }
0x2857   :  { %52280 = vmatprep.subr.mxu1 %v57103_v40  ;;  %52301 = vmatprep.subr.mxu0 %v57103_v40 }
0x2858   :  { %52281 = vmatpush3.msra.mxu1 %v42359_v27  ;;  %52302 = vmatpush3.msra.mxu0 %v42357_v52 }
0x2859   :  { %52283 = vmatmul.mubr.f32.vlgmr.msra.gmra.mxu1 %v52920_v43  ;;  %52292 = vmatprep.subr.mxu1 %v57103_v40 }
0x285a   :  { %52293 = vmatpush3.msra.mxu1 %v42271_v36  ;;  %52296 = vmatprep.mubr.msk.f32.mxu1 %vm52763_vm1, %v57103_v40 }
0x285b   :  { %52294 = vmatprep.subr.mxu1 %v57103_v40  ;;  %52303 = vmatprep.mubr.msk.f32.mxu0 %vm52763_vm1, %v57103_v40 }
0x285c   :  { %52295 = vmatpush3.msra.mxu1 %v42274_v33  ;;  %52304 = vmatmul.mubr.f32.vlgmr.msra.gmra.mxu0 %v52920_v43 }
0x285d   :  { %52297 = vmatmul.mubr.f32.vlgmr.msra.gmra.mxu1 %v52926_v54  ;;  %52306 = vmatprep.subr.mxu1 %v57103_v40 }
0x285e   :  { %52313 = vmatprep.subr.mxu0 %v57189_v37  ;;  %52307 = vmatpush3.msra.mxu1 %v42271_v36 }
0x285f   :  { %52314 = vmatpush3.msra.mxu0 %v57189_v37  ;;  %52308 = vmatprep.subr.mxu1 %v57103_v40 }
0x2860   :  { %52315 = vmatprep.subr.mxu0 %v57190_v39  ;;  %52309 = vmatpush3.msra.mxu1 %v42274_v33 }
0x2861   :  { %52310 = vmatprep.mubr.msk.f32.mxu1 %vm52763_vm1, %v57103_v40  ;;  %52316 = vmatpush3.msra.mxu0 %v57190_v39 }
0x2862   :  { %52317 = vmatprep.mubr.f32.mxu0 %v56723_v17  ;;  %52311 = vmatmul.mubr.f32.vlgmr.msra.gmra.mxu1 %v52920_v43 }
0x2863   :  { %52318 = vmatmul.mubr.f32.vlgmr.msra.gmra.mxu0 %v56727_v46  ;;  %52320 = vmatprep.subr.mxu1 %v57191_v2 }
0x2864   :  { %52327 = vmatprep.subr.mxu0 %v57192_v41  ;;  %52321 = vmatpush3.msra.mxu1 %v57191_v2 }
0x2865   :  { %52328 = vmatpush3.msra.mxu0 %v57192_v41  ;;  %52322 = vmatprep.subr.mxu1 %v57193_v62 }
0x2866   :  { %52329 = vmatprep.subr.mxu0 %v57194_v1  ;;  %52323 = vmatpush3.msra.mxu1 %v57193_v62 }
0x2867   :  { %52324 = vmatprep.mubr.f32.mxu1 %v56682_v38  ;;  %52330 = vmatpush3.msra.mxu0 %v57194_v1 }
0x2868   :  { %52331 = vmatprep.mubr.f32.mxu0 %v56692_v58  ;;  %52325 = vmatmul.mubr.f32.vlgmr.msra.gmra.mxu1 %v56685_v15 }
0x2869   :  { %52332 = vmatmul.mubr.f32.vlgmr.msra.gmra.mxu0 %v56696_v6  ;;  %52334 = vmatprep.subr.mxu1 %v57189_v37 }
0x286a   :  { %52341 = vmatprep.subr.mxu0 %v57195_v32  ;;  %52335 = vmatpush3.msra.mxu1 %v57189_v37 }
0x286b   :  { %52342 = vmatpush3.msra.mxu0 %v57195_v32  ;;  %52336 = vmatprep.subr.mxu1 %v57190_v39 }
0x286c   :  { %52343 = vmatprep.subr.mxu0 %v57196_v10  ;;  %52337 = vmatpush3.msra.mxu1 %v57190_v39 }
0x286d   :  { %52338 = vmatprep.mubr.f32.mxu1 %v56701_v34  ;;  %52344 = vmatpush3.msra.mxu0 %v57196_v10 }
0x286e   :  { %52345 = vmatprep.mubr.f32.mxu0 %v56682_v38  ;;  %52339 = vmatmul.mubr.f32.vlgmr.msra.gmra.mxu1 %v56706_v18 }
0x286f   :  { %52346 = vmatmul.mubr.f32.vlgmr.msra.gmra.mxu0 %v56685_v15  ;;  %52348 = vmatprep.subr.mxu1 %v57189_v37 }
0x2870   :  { %52349 = vmatpush3.msra.mxu1 %v57189_v37  ;;  %52352 = vmatprep.mubr.f32.mxu1 %v56682_v38 }
0x2871   :  { %52350 = vmatprep.subr.mxu1 %v57190_v39  ;;  %52355 = vmatprep.subr.mxu0 %v57103_v40 }
0x2872   :  { %52351 = vmatpush3.msra.mxu1 %v57190_v39  ;;  %52359 = vmatprep.mubr.msk.f32.mxu0 %vm52763_vm1, %v57103_v40 }
0x2873   :  { %52353 = vmatmul.mubr.f32.vlgmr.msra.gmra.mxu1 %v56685_v15  ;;  %52362 = vmatprep.subr.mxu1 %v57103_v40 }
0x2874   :  { %52366 = vmatprep.mubr.msk.f32.mxu1 %vm52763_vm1, %v57103_v40 }
0x2911   :  { %v42315_v2 = vpop.f32.mrf.mxu0 }
0x2913   :  { %v52277_v37 = vpop.f32.mrf.mxu0 }
0x2915   :  { %v42472_v41 = vpop.f32.mrf.mxu0 }
0x2917   :  { %v52291_v62 = vpop.f32.mrf.mxu0 }
0x2919   :  { %v42396_v1 = vpop.f32.mrf.mxu1 }
0x291a   :  { %v42397_v32 = vadd.f32 %v42396_v1, %v42315_v2 }
0x291b   :  { %v52284_v10 = vpop.f32.mrf.mxu1 }
0x291c   :  { %v42473_v16 = vadd.f32 %v42472_v41, %v42397_v32  ;;  %v42624_v36 = vpop.f32.mrf.mxu0 }
0x291d   :  { %v42547_v39 = vpop.f32.mrf.mxu1 }
0x291e   :  { %v42548_v5 = vadd.f32 %v42547_v39, %v42473_v16  ;;  %v52305_v14 = vpop.f32.mrf.mxu0 }
0x291f   :  { %v52298_v3 = vpop.f32.mrf.mxu1 }
0x2920   :  { %v42625_v33 = vadd.f32 %v42624_v36, %v42548_v5 }
0x2922   :  { %v42697_v9 = vpop.f32.mrf.mxu1 }
0x2923   :  { %v56772_v8 = vadd.f32 %v42697_v9, %v42625_v33  ;;  %v52319_v59 = vpop.f32.mrf.mxu0 }
0x2924   :  { %v52312_v52 = vpop.f32.mrf.mxu1 }
0x2925   :  { %v42780_v48 = vpop.f32.mrf.mxu0 }
0x2928   :  { %v52326_v42 = vpop.f32.mrf.mxu1 }
0x2929   :  { %v42878_v27 = vadd.f32 %v52326_v42, %v52319_v59  ;;  %v52333_v7 = vpop.f32.mrf.mxu0 }
0x292a   :  { %v42871_v29 = vpop.f32.mrf.mxu1 }
0x292b   :  { %v42961_v37 = vadd.f32 %v52333_v7, %v42878_v27  ;;  %v42872_v2 = vadd.f32 %v42871_v29, %v42780_v48  ;;  %v42953_v62 = vpop.f32.mrf.mxu0 }
0x292d   :  { %v42954_v41 = vadd.f32 %v42953_v62, %v42872_v2 }
0x292e   :  { %v52340_v1 = vpop.f32.mrf.mxu1 }
0x292f   :  { %v43044_v32 = vadd.f32 %v52340_v1, %v42961_v37  ;;  %v52347_v10 = vpop.f32.mrf.mxu0 }
0x2930   :  { %v43035_v16 = vpop.f32.mrf.mxu1 }
0x2931   :  { %v43127_v39 = vadd.f32 %v52347_v10, %v43044_v32  ;;  %v43036_v36 = vadd.f32 %v43035_v16, %v42954_v41  ;;  %v43120_v5 = vpop.f32.mrf.mxu0 }
0x2933   :  { %v43121_v14 = vadd.f32 %v43120_v5, %v43036_v36  ;;  %v52354_v3 = vpop.f32.mrf.mxu1 }
0x2934   :  { %v43206_v33 = vadd.f32 %v52354_v3, %v43127_v39 }
0x2935   :  { %v43199_v9 = vpop.f32.mrf.mxu1 }
0x2936   :  { %v43238_v52 = vand.u32 4294901760, %v43206_v33  ;;  %v43200_v18 = vadd.f32 %v43199_v9, %v43121_v14 }
0x2938   :  { %v43316_v59 = vsub.f32 %v43206_v33, %v43238_v52  ;;  %v43241_v42 = vand.u32 4294901760, %v43200_v18  ;;  %52356 = vmatpush3.msra.mxu0 %v43238_v52 }
0x2939   :  { %52357 = vmatprep.subr.mxu0 %v57103_v40 }
0x293a   :  { %v43317_v48 = vand.u32 4294901760, %v43316_v59  ;;  %v43323_v27 = vsub.f32 %v43200_v18, %v43241_v42  ;;  %52358 = vmatpush3.msra.mxu0 %v43241_v42 }
0x293b   :  { %52369 = vmatprep.subr.mxu0 %v57103_v40  ;;  %52360 = vmatmul.mubr.f32.vlgmr.msra.gmra.mxu0 %v52936_v12 }
0x293c   :  { %v43318_v7 = vsub.f32 %v43316_v59, %v43317_v48  ;;  %v43324_v29 = vand.u32 4294901760, %v43323_v27  ;;  %52370 = vmatpush3.msra.mxu0 %v43316_v59  ;;  %52373 = vmatprep.mubr.msk.f32.mxu0 %vm52763_vm1, %v57103_v40 }
0x293d   :  { %52371 = vmatprep.subr.mxu0 %v57103_v40 }
0x293e   :  { %v43325_v37 = vsub.f32 %v43323_v27, %v43324_v29  ;;  %52372 = vmatpush3.msra.mxu0 %v43323_v27  ;;  %v43319_v2 = vand.u32 4294901760, %v43318_v7 }
0x293f   :  { %52383 = vmatprep.subr.mxu0 %v57103_v40  ;;  %52374 = vmatmul.mubr.f32.vlgmr.msra.gmra.mxu0 %v52923_v47 }
0x2940   :  { %52363 = vmatpush3.msra.mxu1 %v43319_v2  ;;  %52384 = vmatpush3.msra.mxu0 %v43317_v48  ;;  %v43326_v18 = vand.u32 4294901760, %v43325_v37 }
0x2941   :  { %52364 = vmatprep.subr.mxu1 %v57103_v40  ;;  %52385 = vmatprep.subr.mxu0 %v57103_v40 }
0x2942   :  { %52365 = vmatpush3.msra.mxu1 %v43326_v18  ;;  %52386 = vmatpush3.msra.mxu0 %v43324_v29 }
0x2943   :  { %52367 = vmatmul.mubr.f32.vlgmr.msra.gmra.mxu1 %v52920_v43  ;;  %52376 = vmatprep.subr.mxu1 %v57103_v40 }
0x2944   :  { %52377 = vmatpush3.msra.mxu1 %v43238_v52  ;;  %52380 = vmatprep.mubr.msk.f32.mxu1 %vm52763_vm1, %v57103_v40 }
0x2945   :  { %52378 = vmatprep.subr.mxu1 %v57103_v40  ;;  %52387 = vmatprep.mubr.msk.f32.mxu0 %vm52763_vm1, %v57103_v40 }
0x2946   :  { %52379 = vmatpush3.msra.mxu1 %v43241_v42  ;;  %52388 = vmatmul.mubr.f32.vlgmr.msra.gmra.mxu0 %v52920_v43 }
0x2947   :  { %52381 = vmatmul.mubr.f32.vlgmr.msra.gmra.mxu1 %v52926_v54  ;;  %52390 = vmatprep.subr.mxu1 %v57103_v40 }
0x2948   :  { %52397 = vmatprep.subr.mxu0 %v53134_v4  ;;  %52391 = vmatpush3.msra.mxu1 %v43238_v52 }
0x2949   :  { %52398 = vmatpush3.msra.mxu0 %v53134_v4  ;;  %52392 = vmatprep.subr.mxu1 %v57103_v40 }
0x294a   :  { %52399 = vmatprep.subr.mxu0 %v53137_v11  ;;  %52393 = vmatpush3.msra.mxu1 %v43241_v42 }
0x294b   :  { %52394 = vmatprep.mubr.msk.f32.mxu1 %vm52763_vm1, %v57103_v40  ;;  %52400 = vmatpush3.msra.mxu0 %v53137_v11 }
0x294c   :  { %52401 = vmatprep.mubr.f32.mxu0 %v56524_v26  ;;  %52395 = vmatmul.mubr.f32.vlgmr.msra.gmra.mxu1 %v52920_v43 }
0x294d   :  { %52402 = vmatmul.mubr.f32.vlgmr.msra.gmra.mxu0 %v56528_v56  ;;  %52404 = vmatprep.subr.mxu1 %v53177_v53 }
0x294e   :  { %52411 = vmatprep.subr.mxu0 %v53145_v23  ;;  %52405 = vmatpush3.msra.mxu1 %v53177_v53 }
0x294f   :  { %52412 = vmatpush3.msra.mxu0 %v53145_v23  ;;  %52406 = vmatprep.subr.mxu1 %v53183_v55 }
0x2950   :  { %52413 = vmatprep.subr.mxu0 %v53150_v44  ;;  %52407 = vmatpush3.msra.mxu1 %v53183_v55 }
0x2951   :  { %52408 = vmatprep.mubr.f32.mxu1 %v56483_v13  ;;  %52414 = vmatpush3.msra.mxu0 %v53150_v44 }
0x2952   :  { %52415 = vmatprep.mubr.f32.mxu0 %v56493_v63  ;;  %52409 = vmatmul.mubr.f32.vlgmr.msra.gmra.mxu1 %v56486_v31 }
0x2953   :  { %52416 = vmatmul.mubr.f32.vlgmr.msra.gmra.mxu0 %v56497_v0  ;;  %52418 = vmatprep.subr.mxu1 %v53134_v4 }
0x2954   :  { %52425 = vmatprep.subr.mxu0 %v53155_v49  ;;  %52419 = vmatpush3.msra.mxu1 %v53134_v4 }
0x2955   :  { %52426 = vmatpush3.msra.mxu0 %v53155_v49  ;;  %52420 = vmatprep.subr.mxu1 %v53137_v11 }
0x2956   :  { %52427 = vmatprep.subr.mxu0 %v53160_v50  ;;  %52421 = vmatpush3.msra.mxu1 %v53137_v11 }
0x2957   :  { %52422 = vmatprep.mubr.f32.mxu1 %v56502_v19  ;;  %52428 = vmatpush3.msra.mxu0 %v53160_v50 }
0x2958   :  { %52429 = vmatprep.mubr.f32.mxu0 %v56483_v13  ;;  %52423 = vmatmul.mubr.f32.vlgmr.msra.gmra.mxu1 %v56507_v57 }
0x2959   :  { %52430 = vmatmul.mubr.f32.vlgmr.msra.gmra.mxu0 %v56486_v31  ;;  %52432 = vmatprep.subr.mxu1 %v53134_v4 }
0x295a   :  { %52433 = vmatpush3.msra.mxu1 %v53134_v4  ;;  %52436 = vmatprep.mubr.f32.mxu1 %v56483_v13 }
0x295b   :  { %52434 = vmatprep.subr.mxu1 %v53137_v11  ;;  %52439 = vmatprep.subr.mxu0 %v57103_v40 }
0x295c   :  { %52435 = vmatpush3.msra.mxu1 %v53137_v11  ;;  %52443 = vmatprep.mubr.msk.f32.mxu0 %vm52763_vm1, %v57103_v40 }
0x295d   :  { %52437 = vmatmul.mubr.f32.vlgmr.msra.gmra.mxu1 %v56486_v31  ;;  %52446 = vmatprep.subr.mxu1 %v57103_v40 }
0x295e   :  { %52450 = vmatprep.mubr.msk.f32.mxu1 %vm52763_vm1, %v57103_v40 }
0x29fb   :  { %v43282_v43 = vpop.f32.mrf.mxu0 }
0x29fd   :  { %v52361_v47 = vpop.f32.mrf.mxu0 }
0x29ff   :  { %v43439_v54 = vpop.f32.mrf.mxu0 }
0x2a01   :  { %v52375_v12 = vpop.f32.mrf.mxu0 }
0x2a03   :  { %v43363_v13 = vpop.f32.mrf.mxu1 }
0x2a04   :  { %v43364_v63 = vadd.f32 %v43363_v13, %v43282_v43 }
0x2a05   :  { %v52368_v0 = vpop.f32.mrf.mxu1 }
0x2a06   :  { %v43440_v19 = vadd.f32 %v43439_v54, %v43364_v63  ;;  %v43591_v57 = vpop.f32.mrf.mxu0 }
0x2a07   :  { %v43514_v26 = vpop.f32.mrf.mxu1 }
0x2a08   :  { %v43515_v56 = vadd.f32 %v43514_v26, %v43440_v19  ;;  %v52389_v62 = vpop.f32.mrf.mxu0 }
0x2a09   :  { %v52382_v41 = vpop.f32.mrf.mxu1 }
0x2a0a   :  { %v43592_v1 = vadd.f32 %v43591_v57, %v43515_v56 }
0x2a0c   :  { %v43664_v31 = vpop.f32.mrf.mxu1 }
0x2a0d   :  { %v43665_v32 = vadd.f32 %v43664_v31, %v43592_v1  ;;  %v52403_v10 = vpop.f32.mrf.mxu0 }
0x2a0e   :  { %v52396_v16 = vpop.f32.mrf.mxu1 }
0x2a0f   :  { %v43668_v39 = vmul.f32 %v43665_v32, %v56772_v8  ;;  %v43745_v36 = vpop.f32.mrf.mxu0 }
0x2a11   :  { %52688 = vrsqrt.f32 %v43668_v39 }
0x2a12   :  { %v52410_v5 = vpop.f32.mrf.mxu1 }
0x2a13   :  { %v43843_v14 = vadd.f32 %v52410_v5, %v52403_v10  ;;  %v52417_v3 = vpop.f32.mrf.mxu0 }
0x2a14   :  { %v43836_v33 = vpop.f32.mrf.mxu1 }
0x2a15   :  { %v43926_v9 = vadd.f32 %v52417_v3, %v43843_v14  ;;  %v43837_v52 = vadd.f32 %v43836_v33, %v43745_v36  ;;  %v43918_v59 = vpop.f32.mrf.mxu0 }
0x2a17   :  { %v43919_v42 = vadd.f32 %v43918_v59, %v43837_v52 }
0x2a18   :  { %v52424_v48 = vpop.f32.mrf.mxu1 }
0x2a19   :  { %v44009_v27 = vadd.f32 %v52424_v48, %v43926_v9  ;;  %v52431_v7 = vpop.f32.mrf.mxu0 }
0x2a1a   :  { %v44000_v29 = vpop.f32.mrf.mxu1 }
0x2a1b   :  { %v44092_v37 = vadd.f32 %v52431_v7, %v44009_v27  ;;  %v44001_v2 = vadd.f32 %v44000_v29, %v43919_v42  ;;  %v44085_v18 = vpop.f32.mrf.mxu0 }
0x2a1d   :  { %v44086_v43 = vadd.f32 %v44085_v18, %v44001_v2  ;;  %v52438_v47 = vpop.f32.mrf.mxu1 }
0x2a1e   :  { %v52689_v8 = vpop.eup %52688  ;;  %v44171_v54 = vadd.f32 %v52438_v47, %v44092_v37 }
0x2a1f   :  { %v44164_v12 = vpop.f32.mrf.mxu1  ;;  %v43670_v13 = vmul.f32 %v52689_v8, %v56674_v25 }
0x2a20   :  { %v44203_v63 = vand.u32 4294901760, %v44171_v54  ;;  %v44165_v0 = vadd.f32 %v44164_v12, %v44086_v43 }
0x2a21   :  { %v43671_v19 = vadd.f32 %v43670_v13, %v56331_v20 }
0x2a22   :  { %v44281_v57 = vsub.f32 %v44171_v54, %v44203_v63  ;;  %v44206_v26 = vand.u32 4294901760, %v44165_v0  ;;  %52440 = vmatpush3.msra.mxu0 %v44203_v63 }
0x2a23   :  { %52441 = vmatprep.subr.mxu0 %v57103_v40  ;;  %v46560_v56 = vsel %vm46559_vm2, %v43671_v19, 0.0 }
0x2a24   :  { %v44282_v62 = vand.u32 4294901760, %v44281_v57  ;;  %v44288_v41 = vsub.f32 %v44165_v0, %v44206_v26  ;;  %52442 = vmatpush3.msra.mxu0 %v44206_v26  ;;  %46561 = vadd.xlane.f32.xlu0 %v46560_v56 }
0x2a25   :  { %52453 = vmatprep.subr.mxu0 %v57103_v40  ;;  %52444 = vmatmul.mubr.f32.vlgmr.msra.gmra.mxu0 %v53241_v51 }
0x2a26   :  { %v44283_v25 = vsub.f32 %v44281_v57, %v44282_v62  ;;  %v44289_v1 = vand.u32 4294901760, %v44288_v41  ;;  %52454 = vmatpush3.msra.mxu0 %v44281_v57  ;;  %52457 = vmatprep.mubr.msk.f32.mxu0 %vm52763_vm1, %v57103_v40 }
0x2a27   :  { %52455 = vmatprep.subr.mxu0 %v57103_v40 }
0x2a28   :  { %v44290_v20 = vsub.f32 %v44288_v41, %v44289_v1  ;;  %52456 = vmatpush3.msra.mxu0 %v44288_v41  ;;  %v44284_v31 = vand.u32 4294901760, %v44283_v25 }
0x2a29   :  { %52467 = vmatprep.subr.mxu0 %v57103_v40  ;;  %52458 = vmatmul.mubr.f32.vlgmr.msra.gmra.mxu0 %v53234_v35 }
0x2a2a   :  { %52447 = vmatpush3.msra.mxu1 %v44284_v31  ;;  %52468 = vmatpush3.msra.mxu0 %v44282_v62  ;;  %v44291_v32 = vand.u32 4294901760, %v44290_v20 }
0x2a2b   :  { %52448 = vmatprep.subr.mxu1 %v57103_v40  ;;  %52469 = vmatprep.subr.mxu0 %v57103_v40 }
0x2a2c   :  { %52449 = vmatpush3.msra.mxu1 %v44291_v32  ;;  %52470 = vmatpush3.msra.mxu0 %v44289_v1 }
0x2a2d   :  { %52451 = vmatmul.mubr.f32.vlgmr.msra.gmra.mxu1 %v53231_v45  ;;  %52460 = vmatprep.subr.mxu1 %v57103_v40 }
0x2a2e   :  { %52461 = vmatpush3.msra.mxu1 %v44203_v63  ;;  %52464 = vmatprep.mubr.msk.f32.mxu1 %vm52763_vm1, %v57103_v40 }
0x2a2f   :  { %52462 = vmatprep.subr.mxu1 %v57103_v40  ;;  %52471 = vmatprep.mubr.msk.f32.mxu0 %vm52763_vm1, %v57103_v40 }
0x2a30   :  { %52463 = vmatpush3.msra.mxu1 %v44206_v26  ;;  %52472 = vmatmul.mubr.f32.vlgmr.msra.gmra.mxu0 %v53231_v45 }
0x2a31   :  { %52465 = vmatmul.mubr.f32.vlgmr.msra.gmra.mxu1 %v53237_v61  ;;  %52474 = vmatprep.subr.mxu1 %v57103_v40 }
0x2a32   :  { %52481 = vmatprep.subr.mxu0 %v53134_v4  ;;  %52475 = vmatpush3.msra.mxu1 %v44203_v63 }
0x2a33   :  { %52482 = vmatpush3.msra.mxu0 %v53134_v4  ;;  %52476 = vmatprep.subr.mxu1 %v57103_v40 }
0x2a34   :  { %52483 = vmatprep.subr.mxu0 %v53137_v11  ;;  %52477 = vmatpush3.msra.mxu1 %v44206_v26 }
0x2a35   :  { %52478 = vmatprep.mubr.msk.f32.mxu1 %vm52763_vm1, %v57103_v40  ;;  %52484 = vmatpush3.msra.mxu0 %v53137_v11 }
0x2a36   :  { %52485 = vmatprep.mubr.f32.mxu0 %v56625_v60  ;;  %52479 = vmatmul.mubr.f32.vlgmr.msra.gmra.mxu1 %v53231_v45  ;;  %v57202_v60 = vld [vmem:[#allocation22_spill] sm:$0xff] }
0x2a37   :  { %52486 = vmatmul.mubr.f32.vlgmr.msra.gmra.mxu0 %v56629_v24  ;;  %52488 = vmatprep.subr.mxu1 %v53177_v53 }
0x2a38   :  { %52495 = vmatprep.subr.mxu0 %v53145_v23  ;;  %52489 = vmatpush3.msra.mxu1 %v53177_v53 }
0x2a39   :  { %52496 = vmatpush3.msra.mxu0 %v53145_v23  ;;  %52490 = vmatprep.subr.mxu1 %v53183_v55 }
0x2a3a   :  { %52497 = vmatprep.subr.mxu0 %v53150_v44  ;;  %52491 = vmatpush3.msra.mxu1 %v53183_v55 }
0x2a3b   :  { %52492 = vmatprep.mubr.f32.mxu1 %v56584_v30  ;;  %52498 = vmatpush3.msra.mxu0 %v53150_v44 }
0x2a3c   :  { %52499 = vmatprep.mubr.f32.mxu0 %v56594_v21  ;;  %52493 = vmatmul.mubr.f32.vlgmr.msra.gmra.mxu1 %v56587_v28  ;;  %v57203_v21 = vld [vmem:[#allocation21_spill] sm:$0xff] }
0x2a3d   :  { %52500 = vmatmul.mubr.f32.vlgmr.msra.gmra.mxu0 %v56598_v22  ;;  %52502 = vmatprep.subr.mxu1 %v53134_v4 }
0x2a3e   :  { %52509 = vmatprep.subr.mxu0 %v53155_v49  ;;  %52503 = vmatpush3.msra.mxu1 %v53134_v4 }
0x2a3f   :  { %52510 = vmatpush3.msra.mxu0 %v53155_v49  ;;  %52504 = vmatprep.subr.mxu1 %v53137_v11 }
0x2a40   :  { %52511 = vmatprep.subr.mxu0 %v53160_v50  ;;  %52505 = vmatpush3.msra.mxu1 %v53137_v11 }
0x2a41   :  { %52506 = vmatprep.mubr.f32.mxu1 %v57202_v60  ;;  %52512 = vmatpush3.msra.mxu0 %v53160_v50 }
0x2a42   :  { %52513 = vmatprep.mubr.f32.mxu0 %v56584_v30  ;;  %52507 = vmatmul.mubr.f32.vlgmr.msra.gmra.mxu1 %v57203_v21 }
0x2a43   :  { %52514 = vmatmul.mubr.f32.vlgmr.msra.gmra.mxu0 %v56587_v28  ;;  %52516 = vmatprep.subr.mxu1 %v53134_v4 }
0x2a44   :  { %52517 = vmatpush3.msra.mxu1 %v53134_v4  ;;  %52520 = vmatprep.mubr.f32.mxu1 %v56584_v30 }
0x2a45   :  { %52518 = vmatprep.subr.mxu1 %v53137_v11  ;;  %52523 = vmatprep.subr.mxu0 %v57103_v40 }
0x2a46   :  { %52519 = vmatpush3.msra.mxu1 %v53137_v11  ;;  %52527 = vmatprep.mubr.msk.f32.mxu0 %vm52763_vm1, %v57103_v40 }
0x2a47   :  { %52521 = vmatmul.mubr.f32.vlgmr.msra.gmra.mxu1 %v56587_v28  ;;  %52530 = vmatprep.subr.mxu1 %v57103_v40 }
0x2a48   :  { %52534 = vmatprep.mubr.msk.f32.mxu1 %vm52763_vm1, %v57103_v40 }
0x2aad   :  { %v46562_v22 = vpop.xlane.xlu0 %46561 }
0x2aae   :  { %v46563_v24 = vrot.slane %v46562_v22, 4 }
0x2ab0   :  { %v46564_v10 = vadd.f32 %v46563_v24, %v46562_v22 }
0x2ab2   :  { %v46565_v30 = vrot.slane %v46564_v10, 2 }
0x2ab4   :  { %v46566_v16 = vadd.f32 %v46565_v30, %v46564_v10 }
0x2ab6   :  { %v46567_v39 = vrot.slane %v46566_v16, 1 }
0x2ab8   :  { %v46568_v36 = vadd.f32 %v46567_v39, %v46566_v16 }
0x2aba   :  { %52649 = vpush %v46568_v36 }
0x2ae5   :  { %v44247_v5 = vpop.f32.mrf.mxu0 }
0x2ae7   :  { %v52445_v14 = vpop.f32.mrf.mxu0 }
0x2ae9   :  { %v44404_v3 = vpop.f32.mrf.mxu0 }
0x2aeb   :  { %v52459_v33 = vpop.f32.mrf.mxu0  ;;  %s52650_s4 = spop %52649 }
0x2aec   :  { %v46570_v9 = vstv %s52650_s4 }
0x2aed   :  { %v44328_v28 = vpop.f32.mrf.mxu1  ;;  %46571 = vst [vmem:[#allocation7] sm:$0x1] %v46570_v9 }
0x2aee   :  { %v44329_v52 = vadd.f32 %v44328_v28, %v44247_v5 }
0x2aef   :  { %v52452_v59 = vpop.f32.mrf.mxu1 }
0x2af0   :  { %v44405_v42 = vadd.f32 %v44404_v3, %v44329_v52  ;;  %v44556_v48 = vpop.f32.mrf.mxu0 }
0x2af1   :  { %v44479_v27 = vpop.f32.mrf.mxu1 }
0x2af2   :  { %v44480_v7 = vadd.f32 %v44479_v27, %v44405_v42  ;;  %v52473_v29 = vpop.f32.mrf.mxu0 }
0x2af3   :  { %v52466_v37 = vpop.f32.mrf.mxu1 }
0x2af4   :  { %v44557_v2 = vadd.f32 %v44556_v48, %v44480_v7 }
0x2af6   :  { %v44629_v18 = vpop.f32.mrf.mxu1 }
0x2af7   :  { %v56909_v43 = vadd.f32 %v44629_v18, %v44557_v2  ;;  %v52487_v47 = vpop.f32.mrf.mxu0 }
0x2af8   :  { %v52480_v8 = vpop.f32.mrf.mxu1 }
0x2af9   :  { %v44706_v54 = vpop.f32.mrf.mxu0 }
0x2afc   :  { %v52494_v12 = vpop.f32.mrf.mxu1 }
0x2afd   :  { %v44804_v13 = vadd.f32 %v52494_v12, %v52487_v47  ;;  %v52501_v63 = vpop.f32.mrf.mxu0 }
0x2afe   :  { %v44797_v0 = vpop.f32.mrf.mxu1 }
0x2aff   :  { %v44887_v19 = vadd.f32 %v52501_v63, %v44804_v13  ;;  %v44798_v57 = vadd.f32 %v44797_v0, %v44706_v54  ;;  %v44879_v26 = vpop.f32.mrf.mxu0 }
0x2b01   :  { %v44880_v56 = vadd.f32 %v44879_v26, %v44798_v57 }
0x2b02   :  { %v52508_v62 = vpop.f32.mrf.mxu1 }
0x2b03   :  { %v44970_v41 = vadd.f32 %v52508_v62, %v44887_v19  ;;  %v52515_v25 = vpop.f32.mrf.mxu0 }
0x2b04   :  { %v44961_v1 = vpop.f32.mrf.mxu1 }
0x2b05   :  { %v45053_v20 = vadd.f32 %v52515_v25, %v44970_v41  ;;  %v44962_v31 = vadd.f32 %v44961_v1, %v44880_v56  ;;  %v45046_v32 = vpop.f32.mrf.mxu0 }
0x2b07   :  { %v45047_v60 = vadd.f32 %v45046_v32, %v44962_v31  ;;  %v52522_v21 = vpop.f32.mrf.mxu1 }
0x2b08   :  { %v45132_v22 = vadd.f32 %v52522_v21, %v45053_v20 }
0x2b09   :  { %v45125_v24 = vpop.f32.mrf.mxu1 }
0x2b0a   :  { %v45164_v10 = vand.u32 4294901760, %v45132_v22  ;;  %v45126_v30 = vadd.f32 %v45125_v24, %v45047_v60 }
0x2b0c   :  { %v45242_v16 = vsub.f32 %v45132_v22, %v45164_v10  ;;  %v45167_v39 = vand.u32 4294901760, %v45126_v30  ;;  %52524 = vmatpush3.msra.mxu0 %v45164_v10 }
0x2b0d   :  { %52525 = vmatprep.subr.mxu0 %v57103_v40 }
0x2b0e   :  { %v45243_v36 = vand.u32 4294901760, %v45242_v16  ;;  %v45249_v5 = vsub.f32 %v45126_v30, %v45167_v39  ;;  %52526 = vmatpush3.msra.mxu0 %v45167_v39 }
0x2b0f   :  { %52537 = vmatprep.subr.mxu0 %v57103_v40  ;;  %52528 = vmatmul.mubr.f32.vlgmr.msra.gmra.mxu0 %v53241_v51 }
0x2b10   :  { %v45244_v14 = vsub.f32 %v45242_v16, %v45243_v36  ;;  %v45250_v3 = vand.u32 4294901760, %v45249_v5  ;;  %52538 = vmatpush3.msra.mxu0 %v45242_v16  ;;  %52541 = vmatprep.mubr.msk.f32.mxu0 %vm52763_vm1, %v57103_v40 }
0x2b11   :  { %52539 = vmatprep.subr.mxu0 %v57103_v40 }
0x2b12   :  { %v45251_v33 = vsub.f32 %v45249_v5, %v45250_v3  ;;  %52540 = vmatpush3.msra.mxu0 %v45249_v5  ;;  %v45245_v9 = vand.u32 4294901760, %v45244_v14 }
0x2b13   :  { %52551 = vmatprep.subr.mxu0 %v57103_v40  ;;  %52542 = vmatmul.mubr.f32.vlgmr.msra.gmra.mxu0 %v53234_v35 }
0x2b14   :  { %52531 = vmatpush3.msra.mxu1 %v45245_v9  ;;  %52552 = vmatpush3.msra.mxu0 %v45243_v36  ;;  %v45252_v28 = vand.u32 4294901760, %v45251_v33 }
0x2b15   :  { %52532 = vmatprep.subr.mxu1 %v57103_v40  ;;  %52553 = vmatprep.subr.mxu0 %v57103_v40 }
0x2b16   :  { %52533 = vmatpush3.msra.mxu1 %v45252_v28  ;;  %52554 = vmatpush3.msra.mxu0 %v45250_v3 }
0x2b17   :  { %52535 = vmatmul.mubr.f32.vlgmr.msra.gmra.mxu1 %v53231_v45  ;;  %52544 = vmatprep.subr.mxu1 %v57103_v40 }
0x2b18   :  { %52545 = vmatpush3.msra.mxu1 %v45164_v10  ;;  %52548 = vmatprep.mubr.msk.f32.mxu1 %vm52763_vm1, %v57103_v40 }
0x2b19   :  { %52546 = vmatprep.subr.mxu1 %v57103_v40  ;;  %52555 = vmatprep.mubr.msk.f32.mxu0 %vm52763_vm1, %v57103_v40 }
0x2b1a   :  { %52547 = vmatpush3.msra.mxu1 %v45167_v39  ;;  %52556 = vmatmul.mubr.f32.vlgmr.msra.gmra.mxu0 %v53231_v45 }
0x2b1b   :  { %52549 = vmatmul.mubr.f32.vlgmr.msra.gmra.mxu1 %v53237_v61  ;;  %52558 = vmatprep.subr.mxu1 %v57103_v40 }
0x2b1c   :  { %52565 = vmatprep.subr.mxu0 %v53134_v4  ;;  %52559 = vmatpush3.msra.mxu1 %v45164_v10 }
0x2b1d   :  { %52566 = vmatpush3.msra.mxu0 %v53134_v4  ;;  %52560 = vmatprep.subr.mxu1 %v57103_v40 }
0x2b1e   :  { %52567 = vmatprep.subr.mxu0 %v53137_v11  ;;  %52561 = vmatpush3.msra.mxu1 %v45167_v39 }
0x2b1f   :  { %52562 = vmatprep.mubr.msk.f32.mxu1 %vm52763_vm1, %v57103_v40  ;;  %52568 = vmatpush3.msra.mxu0 %v53137_v11 }
0x2b20   :  { %52569 = vmatprep.mubr.f32.mxu0 %v56723_v17  ;;  %52563 = vmatmul.mubr.f32.vlgmr.msra.gmra.mxu1 %v53231_v45 }
0x2b21   :  { %52570 = vmatmul.mubr.f32.vlgmr.msra.gmra.mxu0 %v56727_v46  ;;  %52572 = vmatprep.subr.mxu1 %v53177_v53 }
0x2b22   :  { %52579 = vmatprep.subr.mxu0 %v53145_v23  ;;  %52573 = vmatpush3.msra.mxu1 %v53177_v53 }
0x2b23   :  { %52580 = vmatpush3.msra.mxu0 %v53145_v23  ;;  %52574 = vmatprep.subr.mxu1 %v53183_v55  ;;  %v57204_v23 = vld [vmem:[#allocation11_spill] sm:$0xff] }
0x2b24   :  { %52581 = vmatprep.subr.mxu0 %v53150_v44  ;;  %52575 = vmatpush3.msra.mxu1 %v53183_v55 }
0x2b25   :  { %52576 = vmatprep.mubr.f32.mxu1 %v56682_v38  ;;  %52582 = vmatpush3.msra.mxu0 %v53150_v44 }
0x2b26   :  { %52583 = vmatprep.mubr.f32.mxu0 %v56692_v58  ;;  %52577 = vmatmul.mubr.f32.vlgmr.msra.gmra.mxu1 %v56685_v15 }
0x2b27   :  { %52584 = vmatmul.mubr.f32.vlgmr.msra.gmra.mxu0 %v56696_v6  ;;  %52586 = vmatprep.subr.mxu1 %v53134_v4 }
0x2b28   :  { %52593 = vmatprep.subr.mxu0 %v53155_v49  ;;  %52587 = vmatpush3.msra.mxu1 %v53134_v4 }
0x2b29   :  { %52594 = vmatpush3.msra.mxu0 %v53155_v49  ;;  %52588 = vmatprep.subr.mxu1 %v53137_v11 }
0x2b2a   :  { %52595 = vmatprep.subr.mxu0 %v53160_v50  ;;  %52589 = vmatpush3.msra.mxu1 %v53137_v11 }
0x2b2b   :  { %52590 = vmatprep.mubr.f32.mxu1 %v56701_v34  ;;  %52596 = vmatpush3.msra.mxu0 %v53160_v50 }
0x2b2c   :  { %52597 = vmatprep.mubr.f32.mxu0 %v56682_v38  ;;  %52591 = vmatmul.mubr.f32.vlgmr.msra.gmra.mxu1 %v57204_v23 }
0x2b2d   :  { %52598 = vmatmul.mubr.f32.vlgmr.msra.gmra.mxu0 %v56685_v15  ;;  %52600 = vmatprep.subr.mxu1 %v53134_v4 }
0x2b2e   :  { %52601 = vmatpush3.msra.mxu1 %v53134_v4  ;;  %52604 = vmatprep.mubr.f32.mxu1 %v56682_v38 }
0x2b2f   :  { %52602 = vmatprep.subr.mxu1 %v53137_v11  ;;  %52607 = vmatprep.subr.mxu0 %v57103_v40 }
0x2b30   :  { %52603 = vmatpush3.msra.mxu1 %v53137_v11  ;;  %52611 = vmatprep.mubr.msk.f32.mxu0 %vm52763_vm1, %v57103_v40 }
0x2b31   :  { %52605 = vmatmul.mubr.f32.vlgmr.msra.gmra.mxu1 %v56685_v15  ;;  %52614 = vmatprep.subr.mxu1 %v57103_v40 }
0x2b32   :  { %52618 = vmatprep.mubr.msk.f32.mxu1 %vm52763_vm1, %v57103_v40 }
0x2bcf   :  { %v45208_v44 = vpop.f32.mrf.mxu0 }
0x2bd1   :  { %v52529_v4 = vpop.f32.mrf.mxu0 }
0x2bd3   :  { %v45365_v49 = vpop.f32.mrf.mxu0 }
0x2bd5   :  { %v52543_v50 = vpop.f32.mrf.mxu0 }
0x2bd7   :  { %v45289_v53 = vpop.f32.mrf.mxu1 }
0x2bd8   :  { %v45290_v55 = vadd.f32 %v45289_v53, %v45208_v44 }
0x2bd9   :  { %v52536_v38 = vpop.f32.mrf.mxu1 }
0x2bda   :  { %v45366_v58 = vadd.f32 %v45365_v49, %v45290_v55  ;;  %v45517_v6 = vpop.f32.mrf.mxu0  ;;  %v57205_v38 = vld [vmem:[#allocation20_spill] sm:$0xff] }
0x2bdb   :  { %v45440_v11 = vpop.f32.mrf.mxu1 }
0x2bdc   :  { %v45441_v34 = vadd.f32 %v45440_v11, %v45366_v58  ;;  %v52557_v17 = vpop.f32.mrf.mxu0 }
0x2bdd   :  { %v52550_v46 = vpop.f32.mrf.mxu1 }
0x2bde   :  { %v45518_v52 = vadd.f32 %v45517_v6, %v45441_v34 }
0x2be0   :  { %v45590_v15 = vpop.f32.mrf.mxu1 }
0x2be1   :  { %v56977_v59 = vadd.f32 %v45590_v15, %v45518_v52  ;;  %v52571_v42 = vpop.f32.mrf.mxu0 }
0x2be2   :  { %v52564_v48 = vpop.f32.mrf.mxu1 }
0x2be3   :  { %v45667_v27 = vpop.f32.mrf.mxu0 }
0x2be6   :  { %v52578_v7 = vpop.f32.mrf.mxu1 }
0x2be7   :  { %v45765_v29 = vadd.f32 %v52578_v7, %v52571_v42  ;;  %v52585_v37 = vpop.f32.mrf.mxu0 }
0x2be8   :  { %v45758_v2 = vpop.f32.mrf.mxu1 }
0x2be9   :  { %v45848_v18 = vadd.f32 %v52585_v37, %v45765_v29  ;;  %v45759_v47 = vadd.f32 %v45758_v2, %v45667_v27  ;;  %v45840_v8 = vpop.f32.mrf.mxu0 }
0x2beb   :  { %v45841_v54 = vadd.f32 %v45840_v8, %v45759_v47 }
0x2bec   :  { %v52592_v12 = vpop.f32.mrf.mxu1 }
0x2bed   :  { %v45931_v13 = vadd.f32 %v52592_v12, %v45848_v18  ;;  %v52599_v63 = vpop.f32.mrf.mxu0 }
0x2bee   :  { %v45922_v0 = vpop.f32.mrf.mxu1 }
0x2bef   :  { %v46014_v19 = vadd.f32 %v52599_v63, %v45931_v13  ;;  %v45923_v57 = vadd.f32 %v45922_v0, %v45841_v54  ;;  %v46007_v26 = vpop.f32.mrf.mxu0 }
0x2bf1   :  { %v46008_v56 = vadd.f32 %v46007_v26, %v45923_v57  ;;  %v52606_v62 = vpop.f32.mrf.mxu1 }
0x2bf2   :  { %v46093_v41 = vadd.f32 %v52606_v62, %v46014_v19 }
0x2bf3   :  { %v46086_v25 = vpop.f32.mrf.mxu1 }
0x2bf4   :  { %v46125_v1 = vand.u32 4294901760, %v46093_v41  ;;  %v46087_v20 = vadd.f32 %v46086_v25, %v46008_v56 }
0x2bf6   :  { %v46203_v31 = vsub.f32 %v46093_v41, %v46125_v1  ;;  %v46128_v32 = vand.u32 4294901760, %v46087_v20  ;;  %52608 = vmatpush3.msra.mxu0 %v46125_v1 }
0x2bf7   :  { %52609 = vmatprep.subr.mxu0 %v57103_v40 }
0x2bf8   :  { %v46204_v60 = vand.u32 4294901760, %v46203_v31  ;;  %v46210_v21 = vsub.f32 %v46087_v20, %v46128_v32  ;;  %52610 = vmatpush3.msra.mxu0 %v46128_v32 }
0x2bf9   :  { %52621 = vmatprep.subr.mxu0 %v57103_v40  ;;  %52612 = vmatmul.mubr.f32.vlgmr.msra.gmra.mxu0 %v53241_v51 }
0x2bfa   :  { %v46205_v22 = vsub.f32 %v46203_v31, %v46204_v60  ;;  %v46211_v24 = vand.u32 4294901760, %v46210_v21  ;;  %52622 = vmatpush3.msra.mxu0 %v46203_v31  ;;  %52625 = vmatprep.mubr.msk.f32.mxu0 %vm52763_vm1, %v57103_v40 }
0x2bfb   :  { %52623 = vmatprep.subr.mxu0 %v57103_v40 }
0x2bfc   :  { %v46212_v10 = vsub.f32 %v46210_v21, %v46211_v24  ;;  %52624 = vmatpush3.msra.mxu0 %v46210_v21  ;;  %v46206_v30 = vand.u32 4294901760, %v46205_v22 }
0x2bfd   :  { %52635 = vmatprep.subr.mxu0 %v57103_v40  ;;  %52626 = vmatmul.mubr.f32.vlgmr.msra.gmra.mxu0 %v53234_v35 }
0x2bfe   :  { %52615 = vmatpush3.msra.mxu1 %v46206_v30  ;;  %52636 = vmatpush3.msra.mxu0 %v46204_v60  ;;  %v46213_v16 = vand.u32 4294901760, %v46212_v10 }
0x2bff   :  { %52616 = vmatprep.subr.mxu1 %v57103_v40  ;;  %52637 = vmatprep.subr.mxu0 %v57103_v40 }
0x2c00   :  { %52617 = vmatpush3.msra.mxu1 %v46213_v16  ;;  %52638 = vmatpush3.msra.mxu0 %v46211_v24 }
0x2c01   :  { %52619 = vmatmul.mubr.f32.vlgmr.msra.gmra.mxu1 %v53231_v45  ;;  %52628 = vmatprep.subr.mxu1 %v57103_v40 }
0x2c02   :  { %52629 = vmatpush3.msra.mxu1 %v46125_v1  ;;  %52632 = vmatprep.mubr.msk.f32.mxu1 %vm52763_vm1, %v57103_v40 }
0x2c03   :  { %52630 = vmatprep.subr.mxu1 %v57103_v40  ;;  %52639 = vmatprep.mubr.msk.f32.mxu0 %vm52763_vm1, %v57103_v40 }
0x2c04   :  { %52631 = vmatpush3.msra.mxu1 %v46128_v32  ;;  %52640 = vmatmul.mubr.f32.vlgmr.msra.gmra.mxu0 %v53231_v45 }
0x2c05   :  { %52633 = vmatmul.mubr.f32.vlgmr.msra.gmra.mxu1 %v53237_v61  ;;  %52642 = vmatprep.subr.mxu1 %v57103_v40 }
0x2c06   :  { %52643 = vmatpush3.msra.mxu1 %v46125_v1  ;;  %52646 = vmatprep.mubr.msk.f32.mxu1 %vm52763_vm1, %v57103_v40 }
0x2c07   :  { %52644 = vmatprep.subr.mxu1 %v57103_v40 }
0x2c08   :  { %52645 = vmatpush3.msra.mxu1 %v46128_v32 }
0x2c09   :  { %52647 = vmatmul.mubr.f32.vlgmr.msra.gmra.mxu1 %v53231_v45 }
0x2cb9   :  { %v46169_v35 = vpop.f32.mrf.mxu0 }
0x2cbb   :  { %v52613_v51 = vpop.f32.mrf.mxu0 }
0x2cbd   :  { %v46326_v39 = vpop.f32.mrf.mxu0 }
0x2cbf   :  { %v52627_v36 = vpop.f32.mrf.mxu0 }
0x2cc1   :  { %v46250_v5 = vpop.f32.mrf.mxu1 }
0x2cc2   :  { %v46251_v14 = vadd.f32 %v46250_v5, %v46169_v35 }
0x2cc3   :  { %v52620_v3 = vpop.f32.mrf.mxu1 }
0x2cc4   :  { %v46327_v33 = vadd.f32 %v46326_v39, %v46251_v14  ;;  %v46478_v61 = vpop.f32.mrf.mxu0 }
0x2cc5   :  { %v46401_v9 = vpop.f32.mrf.mxu1 }
0x2cc6   :  { %v46402_v28 = vadd.f32 %v46401_v9, %v46327_v33  ;;  %v52641_v23 = vpop.f32.mrf.mxu0 }
0x2cc7   :  { %v52634_v44 = vpop.f32.mrf.mxu1 }
0x2cc8   :  { %v46479_v4 = vadd.f32 %v46478_v61, %v46402_v28 }
0x2cc9   :  { %v46551_v49 = vpop.f32.mrf.mxu1 }
0x2cca   :  { %v46552_v50 = vadd.f32 %v46551_v49, %v46479_v4 }
0x2ccb   :  { %v52648_v40 = vpop.f32.mrf.mxu1 }
0x2ccc   :  { %v46555_v53 = vmul.f32 %v46552_v50, %v56977_v59 }
0x2cce   :  { %52690 = vrsqrt.f32 %v46555_v53 }
0x2cdb   :  { %v52691_v45 = vpop.eup %52690 }
0x2cdc   :  { %v46557_v55 = vmul.f32 %v52691_v45, %v56909_v43 }
0x2cde   :  { %v46558_v58 = vadd.f32 %v46557_v55, %v57205_v38 }
0x2ce0   :  { %v46573_v6 = vsel %vm46572_vm3, %v46558_v58, 0.0 }
0x2ce1   :  { %46574 = vadd.xlane.f32.xlu0 %v46573_v6 }
0x2d6a   :  { %v46575_v11 = vpop.xlane.xlu0 %46574 }
0x2d6b   :  { %v46576_v34 = vrot.slane %v46575_v11, 4 }
0x2d6d   :  { %v46577_v17 = vadd.f32 %v46576_v34, %v46575_v11 }
0x2d6f   :  { %v46578_v46 = vrot.slane %v46577_v17, 2 }
0x2d71   :  { %v46579_v52 = vadd.f32 %v46578_v46, %v46577_v17 }
0x2d73   :  { %v46580_v15 = vrot.slane %v46579_v52, 1 }
0x2d75   :  { %v46581_v42 = vadd.f32 %v46580_v15, %v46579_v52 }
0x2d77   :  { %52651 = vpush %v46581_v42 }
0x2da8   :  { %s52652_s18 = spop %52651 }
0x2da9   :  { %v46583_v59 = vstv %s52652_s18 }
0x2daa   :  { %46584 = vst [vmem:[#allocation7 + $0x1] sm:$0x1] %v46583_v59 }
0x2dab   :  { %52743 = shalt.err (!%p52740_p0)
}
0x2dac   :  { %46594 = dma.vmem_to_hbm [thread:$0]  %s46592_s17, 32, %s57015_s6, [#allocation4]  }
0x2dad   :  { %52756 = dma.done.wait [#allocation4], 32  }
0x2dae   :  { %52757 = vsyncadd [#allocation4], 4294967264 }
0x2daf   :  { %46598 = vsyncpa [#allocation3], 1 }
0x2db0   :  { %46599 = vsyncpa [#allocation6], 1 }
0x2db1   :  { %46600 = vsyncpa [#allocation4], 1 }

</bundles_post_ra>
